<compile_context>
chip_gen: v7x
topology: tpu7x:2x2x1
jax: 0.10.0
libtpu: 0.0.40
codegen_flags: <defaults>
</compile_context>

<pallas_src>
import jax
import jax.numpy as jnp
import numpy as np
from jax.experimental import pallas as pl
from jax.experimental.pallas import tpu as pltpu


# ----------------------------------------------------------------------------
# Fused kernel: pooling + concat + 3x(stacked conv3x3 + leaky relu), 1 batch/step
# ----------------------------------------------------------------------------
def _make_cmp_kernel(k, c, H, W, R):
    HW = H * W
    Nb = k * HW                      # lane-axis width per batch element (2048)
    offs = [(oy, ox) for oy in (-1, 0, 1) for ox in (-1, 0, 1)]   # tap order = kh*3+kw

    def kernel(apos_ref, aneg_ref, x_ref, mask_ref,
               w1_ref, w2_ref, w3_ref, o_ref, act, imcol):
        f32 = jnp.float32
        bf16 = jnp.bfloat16

        x = x_ref[...]                                            # (c, Nb) f32

        # enc_in rows 0:c = feats
        act[0:c, :] = x

        # ---- fused edge pooling: rows c:2c = pos, rows 2c:3c = neg ----
        # (k,k) adjacency lives in SMEM; one merged (2c, HW) store per node.
        for i in range(k):
            pos = jnp.zeros((c, HW), f32)
            neg = jnp.zeros((c, HW), f32)
            for j in range(k):
                xj = x[:, j * HW:(j + 1) * HW]                    # aligned 256-lane slice
                pos = pos + apos_ref[i, j] * xj
                neg = neg + aneg_ref[i, j] * xj
            act[c:3 * c, i * HW:(i + 1) * HW] = jnp.concatenate([pos, neg], axis=0)

        # constant ones row feeding the folded bias column (last weight column)
        imcol[R - 1:R, :] = jnp.ones((1, Nb), bf16)

        def build_imcol(cin):
            # im2col in bf16, built in <=8-row channel chunks.  Each shifted
            # window is derived from the aligned base via pltpu.roll (XLU) and
            # masked during the copy, so nothing stays live across taps.
            base_row = 0
            for r0 in range(0, cin, 8):
                rows = min(8, cin - r0)
                src = act[r0:r0 + rows, :]                        # (rows, Nb) f32
                for t, (oy, ox) in enumerate(offs):
                    d = oy * W + ox
                    win = src if d == 0 else pltpu.roll(src, (-d) % Nb, axis=1)
                    if not (oy == 0 and ox == 0):
                        m = t if t < 4 else t - 1                 # mask row (center skipped)
                        win = win * mask_ref[m:m + 1, :]          # zero OOB / wrapped lanes
                    dst = base_row + rows * t
                    imcol[dst:dst + rows, :] = win.astype(bf16)
                base_row += 9 * rows

        def conv_layer(w_ref):
            # ONE stacked matmul per layer: (cout, R) @ (R, Nb), bf16 in / f32 acc.
            # im2col rows beyond this layer's 9*cin hit zero-padded weight columns.
            y = jnp.dot(w_ref[...], imcol[...], preferred_element_type=f32)
            return jnp.where(y > 0, y, 0.1 * y)                   # LeakyReLU(0.1)

        build_imcol(3 * c)
        h1 = conv_layer(w1_ref)                                   # (2c, Nb)
        act[0:2 * c, :] = h1
        build_imcol(2 * c)
        h2 = conv_layer(w2_ref)                                   # (2c, Nb)
        act[0:2 * c, :] = h2
        build_imcol(2 * c)
        o_ref[...] = conv_layer(w3_ref)                           # (c, Nb), lane-dense

    return kernel


# ----------------------------------------------------------------------------
# Glue
# ----------------------------------------------------------------------------
def build_adjacency(edges, k, positive):
    """Dense (k,k) count matrix equivalent of the gather/scatter_add pooling."""
    sel = (edges[:, 1] > 0) if positive else (edges[:, 1] < 0)
    wgt = sel.astype(jnp.float32)
    i = edges[:, 0].astype(jnp.int32)
    j = edges[:, 2].astype(jnp.int32)
    a = jnp.zeros((k, k), jnp.float32)
    a = a.at[i, j].add(wgt)   # pooled[i] += feats[j]
    a = a.at[j, i].add(wgt)   # pooled[j] += feats[i]
    return a


def _stack_weight(w_hwio, bias, R):
    """HWIO (3,3,cin,cout) + (cout,) -> bf16 (cout, R) matching the kernel's
    im2col row order: [8-channel chunk][tap][channel-in-chunk], bias column last,
    zero padding up to R for layers with cin < 3c."""
    kh, kw, cin, cout = w_hwio.shape
    w9 = jnp.transpose(w_hwio, (3, 0, 1, 2)).reshape(cout, kh * kw, cin)   # (cout,9,cin)
    blocks = []
    for r0 in range(0, cin, 8):
        rows = min(8, cin - r0)
        blocks.append(w9[:, :, r0:r0 + rows].reshape(cout, kh * kw * rows))
    w_flat = jnp.concatenate(blocks, axis=1)                               # (cout, 9*cin)
    pad = R - 1 - w_flat.shape[1]
    w_full = jnp.concatenate(
        [w_flat,
         jnp.zeros((cout, pad), jnp.float32),
         bias.reshape(cout, 1).astype(jnp.float32)], axis=1)               # (cout, R)
    return w_full.astype(jnp.bfloat16)


def _boundary_masks(k, H, W):
    """(8, k*H*W) f32: per non-center tap, 1 where the shifted read stays inside
    the node's own HxW image (covers both spatial zero-padding and node-crossing
    / lane-wrap reads from the rolled windows)."""
    Nb = k * H * W
    q = jnp.arange(Nb, dtype=jnp.int32)
    wi = q % W
    hi = (q // W) % H
    rows = []
    for oy in (-1, 0, 1):
        for ox in (-1, 0, 1):
            if oy == 0 and ox == 0:
                continue
            valid = ((hi + oy >= 0) & (hi + oy < H) &
                     (wi + ox >= 0) & (wi + ox < W))
            rows.append(valid.astype(jnp.float32))
    return jnp.stack(rows)


def cmp_forward(feats, edges, params):
    """feats: (b, k, c, h, w) float32, edges: (E, 3) int32. Returns (b, k, c, h, w)."""
    b, k, c, H, W = feats.shape
    HW = H * W
    Nb = k * HW
    R = 9 * 3 * c + 1                       # stacked contraction width (+1 bias row)

    a_pos = build_adjacency(edges, k, positive=True)
    a_neg = build_adjacency(edges, k, positive=False)
    masks = _boundary_masks(k, H, W)

    # lane-dense conv layout: rows = channel, columns = (batch, node, h, w)
    x2d = jnp.transpose(feats.astype(jnp.float32), (2, 0, 1, 3, 4)).reshape(c, b * Nb)

    w1, b1, w2, b2, w3, b3 = params
    w1s = _stack_weight(w1, b1, R)          # (2c, R) bf16
    w2s = _stack_weight(w2, b2, R)          # (2c, R) bf16
    w3s = _stack_weight(w3, b3, R)          # (c,  R) bf16

    kernel = _make_cmp_kernel(k, c, H, W, R)
    out2d = pl.pallas_call(
        kernel,
        out_shape=jax.ShapeDtypeStruct((c, b * Nb), jnp.float32),
        grid_spec=pltpu.PrefetchScalarGridSpec(
            num_scalar_prefetch=0,
            grid=(b,),
            in_specs=[
                pl.BlockSpec(memory_space=pltpu.MemorySpace.SMEM),   # a_pos (k,k)
                pl.BlockSpec(memory_space=pltpu.MemorySpace.SMEM),   # a_neg (k,k)
                pl.BlockSpec((c, Nb), lambda i: (0, i)),             # feats, conv layout
                pl.BlockSpec((8, Nb), lambda i: (0, 0)),             # boundary masks
                pl.BlockSpec(w1s.shape, lambda i: (0, 0)),           # stacked conv1 (+bias)
                pl.BlockSpec(w2s.shape, lambda i: (0, 0)),           # stacked conv2 (+bias)
                pl.BlockSpec(w3s.shape, lambda i: (0, 0)),           # stacked conv3 (+bias)
            ],
            out_specs=pl.BlockSpec((c, Nb), lambda i: (0, i)),
            scratch_shapes=[
                pltpu.VMEM((3 * c, Nb), jnp.float32),   # enc_in / layer activations
                pltpu.VMEM((R, Nb), jnp.bfloat16),      # stacked im2col (+ ones row)
            ]),
        compiler_params=pltpu.CompilerParams(
            dimension_semantics=("parallel",)),          # v7x: shard batch over 2 TCs
    )(a_pos, a_neg, x2d, masks, w1s, w2s, w3s)

    out = out2d.reshape(c, b, k, H, W)
    return jnp.transpose(out, (1, 2, 0, 3, 4))           # back to (b, k, c, h, w)


def init_params(key, c):
    """Deterministic synthetic weights, HWIO layout: (3,3,Cin,Cout)."""
    ks = jax.random.split(key, 3)

    def conv_params(k_, cin, cout):
        w = jax.random.normal(k_, (3, 3, cin, cout), jnp.float32) * 0.1
        bias = jnp.linspace(-0.05, 0.05, cout, dtype=jnp.float32)
        return w, bias

    w1, b1 = conv_params(ks[0], 3 * c, 2 * c)
    w2, b2 = conv_params(ks[1], 2 * c, 2 * c)
    w3, b3 = conv_params(ks[2], 2 * c, c)
    return (w1, b1, w2, b2, w3, b3)


# ----------------------------------------------------------------------------
# Pure-JAX reference (for correctness check)
# ----------------------------------------------------------------------------
def _q(x):
    # emulate the kernel's bf16 rounding of matmul operands
    return x.astype(jnp.bfloat16).astype(jnp.float32)


def cmp_reference(feats, edges, params, quantize_bf16=False):
    b, k, c, h, w = feats.shape
    a_pos = build_adjacency(edges, k, True)
    a_neg = build_adjacency(edges, k, False)
    pos = jnp.einsum('ij,bjchw->bichw', a_pos, feats)
    neg = jnp.einsum('ij,bjchw->bichw', a_neg, feats)
    enc_in = jnp.concatenate([feats, pos, neg], axis=2)          # (b,k,3c,h,w)
    x = jnp.transpose(enc_in.reshape(b * k, 3 * c, h, w), (0, 2, 3, 1))  # NHWC
    w1, b1, w2, b2, w3, b3 = params

    def conv(x, wgt, bias):
        if quantize_bf16:
            x, wgt, bias = _q(x), _q(wgt), _q(bias)
        y = jax.lax.conv_general_dilated(
            x, wgt, (1, 1), 'SAME', dimension_numbers=('NHWC', 'HWIO', 'NHWC'))
        y = y + bias[None, None, None, :]
        return jnp.where(y > 0, y, 0.1 * y)

    x = conv(x, w1, b1)
    x = conv(x, w2, b2)
    x = conv(x, w3, b3)
    return jnp.transpose(x, (0, 3, 1, 2)).reshape(b, k, c, h, w)


if __name__ == "__main__":
    b, k, c, H, W = 2, 8, 4, 16, 16
    E = 12

    key = jax.random.PRNGKey(0)
    k_feat, k_i, k_j, k_s, k_w = jax.random.split(key, 5)

    feats = jax.random.normal(k_feat, (b, k, c, H, W), jnp.float32)
    src = jax.random.randint(k_i, (E,), 0, k)
    dst = (src + 1 + jax.random.randint(k_j, (E,), 0, k - 1)) % k    # no self edges
    sign = jax.random.randint(k_s, (E,), 0, 2) * 2 - 1               # {-1, +1}
    edges = jnp.stack([src, sign, dst], axis=-1).astype(jnp.int32)   # (E, 3)

    params = init_params(k_w, c)

    out = cmp_forward(feats, edges, params)
    out = jax.block_until_ready(out)
    out_np = np.asarray(out)

    # Tight check against a reference that emulates the kernel's bf16 operand
    # rounding (same math, only accumulation order differs).
    ref_bf16 = np.asarray(jax.block_until_ready(
        cmp_reference(feats, edges, params, quantize_bf16=True)))
    np.testing.assert_allclose(out_np, ref_bf16, rtol=2e-3, atol=2e-3)

    # Loose sanity check against the full-f32 reference (bf16 matmul operands).
    ref_f32 = np.asarray(jax.block_until_ready(
        cmp_reference(feats, edges, params, quantize_bf16=False)))
    np.testing.assert_allclose(out_np, ref_f32, rtol=1e-1, atol=2e-1)

    assert out.shape == (b, k, c, H, W)
    print("KERNEL_OK")
</pallas_src>

<mosaic_0001>
module attributes {stable_mosaic.version = 11 : i64} {
  func.func @kernel(%arg0: i32, %arg1: memref<8x8xf32, #tpu.memory_space<smem>>, %arg2: memref<8x8xf32, #tpu.memory_space<smem>>, %arg3: memref<4x2048xf32, #tpu.memory_space<vmem>>, %arg4: memref<8x2048xf32, #tpu.memory_space<vmem>>, %arg5: memref<8x109xbf16, #tpu.memory_space<vmem>>, %arg6: memref<8x109xbf16, #tpu.memory_space<vmem>>, %arg7: memref<4x109xbf16, #tpu.memory_space<vmem>>, %arg8: memref<4x2048xf32, #tpu.memory_space<vmem>>, %arg9: memref<12x2048xf32, #tpu.memory_space<vmem>>, %arg10: memref<109x2048xbf16, #tpu.memory_space<vmem>>) attributes {dimension_semantics = [#tpu.dimension_semantics<parallel>], iteration_bounds = array<i64: 2>, scalar_prefetch = 0 : i64, scratch_operands = 2 : i64, tpu.core_type = #tpu.core_type<tc>, window_params = [{transform_indices = @transform_0, window_bounds = array<i64: 8, 8>}, {transform_indices = @transform_1, window_bounds = array<i64: 8, 8>}, {transform_indices = @transform_2, window_bounds = array<i64: 4, 2048>}, {pipeline_mode = #tpu.pipeline_mode<synchronous>, transform_indices = @transform_3, window_bounds = array<i64: 8, 2048>}, {pipeline_mode = #tpu.pipeline_mode<synchronous>, transform_indices = @transform_4, window_bounds = array<i64: 8, 109>}, {pipeline_mode = #tpu.pipeline_mode<synchronous>, transform_indices = @transform_5, window_bounds = array<i64: 8, 109>}, {pipeline_mode = #tpu.pipeline_mode<synchronous>, transform_indices = @transform_6, window_bounds = array<i64: 4, 109>}, {transform_indices = @transform_7, window_bounds = array<i64: 4, 2048>}]} {
    %c0 = arith.constant 0 : index
    %c0_0 = arith.constant 0 : index
    %0 = vector.load %arg3[%c0, %c0_0] : memref<4x2048xf32, #tpu.memory_space<vmem>>, vector<4x2048xf32>
    %c0_1 = arith.constant 0 : index
    %c0_2 = arith.constant 0 : index
    %1 = vector.load %arg9[%c0_1, %c0_2] : memref<12x2048xf32, #tpu.memory_space<vmem>>, vector<4x2048xf32>
    tpu.vector_store %arg9[%c0_1, %c0_2], %0 {strides = array<i32>} : memref<12x2048xf32, #tpu.memory_space<vmem>>, vector<4x2048xf32>,
    %cst = arith.constant 0.000000e+00 : f32
    %2 = vector.broadcast %cst : f32 to vector<4x256xf32>
    %cst_3 = arith.constant 0.000000e+00 : f32
    %3 = vector.broadcast %cst_3 : f32 to vector<4x256xf32>
    %4 = vector.extract_strided_slice %0 {offsets = [0, 0], sizes = [4, 256], strides = [1, 1]} : vector<4x2048xf32> to vector<4x256xf32>
    %c0_4 = arith.constant 0 : index
    %c0_5 = arith.constant 0 : index
    %5 = memref.load %arg1[%c0_4, %c0_5] : memref<8x8xf32, #tpu.memory_space<smem>>
    %6 = vector.broadcast %5 : f32 to vector<4x256xf32>
    %7 = arith.mulf %6, %4 : vector<4x256xf32>
    %8 = arith.addf %2, %7 : vector<4x256xf32>
    %c0_6 = arith.constant 0 : index
    %c0_7 = arith.constant 0 : index
    %9 = memref.load %arg2[%c0_6, %c0_7] : memref<8x8xf32, #tpu.memory_space<smem>>
    %10 = vector.broadcast %9 : f32 to vector<4x256xf32>
    %11 = arith.mulf %10, %4 : vector<4x256xf32>
    %12 = arith.addf %3, %11 : vector<4x256xf32>
    %13 = vector.extract_strided_slice %0 {offsets = [0, 256], sizes = [4, 256], strides = [1, 1]} : vector<4x2048xf32> to vector<4x256xf32>
    %c0_8 = arith.constant 0 : index
    %c1 = arith.constant 1 : index
    %14 = memref.load %arg1[%c0_8, %c1] : memref<8x8xf32, #tpu.memory_space<smem>>
    %15 = vector.broadcast %14 : f32 to vector<4x256xf32>
    %16 = arith.mulf %15, %13 : vector<4x256xf32>
    %17 = arith.addf %8, %16 : vector<4x256xf32>
    %c0_9 = arith.constant 0 : index
    %c1_10 = arith.constant 1 : index
    %18 = memref.load %arg2[%c0_9, %c1_10] : memref<8x8xf32, #tpu.memory_space<smem>>
    %19 = vector.broadcast %18 : f32 to vector<4x256xf32>
    %20 = arith.mulf %19, %13 : vector<4x256xf32>
    %21 = arith.addf %12, %20 : vector<4x256xf32>
    %22 = vector.extract_strided_slice %0 {offsets = [0, 512], sizes = [4, 256], strides = [1, 1]} : vector<4x2048xf32> to vector<4x256xf32>
    %c0_11 = arith.constant 0 : index
    %c2 = arith.constant 2 : index
    %23 = memref.load %arg1[%c0_11, %c2] : memref<8x8xf32, #tpu.memory_space<smem>>
    %24 = vector.broadcast %23 : f32 to vector<4x256xf32>
    %25 = arith.mulf %24, %22 : vector<4x256xf32>
    %26 = arith.addf %17, %25 : vector<4x256xf32>
    %c0_12 = arith.constant 0 : index
    %c2_13 = arith.constant 2 : index
    %27 = memref.load %arg2[%c0_12, %c2_13] : memref<8x8xf32, #tpu.memory_space<smem>>
    %28 = vector.broadcast %27 : f32 to vector<4x256xf32>
    %29 = arith.mulf %28, %22 : vector<4x256xf32>
    %30 = arith.addf %21, %29 : vector<4x256xf32>
    %31 = vector.extract_strided_slice %0 {offsets = [0, 768], sizes = [4, 256], strides = [1, 1]} : vector<4x2048xf32> to vector<4x256xf32>
    %c0_14 = arith.constant 0 : index
    %c3 = arith.constant 3 : index
    %32 = memref.load %arg1[%c0_14, %c3] : memref<8x8xf32, #tpu.memory_space<smem>>
    %33 = vector.broadcast %32 : f32 to vector<4x256xf32>
    %34 = arith.mulf %33, %31 : vector<4x256xf32>
    %35 = arith.addf %26, %34 : vector<4x256xf32>
    %c0_15 = arith.constant 0 : index
    %c3_16 = arith.constant 3 : index
    %36 = memref.load %arg2[%c0_15, %c3_16] : memref<8x8xf32, #tpu.memory_space<smem>>
    %37 = vector.broadcast %36 : f32 to vector<4x256xf32>
    %38 = arith.mulf %37, %31 : vector<4x256xf32>
    %39 = arith.addf %30, %38 : vector<4x256xf32>
    %40 = vector.extract_strided_slice %0 {offsets = [0, 1024], sizes = [4, 256], strides = [1, 1]} : vector<4x2048xf32> to vector<4x256xf32>
    %c0_17 = arith.constant 0 : index
    %c4 = arith.constant 4 : index
    %41 = memref.load %arg1[%c0_17, %c4] : memref<8x8xf32, #tpu.memory_space<smem>>
    %42 = vector.broadcast %41 : f32 to vector<4x256xf32>
    %43 = arith.mulf %42, %40 : vector<4x256xf32>
    %44 = arith.addf %35, %43 : vector<4x256xf32>
    %c0_18 = arith.constant 0 : index
    %c4_19 = arith.constant 4 : index
    %45 = memref.load %arg2[%c0_18, %c4_19] : memref<8x8xf32, #tpu.memory_space<smem>>
    %46 = vector.broadcast %45 : f32 to vector<4x256xf32>
    %47 = arith.mulf %46, %40 : vector<4x256xf32>
    %48 = arith.addf %39, %47 : vector<4x256xf32>
    %49 = vector.extract_strided_slice %0 {offsets = [0, 1280], sizes = [4, 256], strides = [1, 1]} : vector<4x2048xf32> to vector<4x256xf32>
    %c0_20 = arith.constant 0 : index
    %c5 = arith.constant 5 : index
    %50 = memref.load %arg1[%c0_20, %c5] : memref<8x8xf32, #tpu.memory_space<smem>>
    %51 = vector.broadcast %50 : f32 to vector<4x256xf32>
    %52 = arith.mulf %51, %49 : vector<4x256xf32>
    %53 = arith.addf %44, %52 : vector<4x256xf32>
    %c0_21 = arith.constant 0 : index
    %c5_22 = arith.constant 5 : index
    %54 = memref.load %arg2[%c0_21, %c5_22] : memref<8x8xf32, #tpu.memory_space<smem>>
    %55 = vector.broadcast %54 : f32 to vector<4x256xf32>
    %56 = arith.mulf %55, %49 : vector<4x256xf32>
    %57 = arith.addf %48, %56 : vector<4x256xf32>
    %58 = vector.extract_strided_slice %0 {offsets = [0, 1536], sizes = [4, 256], strides = [1, 1]} : vector<4x2048xf32> to vector<4x256xf32>
    %c0_23 = arith.constant 0 : index
    %c6 = arith.constant 6 : index
    %59 = memref.load %arg1[%c0_23, %c6] : memref<8x8xf32, #tpu.memory_space<smem>>
    %60 = vector.broadcast %59 : f32 to vector<4x256xf32>
    %61 = arith.mulf %60, %58 : vector<4x256xf32>
    %62 = arith.addf %53, %61 : vector<4x256xf32>
    %c0_24 = arith.constant 0 : index
    %c6_25 = arith.constant 6 : index
    %63 = memref.load %arg2[%c0_24, %c6_25] : memref<8x8xf32, #tpu.memory_space<smem>>
    %64 = vector.broadcast %63 : f32 to vector<4x256xf32>
    %65 = arith.mulf %64, %58 : vector<4x256xf32>
    %66 = arith.addf %57, %65 : vector<4x256xf32>
    %67 = vector.extract_strided_slice %0 {offsets = [0, 1792], sizes = [4, 256], strides = [1, 1]} : vector<4x2048xf32> to vector<4x256xf32>
    %c0_26 = arith.constant 0 : index
    %c7 = arith.constant 7 : index
    %68 = memref.load %arg1[%c0_26, %c7] : memref<8x8xf32, #tpu.memory_space<smem>>
    %69 = vector.broadcast %68 : f32 to vector<4x256xf32>
    %70 = arith.mulf %69, %67 : vector<4x256xf32>
    %71 = arith.addf %62, %70 : vector<4x256xf32>
    %c0_27 = arith.constant 0 : index
    %c7_28 = arith.constant 7 : index
    %72 = memref.load %arg2[%c0_27, %c7_28] : memref<8x8xf32, #tpu.memory_space<smem>>
    %73 = vector.broadcast %72 : f32 to vector<4x256xf32>
    %74 = arith.mulf %73, %67 : vector<4x256xf32>
    %75 = arith.addf %66, %74 : vector<4x256xf32>
    %76 = tpu.concatenate %71, %75 in 0 : vector<4x256xf32>, vector<4x256xf32> -> vector<8x256xf32>
    %c4_29 = arith.constant 4 : index
    %c0_30 = arith.constant 0 : index
    %77 = vector.load %arg9[%c4_29, %c0_30] : memref<12x2048xf32, #tpu.memory_space<vmem>>, vector<8x256xf32>
    tpu.vector_store %arg9[%c4_29, %c0_30], %76 {strides = array<i32>} : memref<12x2048xf32, #tpu.memory_space<vmem>>, vector<8x256xf32>,
    %cst_31 = arith.constant 0.000000e+00 : f32
    %78 = vector.broadcast %cst_31 : f32 to vector<4x256xf32>
    %cst_32 = arith.constant 0.000000e+00 : f32
    %79 = vector.broadcast %cst_32 : f32 to vector<4x256xf32>
    %80 = vector.extract_strided_slice %0 {offsets = [0, 0], sizes = [4, 256], strides = [1, 1]} : vector<4x2048xf32> to vector<4x256xf32>
    %c1_33 = arith.constant 1 : index
    %c0_34 = arith.constant 0 : index
    %81 = memref.load %arg1[%c1_33, %c0_34] : memref<8x8xf32, #tpu.memory_space<smem>>
    %82 = vector.broadcast %81 : f32 to vector<4x256xf32>
    %83 = arith.mulf %82, %80 : vector<4x256xf32>
    %84 = arith.addf %78, %83 : vector<4x256xf32>
    %c1_35 = arith.constant 1 : index
    %c0_36 = arith.constant 0 : index
    %85 = memref.load %arg2[%c1_35, %c0_36] : memref<8x8xf32, #tpu.memory_space<smem>>
    %86 = vector.broadcast %85 : f32 to vector<4x256xf32>
    %87 = arith.mulf %86, %80 : vector<4x256xf32>
    %88 = arith.addf %79, %87 : vector<4x256xf32>
    %89 = vector.extract_strided_slice %0 {offsets = [0, 256], sizes = [4, 256], strides = [1, 1]} : vector<4x2048xf32> to vector<4x256xf32>
    %c1_37 = arith.constant 1 : index
    %c1_38 = arith.constant 1 : index
    %90 = memref.load %arg1[%c1_37, %c1_38] : memref<8x8xf32, #tpu.memory_space<smem>>
    %91 = vector.broadcast %90 : f32 to vector<4x256xf32>
    %92 = arith.mulf %91, %89 : vector<4x256xf32>
    %93 = arith.addf %84, %92 : vector<4x256xf32>
    %c1_39 = arith.constant 1 : index
    %c1_40 = arith.constant 1 : index
    %94 = memref.load %arg2[%c1_39, %c1_40] : memref<8x8xf32, #tpu.memory_space<smem>>
    %95 = vector.broadcast %94 : f32 to vector<4x256xf32>
    %96 = arith.mulf %95, %89 : vector<4x256xf32>
    %97 = arith.addf %88, %96 : vector<4x256xf32>
    %98 = vector.extract_strided_slice %0 {offsets = [0, 512], sizes = [4, 256], strides = [1, 1]} : vector<4x2048xf32> to vector<4x256xf32>
    %c1_41 = arith.constant 1 : index
    %c2_42 = arith.constant 2 : index
    %99 = memref.load %arg1[%c1_41, %c2_42] : memref<8x8xf32, #tpu.memory_space<smem>>
    %100 = vector.broadcast %99 : f32 to vector<4x256xf32>
    %101 = arith.mulf %100, %98 : vector<4x256xf32>
    %102 = arith.addf %93, %101 : vector<4x256xf32>
    %c1_43 = arith.constant 1 : index
    %c2_44 = arith.constant 2 : index
    %103 = memref.load %arg2[%c1_43, %c2_44] : memref<8x8xf32, #tpu.memory_space<smem>>
    %104 = vector.broadcast %103 : f32 to vector<4x256xf32>
    %105 = arith.mulf %104, %98 : vector<4x256xf32>
    %106 = arith.addf %97, %105 : vector<4x256xf32>
    %107 = vector.extract_strided_slice %0 {offsets = [0, 768], sizes = [4, 256], strides = [1, 1]} : vector<4x2048xf32> to vector<4x256xf32>
    %c1_45 = arith.constant 1 : index
    %c3_46 = arith.constant 3 : index
    %108 = memref.load %arg1[%c1_45, %c3_46] : memref<8x8xf32, #tpu.memory_space<smem>>
    %109 = vector.broadcast %108 : f32 to vector<4x256xf32>
    %110 = arith.mulf %109, %107 : vector<4x256xf32>
    %111 = arith.addf %102, %110 : vector<4x256xf32>
    %c1_47 = arith.constant 1 : index
    %c3_48 = arith.constant 3 : index
    %112 = memref.load %arg2[%c1_47, %c3_48] : memref<8x8xf32, #tpu.memory_space<smem>>
    %113 = vector.broadcast %112 : f32 to vector<4x256xf32>
    %114 = arith.mulf %113, %107 : vector<4x256xf32>
    %115 = arith.addf %106, %114 : vector<4x256xf32>
    %116 = vector.extract_strided_slice %0 {offsets = [0, 1024], sizes = [4, 256], strides = [1, 1]} : vector<4x2048xf32> to vector<4x256xf32>
    %c1_49 = arith.constant 1 : index
    %c4_50 = arith.constant 4 : index
    %117 = memref.load %arg1[%c1_49, %c4_50] : memref<8x8xf32, #tpu.memory_space<smem>>
    %118 = vector.broadcast %117 : f32 to vector<4x256xf32>
    %119 = arith.mulf %118, %116 : vector<4x256xf32>
    %120 = arith.addf %111, %119 : vector<4x256xf32>
    %c1_51 = arith.constant 1 : index
    %c4_52 = arith.constant 4 : index
    %121 = memref.load %arg2[%c1_51, %c4_52] : memref<8x8xf32, #tpu.memory_space<smem>>
    %122 = vector.broadcast %121 : f32 to vector<4x256xf32>
    %123 = arith.mulf %122, %116 : vector<4x256xf32>
    %124 = arith.addf %115, %123 : vector<4x256xf32>
    %125 = vector.extract_strided_slice %0 {offsets = [0, 1280], sizes = [4, 256], strides = [1, 1]} : vector<4x2048xf32> to vector<4x256xf32>
    %c1_53 = arith.constant 1 : index
    %c5_54 = arith.constant 5 : index
    %126 = memref.load %arg1[%c1_53, %c5_54] : memref<8x8xf32, #tpu.memory_space<smem>>
    %127 = vector.broadcast %126 : f32 to vector<4x256xf32>
    %128 = arith.mulf %127, %125 : vector<4x256xf32>
    %129 = arith.addf %120, %128 : vector<4x256xf32>
    %c1_55 = arith.constant 1 : index
    %c5_56 = arith.constant 5 : index
    %130 = memref.load %arg2[%c1_55, %c5_56] : memref<8x8xf32, #tpu.memory_space<smem>>
    %131 = vector.broadcast %130 : f32 to vector<4x256xf32>
    %132 = arith.mulf %131, %125 : vector<4x256xf32>
    %133 = arith.addf %124, %132 : vector<4x256xf32>
    %134 = vector.extract_strided_slice %0 {offsets = [0, 1536], sizes = [4, 256], strides = [1, 1]} : vector<4x2048xf32> to vector<4x256xf32>
    %c1_57 = arith.constant 1 : index
    %c6_58 = arith.constant 6 : index
    %135 = memref.load %arg1[%c1_57, %c6_58] : memref<8x8xf32, #tpu.memory_space<smem>>
    %136 = vector.broadcast %135 : f32 to vector<4x256xf32>
    %137 = arith.mulf %136, %134 : vector<4x256xf32>
    %138 = arith.addf %129, %137 : vector<4x256xf32>
    %c1_59 = arith.constant 1 : index
    %c6_60 = arith.constant 6 : index
    %139 = memref.load %arg2[%c1_59, %c6_60] : memref<8x8xf32, #tpu.memory_space<smem>>
    %140 = vector.broadcast %139 : f32 to vector<4x256xf32>
    %141 = arith.mulf %140, %134 : vector<4x256xf32>
    %142 = arith.addf %133, %141 : vector<4x256xf32>
    %143 = vector.extract_strided_slice %0 {offsets = [0, 1792], sizes = [4, 256], strides = [1, 1]} : vector<4x2048xf32> to vector<4x256xf32>
    %c1_61 = arith.constant 1 : index
    %c7_62 = arith.constant 7 : index
    %144 = memref.load %arg1[%c1_61, %c7_62] : memref<8x8xf32, #tpu.memory_space<smem>>
    %145 = vector.broadcast %144 : f32 to vector<4x256xf32>
    %146 = arith.mulf %145, %143 : vector<4x256xf32>
    %147 = arith.addf %138, %146 : vector<4x256xf32>
    %c1_63 = arith.constant 1 : index
    %c7_64 = arith.constant 7 : index
    %148 = memref.load %arg2[%c1_63, %c7_64] : memref<8x8xf32, #tpu.memory_space<smem>>
    %149 = vector.broadcast %148 : f32 to vector<4x256xf32>
    %150 = arith.mulf %149, %143 : vector<4x256xf32>
    %151 = arith.addf %142, %150 : vector<4x256xf32>
    %152 = tpu.concatenate %147, %151 in 0 : vector<4x256xf32>, vector<4x256xf32> -> vector<8x256xf32>
    %c4_65 = arith.constant 4 : index
    %c256 = arith.constant 256 : index
    %153 = vector.load %arg9[%c4_65, %c256] : memref<12x2048xf32, #tpu.memory_space<vmem>>, vector<8x256xf32>
    tpu.vector_store %arg9[%c4_65, %c256], %152 {strides = array<i32>} : memref<12x2048xf32, #tpu.memory_space<vmem>>, vector<8x256xf32>,
    %cst_66 = arith.constant 0.000000e+00 : f32
    %154 = vector.broadcast %cst_66 : f32 to vector<4x256xf32>
    %cst_67 = arith.constant 0.000000e+00 : f32
    %155 = vector.broadcast %cst_67 : f32 to vector<4x256xf32>
    %156 = vector.extract_strided_slice %0 {offsets = [0, 0], sizes = [4, 256], strides = [1, 1]} : vector<4x2048xf32> to vector<4x256xf32>
    %c2_68 = arith.constant 2 : index
    %c0_69 = arith.constant 0 : index
    %157 = memref.load %arg1[%c2_68, %c0_69] : memref<8x8xf32, #tpu.memory_space<smem>>
    %158 = vector.broadcast %157 : f32 to vector<4x256xf32>
    %159 = arith.mulf %158, %156 : vector<4x256xf32>
    %160 = arith.addf %154, %159 : vector<4x256xf32>
    %c2_70 = arith.constant 2 : index
    %c0_71 = arith.constant 0 : index
    %161 = memref.load %arg2[%c2_70, %c0_71] : memref<8x8xf32, #tpu.memory_space<smem>>
    %162 = vector.broadcast %161 : f32 to vector<4x256xf32>
    %163 = arith.mulf %162, %156 : vector<4x256xf32>
    %164 = arith.addf %155, %163 : vector<4x256xf32>
    %165 = vector.extract_strided_slice %0 {offsets = [0, 256], sizes = [4, 256], strides = [1, 1]} : vector<4x2048xf32> to vector<4x256xf32>
    %c2_72 = arith.constant 2 : index
    %c1_73 = arith.constant 1 : index
    %166 = memref.load %arg1[%c2_72, %c1_73] : memref<8x8xf32, #tpu.memory_space<smem>>
    %167 = vector.broadcast %166 : f32 to vector<4x256xf32>
    %168 = arith.mulf %167, %165 : vector<4x256xf32>
    %169 = arith.addf %160, %168 : vector<4x256xf32>
    %c2_74 = arith.constant 2 : index
    %c1_75 = arith.constant 1 : index
    %170 = memref.load %arg2[%c2_74, %c1_75] : memref<8x8xf32, #tpu.memory_space<smem>>
    %171 = vector.broadcast %170 : f32 to vector<4x256xf32>
    %172 = arith.mulf %171, %165 : vector<4x256xf32>
    %173 = arith.addf %164, %172 : vector<4x256xf32>
    %174 = vector.extract_strided_slice %0 {offsets = [0, 512], sizes = [4, 256], strides = [1, 1]} : vector<4x2048xf32> to vector<4x256xf32>
    %c2_76 = arith.constant 2 : index
    %c2_77 = arith.constant 2 : index
    %175 = memref.load %arg1[%c2_76, %c2_77] : memref<8x8xf32, #tpu.memory_space<smem>>
    %176 = vector.broadcast %175 : f32 to vector<4x256xf32>
    %177 = arith.mulf %176, %174 : vector<4x256xf32>
    %178 = arith.addf %169, %177 : vector<4x256xf32>
    %c2_78 = arith.constant 2 : index
    %c2_79 = arith.constant 2 : index
    %179 = memref.load %arg2[%c2_78, %c2_79] : memref<8x8xf32, #tpu.memory_space<smem>>
    %180 = vector.broadcast %179 : f32 to vector<4x256xf32>
    %181 = arith.mulf %180, %174 : vector<4x256xf32>
    %182 = arith.addf %173, %181 : vector<4x256xf32>
    %183 = vector.extract_strided_slice %0 {offsets = [0, 768], sizes = [4, 256], strides = [1, 1]} : vector<4x2048xf32> to vector<4x256xf32>
    %c2_80 = arith.constant 2 : index
    %c3_81 = arith.constant 3 : index
    %184 = memref.load %arg1[%c2_80, %c3_81] : memref<8x8xf32, #tpu.memory_space<smem>>
    %185 = vector.broadcast %184 : f32 to vector<4x256xf32>
    %186 = arith.mulf %185, %183 : vector<4x256xf32>
    %187 = arith.addf %178, %186 : vector<4x256xf32>
    %c2_82 = arith.constant 2 : index
    %c3_83 = arith.constant 3 : index
    %188 = memref.load %arg2[%c2_82, %c3_83] : memref<8x8xf32, #tpu.memory_space<smem>>
    %189 = vector.broadcast %188 : f32 to vector<4x256xf32>
    %190 = arith.mulf %189, %183 : vector<4x256xf32>
    %191 = arith.addf %182, %190 : vector<4x256xf32>
    %192 = vector.extract_strided_slice %0 {offsets = [0, 1024], sizes = [4, 256], strides = [1, 1]} : vector<4x2048xf32> to vector<4x256xf32>
    %c2_84 = arith.constant 2 : index
    %c4_85 = arith.constant 4 : index
    %193 = memref.load %arg1[%c2_84, %c4_85] : memref<8x8xf32, #tpu.memory_space<smem>>
    %194 = vector.broadcast %193 : f32 to vector<4x256xf32>
    %195 = arith.mulf %194, %192 : vector<4x256xf32>
    %196 = arith.addf %187, %195 : vector<4x256xf32>
    %c2_86 = arith.constant 2 : index
    %c4_87 = arith.constant 4 : index
    %197 = memref.load %arg2[%c2_86, %c4_87] : memref<8x8xf32, #tpu.memory_space<smem>>
    %198 = vector.broadcast %197 : f32 to vector<4x256xf32>
    %199 = arith.mulf %198, %192 : vector<4x256xf32>
    %200 = arith.addf %191, %199 : vector<4x256xf32>
    %201 = vector.extract_strided_slice %0 {offsets = [0, 1280], sizes = [4, 256], strides = [1, 1]} : vector<4x2048xf32> to vector<4x256xf32>
    %c2_88 = arith.constant 2 : index
    %c5_89 = arith.constant 5 : index
    %202 = memref.load %arg1[%c2_88, %c5_89] : memref<8x8xf32, #tpu.memory_space<smem>>
    %203 = vector.broadcast %202 : f32 to vector<4x256xf32>
    %204 = arith.mulf %203, %201 : vector<4x256xf32>
    %205 = arith.addf %196, %204 : vector<4x256xf32>
    %c2_90 = arith.constant 2 : index
    %c5_91 = arith.constant 5 : index
    %206 = memref.load %arg2[%c2_90, %c5_91] : memref<8x8xf32, #tpu.memory_space<smem>>
    %207 = vector.broadcast %206 : f32 to vector<4x256xf32>
    %208 = arith.mulf %207, %201 : vector<4x256xf32>
    %209 = arith.addf %200, %208 : vector<4x256xf32>
    %210 = vector.extract_strided_slice %0 {offsets = [0, 1536], sizes = [4, 256], strides = [1, 1]} : vector<4x2048xf32> to vector<4x256xf32>
    %c2_92 = arith.constant 2 : index
    %c6_93 = arith.constant 6 : index
    %211 = memref.load %arg1[%c2_92, %c6_93] : memref<8x8xf32, #tpu.memory_space<smem>>
    %212 = vector.broadcast %211 : f32 to vector<4x256xf32>
    %213 = arith.mulf %212, %210 : vector<4x256xf32>
    %214 = arith.addf %205, %213 : vector<4x256xf32>
    %c2_94 = arith.constant 2 : index
    %c6_95 = arith.constant 6 : index
    %215 = memref.load %arg2[%c2_94, %c6_95] : memref<8x8xf32, #tpu.memory_space<smem>>
    %216 = vector.broadcast %215 : f32 to vector<4x256xf32>
    %217 = arith.mulf %216, %210 : vector<4x256xf32>
    %218 = arith.addf %209, %217 : vector<4x256xf32>
    %219 = vector.extract_strided_slice %0 {offsets = [0, 1792], sizes = [4, 256], strides = [1, 1]} : vector<4x2048xf32> to vector<4x256xf32>
    %c2_96 = arith.constant 2 : index
    %c7_97 = arith.constant 7 : index
    %220 = memref.load %arg1[%c2_96, %c7_97] : memref<8x8xf32, #tpu.memory_space<smem>>
    %221 = vector.broadcast %220 : f32 to vector<4x256xf32>
    %222 = arith.mulf %221, %219 : vector<4x256xf32>
    %223 = arith.addf %214, %222 : vector<4x256xf32>
    %c2_98 = arith.constant 2 : index
    %c7_99 = arith.constant 7 : index
    %224 = memref.load %arg2[%c2_98, %c7_99] : memref<8x8xf32, #tpu.memory_space<smem>>
    %225 = vector.broadcast %224 : f32 to vector<4x256xf32>
    %226 = arith.mulf %225, %219 : vector<4x256xf32>
    %227 = arith.addf %218, %226 : vector<4x256xf32>
    %228 = tpu.concatenate %223, %227 in 0 : vector<4x256xf32>, vector<4x256xf32> -> vector<8x256xf32>
    %c4_100 = arith.constant 4 : index
    %c512 = arith.constant 512 : index
    %229 = vector.load %arg9[%c4_100, %c512] : memref<12x2048xf32, #tpu.memory_space<vmem>>, vector<8x256xf32>
    tpu.vector_store %arg9[%c4_100, %c512], %228 {strides = array<i32>} : memref<12x2048xf32, #tpu.memory_space<vmem>>, vector<8x256xf32>,
    %cst_101 = arith.constant 0.000000e+00 : f32
    %230 = vector.broadcast %cst_101 : f32 to vector<4x256xf32>
    %cst_102 = arith.constant 0.000000e+00 : f32
    %231 = vector.broadcast %cst_102 : f32 to vector<4x256xf32>
    %232 = vector.extract_strided_slice %0 {offsets = [0, 0], sizes = [4, 256], strides = [1, 1]} : vector<4x2048xf32> to vector<4x256xf32>
    %c3_103 = arith.constant 3 : index
    %c0_104 = arith.constant 0 : index
    %233 = memref.load %arg1[%c3_103, %c0_104] : memref<8x8xf32, #tpu.memory_space<smem>>
    %234 = vector.broadcast %233 : f32 to vector<4x256xf32>
    %235 = arith.mulf %234, %232 : vector<4x256xf32>
    %236 = arith.addf %230, %235 : vector<4x256xf32>
    %c3_105 = arith.constant 3 : index
    %c0_106 = arith.constant 0 : index
    %237 = memref.load %arg2[%c3_105, %c0_106] : memref<8x8xf32, #tpu.memory_space<smem>>
    %238 = vector.broadcast %237 : f32 to vector<4x256xf32>
    %239 = arith.mulf %238, %232 : vector<4x256xf32>
    %240 = arith.addf %231, %239 : vector<4x256xf32>
    %241 = vector.extract_strided_slice %0 {offsets = [0, 256], sizes = [4, 256], strides = [1, 1]} : vector<4x2048xf32> to vector<4x256xf32>
    %c3_107 = arith.constant 3 : index
    %c1_108 = arith.constant 1 : index
    %242 = memref.load %arg1[%c3_107, %c1_108] : memref<8x8xf32, #tpu.memory_space<smem>>
    %243 = vector.broadcast %242 : f32 to vector<4x256xf32>
    %244 = arith.mulf %243, %241 : vector<4x256xf32>
    %245 = arith.addf %236, %244 : vector<4x256xf32>
    %c3_109 = arith.constant 3 : index
    %c1_110 = arith.constant 1 : index
    %246 = memref.load %arg2[%c3_109, %c1_110] : memref<8x8xf32, #tpu.memory_space<smem>>
    %247 = vector.broadcast %246 : f32 to vector<4x256xf32>
    %248 = arith.mulf %247, %241 : vector<4x256xf32>
    %249 = arith.addf %240, %248 : vector<4x256xf32>
    %250 = vector.extract_strided_slice %0 {offsets = [0, 512], sizes = [4, 256], strides = [1, 1]} : vector<4x2048xf32> to vector<4x256xf32>
    %c3_111 = arith.constant 3 : index
    %c2_112 = arith.constant 2 : index
    %251 = memref.load %arg1[%c3_111, %c2_112] : memref<8x8xf32, #tpu.memory_space<smem>>
    %252 = vector.broadcast %251 : f32 to vector<4x256xf32>
    %253 = arith.mulf %252, %250 : vector<4x256xf32>
    %254 = arith.addf %245, %253 : vector<4x256xf32>
    %c3_113 = arith.constant 3 : index
    %c2_114 = arith.constant 2 : index
    %255 = memref.load %arg2[%c3_113, %c2_114] : memref<8x8xf32, #tpu.memory_space<smem>>
    %256 = vector.broadcast %255 : f32 to vector<4x256xf32>
    %257 = arith.mulf %256, %250 : vector<4x256xf32>
    %258 = arith.addf %249, %257 : vector<4x256xf32>
    %259 = vector.extract_strided_slice %0 {offsets = [0, 768], sizes = [4, 256], strides = [1, 1]} : vector<4x2048xf32> to vector<4x256xf32>
    %c3_115 = arith.constant 3 : index
    %c3_116 = arith.constant 3 : index
    %260 = memref.load %arg1[%c3_115, %c3_116] : memref<8x8xf32, #tpu.memory_space<smem>>
    %261 = vector.broadcast %260 : f32 to vector<4x256xf32>
    %262 = arith.mulf %261, %259 : vector<4x256xf32>
    %263 = arith.addf %254, %262 : vector<4x256xf32>
    %c3_117 = arith.constant 3 : index
    %c3_118 = arith.constant 3 : index
    %264 = memref.load %arg2[%c3_117, %c3_118] : memref<8x8xf32, #tpu.memory_space<smem>>
    %265 = vector.broadcast %264 : f32 to vector<4x256xf32>
    %266 = arith.mulf %265, %259 : vector<4x256xf32>
    %267 = arith.addf %258, %266 : vector<4x256xf32>
    %268 = vector.extract_strided_slice %0 {offsets = [0, 1024], sizes = [4, 256], strides = [1, 1]} : vector<4x2048xf32> to vector<4x256xf32>
    %c3_119 = arith.constant 3 : index
    %c4_120 = arith.constant 4 : index
    %269 = memref.load %arg1[%c3_119, %c4_120] : memref<8x8xf32, #tpu.memory_space<smem>>
    %270 = vector.broadcast %269 : f32 to vector<4x256xf32>
    %271 = arith.mulf %270, %268 : vector<4x256xf32>
    %272 = arith.addf %263, %271 : vector<4x256xf32>
    %c3_121 = arith.constant 3 : index
    %c4_122 = arith.constant 4 : index
    %273 = memref.load %arg2[%c3_121, %c4_122] : memref<8x8xf32, #tpu.memory_space<smem>>
    %274 = vector.broadcast %273 : f32 to vector<4x256xf32>
    %275 = arith.mulf %274, %268 : vector<4x256xf32>
    %276 = arith.addf %267, %275 : vector<4x256xf32>
    %277 = vector.extract_strided_slice %0 {offsets = [0, 1280], sizes = [4, 256], strides = [1, 1]} : vector<4x2048xf32> to vector<4x256xf32>
    %c3_123 = arith.constant 3 : index
    %c5_124 = arith.constant 5 : index
    %278 = memref.load %arg1[%c3_123, %c5_124] : memref<8x8xf32, #tpu.memory_space<smem>>
    %279 = vector.broadcast %278 : f32 to vector<4x256xf32>
    %280 = arith.mulf %279, %277 : vector<4x256xf32>
    %281 = arith.addf %272, %280 : vector<4x256xf32>
    %c3_125 = arith.constant 3 : index
    %c5_126 = arith.constant 5 : index
    %282 = memref.load %arg2[%c3_125, %c5_126] : memref<8x8xf32, #tpu.memory_space<smem>>
    %283 = vector.broadcast %282 : f32 to vector<4x256xf32>
    %284 = arith.mulf %283, %277 : vector<4x256xf32>
    %285 = arith.addf %276, %284 : vector<4x256xf32>
    %286 = vector.extract_strided_slice %0 {offsets = [0, 1536], sizes = [4, 256], strides = [1, 1]} : vector<4x2048xf32> to vector<4x256xf32>
    %c3_127 = arith.constant 3 : index
    %c6_128 = arith.constant 6 : index
    %287 = memref.load %arg1[%c3_127, %c6_128] : memref<8x8xf32, #tpu.memory_space<smem>>
    %288 = vector.broadcast %287 : f32 to vector<4x256xf32>
    %289 = arith.mulf %288, %286 : vector<4x256xf32>
    %290 = arith.addf %281, %289 : vector<4x256xf32>
    %c3_129 = arith.constant 3 : index
    %c6_130 = arith.constant 6 : index
    %291 = memref.load %arg2[%c3_129, %c6_130] : memref<8x8xf32, #tpu.memory_space<smem>>
    %292 = vector.broadcast %291 : f32 to vector<4x256xf32>
    %293 = arith.mulf %292, %286 : vector<4x256xf32>
    %294 = arith.addf %285, %293 : vector<4x256xf32>
    %295 = vector.extract_strided_slice %0 {offsets = [0, 1792], sizes = [4, 256], strides = [1, 1]} : vector<4x2048xf32> to vector<4x256xf32>
    %c3_131 = arith.constant 3 : index
    %c7_132 = arith.constant 7 : index
    %296 = memref.load %arg1[%c3_131, %c7_132] : memref<8x8xf32, #tpu.memory_space<smem>>
    %297 = vector.broadcast %296 : f32 to vector<4x256xf32>
    %298 = arith.mulf %297, %295 : vector<4x256xf32>
    %299 = arith.addf %290, %298 : vector<4x256xf32>
    %c3_133 = arith.constant 3 : index
    %c7_134 = arith.constant 7 : index
    %300 = memref.load %arg2[%c3_133, %c7_134] : memref<8x8xf32, #tpu.memory_space<smem>>
    %301 = vector.broadcast %300 : f32 to vector<4x256xf32>
    %302 = arith.mulf %301, %295 : vector<4x256xf32>
    %303 = arith.addf %294, %302 : vector<4x256xf32>
    %304 = tpu.concatenate %299, %303 in 0 : vector<4x256xf32>, vector<4x256xf32> -> vector<8x256xf32>
    %c4_135 = arith.constant 4 : index
    %c768 = arith.constant 768 : index
    %305 = vector.load %arg9[%c4_135, %c768] : memref<12x2048xf32, #tpu.memory_space<vmem>>, vector<8x256xf32>
    tpu.vector_store %arg9[%c4_135, %c768], %304 {strides = array<i32>} : memref<12x2048xf32, #tpu.memory_space<vmem>>, vector<8x256xf32>,
    %cst_136 = arith.constant 0.000000e+00 : f32
    %306 = vector.broadcast %cst_136 : f32 to vector<4x256xf32>
    %cst_137 = arith.constant 0.000000e+00 : f32
    %307 = vector.broadcast %cst_137 : f32 to vector<4x256xf32>
    %308 = vector.extract_strided_slice %0 {offsets = [0, 0], sizes = [4, 256], strides = [1, 1]} : vector<4x2048xf32> to vector<4x256xf32>
    %c4_138 = arith.constant 4 : index
    %c0_139 = arith.constant 0 : index
    %309 = memref.load %arg1[%c4_138, %c0_139] : memref<8x8xf32, #tpu.memory_space<smem>>
    %310 = vector.broadcast %309 : f32 to vector<4x256xf32>
    %311 = arith.mulf %310, %308 : vector<4x256xf32>
    %312 = arith.addf %306, %311 : vector<4x256xf32>
    %c4_140 = arith.constant 4 : index
    %c0_141 = arith.constant 0 : index
    %313 = memref.load %arg2[%c4_140, %c0_141] : memref<8x8xf32, #tpu.memory_space<smem>>
    %314 = vector.broadcast %313 : f32 to vector<4x256xf32>
    %315 = arith.mulf %314, %308 : vector<4x256xf32>
    %316 = arith.addf %307, %315 : vector<4x256xf32>
    %317 = vector.extract_strided_slice %0 {offsets = [0, 256], sizes = [4, 256], strides = [1, 1]} : vector<4x2048xf32> to vector<4x256xf32>
    %c4_142 = arith.constant 4 : index
    %c1_143 = arith.constant 1 : index
    %318 = memref.load %arg1[%c4_142, %c1_143] : memref<8x8xf32, #tpu.memory_space<smem>>
    %319 = vector.broadcast %318 : f32 to vector<4x256xf32>
    %320 = arith.mulf %319, %317 : vector<4x256xf32>
    %321 = arith.addf %312, %320 : vector<4x256xf32>
    %c4_144 = arith.constant 4 : index
    %c1_145 = arith.constant 1 : index
    %322 = memref.load %arg2[%c4_144, %c1_145] : memref<8x8xf32, #tpu.memory_space<smem>>
    %323 = vector.broadcast %322 : f32 to vector<4x256xf32>
    %324 = arith.mulf %323, %317 : vector<4x256xf32>
    %325 = arith.addf %316, %324 : vector<4x256xf32>
    %326 = vector.extract_strided_slice %0 {offsets = [0, 512], sizes = [4, 256], strides = [1, 1]} : vector<4x2048xf32> to vector<4x256xf32>
    %c4_146 = arith.constant 4 : index
    %c2_147 = arith.constant 2 : index
    %327 = memref.load %arg1[%c4_146, %c2_147] : memref<8x8xf32, #tpu.memory_space<smem>>
    %328 = vector.broadcast %327 : f32 to vector<4x256xf32>
    %329 = arith.mulf %328, %326 : vector<4x256xf32>
    %330 = arith.addf %321, %329 : vector<4x256xf32>
    %c4_148 = arith.constant 4 : index
    %c2_149 = arith.constant 2 : index
    %331 = memref.load %arg2[%c4_148, %c2_149] : memref<8x8xf32, #tpu.memory_space<smem>>
    %332 = vector.broadcast %331 : f32 to vector<4x256xf32>
    %333 = arith.mulf %332, %326 : vector<4x256xf32>
    %334 = arith.addf %325, %333 : vector<4x256xf32>
    %335 = vector.extract_strided_slice %0 {offsets = [0, 768], sizes = [4, 256], strides = [1, 1]} : vector<4x2048xf32> to vector<4x256xf32>
    %c4_150 = arith.constant 4 : index
    %c3_151 = arith.constant 3 : index
    %336 = memref.load %arg1[%c4_150, %c3_151] : memref<8x8xf32, #tpu.memory_space<smem>>
    %337 = vector.broadcast %336 : f32 to vector<4x256xf32>
    %338 = arith.mulf %337, %335 : vector<4x256xf32>
    %339 = arith.addf %330, %338 : vector<4x256xf32>
    %c4_152 = arith.constant 4 : index
    %c3_153 = arith.constant 3 : index
    %340 = memref.load %arg2[%c4_152, %c3_153] : memref<8x8xf32, #tpu.memory_space<smem>>
    %341 = vector.broadcast %340 : f32 to vector<4x256xf32>
    %342 = arith.mulf %341, %335 : vector<4x256xf32>
    %343 = arith.addf %334, %342 : vector<4x256xf32>
    %344 = vector.extract_strided_slice %0 {offsets = [0, 1024], sizes = [4, 256], strides = [1, 1]} : vector<4x2048xf32> to vector<4x256xf32>
    %c4_154 = arith.constant 4 : index
    %c4_155 = arith.constant 4 : index
    %345 = memref.load %arg1[%c4_154, %c4_155] : memref<8x8xf32, #tpu.memory_space<smem>>
    %346 = vector.broadcast %345 : f32 to vector<4x256xf32>
    %347 = arith.mulf %346, %344 : vector<4x256xf32>
    %348 = arith.addf %339, %347 : vector<4x256xf32>
    %c4_156 = arith.constant 4 : index
    %c4_157 = arith.constant 4 : index
    %349 = memref.load %arg2[%c4_156, %c4_157] : memref<8x8xf32, #tpu.memory_space<smem>>
    %350 = vector.broadcast %349 : f32 to vector<4x256xf32>
    %351 = arith.mulf %350, %344 : vector<4x256xf32>
    %352 = arith.addf %343, %351 : vector<4x256xf32>
    %353 = vector.extract_strided_slice %0 {offsets = [0, 1280], sizes = [4, 256], strides = [1, 1]} : vector<4x2048xf32> to vector<4x256xf32>
    %c4_158 = arith.constant 4 : index
    %c5_159 = arith.constant 5 : index
    %354 = memref.load %arg1[%c4_158, %c5_159] : memref<8x8xf32, #tpu.memory_space<smem>>
    %355 = vector.broadcast %354 : f32 to vector<4x256xf32>
    %356 = arith.mulf %355, %353 : vector<4x256xf32>
    %357 = arith.addf %348, %356 : vector<4x256xf32>
    %c4_160 = arith.constant 4 : index
    %c5_161 = arith.constant 5 : index
    %358 = memref.load %arg2[%c4_160, %c5_161] : memref<8x8xf32, #tpu.memory_space<smem>>
    %359 = vector.broadcast %358 : f32 to vector<4x256xf32>
    %360 = arith.mulf %359, %353 : vector<4x256xf32>
    %361 = arith.addf %352, %360 : vector<4x256xf32>
    %362 = vector.extract_strided_slice %0 {offsets = [0, 1536], sizes = [4, 256], strides = [1, 1]} : vector<4x2048xf32> to vector<4x256xf32>
    %c4_162 = arith.constant 4 : index
    %c6_163 = arith.constant 6 : index
    %363 = memref.load %arg1[%c4_162, %c6_163] : memref<8x8xf32, #tpu.memory_space<smem>>
    %364 = vector.broadcast %363 : f32 to vector<4x256xf32>
    %365 = arith.mulf %364, %362 : vector<4x256xf32>
    %366 = arith.addf %357, %365 : vector<4x256xf32>
    %c4_164 = arith.constant 4 : index
    %c6_165 = arith.constant 6 : index
    %367 = memref.load %arg2[%c4_164, %c6_165] : memref<8x8xf32, #tpu.memory_space<smem>>
    %368 = vector.broadcast %367 : f32 to vector<4x256xf32>
    %369 = arith.mulf %368, %362 : vector<4x256xf32>
    %370 = arith.addf %361, %369 : vector<4x256xf32>
    %371 = vector.extract_strided_slice %0 {offsets = [0, 1792], sizes = [4, 256], strides = [1, 1]} : vector<4x2048xf32> to vector<4x256xf32>
    %c4_166 = arith.constant 4 : index
    %c7_167 = arith.constant 7 : index
    %372 = memref.load %arg1[%c4_166, %c7_167] : memref<8x8xf32, #tpu.memory_space<smem>>
    %373 = vector.broadcast %372 : f32 to vector<4x256xf32>
    %374 = arith.mulf %373, %371 : vector<4x256xf32>
    %375 = arith.addf %366, %374 : vector<4x256xf32>
    %c4_168 = arith.constant 4 : index
    %c7_169 = arith.constant 7 : index
    %376 = memref.load %arg2[%c4_168, %c7_169] : memref<8x8xf32, #tpu.memory_space<smem>>
    %377 = vector.broadcast %376 : f32 to vector<4x256xf32>
    %378 = arith.mulf %377, %371 : vector<4x256xf32>
    %379 = arith.addf %370, %378 : vector<4x256xf32>
    %380 = tpu.concatenate %375, %379 in 0 : vector<4x256xf32>, vector<4x256xf32> -> vector<8x256xf32>
    %c4_170 = arith.constant 4 : index
    %c1024 = arith.constant 1024 : index
    %381 = vector.load %arg9[%c4_170, %c1024] : memref<12x2048xf32, #tpu.memory_space<vmem>>, vector<8x256xf32>
    tpu.vector_store %arg9[%c4_170, %c1024], %380 {strides = array<i32>} : memref<12x2048xf32, #tpu.memory_space<vmem>>, vector<8x256xf32>,
    %cst_171 = arith.constant 0.000000e+00 : f32
    %382 = vector.broadcast %cst_171 : f32 to vector<4x256xf32>
    %cst_172 = arith.constant 0.000000e+00 : f32
    %383 = vector.broadcast %cst_172 : f32 to vector<4x256xf32>
    %384 = vector.extract_strided_slice %0 {offsets = [0, 0], sizes = [4, 256], strides = [1, 1]} : vector<4x2048xf32> to vector<4x256xf32>
    %c5_173 = arith.constant 5 : index
    %c0_174 = arith.constant 0 : index
    %385 = memref.load %arg1[%c5_173, %c0_174] : memref<8x8xf32, #tpu.memory_space<smem>>
    %386 = vector.broadcast %385 : f32 to vector<4x256xf32>
    %387 = arith.mulf %386, %384 : vector<4x256xf32>
    %388 = arith.addf %382, %387 : vector<4x256xf32>
    %c5_175 = arith.constant 5 : index
    %c0_176 = arith.constant 0 : index
    %389 = memref.load %arg2[%c5_175, %c0_176] : memref<8x8xf32, #tpu.memory_space<smem>>
    %390 = vector.broadcast %389 : f32 to vector<4x256xf32>
    %391 = arith.mulf %390, %384 : vector<4x256xf32>
    %392 = arith.addf %383, %391 : vector<4x256xf32>
    %393 = vector.extract_strided_slice %0 {offsets = [0, 256], sizes = [4, 256], strides = [1, 1]} : vector<4x2048xf32> to vector<4x256xf32>
    %c5_177 = arith.constant 5 : index
    %c1_178 = arith.constant 1 : index
    %394 = memref.load %arg1[%c5_177, %c1_178] : memref<8x8xf32, #tpu.memory_space<smem>>
    %395 = vector.broadcast %394 : f32 to vector<4x256xf32>
    %396 = arith.mulf %395, %393 : vector<4x256xf32>
    %397 = arith.addf %388, %396 : vector<4x256xf32>
    %c5_179 = arith.constant 5 : index
    %c1_180 = arith.constant 1 : index
    %398 = memref.load %arg2[%c5_179, %c1_180] : memref<8x8xf32, #tpu.memory_space<smem>>
    %399 = vector.broadcast %398 : f32 to vector<4x256xf32>
    %400 = arith.mulf %399, %393 : vector<4x256xf32>
    %401 = arith.addf %392, %400 : vector<4x256xf32>
    %402 = vector.extract_strided_slice %0 {offsets = [0, 512], sizes = [4, 256], strides = [1, 1]} : vector<4x2048xf32> to vector<4x256xf32>
    %c5_181 = arith.constant 5 : index
    %c2_182 = arith.constant 2 : index
    %403 = memref.load %arg1[%c5_181, %c2_182] : memref<8x8xf32, #tpu.memory_space<smem>>
    %404 = vector.broadcast %403 : f32 to vector<4x256xf32>
    %405 = arith.mulf %404, %402 : vector<4x256xf32>
    %406 = arith.addf %397, %405 : vector<4x256xf32>
    %c5_183 = arith.constant 5 : index
    %c2_184 = arith.constant 2 : index
    %407 = memref.load %arg2[%c5_183, %c2_184] : memref<8x8xf32, #tpu.memory_space<smem>>
    %408 = vector.broadcast %407 : f32 to vector<4x256xf32>
    %409 = arith.mulf %408, %402 : vector<4x256xf32>
    %410 = arith.addf %401, %409 : vector<4x256xf32>
    %411 = vector.extract_strided_slice %0 {offsets = [0, 768], sizes = [4, 256], strides = [1, 1]} : vector<4x2048xf32> to vector<4x256xf32>
    %c5_185 = arith.constant 5 : index
    %c3_186 = arith.constant 3 : index
    %412 = memref.load %arg1[%c5_185, %c3_186] : memref<8x8xf32, #tpu.memory_space<smem>>
    %413 = vector.broadcast %412 : f32 to vector<4x256xf32>
    %414 = arith.mulf %413, %411 : vector<4x256xf32>
    %415 = arith.addf %406, %414 : vector<4x256xf32>
    %c5_187 = arith.constant 5 : index
    %c3_188 = arith.constant 3 : index
    %416 = memref.load %arg2[%c5_187, %c3_188] : memref<8x8xf32, #tpu.memory_space<smem>>
    %417 = vector.broadcast %416 : f32 to vector<4x256xf32>
    %418 = arith.mulf %417, %411 : vector<4x256xf32>
    %419 = arith.addf %410, %418 : vector<4x256xf32>
    %420 = vector.extract_strided_slice %0 {offsets = [0, 1024], sizes = [4, 256], strides = [1, 1]} : vector<4x2048xf32> to vector<4x256xf32>
    %c5_189 = arith.constant 5 : index
    %c4_190 = arith.constant 4 : index
    %421 = memref.load %arg1[%c5_189, %c4_190] : memref<8x8xf32, #tpu.memory_space<smem>>
    %422 = vector.broadcast %421 : f32 to vector<4x256xf32>
    %423 = arith.mulf %422, %420 : vector<4x256xf32>
    %424 = arith.addf %415, %423 : vector<4x256xf32>
    %c5_191 = arith.constant 5 : index
    %c4_192 = arith.constant 4 : index
    %425 = memref.load %arg2[%c5_191, %c4_192] : memref<8x8xf32, #tpu.memory_space<smem>>
    %426 = vector.broadcast %425 : f32 to vector<4x256xf32>
    %427 = arith.mulf %426, %420 : vector<4x256xf32>
    %428 = arith.addf %419, %427 : vector<4x256xf32>
    %429 = vector.extract_strided_slice %0 {offsets = [0, 1280], sizes = [4, 256], strides = [1, 1]} : vector<4x2048xf32> to vector<4x256xf32>
    %c5_193 = arith.constant 5 : index
    %c5_194 = arith.constant 5 : index
    %430 = memref.load %arg1[%c5_193, %c5_194] : memref<8x8xf32, #tpu.memory_space<smem>>
    %431 = vector.broadcast %430 : f32 to vector<4x256xf32>
    %432 = arith.mulf %431, %429 : vector<4x256xf32>
    %433 = arith.addf %424, %432 : vector<4x256xf32>
    %c5_195 = arith.constant 5 : index
    %c5_196 = arith.constant 5 : index
    %434 = memref.load %arg2[%c5_195, %c5_196] : memref<8x8xf32, #tpu.memory_space<smem>>
    %435 = vector.broadcast %434 : f32 to vector<4x256xf32>
    %436 = arith.mulf %435, %429 : vector<4x256xf32>
    %437 = arith.addf %428, %436 : vector<4x256xf32>
    %438 = vector.extract_strided_slice %0 {offsets = [0, 1536], sizes = [4, 256], strides = [1, 1]} : vector<4x2048xf32> to vector<4x256xf32>
    %c5_197 = arith.constant 5 : index
    %c6_198 = arith.constant 6 : index
    %439 = memref.load %arg1[%c5_197, %c6_198] : memref<8x8xf32, #tpu.memory_space<smem>>
    %440 = vector.broadcast %439 : f32 to vector<4x256xf32>
    %441 = arith.mulf %440, %438 : vector<4x256xf32>
    %442 = arith.addf %433, %441 : vector<4x256xf32>
    %c5_199 = arith.constant 5 : index
    %c6_200 = arith.constant 6 : index
    %443 = memref.load %arg2[%c5_199, %c6_200] : memref<8x8xf32, #tpu.memory_space<smem>>
    %444 = vector.broadcast %443 : f32 to vector<4x256xf32>
    %445 = arith.mulf %444, %438 : vector<4x256xf32>
    %446 = arith.addf %437, %445 : vector<4x256xf32>
    %447 = vector.extract_strided_slice %0 {offsets = [0, 1792], sizes = [4, 256], strides = [1, 1]} : vector<4x2048xf32> to vector<4x256xf32>
    %c5_201 = arith.constant 5 : index
    %c7_202 = arith.constant 7 : index
    %448 = memref.load %arg1[%c5_201, %c7_202] : memref<8x8xf32, #tpu.memory_space<smem>>
    %449 = vector.broadcast %448 : f32 to vector<4x256xf32>
    %450 = arith.mulf %449, %447 : vector<4x256xf32>
    %451 = arith.addf %442, %450 : vector<4x256xf32>
    %c5_203 = arith.constant 5 : index
    %c7_204 = arith.constant 7 : index
    %452 = memref.load %arg2[%c5_203, %c7_204] : memref<8x8xf32, #tpu.memory_space<smem>>
    %453 = vector.broadcast %452 : f32 to vector<4x256xf32>
    %454 = arith.mulf %453, %447 : vector<4x256xf32>
    %455 = arith.addf %446, %454 : vector<4x256xf32>
    %456 = tpu.concatenate %451, %455 in 0 : vector<4x256xf32>, vector<4x256xf32> -> vector<8x256xf32>
    %c4_205 = arith.constant 4 : index
    %c1280 = arith.constant 1280 : index
    %457 = vector.load %arg9[%c4_205, %c1280] : memref<12x2048xf32, #tpu.memory_space<vmem>>, vector<8x256xf32>
    tpu.vector_store %arg9[%c4_205, %c1280], %456 {strides = array<i32>} : memref<12x2048xf32, #tpu.memory_space<vmem>>, vector<8x256xf32>,
    %cst_206 = arith.constant 0.000000e+00 : f32
    %458 = vector.broadcast %cst_206 : f32 to vector<4x256xf32>
    %cst_207 = arith.constant 0.000000e+00 : f32
    %459 = vector.broadcast %cst_207 : f32 to vector<4x256xf32>
    %460 = vector.extract_strided_slice %0 {offsets = [0, 0], sizes = [4, 256], strides = [1, 1]} : vector<4x2048xf32> to vector<4x256xf32>
    %c6_208 = arith.constant 6 : index
    %c0_209 = arith.constant 0 : index
    %461 = memref.load %arg1[%c6_208, %c0_209] : memref<8x8xf32, #tpu.memory_space<smem>>
    %462 = vector.broadcast %461 : f32 to vector<4x256xf32>
    %463 = arith.mulf %462, %460 : vector<4x256xf32>
    %464 = arith.addf %458, %463 : vector<4x256xf32>
    %c6_210 = arith.constant 6 : index
    %c0_211 = arith.constant 0 : index
    %465 = memref.load %arg2[%c6_210, %c0_211] : memref<8x8xf32, #tpu.memory_space<smem>>
    %466 = vector.broadcast %465 : f32 to vector<4x256xf32>
    %467 = arith.mulf %466, %460 : vector<4x256xf32>
    %468 = arith.addf %459, %467 : vector<4x256xf32>
    %469 = vector.extract_strided_slice %0 {offsets = [0, 256], sizes = [4, 256], strides = [1, 1]} : vector<4x2048xf32> to vector<4x256xf32>
    %c6_212 = arith.constant 6 : index
    %c1_213 = arith.constant 1 : index
    %470 = memref.load %arg1[%c6_212, %c1_213] : memref<8x8xf32, #tpu.memory_space<smem>>
    %471 = vector.broadcast %470 : f32 to vector<4x256xf32>
    %472 = arith.mulf %471, %469 : vector<4x256xf32>
    %473 = arith.addf %464, %472 : vector<4x256xf32>
    %c6_214 = arith.constant 6 : index
    %c1_215 = arith.constant 1 : index
    %474 = memref.load %arg2[%c6_214, %c1_215] : memref<8x8xf32, #tpu.memory_space<smem>>
    %475 = vector.broadcast %474 : f32 to vector<4x256xf32>
    %476 = arith.mulf %475, %469 : vector<4x256xf32>
    %477 = arith.addf %468, %476 : vector<4x256xf32>
    %478 = vector.extract_strided_slice %0 {offsets = [0, 512], sizes = [4, 256], strides = [1, 1]} : vector<4x2048xf32> to vector<4x256xf32>
    %c6_216 = arith.constant 6 : index
    %c2_217 = arith.constant 2 : index
    %479 = memref.load %arg1[%c6_216, %c2_217] : memref<8x8xf32, #tpu.memory_space<smem>>
    %480 = vector.broadcast %479 : f32 to vector<4x256xf32>
    %481 = arith.mulf %480, %478 : vector<4x256xf32>
    %482 = arith.addf %473, %481 : vector<4x256xf32>
    %c6_218 = arith.constant 6 : index
    %c2_219 = arith.constant 2 : index
    %483 = memref.load %arg2[%c6_218, %c2_219] : memref<8x8xf32, #tpu.memory_space<smem>>
    %484 = vector.broadcast %483 : f32 to vector<4x256xf32>
    %485 = arith.mulf %484, %478 : vector<4x256xf32>
    %486 = arith.addf %477, %485 : vector<4x256xf32>
    %487 = vector.extract_strided_slice %0 {offsets = [0, 768], sizes = [4, 256], strides = [1, 1]} : vector<4x2048xf32> to vector<4x256xf32>
    %c6_220 = arith.constant 6 : index
    %c3_221 = arith.constant 3 : index
    %488 = memref.load %arg1[%c6_220, %c3_221] : memref<8x8xf32, #tpu.memory_space<smem>>
    %489 = vector.broadcast %488 : f32 to vector<4x256xf32>
    %490 = arith.mulf %489, %487 : vector<4x256xf32>
    %491 = arith.addf %482, %490 : vector<4x256xf32>
    %c6_222 = arith.constant 6 : index
    %c3_223 = arith.constant 3 : index
    %492 = memref.load %arg2[%c6_222, %c3_223] : memref<8x8xf32, #tpu.memory_space<smem>>
    %493 = vector.broadcast %492 : f32 to vector<4x256xf32>
    %494 = arith.mulf %493, %487 : vector<4x256xf32>
    %495 = arith.addf %486, %494 : vector<4x256xf32>
    %496 = vector.extract_strided_slice %0 {offsets = [0, 1024], sizes = [4, 256], strides = [1, 1]} : vector<4x2048xf32> to vector<4x256xf32>
    %c6_224 = arith.constant 6 : index
    %c4_225 = arith.constant 4 : index
    %497 = memref.load %arg1[%c6_224, %c4_225] : memref<8x8xf32, #tpu.memory_space<smem>>
    %498 = vector.broadcast %497 : f32 to vector<4x256xf32>
    %499 = arith.mulf %498, %496 : vector<4x256xf32>
    %500 = arith.addf %491, %499 : vector<4x256xf32>
    %c6_226 = arith.constant 6 : index
    %c4_227 = arith.constant 4 : index
    %501 = memref.load %arg2[%c6_226, %c4_227] : memref<8x8xf32, #tpu.memory_space<smem>>
    %502 = vector.broadcast %501 : f32 to vector<4x256xf32>
    %503 = arith.mulf %502, %496 : vector<4x256xf32>
    %504 = arith.addf %495, %503 : vector<4x256xf32>
    %505 = vector.extract_strided_slice %0 {offsets = [0, 1280], sizes = [4, 256], strides = [1, 1]} : vector<4x2048xf32> to vector<4x256xf32>
    %c6_228 = arith.constant 6 : index
    %c5_229 = arith.constant 5 : index
    %506 = memref.load %arg1[%c6_228, %c5_229] : memref<8x8xf32, #tpu.memory_space<smem>>
    %507 = vector.broadcast %506 : f32 to vector<4x256xf32>
    %508 = arith.mulf %507, %505 : vector<4x256xf32>
    %509 = arith.addf %500, %508 : vector<4x256xf32>
    %c6_230 = arith.constant 6 : index
    %c5_231 = arith.constant 5 : index
    %510 = memref.load %arg2[%c6_230, %c5_231] : memref<8x8xf32, #tpu.memory_space<smem>>
    %511 = vector.broadcast %510 : f32 to vector<4x256xf32>
    %512 = arith.mulf %511, %505 : vector<4x256xf32>
    %513 = arith.addf %504, %512 : vector<4x256xf32>
    %514 = vector.extract_strided_slice %0 {offsets = [0, 1536], sizes = [4, 256], strides = [1, 1]} : vector<4x2048xf32> to vector<4x256xf32>
    %c6_232 = arith.constant 6 : index
    %c6_233 = arith.constant 6 : index
    %515 = memref.load %arg1[%c6_232, %c6_233] : memref<8x8xf32, #tpu.memory_space<smem>>
    %516 = vector.broadcast %515 : f32 to vector<4x256xf32>
    %517 = arith.mulf %516, %514 : vector<4x256xf32>
    %518 = arith.addf %509, %517 : vector<4x256xf32>
    %c6_234 = arith.constant 6 : index
    %c6_235 = arith.constant 6 : index
    %519 = memref.load %arg2[%c6_234, %c6_235] : memref<8x8xf32, #tpu.memory_space<smem>>
    %520 = vector.broadcast %519 : f32 to vector<4x256xf32>
    %521 = arith.mulf %520, %514 : vector<4x256xf32>
    %522 = arith.addf %513, %521 : vector<4x256xf32>
    %523 = vector.extract_strided_slice %0 {offsets = [0, 1792], sizes = [4, 256], strides = [1, 1]} : vector<4x2048xf32> to vector<4x256xf32>
    %c6_236 = arith.constant 6 : index
    %c7_237 = arith.constant 7 : index
    %524 = memref.load %arg1[%c6_236, %c7_237] : memref<8x8xf32, #tpu.memory_space<smem>>
    %525 = vector.broadcast %524 : f32 to vector<4x256xf32>
    %526 = arith.mulf %525, %523 : vector<4x256xf32>
    %527 = arith.addf %518, %526 : vector<4x256xf32>
    %c6_238 = arith.constant 6 : index
    %c7_239 = arith.constant 7 : index
    %528 = memref.load %arg2[%c6_238, %c7_239] : memref<8x8xf32, #tpu.memory_space<smem>>
    %529 = vector.broadcast %528 : f32 to vector<4x256xf32>
    %530 = arith.mulf %529, %523 : vector<4x256xf32>
    %531 = arith.addf %522, %530 : vector<4x256xf32>
    %532 = tpu.concatenate %527, %531 in 0 : vector<4x256xf32>, vector<4x256xf32> -> vector<8x256xf32>
    %c4_240 = arith.constant 4 : index
    %c1536 = arith.constant 1536 : index
    %533 = vector.load %arg9[%c4_240, %c1536] : memref<12x2048xf32, #tpu.memory_space<vmem>>, vector<8x256xf32>
    tpu.vector_store %arg9[%c4_240, %c1536], %532 {strides = array<i32>} : memref<12x2048xf32, #tpu.memory_space<vmem>>, vector<8x256xf32>,
    %cst_241 = arith.constant 0.000000e+00 : f32
    %534 = vector.broadcast %cst_241 : f32 to vector<4x256xf32>
    %cst_242 = arith.constant 0.000000e+00 : f32
    %535 = vector.broadcast %cst_242 : f32 to vector<4x256xf32>
    %536 = vector.extract_strided_slice %0 {offsets = [0, 0], sizes = [4, 256], strides = [1, 1]} : vector<4x2048xf32> to vector<4x256xf32>
    %c7_243 = arith.constant 7 : index
    %c0_244 = arith.constant 0 : index
    %537 = memref.load %arg1[%c7_243, %c0_244] : memref<8x8xf32, #tpu.memory_space<smem>>
    %538 = vector.broadcast %537 : f32 to vector<4x256xf32>
    %539 = arith.mulf %538, %536 : vector<4x256xf32>
    %540 = arith.addf %534, %539 : vector<4x256xf32>
    %c7_245 = arith.constant 7 : index
    %c0_246 = arith.constant 0 : index
    %541 = memref.load %arg2[%c7_245, %c0_246] : memref<8x8xf32, #tpu.memory_space<smem>>
    %542 = vector.broadcast %541 : f32 to vector<4x256xf32>
    %543 = arith.mulf %542, %536 : vector<4x256xf32>
    %544 = arith.addf %535, %543 : vector<4x256xf32>
    %545 = vector.extract_strided_slice %0 {offsets = [0, 256], sizes = [4, 256], strides = [1, 1]} : vector<4x2048xf32> to vector<4x256xf32>
    %c7_247 = arith.constant 7 : index
    %c1_248 = arith.constant 1 : index
    %546 = memref.load %arg1[%c7_247, %c1_248] : memref<8x8xf32, #tpu.memory_space<smem>>
    %547 = vector.broadcast %546 : f32 to vector<4x256xf32>
    %548 = arith.mulf %547, %545 : vector<4x256xf32>
    %549 = arith.addf %540, %548 : vector<4x256xf32>
    %c7_249 = arith.constant 7 : index
    %c1_250 = arith.constant 1 : index
    %550 = memref.load %arg2[%c7_249, %c1_250] : memref<8x8xf32, #tpu.memory_space<smem>>
    %551 = vector.broadcast %550 : f32 to vector<4x256xf32>
    %552 = arith.mulf %551, %545 : vector<4x256xf32>
    %553 = arith.addf %544, %552 : vector<4x256xf32>
    %554 = vector.extract_strided_slice %0 {offsets = [0, 512], sizes = [4, 256], strides = [1, 1]} : vector<4x2048xf32> to vector<4x256xf32>
    %c7_251 = arith.constant 7 : index
    %c2_252 = arith.constant 2 : index
    %555 = memref.load %arg1[%c7_251, %c2_252] : memref<8x8xf32, #tpu.memory_space<smem>>
    %556 = vector.broadcast %555 : f32 to vector<4x256xf32>
    %557 = arith.mulf %556, %554 : vector<4x256xf32>
    %558 = arith.addf %549, %557 : vector<4x256xf32>
    %c7_253 = arith.constant 7 : index
    %c2_254 = arith.constant 2 : index
    %559 = memref.load %arg2[%c7_253, %c2_254] : memref<8x8xf32, #tpu.memory_space<smem>>
    %560 = vector.broadcast %559 : f32 to vector<4x256xf32>
    %561 = arith.mulf %560, %554 : vector<4x256xf32>
    %562 = arith.addf %553, %561 : vector<4x256xf32>
    %563 = vector.extract_strided_slice %0 {offsets = [0, 768], sizes = [4, 256], strides = [1, 1]} : vector<4x2048xf32> to vector<4x256xf32>
    %c7_255 = arith.constant 7 : index
    %c3_256 = arith.constant 3 : index
    %564 = memref.load %arg1[%c7_255, %c3_256] : memref<8x8xf32, #tpu.memory_space<smem>>
    %565 = vector.broadcast %564 : f32 to vector<4x256xf32>
    %566 = arith.mulf %565, %563 : vector<4x256xf32>
    %567 = arith.addf %558, %566 : vector<4x256xf32>
    %c7_257 = arith.constant 7 : index
    %c3_258 = arith.constant 3 : index
    %568 = memref.load %arg2[%c7_257, %c3_258] : memref<8x8xf32, #tpu.memory_space<smem>>
    %569 = vector.broadcast %568 : f32 to vector<4x256xf32>
    %570 = arith.mulf %569, %563 : vector<4x256xf32>
    %571 = arith.addf %562, %570 : vector<4x256xf32>
    %572 = vector.extract_strided_slice %0 {offsets = [0, 1024], sizes = [4, 256], strides = [1, 1]} : vector<4x2048xf32> to vector<4x256xf32>
    %c7_259 = arith.constant 7 : index
    %c4_260 = arith.constant 4 : index
    %573 = memref.load %arg1[%c7_259, %c4_260] : memref<8x8xf32, #tpu.memory_space<smem>>
    %574 = vector.broadcast %573 : f32 to vector<4x256xf32>
    %575 = arith.mulf %574, %572 : vector<4x256xf32>
    %576 = arith.addf %567, %575 : vector<4x256xf32>
    %c7_261 = arith.constant 7 : index
    %c4_262 = arith.constant 4 : index
    %577 = memref.load %arg2[%c7_261, %c4_262] : memref<8x8xf32, #tpu.memory_space<smem>>
    %578 = vector.broadcast %577 : f32 to vector<4x256xf32>
    %579 = arith.mulf %578, %572 : vector<4x256xf32>
    %580 = arith.addf %571, %579 : vector<4x256xf32>
    %581 = vector.extract_strided_slice %0 {offsets = [0, 1280], sizes = [4, 256], strides = [1, 1]} : vector<4x2048xf32> to vector<4x256xf32>
    %c7_263 = arith.constant 7 : index
    %c5_264 = arith.constant 5 : index
    %582 = memref.load %arg1[%c7_263, %c5_264] : memref<8x8xf32, #tpu.memory_space<smem>>
    %583 = vector.broadcast %582 : f32 to vector<4x256xf32>
    %584 = arith.mulf %583, %581 : vector<4x256xf32>
    %585 = arith.addf %576, %584 : vector<4x256xf32>
    %c7_265 = arith.constant 7 : index
    %c5_266 = arith.constant 5 : index
    %586 = memref.load %arg2[%c7_265, %c5_266] : memref<8x8xf32, #tpu.memory_space<smem>>
    %587 = vector.broadcast %586 : f32 to vector<4x256xf32>
    %588 = arith.mulf %587, %581 : vector<4x256xf32>
    %589 = arith.addf %580, %588 : vector<4x256xf32>
    %590 = vector.extract_strided_slice %0 {offsets = [0, 1536], sizes = [4, 256], strides = [1, 1]} : vector<4x2048xf32> to vector<4x256xf32>
    %c7_267 = arith.constant 7 : index
    %c6_268 = arith.constant 6 : index
    %591 = memref.load %arg1[%c7_267, %c6_268] : memref<8x8xf32, #tpu.memory_space<smem>>
    %592 = vector.broadcast %591 : f32 to vector<4x256xf32>
    %593 = arith.mulf %592, %590 : vector<4x256xf32>
    %594 = arith.addf %585, %593 : vector<4x256xf32>
    %c7_269 = arith.constant 7 : index
    %c6_270 = arith.constant 6 : index
    %595 = memref.load %arg2[%c7_269, %c6_270] : memref<8x8xf32, #tpu.memory_space<smem>>
    %596 = vector.broadcast %595 : f32 to vector<4x256xf32>
    %597 = arith.mulf %596, %590 : vector<4x256xf32>
    %598 = arith.addf %589, %597 : vector<4x256xf32>
    %599 = vector.extract_strided_slice %0 {offsets = [0, 1792], sizes = [4, 256], strides = [1, 1]} : vector<4x2048xf32> to vector<4x256xf32>
    %c7_271 = arith.constant 7 : index
    %c7_272 = arith.constant 7 : index
    %600 = memref.load %arg1[%c7_271, %c7_272] : memref<8x8xf32, #tpu.memory_space<smem>>
    %601 = vector.broadcast %600 : f32 to vector<4x256xf32>
    %602 = arith.mulf %601, %599 : vector<4x256xf32>
    %603 = arith.addf %594, %602 : vector<4x256xf32>
    %c7_273 = arith.constant 7 : index
    %c7_274 = arith.constant 7 : index
    %604 = memref.load %arg2[%c7_273, %c7_274] : memref<8x8xf32, #tpu.memory_space<smem>>
    %605 = vector.broadcast %604 : f32 to vector<4x256xf32>
    %606 = arith.mulf %605, %599 : vector<4x256xf32>
    %607 = arith.addf %598, %606 : vector<4x256xf32>
    %608 = tpu.concatenate %603, %607 in 0 : vector<4x256xf32>, vector<4x256xf32> -> vector<8x256xf32>
    %c4_275 = arith.constant 4 : index
    %c1792 = arith.constant 1792 : index
    %609 = vector.load %arg9[%c4_275, %c1792] : memref<12x2048xf32, #tpu.memory_space<vmem>>, vector<8x256xf32>
    tpu.vector_store %arg9[%c4_275, %c1792], %608 {strides = array<i32>} : memref<12x2048xf32, #tpu.memory_space<vmem>>, vector<8x256xf32>,
    %cst_276 = arith.constant 1.000000e+00 : bf16
    %610 = vector.broadcast %cst_276 : bf16 to vector<1x2048xbf16>
    %c108 = arith.constant 108 : index
    %c0_277 = arith.constant 0 : index
    %611 = vector.load %arg10[%c108, %c0_277] : memref<109x2048xbf16, #tpu.memory_space<vmem>>, vector<1x2048xbf16>
    tpu.vector_store %arg10[%c108, %c0_277], %610 {strides = array<i32>} : memref<109x2048xbf16, #tpu.memory_space<vmem>>, vector<1x2048xbf16>,
    %c0_278 = arith.constant 0 : index
    %c0_279 = arith.constant 0 : index
    %612 = vector.load %arg9[%c0_278, %c0_279] : memref<12x2048xf32, #tpu.memory_space<vmem>>, vector<8x2048xf32>
    %c17_i32 = arith.constant 17 : i32
    %613 = tpu.dynamic_rotate %612 by %c17_i32 dim 1 : vector<8x2048xf32>, i32 -> vector<8x2048xf32>
    %c0_280 = arith.constant 0 : index
    %c0_281 = arith.constant 0 : index
    %614 = vector.load %arg4[%c0_280, %c0_281] : memref<8x2048xf32, #tpu.memory_space<vmem>>, vector<1x2048xf32>
    %615 = vector.broadcast %614 : vector<1x2048xf32> to vector<8x2048xf32>
    %616 = arith.mulf %613, %615 : vector<8x2048xf32>
    %617 = arith.truncf %616 : vector<8x2048xf32> to vector<8x2048xbf16>
    %c0_282 = arith.constant 0 : index
    %c0_283 = arith.constant 0 : index
    %618 = vector.load %arg10[%c0_282, %c0_283] : memref<109x2048xbf16, #tpu.memory_space<vmem>>, vector<8x2048xbf16>
    tpu.vector_store %arg10[%c0_282, %c0_283], %617 {strides = array<i32>} : memref<109x2048xbf16, #tpu.memory_space<vmem>>, vector<8x2048xbf16>,
    %c16_i32 = arith.constant 16 : i32
    %619 = tpu.dynamic_rotate %612 by %c16_i32 dim 1 : vector<8x2048xf32>, i32 -> vector<8x2048xf32>
    %c1_284 = arith.constant 1 : index
    %c0_285 = arith.constant 0 : index
    %620 = vector.load %arg4[%c1_284, %c0_285] : memref<8x2048xf32, #tpu.memory_space<vmem>>, vector<1x2048xf32>
    %621 = vector.broadcast %620 : vector<1x2048xf32> to vector<8x2048xf32>
    %622 = arith.mulf %619, %621 : vector<8x2048xf32>
    %623 = arith.truncf %622 : vector<8x2048xf32> to vector<8x2048xbf16>
    %c8 = arith.constant 8 : index
    %c0_286 = arith.constant 0 : index
    %624 = vector.load %arg10[%c8, %c0_286] : memref<109x2048xbf16, #tpu.memory_space<vmem>>, vector<8x2048xbf16>
    tpu.vector_store %arg10[%c8, %c0_286], %623 {strides = array<i32>} : memref<109x2048xbf16, #tpu.memory_space<vmem>>, vector<8x2048xbf16>,
    %c15_i32 = arith.constant 15 : i32
    %625 = tpu.dynamic_rotate %612 by %c15_i32 dim 1 : vector<8x2048xf32>, i32 -> vector<8x2048xf32>
    %c2_287 = arith.constant 2 : index
    %c0_288 = arith.constant 0 : index
    %626 = vector.load %arg4[%c2_287, %c0_288] : memref<8x2048xf32, #tpu.memory_space<vmem>>, vector<1x2048xf32>
    %627 = vector.broadcast %626 : vector<1x2048xf32> to vector<8x2048xf32>
    %628 = arith.mulf %625, %627 : vector<8x2048xf32>
    %629 = arith.truncf %628 : vector<8x2048xf32> to vector<8x2048xbf16>
    %c16 = arith.constant 16 : index
    %c0_289 = arith.constant 0 : index
    %630 = vector.load %arg10[%c16, %c0_289] : memref<109x2048xbf16, #tpu.memory_space<vmem>>, vector<8x2048xbf16>
    tpu.vector_store %arg10[%c16, %c0_289], %629 {strides = array<i32>} : memref<109x2048xbf16, #tpu.memory_space<vmem>>, vector<8x2048xbf16>,
    %c1_i32 = arith.constant 1 : i32
    %631 = tpu.dynamic_rotate %612 by %c1_i32 dim 1 : vector<8x2048xf32>, i32 -> vector<8x2048xf32>
    %c3_290 = arith.constant 3 : index
    %c0_291 = arith.constant 0 : index
    %632 = vector.load %arg4[%c3_290, %c0_291] : memref<8x2048xf32, #tpu.memory_space<vmem>>, vector<1x2048xf32>
    %633 = vector.broadcast %632 : vector<1x2048xf32> to vector<8x2048xf32>
    %634 = arith.mulf %631, %633 : vector<8x2048xf32>
    %635 = arith.truncf %634 : vector<8x2048xf32> to vector<8x2048xbf16>
    %c24 = arith.constant 24 : index
    %c0_292 = arith.constant 0 : index
    %636 = vector.load %arg10[%c24, %c0_292] : memref<109x2048xbf16, #tpu.memory_space<vmem>>, vector<8x2048xbf16>
    tpu.vector_store %arg10[%c24, %c0_292], %635 {strides = array<i32>} : memref<109x2048xbf16, #tpu.memory_space<vmem>>, vector<8x2048xbf16>,
    %637 = arith.truncf %612 : vector<8x2048xf32> to vector<8x2048xbf16>
    %c32 = arith.constant 32 : index
    %c0_293 = arith.constant 0 : index
    %638 = vector.load %arg10[%c32, %c0_293] : memref<109x2048xbf16, #tpu.memory_space<vmem>>, vector<8x2048xbf16>
    tpu.vector_store %arg10[%c32, %c0_293], %637 {strides = array<i32>} : memref<109x2048xbf16, #tpu.memory_space<vmem>>, vector<8x2048xbf16>,
    %c2047_i32 = arith.constant 2047 : i32
    %639 = tpu.dynamic_rotate %612 by %c2047_i32 dim 1 : vector<8x2048xf32>, i32 -> vector<8x2048xf32>
    %c4_294 = arith.constant 4 : index
    %c0_295 = arith.constant 0 : index
    %640 = vector.load %arg4[%c4_294, %c0_295] : memref<8x2048xf32, #tpu.memory_space<vmem>>, vector<1x2048xf32>
    %641 = vector.broadcast %640 : vector<1x2048xf32> to vector<8x2048xf32>
    %642 = arith.mulf %639, %641 : vector<8x2048xf32>
    %643 = arith.truncf %642 : vector<8x2048xf32> to vector<8x2048xbf16>
    %c40 = arith.constant 40 : index
    %c0_296 = arith.constant 0 : index
    %644 = vector.load %arg10[%c40, %c0_296] : memref<109x2048xbf16, #tpu.memory_space<vmem>>, vector<8x2048xbf16>
    tpu.vector_store %arg10[%c40, %c0_296], %643 {strides = array<i32>} : memref<109x2048xbf16, #tpu.memory_space<vmem>>, vector<8x2048xbf16>,
    %c2033_i32 = arith.constant 2033 : i32
    %645 = tpu.dynamic_rotate %612 by %c2033_i32 dim 1 : vector<8x2048xf32>, i32 -> vector<8x2048xf32>
    %c5_297 = arith.constant 5 : index
    %c0_298 = arith.constant 0 : index
    %646 = vector.load %arg4[%c5_297, %c0_298] : memref<8x2048xf32, #tpu.memory_space<vmem>>, vector<1x2048xf32>
    %647 = vector.broadcast %646 : vector<1x2048xf32> to vector<8x2048xf32>
    %648 = arith.mulf %645, %647 : vector<8x2048xf32>
    %649 = arith.truncf %648 : vector<8x2048xf32> to vector<8x2048xbf16>
    %c48 = arith.constant 48 : index
    %c0_299 = arith.constant 0 : index
    %650 = vector.load %arg10[%c48, %c0_299] : memref<109x2048xbf16, #tpu.memory_space<vmem>>, vector<8x2048xbf16>
    tpu.vector_store %arg10[%c48, %c0_299], %649 {strides = array<i32>} : memref<109x2048xbf16, #tpu.memory_space<vmem>>, vector<8x2048xbf16>,
    %c2032_i32 = arith.constant 2032 : i32
    %651 = tpu.dynamic_rotate %612 by %c2032_i32 dim 1 : vector<8x2048xf32>, i32 -> vector<8x2048xf32>
    %c6_300 = arith.constant 6 : index
    %c0_301 = arith.constant 0 : index
    %652 = vector.load %arg4[%c6_300, %c0_301] : memref<8x2048xf32, #tpu.memory_space<vmem>>, vector<1x2048xf32>
    %653 = vector.broadcast %652 : vector<1x2048xf32> to vector<8x2048xf32>
    %654 = arith.mulf %651, %653 : vector<8x2048xf32>
    %655 = arith.truncf %654 : vector<8x2048xf32> to vector<8x2048xbf16>
    %c56 = arith.constant 56 : index
    %c0_302 = arith.constant 0 : index
    %656 = vector.load %arg10[%c56, %c0_302] : memref<109x2048xbf16, #tpu.memory_space<vmem>>, vector<8x2048xbf16>
    tpu.vector_store %arg10[%c56, %c0_302], %655 {strides = array<i32>} : memref<109x2048xbf16, #tpu.memory_space<vmem>>, vector<8x2048xbf16>,
    %c2031_i32 = arith.constant 2031 : i32
    %657 = tpu.dynamic_rotate %612 by %c2031_i32 dim 1 : vector<8x2048xf32>, i32 -> vector<8x2048xf32>
    %c7_303 = arith.constant 7 : index
    %c0_304 = arith.constant 0 : index
    %658 = vector.load %arg4[%c7_303, %c0_304] : memref<8x2048xf32, #tpu.memory_space<vmem>>, vector<1x2048xf32>
    %659 = vector.broadcast %658 : vector<1x2048xf32> to vector<8x2048xf32>
    %660 = arith.mulf %657, %659 : vector<8x2048xf32>
    %661 = arith.truncf %660 : vector<8x2048xf32> to vector<8x2048xbf16>
    %c64 = arith.constant 64 : index
    %c0_305 = arith.constant 0 : index
    %662 = vector.load %arg10[%c64, %c0_305] : memref<109x2048xbf16, #tpu.memory_space<vmem>>, vector<8x2048xbf16>
    tpu.vector_store %arg10[%c64, %c0_305], %661 {strides = array<i32>} : memref<109x2048xbf16, #tpu.memory_space<vmem>>, vector<8x2048xbf16>,
    %c8_306 = arith.constant 8 : index
    %c0_307 = arith.constant 0 : index
    %663 = vector.load %arg9[%c8_306, %c0_307] : memref<12x2048xf32, #tpu.memory_space<vmem>>, vector<4x2048xf32>
    %c17_i32_308 = arith.constant 17 : i32
    %664 = tpu.dynamic_rotate %663 by %c17_i32_308 dim 1 : vector<4x2048xf32>, i32 -> vector<4x2048xf32>
    %c0_309 = arith.constant 0 : index
    %c0_310 = arith.constant 0 : index
    %665 = vector.load %arg4[%c0_309, %c0_310] : memref<8x2048xf32, #tpu.memory_space<vmem>>, vector<1x2048xf32>
    %666 = vector.broadcast %665 : vector<1x2048xf32> to vector<4x2048xf32>
    %667 = arith.mulf %664, %666 : vector<4x2048xf32>
    %668 = arith.truncf %667 : vector<4x2048xf32> to vector<4x2048xbf16>
    %c72 = arith.constant 72 : index
    %c0_311 = arith.constant 0 : index
    %669 = vector.load %arg10[%c72, %c0_311] : memref<109x2048xbf16, #tpu.memory_space<vmem>>, vector<4x2048xbf16>
    tpu.vector_store %arg10[%c72, %c0_311], %668 {strides = array<i32>} : memref<109x2048xbf16, #tpu.memory_space<vmem>>, vector<4x2048xbf16>,
    %c16_i32_312 = arith.constant 16 : i32
    %670 = tpu.dynamic_rotate %663 by %c16_i32_312 dim 1 : vector<4x2048xf32>, i32 -> vector<4x2048xf32>
    %c1_313 = arith.constant 1 : index
    %c0_314 = arith.constant 0 : index
    %671 = vector.load %arg4[%c1_313, %c0_314] : memref<8x2048xf32, #tpu.memory_space<vmem>>, vector<1x2048xf32>
    %672 = vector.broadcast %671 : vector<1x2048xf32> to vector<4x2048xf32>
    %673 = arith.mulf %670, %672 : vector<4x2048xf32>
    %674 = arith.truncf %673 : vector<4x2048xf32> to vector<4x2048xbf16>
    %c76 = arith.constant 76 : index
    %c0_315 = arith.constant 0 : index
    %675 = vector.load %arg10[%c76, %c0_315] : memref<109x2048xbf16, #tpu.memory_space<vmem>>, vector<4x2048xbf16>
    tpu.vector_store %arg10[%c76, %c0_315], %674 {strides = array<i32>} : memref<109x2048xbf16, #tpu.memory_space<vmem>>, vector<4x2048xbf16>,
    %c15_i32_316 = arith.constant 15 : i32
    %676 = tpu.dynamic_rotate %663 by %c15_i32_316 dim 1 : vector<4x2048xf32>, i32 -> vector<4x2048xf32>
    %c2_317 = arith.constant 2 : index
    %c0_318 = arith.constant 0 : index
    %677 = vector.load %arg4[%c2_317, %c0_318] : memref<8x2048xf32, #tpu.memory_space<vmem>>, vector<1x2048xf32>
    %678 = vector.broadcast %677 : vector<1x2048xf32> to vector<4x2048xf32>
    %679 = arith.mulf %676, %678 : vector<4x2048xf32>
    %680 = arith.truncf %679 : vector<4x2048xf32> to vector<4x2048xbf16>
    %c80 = arith.constant 80 : index
    %c0_319 = arith.constant 0 : index
    %681 = vector.load %arg10[%c80, %c0_319] : memref<109x2048xbf16, #tpu.memory_space<vmem>>, vector<4x2048xbf16>
    tpu.vector_store %arg10[%c80, %c0_319], %680 {strides = array<i32>} : memref<109x2048xbf16, #tpu.memory_space<vmem>>, vector<4x2048xbf16>,
    %c1_i32_320 = arith.constant 1 : i32
    %682 = tpu.dynamic_rotate %663 by %c1_i32_320 dim 1 : vector<4x2048xf32>, i32 -> vector<4x2048xf32>
    %c3_321 = arith.constant 3 : index
    %c0_322 = arith.constant 0 : index
    %683 = vector.load %arg4[%c3_321, %c0_322] : memref<8x2048xf32, #tpu.memory_space<vmem>>, vector<1x2048xf32>
    %684 = vector.broadcast %683 : vector<1x2048xf32> to vector<4x2048xf32>
    %685 = arith.mulf %682, %684 : vector<4x2048xf32>
    %686 = arith.truncf %685 : vector<4x2048xf32> to vector<4x2048xbf16>
    %c84 = arith.constant 84 : index
    %c0_323 = arith.constant 0 : index
    %687 = vector.load %arg10[%c84, %c0_323] : memref<109x2048xbf16, #tpu.memory_space<vmem>>, vector<4x2048xbf16>
    tpu.vector_store %arg10[%c84, %c0_323], %686 {strides = array<i32>} : memref<109x2048xbf16, #tpu.memory_space<vmem>>, vector<4x2048xbf16>,
    %688 = arith.truncf %663 : vector<4x2048xf32> to vector<4x2048xbf16>
    %c88 = arith.constant 88 : index
    %c0_324 = arith.constant 0 : index
    %689 = vector.load %arg10[%c88, %c0_324] : memref<109x2048xbf16, #tpu.memory_space<vmem>>, vector<4x2048xbf16>
    tpu.vector_store %arg10[%c88, %c0_324], %688 {strides = array<i32>} : memref<109x2048xbf16, #tpu.memory_space<vmem>>, vector<4x2048xbf16>,
    %c2047_i32_325 = arith.constant 2047 : i32
    %690 = tpu.dynamic_rotate %663 by %c2047_i32_325 dim 1 : vector<4x2048xf32>, i32 -> vector<4x2048xf32>
    %c4_326 = arith.constant 4 : index
    %c0_327 = arith.constant 0 : index
    %691 = vector.load %arg4[%c4_326, %c0_327] : memref<8x2048xf32, #tpu.memory_space<vmem>>, vector<1x2048xf32>
    %692 = vector.broadcast %691 : vector<1x2048xf32> to vector<4x2048xf32>
    %693 = arith.mulf %690, %692 : vector<4x2048xf32>
    %694 = arith.truncf %693 : vector<4x2048xf32> to vector<4x2048xbf16>
    %c92 = arith.constant 92 : index
    %c0_328 = arith.constant 0 : index
    %695 = vector.load %arg10[%c92, %c0_328] : memref<109x2048xbf16, #tpu.memory_space<vmem>>, vector<4x2048xbf16>
    tpu.vector_store %arg10[%c92, %c0_328], %694 {strides = array<i32>} : memref<109x2048xbf16, #tpu.memory_space<vmem>>, vector<4x2048xbf16>,
    %c2033_i32_329 = arith.constant 2033 : i32
    %696 = tpu.dynamic_rotate %663 by %c2033_i32_329 dim 1 : vector<4x2048xf32>, i32 -> vector<4x2048xf32>
    %c5_330 = arith.constant 5 : index
    %c0_331 = arith.constant 0 : index
    %697 = vector.load %arg4[%c5_330, %c0_331] : memref<8x2048xf32, #tpu.memory_space<vmem>>, vector<1x2048xf32>
    %698 = vector.broadcast %697 : vector<1x2048xf32> to vector<4x2048xf32>
    %699 = arith.mulf %696, %698 : vector<4x2048xf32>
    %700 = arith.truncf %699 : vector<4x2048xf32> to vector<4x2048xbf16>
    %c96 = arith.constant 96 : index
    %c0_332 = arith.constant 0 : index
    %701 = vector.load %arg10[%c96, %c0_332] : memref<109x2048xbf16, #tpu.memory_space<vmem>>, vector<4x2048xbf16>
    tpu.vector_store %arg10[%c96, %c0_332], %700 {strides = array<i32>} : memref<109x2048xbf16, #tpu.memory_space<vmem>>, vector<4x2048xbf16>,
    %c2032_i32_333 = arith.constant 2032 : i32
    %702 = tpu.dynamic_rotate %663 by %c2032_i32_333 dim 1 : vector<4x2048xf32>, i32 -> vector<4x2048xf32>
    %c6_334 = arith.constant 6 : index
    %c0_335 = arith.constant 0 : index
    %703 = vector.load %arg4[%c6_334, %c0_335] : memref<8x2048xf32, #tpu.memory_space<vmem>>, vector<1x2048xf32>
    %704 = vector.broadcast %703 : vector<1x2048xf32> to vector<4x2048xf32>
    %705 = arith.mulf %702, %704 : vector<4x2048xf32>
    %706 = arith.truncf %705 : vector<4x2048xf32> to vector<4x2048xbf16>
    %c100 = arith.constant 100 : index
    %c0_336 = arith.constant 0 : index
    %707 = vector.load %arg10[%c100, %c0_336] : memref<109x2048xbf16, #tpu.memory_space<vmem>>, vector<4x2048xbf16>
    tpu.vector_store %arg10[%c100, %c0_336], %706 {strides = array<i32>} : memref<109x2048xbf16, #tpu.memory_space<vmem>>, vector<4x2048xbf16>,
    %c2031_i32_337 = arith.constant 2031 : i32
    %708 = tpu.dynamic_rotate %663 by %c2031_i32_337 dim 1 : vector<4x2048xf32>, i32 -> vector<4x2048xf32>
    %c7_338 = arith.constant 7 : index
    %c0_339 = arith.constant 0 : index
    %709 = vector.load %arg4[%c7_338, %c0_339] : memref<8x2048xf32, #tpu.memory_space<vmem>>, vector<1x2048xf32>
    %710 = vector.broadcast %709 : vector<1x2048xf32> to vector<4x2048xf32>
    %711 = arith.mulf %708, %710 : vector<4x2048xf32>
    %712 = arith.truncf %711 : vector<4x2048xf32> to vector<4x2048xbf16>
    %c104 = arith.constant 104 : index
    %c0_340 = arith.constant 0 : index
    %713 = vector.load %arg10[%c104, %c0_340] : memref<109x2048xbf16, #tpu.memory_space<vmem>>, vector<4x2048xbf16>
    tpu.vector_store %arg10[%c104, %c0_340], %712 {strides = array<i32>} : memref<109x2048xbf16, #tpu.memory_space<vmem>>, vector<4x2048xbf16>,
    %c0_341 = arith.constant 0 : index
    %c0_342 = arith.constant 0 : index
    %714 = vector.load %arg5[%c0_341, %c0_342] : memref<8x109xbf16, #tpu.memory_space<vmem>>, vector<8x109xbf16>
    %c0_343 = arith.constant 0 : index
    %c0_344 = arith.constant 0 : index
    %715 = vector.load %arg10[%c0_343, %c0_344] : memref<109x2048xbf16, #tpu.memory_space<vmem>>, vector<109x2048xbf16>
    %cst_345 = arith.constant dense<0.000000e+00> : vector<8x2048xf32>
    %716 = tpu.matmul %714, %715, %cst_345 {dimension_numbers = #tpu.dot_dimension_numbers<[1], [0], [0], [1], [0, 0, 1, 1], [], []>} : vector<8x109xbf16>, vector<109x2048xbf16>, vector<8x2048xf32> -> vector<8x2048xf32>
    %cst_346 = arith.constant 0.000000e+00 : f32
    %717 = vector.broadcast %cst_346 : f32 to vector<8x2048xf32>
    %718 = arith.cmpf ogt, %716, %717 : vector<8x2048xf32>
    %cst_347 = arith.constant 1.000000e-01 : f32
    %719 = vector.broadcast %cst_347 : f32 to vector<8x2048xf32>
    %720 = arith.mulf %719, %716 : vector<8x2048xf32>
    %721 = arith.select %718, %716, %720 : vector<8x2048xi1>, vector<8x2048xf32>
    %c0_348 = arith.constant 0 : index
    %c0_349 = arith.constant 0 : index
    %722 = vector.load %arg9[%c0_348, %c0_349] : memref<12x2048xf32, #tpu.memory_space<vmem>>, vector<8x2048xf32>
    tpu.vector_store %arg9[%c0_348, %c0_349], %721 {strides = array<i32>} : memref<12x2048xf32, #tpu.memory_space<vmem>>, vector<8x2048xf32>,
    %c0_350 = arith.constant 0 : index
    %c0_351 = arith.constant 0 : index
    %723 = vector.load %arg9[%c0_350, %c0_351] : memref<12x2048xf32, #tpu.memory_space<vmem>>, vector<8x2048xf32>
    %c17_i32_352 = arith.constant 17 : i32
    %724 = tpu.dynamic_rotate %723 by %c17_i32_352 dim 1 : vector<8x2048xf32>, i32 -> vector<8x2048xf32>
    %c0_353 = arith.constant 0 : index
    %c0_354 = arith.constant 0 : index
    %725 = vector.load %arg4[%c0_353, %c0_354] : memref<8x2048xf32, #tpu.memory_space<vmem>>, vector<1x2048xf32>
    %726 = vector.broadcast %725 : vector<1x2048xf32> to vector<8x2048xf32>
    %727 = arith.mulf %724, %726 : vector<8x2048xf32>
    %728 = arith.truncf %727 : vector<8x2048xf32> to vector<8x2048xbf16>
    %c0_355 = arith.constant 0 : index
    %c0_356 = arith.constant 0 : index
    %729 = vector.load %arg10[%c0_355, %c0_356] : memref<109x2048xbf16, #tpu.memory_space<vmem>>, vector<8x2048xbf16>
    tpu.vector_store %arg10[%c0_355, %c0_356], %728 {strides = array<i32>} : memref<109x2048xbf16, #tpu.memory_space<vmem>>, vector<8x2048xbf16>,
    %c16_i32_357 = arith.constant 16 : i32
    %730 = tpu.dynamic_rotate %723 by %c16_i32_357 dim 1 : vector<8x2048xf32>, i32 -> vector<8x2048xf32>
    %c1_358 = arith.constant 1 : index
    %c0_359 = arith.constant 0 : index
    %731 = vector.load %arg4[%c1_358, %c0_359] : memref<8x2048xf32, #tpu.memory_space<vmem>>, vector<1x2048xf32>
    %732 = vector.broadcast %731 : vector<1x2048xf32> to vector<8x2048xf32>
    %733 = arith.mulf %730, %732 : vector<8x2048xf32>
    %734 = arith.truncf %733 : vector<8x2048xf32> to vector<8x2048xbf16>
    %c8_360 = arith.constant 8 : index
    %c0_361 = arith.constant 0 : index
    %735 = vector.load %arg10[%c8_360, %c0_361] : memref<109x2048xbf16, #tpu.memory_space<vmem>>, vector<8x2048xbf16>
    tpu.vector_store %arg10[%c8_360, %c0_361], %734 {strides = array<i32>} : memref<109x2048xbf16, #tpu.memory_space<vmem>>, vector<8x2048xbf16>,
    %c15_i32_362 = arith.constant 15 : i32
    %736 = tpu.dynamic_rotate %723 by %c15_i32_362 dim 1 : vector<8x2048xf32>, i32 -> vector<8x2048xf32>
    %c2_363 = arith.constant 2 : index
    %c0_364 = arith.constant 0 : index
    %737 = vector.load %arg4[%c2_363, %c0_364] : memref<8x2048xf32, #tpu.memory_space<vmem>>, vector<1x2048xf32>
    %738 = vector.broadcast %737 : vector<1x2048xf32> to vector<8x2048xf32>
    %739 = arith.mulf %736, %738 : vector<8x2048xf32>
    %740 = arith.truncf %739 : vector<8x2048xf32> to vector<8x2048xbf16>
    %c16_365 = arith.constant 16 : index
    %c0_366 = arith.constant 0 : index
    %741 = vector.load %arg10[%c16_365, %c0_366] : memref<109x2048xbf16, #tpu.memory_space<vmem>>, vector<8x2048xbf16>
    tpu.vector_store %arg10[%c16_365, %c0_366], %740 {strides = array<i32>} : memref<109x2048xbf16, #tpu.memory_space<vmem>>, vector<8x2048xbf16>,
    %c1_i32_367 = arith.constant 1 : i32
    %742 = tpu.dynamic_rotate %723 by %c1_i32_367 dim 1 : vector<8x2048xf32>, i32 -> vector<8x2048xf32>
    %c3_368 = arith.constant 3 : index
    %c0_369 = arith.constant 0 : index
    %743 = vector.load %arg4[%c3_368, %c0_369] : memref<8x2048xf32, #tpu.memory_space<vmem>>, vector<1x2048xf32>
    %744 = vector.broadcast %743 : vector<1x2048xf32> to vector<8x2048xf32>
    %745 = arith.mulf %742, %744 : vector<8x2048xf32>
    %746 = arith.truncf %745 : vector<8x2048xf32> to vector<8x2048xbf16>
    %c24_370 = arith.constant 24 : index
    %c0_371 = arith.constant 0 : index
    %747 = vector.load %arg10[%c24_370, %c0_371] : memref<109x2048xbf16, #tpu.memory_space<vmem>>, vector<8x2048xbf16>
    tpu.vector_store %arg10[%c24_370, %c0_371], %746 {strides = array<i32>} : memref<109x2048xbf16, #tpu.memory_space<vmem>>, vector<8x2048xbf16>,
    %748 = arith.truncf %723 : vector<8x2048xf32> to vector<8x2048xbf16>
    %c32_372 = arith.constant 32 : index
    %c0_373 = arith.constant 0 : index
    %749 = vector.load %arg10[%c32_372, %c0_373] : memref<109x2048xbf16, #tpu.memory_space<vmem>>, vector<8x2048xbf16>
    tpu.vector_store %arg10[%c32_372, %c0_373], %748 {strides = array<i32>} : memref<109x2048xbf16, #tpu.memory_space<vmem>>, vector<8x2048xbf16>,
    %c2047_i32_374 = arith.constant 2047 : i32
    %750 = tpu.dynamic_rotate %723 by %c2047_i32_374 dim 1 : vector<8x2048xf32>, i32 -> vector<8x2048xf32>
    %c4_375 = arith.constant 4 : index
    %c0_376 = arith.constant 0 : index
    %751 = vector.load %arg4[%c4_375, %c0_376] : memref<8x2048xf32, #tpu.memory_space<vmem>>, vector<1x2048xf32>
    %752 = vector.broadcast %751 : vector<1x2048xf32> to vector<8x2048xf32>
    %753 = arith.mulf %750, %752 : vector<8x2048xf32>
    %754 = arith.truncf %753 : vector<8x2048xf32> to vector<8x2048xbf16>
    %c40_377 = arith.constant 40 : index
    %c0_378 = arith.constant 0 : index
    %755 = vector.load %arg10[%c40_377, %c0_378] : memref<109x2048xbf16, #tpu.memory_space<vmem>>, vector<8x2048xbf16>
    tpu.vector_store %arg10[%c40_377, %c0_378], %754 {strides = array<i32>} : memref<109x2048xbf16, #tpu.memory_space<vmem>>, vector<8x2048xbf16>,
    %c2033_i32_379 = arith.constant 2033 : i32
    %756 = tpu.dynamic_rotate %723 by %c2033_i32_379 dim 1 : vector<8x2048xf32>, i32 -> vector<8x2048xf32>
    %c5_380 = arith.constant 5 : index
    %c0_381 = arith.constant 0 : index
    %757 = vector.load %arg4[%c5_380, %c0_381] : memref<8x2048xf32, #tpu.memory_space<vmem>>, vector<1x2048xf32>
    %758 = vector.broadcast %757 : vector<1x2048xf32> to vector<8x2048xf32>
    %759 = arith.mulf %756, %758 : vector<8x2048xf32>
    %760 = arith.truncf %759 : vector<8x2048xf32> to vector<8x2048xbf16>
    %c48_382 = arith.constant 48 : index
    %c0_383 = arith.constant 0 : index
    %761 = vector.load %arg10[%c48_382, %c0_383] : memref<109x2048xbf16, #tpu.memory_space<vmem>>, vector<8x2048xbf16>
    tpu.vector_store %arg10[%c48_382, %c0_383], %760 {strides = array<i32>} : memref<109x2048xbf16, #tpu.memory_space<vmem>>, vector<8x2048xbf16>,
    %c2032_i32_384 = arith.constant 2032 : i32
    %762 = tpu.dynamic_rotate %723 by %c2032_i32_384 dim 1 : vector<8x2048xf32>, i32 -> vector<8x2048xf32>
    %c6_385 = arith.constant 6 : index
    %c0_386 = arith.constant 0 : index
    %763 = vector.load %arg4[%c6_385, %c0_386] : memref<8x2048xf32, #tpu.memory_space<vmem>>, vector<1x2048xf32>
    %764 = vector.broadcast %763 : vector<1x2048xf32> to vector<8x2048xf32>
    %765 = arith.mulf %762, %764 : vector<8x2048xf32>
    %766 = arith.truncf %765 : vector<8x2048xf32> to vector<8x2048xbf16>
    %c56_387 = arith.constant 56 : index
    %c0_388 = arith.constant 0 : index
    %767 = vector.load %arg10[%c56_387, %c0_388] : memref<109x2048xbf16, #tpu.memory_space<vmem>>, vector<8x2048xbf16>
    tpu.vector_store %arg10[%c56_387, %c0_388], %766 {strides = array<i32>} : memref<109x2048xbf16, #tpu.memory_space<vmem>>, vector<8x2048xbf16>,
    %c2031_i32_389 = arith.constant 2031 : i32
    %768 = tpu.dynamic_rotate %723 by %c2031_i32_389 dim 1 : vector<8x2048xf32>, i32 -> vector<8x2048xf32>
    %c7_390 = arith.constant 7 : index
    %c0_391 = arith.constant 0 : index
    %769 = vector.load %arg4[%c7_390, %c0_391] : memref<8x2048xf32, #tpu.memory_space<vmem>>, vector<1x2048xf32>
    %770 = vector.broadcast %769 : vector<1x2048xf32> to vector<8x2048xf32>
    %771 = arith.mulf %768, %770 : vector<8x2048xf32>
    %772 = arith.truncf %771 : vector<8x2048xf32> to vector<8x2048xbf16>
    %c64_392 = arith.constant 64 : index
    %c0_393 = arith.constant 0 : index
    %773 = vector.load %arg10[%c64_392, %c0_393] : memref<109x2048xbf16, #tpu.memory_space<vmem>>, vector<8x2048xbf16>
    tpu.vector_store %arg10[%c64_392, %c0_393], %772 {strides = array<i32>} : memref<109x2048xbf16, #tpu.memory_space<vmem>>, vector<8x2048xbf16>,
    %c0_394 = arith.constant 0 : index
    %c0_395 = arith.constant 0 : index
    %774 = vector.load %arg6[%c0_394, %c0_395] : memref<8x109xbf16, #tpu.memory_space<vmem>>, vector<8x109xbf16>
    %c0_396 = arith.constant 0 : index
    %c0_397 = arith.constant 0 : index
    %775 = vector.load %arg10[%c0_396, %c0_397] : memref<109x2048xbf16, #tpu.memory_space<vmem>>, vector<109x2048xbf16>
    %cst_398 = arith.constant dense<0.000000e+00> : vector<8x2048xf32>
    %776 = tpu.matmul %774, %775, %cst_398 {dimension_numbers = #tpu.dot_dimension_numbers<[1], [0], [0], [1], [0, 0, 1, 1], [], []>} : vector<8x109xbf16>, vector<109x2048xbf16>, vector<8x2048xf32> -> vector<8x2048xf32>
    %cst_399 = arith.constant 0.000000e+00 : f32
    %777 = vector.broadcast %cst_399 : f32 to vector<8x2048xf32>
    %778 = arith.cmpf ogt, %776, %777 : vector<8x2048xf32>
    %cst_400 = arith.constant 1.000000e-01 : f32
    %779 = vector.broadcast %cst_400 : f32 to vector<8x2048xf32>
    %780 = arith.mulf %779, %776 : vector<8x2048xf32>
    %781 = arith.select %778, %776, %780 : vector<8x2048xi1>, vector<8x2048xf32>
    %c0_401 = arith.constant 0 : index
    %c0_402 = arith.constant 0 : index
    %782 = vector.load %arg9[%c0_401, %c0_402] : memref<12x2048xf32, #tpu.memory_space<vmem>>, vector<8x2048xf32>
    tpu.vector_store %arg9[%c0_401, %c0_402], %781 {strides = array<i32>} : memref<12x2048xf32, #tpu.memory_space<vmem>>, vector<8x2048xf32>,
    %c0_403 = arith.constant 0 : index
    %c0_404 = arith.constant 0 : index
    %783 = vector.load %arg9[%c0_403, %c0_404] : memref<12x2048xf32, #tpu.memory_space<vmem>>, vector<8x2048xf32>
    %c17_i32_405 = arith.constant 17 : i32
    %784 = tpu.dynamic_rotate %783 by %c17_i32_405 dim 1 : vector<8x2048xf32>, i32 -> vector<8x2048xf32>
    %c0_406 = arith.constant 0 : index
    %c0_407 = arith.constant 0 : index
    %785 = vector.load %arg4[%c0_406, %c0_407] : memref<8x2048xf32, #tpu.memory_space<vmem>>, vector<1x2048xf32>
    %786 = vector.broadcast %785 : vector<1x2048xf32> to vector<8x2048xf32>
    %787 = arith.mulf %784, %786 : vector<8x2048xf32>
    %788 = arith.truncf %787 : vector<8x2048xf32> to vector<8x2048xbf16>
    %c0_408 = arith.constant 0 : index
    %c0_409 = arith.constant 0 : index
    %789 = vector.load %arg10[%c0_408, %c0_409] : memref<109x2048xbf16, #tpu.memory_space<vmem>>, vector<8x2048xbf16>
    tpu.vector_store %arg10[%c0_408, %c0_409], %788 {strides = array<i32>} : memref<109x2048xbf16, #tpu.memory_space<vmem>>, vector<8x2048xbf16>,
    %c16_i32_410 = arith.constant 16 : i32
    %790 = tpu.dynamic_rotate %783 by %c16_i32_410 dim 1 : vector<8x2048xf32>, i32 -> vector<8x2048xf32>
    %c1_411 = arith.constant 1 : index
    %c0_412 = arith.constant 0 : index
    %791 = vector.load %arg4[%c1_411, %c0_412] : memref<8x2048xf32, #tpu.memory_space<vmem>>, vector<1x2048xf32>
    %792 = vector.broadcast %791 : vector<1x2048xf32> to vector<8x2048xf32>
    %793 = arith.mulf %790, %792 : vector<8x2048xf32>
    %794 = arith.truncf %793 : vector<8x2048xf32> to vector<8x2048xbf16>
    %c8_413 = arith.constant 8 : index
    %c0_414 = arith.constant 0 : index
    %795 = vector.load %arg10[%c8_413, %c0_414] : memref<109x2048xbf16, #tpu.memory_space<vmem>>, vector<8x2048xbf16>
    tpu.vector_store %arg10[%c8_413, %c0_414], %794 {strides = array<i32>} : memref<109x2048xbf16, #tpu.memory_space<vmem>>, vector<8x2048xbf16>,
    %c15_i32_415 = arith.constant 15 : i32
    %796 = tpu.dynamic_rotate %783 by %c15_i32_415 dim 1 : vector<8x2048xf32>, i32 -> vector<8x2048xf32>
    %c2_416 = arith.constant 2 : index
    %c0_417 = arith.constant 0 : index
    %797 = vector.load %arg4[%c2_416, %c0_417] : memref<8x2048xf32, #tpu.memory_space<vmem>>, vector<1x2048xf32>
    %798 = vector.broadcast %797 : vector<1x2048xf32> to vector<8x2048xf32>
    %799 = arith.mulf %796, %798 : vector<8x2048xf32>
    %800 = arith.truncf %799 : vector<8x2048xf32> to vector<8x2048xbf16>
    %c16_418 = arith.constant 16 : index
    %c0_419 = arith.constant 0 : index
    %801 = vector.load %arg10[%c16_418, %c0_419] : memref<109x2048xbf16, #tpu.memory_space<vmem>>, vector<8x2048xbf16>
    tpu.vector_store %arg10[%c16_418, %c0_419], %800 {strides = array<i32>} : memref<109x2048xbf16, #tpu.memory_space<vmem>>, vector<8x2048xbf16>,
    %c1_i32_420 = arith.constant 1 : i32
    %802 = tpu.dynamic_rotate %783 by %c1_i32_420 dim 1 : vector<8x2048xf32>, i32 -> vector<8x2048xf32>
    %c3_421 = arith.constant 3 : index
    %c0_422 = arith.constant 0 : index
    %803 = vector.load %arg4[%c3_421, %c0_422] : memref<8x2048xf32, #tpu.memory_space<vmem>>, vector<1x2048xf32>
    %804 = vector.broadcast %803 : vector<1x2048xf32> to vector<8x2048xf32>
    %805 = arith.mulf %802, %804 : vector<8x2048xf32>
    %806 = arith.truncf %805 : vector<8x2048xf32> to vector<8x2048xbf16>
    %c24_423 = arith.constant 24 : index
    %c0_424 = arith.constant 0 : index
    %807 = vector.load %arg10[%c24_423, %c0_424] : memref<109x2048xbf16, #tpu.memory_space<vmem>>, vector<8x2048xbf16>
    tpu.vector_store %arg10[%c24_423, %c0_424], %806 {strides = array<i32>} : memref<109x2048xbf16, #tpu.memory_space<vmem>>, vector<8x2048xbf16>,
    %808 = arith.truncf %783 : vector<8x2048xf32> to vector<8x2048xbf16>
    %c32_425 = arith.constant 32 : index
    %c0_426 = arith.constant 0 : index
    %809 = vector.load %arg10[%c32_425, %c0_426] : memref<109x2048xbf16, #tpu.memory_space<vmem>>, vector<8x2048xbf16>
    tpu.vector_store %arg10[%c32_425, %c0_426], %808 {strides = array<i32>} : memref<109x2048xbf16, #tpu.memory_space<vmem>>, vector<8x2048xbf16>,
    %c2047_i32_427 = arith.constant 2047 : i32
    %810 = tpu.dynamic_rotate %783 by %c2047_i32_427 dim 1 : vector<8x2048xf32>, i32 -> vector<8x2048xf32>
    %c4_428 = arith.constant 4 : index
    %c0_429 = arith.constant 0 : index
    %811 = vector.load %arg4[%c4_428, %c0_429] : memref<8x2048xf32, #tpu.memory_space<vmem>>, vector<1x2048xf32>
    %812 = vector.broadcast %811 : vector<1x2048xf32> to vector<8x2048xf32>
    %813 = arith.mulf %810, %812 : vector<8x2048xf32>
    %814 = arith.truncf %813 : vector<8x2048xf32> to vector<8x2048xbf16>
    %c40_430 = arith.constant 40 : index
    %c0_431 = arith.constant 0 : index
    %815 = vector.load %arg10[%c40_430, %c0_431] : memref<109x2048xbf16, #tpu.memory_space<vmem>>, vector<8x2048xbf16>
    tpu.vector_store %arg10[%c40_430, %c0_431], %814 {strides = array<i32>} : memref<109x2048xbf16, #tpu.memory_space<vmem>>, vector<8x2048xbf16>,
    %c2033_i32_432 = arith.constant 2033 : i32
    %816 = tpu.dynamic_rotate %783 by %c2033_i32_432 dim 1 : vector<8x2048xf32>, i32 -> vector<8x2048xf32>
    %c5_433 = arith.constant 5 : index
    %c0_434 = arith.constant 0 : index
    %817 = vector.load %arg4[%c5_433, %c0_434] : memref<8x2048xf32, #tpu.memory_space<vmem>>, vector<1x2048xf32>
    %818 = vector.broadcast %817 : vector<1x2048xf32> to vector<8x2048xf32>
    %819 = arith.mulf %816, %818 : vector<8x2048xf32>
    %820 = arith.truncf %819 : vector<8x2048xf32> to vector<8x2048xbf16>
    %c48_435 = arith.constant 48 : index
    %c0_436 = arith.constant 0 : index
    %821 = vector.load %arg10[%c48_435, %c0_436] : memref<109x2048xbf16, #tpu.memory_space<vmem>>, vector<8x2048xbf16>
    tpu.vector_store %arg10[%c48_435, %c0_436], %820 {strides = array<i32>} : memref<109x2048xbf16, #tpu.memory_space<vmem>>, vector<8x2048xbf16>,
    %c2032_i32_437 = arith.constant 2032 : i32
    %822 = tpu.dynamic_rotate %783 by %c2032_i32_437 dim 1 : vector<8x2048xf32>, i32 -> vector<8x2048xf32>
    %c6_438 = arith.constant 6 : index
    %c0_439 = arith.constant 0 : index
    %823 = vector.load %arg4[%c6_438, %c0_439] : memref<8x2048xf32, #tpu.memory_space<vmem>>, vector<1x2048xf32>
    %824 = vector.broadcast %823 : vector<1x2048xf32> to vector<8x2048xf32>
    %825 = arith.mulf %822, %824 : vector<8x2048xf32>
    %826 = arith.truncf %825 : vector<8x2048xf32> to vector<8x2048xbf16>
    %c56_440 = arith.constant 56 : index
    %c0_441 = arith.constant 0 : index
    %827 = vector.load %arg10[%c56_440, %c0_441] : memref<109x2048xbf16, #tpu.memory_space<vmem>>, vector<8x2048xbf16>
    tpu.vector_store %arg10[%c56_440, %c0_441], %826 {strides = array<i32>} : memref<109x2048xbf16, #tpu.memory_space<vmem>>, vector<8x2048xbf16>,
    %c2031_i32_442 = arith.constant 2031 : i32
    %828 = tpu.dynamic_rotate %783 by %c2031_i32_442 dim 1 : vector<8x2048xf32>, i32 -> vector<8x2048xf32>
    %c7_443 = arith.constant 7 : index
    %c0_444 = arith.constant 0 : index
    %829 = vector.load %arg4[%c7_443, %c0_444] : memref<8x2048xf32, #tpu.memory_space<vmem>>, vector<1x2048xf32>
    %830 = vector.broadcast %829 : vector<1x2048xf32> to vector<8x2048xf32>
    %831 = arith.mulf %828, %830 : vector<8x2048xf32>
    %832 = arith.truncf %831 : vector<8x2048xf32> to vector<8x2048xbf16>
    %c64_445 = arith.constant 64 : index
    %c0_446 = arith.constant 0 : index
    %833 = vector.load %arg10[%c64_445, %c0_446] : memref<109x2048xbf16, #tpu.memory_space<vmem>>, vector<8x2048xbf16>
    tpu.vector_store %arg10[%c64_445, %c0_446], %832 {strides = array<i32>} : memref<109x2048xbf16, #tpu.memory_space<vmem>>, vector<8x2048xbf16>,
    %c0_447 = arith.constant 0 : index
    %c0_448 = arith.constant 0 : index
    %834 = vector.load %arg7[%c0_447, %c0_448] : memref<4x109xbf16, #tpu.memory_space<vmem>>, vector<4x109xbf16>
    %c0_449 = arith.constant 0 : index
    %c0_450 = arith.constant 0 : index
    %835 = vector.load %arg10[%c0_449, %c0_450] : memref<109x2048xbf16, #tpu.memory_space<vmem>>, vector<109x2048xbf16>
    %cst_451 = arith.constant dense<0.000000e+00> : vector<4x2048xf32>
    %836 = tpu.matmul %834, %835, %cst_451 {dimension_numbers = #tpu.dot_dimension_numbers<[1], [0], [0], [1], [0, 0, 1, 1], [], []>} : vector<4x109xbf16>, vector<109x2048xbf16>, vector<4x2048xf32> -> vector<4x2048xf32>
    %cst_452 = arith.constant 0.000000e+00 : f32
    %837 = vector.broadcast %cst_452 : f32 to vector<4x2048xf32>
    %838 = arith.cmpf ogt, %836, %837 : vector<4x2048xf32>
    %cst_453 = arith.constant 1.000000e-01 : f32
    %839 = vector.broadcast %cst_453 : f32 to vector<4x2048xf32>
    %840 = arith.mulf %839, %836 : vector<4x2048xf32>
    %841 = arith.select %838, %836, %840 : vector<4x2048xi1>, vector<4x2048xf32>
    %c0_454 = arith.constant 0 : index
    %c0_455 = arith.constant 0 : index
    %842 = vector.load %arg8[%c0_454, %c0_455] : memref<4x2048xf32, #tpu.memory_space<vmem>>, vector<4x2048xf32>
    tpu.vector_store %arg8[%c0_454, %c0_455], %841 {strides = array<i32>} : memref<4x2048xf32, #tpu.memory_space<vmem>>, vector<4x2048xf32>,
    return
  }
  func.func @transform_0(%arg0: i32) -> (i32, i32) {
    %c0_i32 = arith.constant 0 : i32
    %c0_i32_0 = arith.constant 0 : i32
    %c0_i32_1 = arith.constant 0 : i32
    return %c0_i32, %c0_i32_0 : i32, i32
  }
  func.func @transform_1(%arg0: i32) -> (i32, i32) {
    %c0_i32 = arith.constant 0 : i32
    %c0_i32_0 = arith.constant 0 : i32
    %c0_i32_1 = arith.constant 0 : i32
    return %c0_i32, %c0_i32_0 : i32, i32
  }
  func.func @transform_2(%arg0: i32) -> (i32, i32) {
    %c0_i32 = arith.constant 0 : i32
    %c0_i32_0 = arith.constant 0 : i32
    return %c0_i32, %arg0 : i32, i32
  }
  func.func @transform_3(%arg0: i32) -> (i32, i32) {
    %c0_i32 = arith.constant 0 : i32
    %c0_i32_0 = arith.constant 0 : i32
    %c0_i32_1 = arith.constant 0 : i32
    return %c0_i32, %c0_i32_0 : i32, i32
  }
  func.func @transform_4(%arg0: i32) -> (i32, i32) {
    %c0_i32 = arith.constant 0 : i32
    %c0_i32_0 = arith.constant 0 : i32
    %c0_i32_1 = arith.constant 0 : i32
    return %c0_i32, %c0_i32_0 : i32, i32
  }
  func.func @transform_5(%arg0: i32) -> (i32, i32) {
    %c0_i32 = arith.constant 0 : i32
    %c0_i32_0 = arith.constant 0 : i32
    %c0_i32_1 = arith.constant 0 : i32
    return %c0_i32, %c0_i32_0 : i32, i32
  }
  func.func @transform_6(%arg0: i32) -> (i32, i32) {
    %c0_i32 = arith.constant 0 : i32
    %c0_i32_0 = arith.constant 0 : i32
    %c0_i32_1 = arith.constant 0 : i32
    return %c0_i32, %c0_i32_0 : i32, i32
  }
  func.func @transform_7(%arg0: i32) -> (i32, i32) {
    %c0_i32 = arith.constant 0 : i32
    %c0_i32_0 = arith.constant 0 : i32
    return %c0_i32, %arg0 : i32, i32
  }
}

</mosaic_0001>

<bundles_post_ra>
// kernel: tpu_custom_call.1
= control target key start
LH: loop header
LB: loop body
LE: loop exit
PB: predicated region body
PF: predicated region fallthrough
CT: control target
= control target key end

     0   :  { %s19160_s0 = inlined_call_operand.hbm [shape: f32[8,8], index: 0, kind: input, shape index: {}]   ;;  %s19161_s1 = inlined_call_operand.hbm [shape: f32[8,8], index: 1, kind: input, shape index: {}]   ;;  %s19162_s2 = inlined_call_operand.hbm [shape: f32[4,4096], index: 2, kind: input, shape index: {}]   ;;  %s19163_s3 = inlined_call_operand.hbm [shape: f32[8,2048], index: 3, kind: input, shape index: {}]   ;;  %s19164_s4 = inlined_call_operand.vmem [shape: bf16[8,109], index: 4, kind: input, shape index: {}]   ;;  %s19165_s5 = inlined_call_operand.vmem [shape: bf16[8,109], index: 5, kind: input, shape index: {}]   ;;  %s19166_s6 = inlined_call_operand.vmem [shape: bf16[4,109], index: 6, kind: input, shape index: {}]   ;;  %s19167_s7 = inlined_call_operand.hbm [shape: f32[4,4096], index: 7, kind: output, shape index: {}]  }
   0x1   :  { %19330 = sst [smem:[#allocation74_spill]] %s19160_s0 }
   0x2   :  { %19331 = sst [smem:[#allocation75_spill]] %s19161_s1 }
   0x3   :  { %19332 = sst [smem:[#allocation76_spill]] %s19162_s2 }
   0x4   :  { %12 = vsyncpa [#allocation7], 0 }
   0x5   :  { %13 = vsyncpa [#allocation9], 0 }
   0x6   :  { %14 = vsyncpa [#allocation5], 0 }
   0x7   :  { %16 = vsyncpa [#allocation5 + $0x1], 0 }
   0x8   :  { %17 = vsyncpa [#allocation12], 0 }
   0x9   :  { %18 = vsyncpa [#allocation6], 0 }
   0xa   :  { %20 = vsyncpa [#allocation6 + $0x1], 0  ;;  %s13692_s24 = smov 0   ;;  %s13694_s25 = smov 0  }
   0xb   :  { %s13696_s26 = smov 0   ;;  %s13698_s27 = smov 0  }
   0xc LB: > { %s13713_s28 = sadd.s32 4294967295, %s13635_s27   ;;  %s12094_s29 = sadd.s32 4294967294, %s13635_s27   ;;  %s13635_s27 = sphi %s13698_s27, %s19636_s27   ;;  %s13631_s26 = sphi %s13696_s26, %s19635_s26   ;;  %s13627_s25 = sphi %s13694_s25, %s19634_s25   ;;  %s13623_s24 = sphi %s13692_s24, %s19633_s24  }
   0xd   : > { %p88_p0 = scmp.ne.s32.totalorder %s13627_s25, %s13623_s24  ;;  %p19168_p1 = scmp.eq.s32.totalorder %s13713_s28, 0 }
   0xe   : > { %p202_p3 = scmp.eq.s32.totalorder %s12094_s29, 1  ;;  %p12095_p5 = scmp.ge.s32.totalorder %s13635_s27, 1 }
   0xf   : > { %p13722_p4 = por %p19168_p1, %p88_p0  ;;  %p209_p7 = scmp.lt.s32.totalorder %s13635_s27, 3 }
  0x10   : > { %p13727_p6 = por %p202_p3, %p88_p0  ;;  %s13637_s10 = smov [#allocation11]  }
  0x11   : > { %s19333_s30 = scalar_select %p13722_p4, 1, 0 }
  0x12   : > { %s19334_s8 = scalar_select %p13727_p6, 1, 0 }
  0x13   : > { %p13732_p8 = pnand %p12095_p5, %p209_p7  ;;  %s240_s11 = sshll.u32 %s13637_s10, 4  ;;  %s13739_s11 = int_to_ptr.vmem [resolvable:$true] %s240_s11 }
  0x14   : > { %s13748_s13 = sadd.s32 1, %s13635_s27   ;;  %s19337_s0 = sld [smem:[#allocation74_spill]] }
  0x15   : > { %p13194_p10 = pneg %p13732_p8  ;;  %s72_s15 = ssub.s32 %s13635_s27, %s13748_s13 }
  0x17   : > { %p13743_p11 = pnand %p13194_p10, %p19168_p1 }
  0x19   : > { %p13475_p13 = pneg %p13743_p11 }
  0x1a   : > { %s13473_s18 = scalar_lea.hbm %s19337_s0, 128 }
  0x1b   : > { %p13474_p12 = scmp.ne.s32.totalorder %s19337_s0, %s13473_s18  ;;  %p13480_p5 = scmp.lt.u32.totalorder %s13473_s18, %s19337_s0 }
  0x1d   : > { %p13476_p0 = pnand %p13475_p13, %p13474_p12 }
  0x1f   : > { %p13477_p3 = pneg %p13476_p0 }
  0x21   : > { %p13482_p7 = pnand %p13480_p5, %p13477_p3 }
  0x23   : > { %13485 = shalt.err (!%p13482_p7)
}
  0x24   : > { %s13638_s23 = smov [#allocation4]   ;;  %s19338_s1 = sld [smem:[#allocation75_spill]] }
  0x25   : > { %13197 = dma.hbm_to_smem (!%p13743_p11), %s19337_s0, 128, %s13638_s23, [#allocation7]  }
  0x2a   : > { %s13486_s19 = scalar_lea.hbm %s19338_s1, 128 }
  0x2b   : > { %p13487_p10 = scmp.ne.s32.totalorder %s19338_s1, %s13486_s19  ;;  %p13493_p3 = scmp.lt.u32.totalorder %s13486_s19, %s19338_s1 }
  0x2d   : > { %p13489_p12 = pnand %p13487_p10, %p13475_p13 }
  0x2f   : > { %p13490_p0 = pneg %p13489_p12 }
  0x31   : > { %p13495_p5 = pnand %p13493_p3, %p13490_p0 }
  0x33   : > { %13498 = shalt.err (!%p13495_p5)
}
  0x34   : > { %s13639_s22 = smov [#allocation8]   ;;  %s13499_s16 = scalar_lea.hbm %s19163_s3, 2048 }
  0x35   : > { %13200 = dma.hbm_to_smem (!%p13743_p11), %s19338_s1, 128, %s13639_s22, [#allocation9]  }
  0x36   : > { %p13500_p7 = scmp.ne.s32.totalorder %s19163_s3, %s13499_s16  ;;  %p13506_p0 = scmp.lt.u32.totalorder %s13499_s16, %s19163_s3 }
  0x38   : > { %p13502_p10 = pnand %p13500_p7, %p13475_p13 }
  0x3a   : > { %p13503_p12 = pneg %p13502_p10 }
  0x3c   : > { %p13508_p3 = pnand %p13506_p0, %p13503_p12 }
  0x3e   : > { %13511 = shalt.err (!%p13508_p3)
}
  0x3f   : > { %s13512_s21 = scalar_lea.vmem %s13739_s11, 2048  ;;  %p13520_p2 = scmp.lt.s32.totalorder %s13739_s11, %s13739_s11 }
  0x40   : > { %p13513_p5 = scmp.ne.s32.totalorder %s13739_s11, %s13512_s21  ;;  %p13521_p7 = scmp.lt.s32.totalorder %s13512_s21, %s13512_s21 }
  0x42   : > { %p13515_p9 = pnand %p13513_p5, %p13475_p13  ;;  %p13522_p10 = por %p13521_p7, %p13520_p2 }
  0x44   : > { %p13516_p1 = pneg %p13515_p9 }
  0x46   : > { %p13523_p6 = pnand %p13522_p10, %p13516_p1 }
  0x48   : > { %13526 = shalt.err (!%p13523_p6)
}
  0x49   : > { %13203 = dma.hbm_to_vmem [thread:$0]  (!%p13743_p11), %s19163_s3, 2048, %s13739_s11, [#allocation12]  }
  0x4a   : > { %p73_p1 = scmp.eq.s32.totalorder %s72_s15, 0  ;;  %p82_p2 = scmp.ne.s32.totalorder %s13631_s26, %s13627_s25 }
  0x4b   : > { %p83_p6 = scmp.eq.s32.totalorder %s13635_s27, 0  ;;  %p13215_p9 = scmp.lt.s32.totalorder %s13635_s27, 2 }
  0x4c   : > { %s19339_s12 = sadd.s32 1, %s13631_s26  ;;  %p19340_p12 = scmp.eq.s32.totalorder %s13713_s28, 1 }
  0x4d   : > { %s13824_s29 = scalar_select %p73_p1, %s13631_s26, %s19339_s12  }
  0x4e   : > { %p84_p13 = por %p83_p6, %p82_p2  ;;  %p13828_p0 = por %p19340_p12, %p82_p2 }
  0x4f   : > { %s260_s10 = sand.u32 1, %s13631_s26   ;;  %s12888_s16 = sshll.u32 %s13635_s27, 10 }
  0x50   : > { %s19341_s14 = scalar_select %p13828_p0, 1, 0 }
  0x51   : > { %s12100_s17 = sshll.u32 %s260_s10, 6  ;;  %s19342_s2 = sld [smem:[#allocation76_spill]] }
  0x52   : > { %s264_s15 = scalar_lea.vmem [#allocation10], %s12100_s17  ;;  %p13839_p11 = pnand %p13215_p9, %p84_p13 }
  0x53   : > { %s272_s18 = sshll.u32 %s264_s15, 4  ;;  %s261_s22 = scalar_lea.sflag [#allocation5], %s260_s10  ;;  %s13843_s18 = int_to_ptr.vmem [resolvable:$true] %s272_s18 }
  0x54   : > { %p13529_p5 = pneg %p13839_p11 }
  0x57   : > { %s13837_s11 = scalar_lea.hbm %s19342_s2, %s12888_s16  ;;  %s13532_s17 = scalar_lea.hbm %s19342_s2, 2048 }
  0x58   : > { %s13527_s23 = scalar_lea.hbm %s13837_s11, 1024  ;;  %p13533_p1 = scmp.lt.u32.totalorder %s13837_s11, %s19342_s2 }
  0x59   : > { %p13528_p3 = scmp.ne.s32.totalorder %s13837_s11, %s13527_s23  ;;  %p13534_p2 = scmp.lt.u32.totalorder %s13532_s17, %s13527_s23 }
  0x5a   : > { %p13536_p9 = scmp.lt.u32.totalorder %s13527_s23, %s13837_s11 }
  0x5b   : > { %p13530_p7 = pnand %p13529_p5, %p13528_p3  ;;  %p13535_p6 = por %p13534_p2, %p13533_p1 }
  0x5d   : > { %p13531_p10 = pneg %p13530_p7  ;;  %p13537_p13 = por %p13536_p9, %p13535_p6 }
  0x5f   : > { %p13538_p12 = pnand %p13537_p13, %p13531_p10 }
  0x61   : > { %13541 = shalt.err (!%p13538_p12)
}
  0x62   : > { %s13542_s10 = scalar_lea.vmem %s13843_s18, 1024  ;;  %s13640_s15 = smov [#allocation10]  }
  0x63   : > { %p13543_p3 = scmp.ne.s32.totalorder %s13843_s18, %s13542_s10  ;;  %s13547_s12 = sshll.u32 %s13640_s15, 4  ;;  %s13548_s12 = int_to_ptr.vmem [resolvable:$false] %s13547_s12 }
  0x64   : > { %s13549_s16 = scalar_lea.vmem %s13548_s12, 2048  ;;  %p13550_p4 = scmp.lt.s32.totalorder %s13843_s18, %s13548_s12 }
  0x65   : > { %p13545_p7 = pnand %p13543_p3, %p13529_p5  ;;  %p13551_p1 = scmp.lt.s32.totalorder %s13549_s16, %s13542_s10 }
  0x67   : > { %p13546_p0 = pneg %p13545_p7  ;;  %p13552_p2 = por %p13551_p1, %p13550_p4 }
  0x69   : > { %p13553_p6 = pnand %p13552_p2, %p13546_p0 }
  0x6b   : > { %13556 = shalt.err (!%p13553_p6)
}
  0x6c   : > { %13207 = dma.hbm_to_vmem [thread:$0]  (!%p13839_p11), %s13837_s11, 1024, %s13843_s18, %s261_s22  }
  0x6d   : > { %281 = sbr.rel (%p13732_p8) target bundleno = 2005 (0x7d5), region = 48 }
  0x74   : > { %p19344_p5 = scmp.eq.s32.totalorder %s13713_s28, 0 }
  0x76   : > { %13602 = dma.done.wait (%p19344_p5), [#allocation7], 128   ;;  %p19345_p10 = pmov %p19344_p5 }
  0x77   : > { %p19346_p9 = pmov %p19344_p5 }
  0x78   : > { %13604 = vsyncadd (%p19345_p10), [#allocation7], 4294967168 }
  0x79   : > { %13606 = dma.done.wait (%p19346_p9), [#allocation9], 128   ;;  %p19347_p4 = pmov %p19344_p5 }
  0x7a   : > { %s13881_s21 = sand.u32 1, %s13627_s25   ;;  %p19348_p8 = scmp.ne.s32.totalorder %s19333_s30, 0 }
  0x7b   : > { %13608 = vsyncadd (%p19347_p4), [#allocation9], 4294967168  ;;  %s19171_s9 = sshll.u32 %s13881_s21, 6  ;;  %s292_s11 = scalar_lea.sflag [#allocation5], %s13881_s21 }
  0x7c   : > { %s295_s18 = scalar_lea.vmem [#allocation10], %s19171_s9 }
  0x7d   : > { %13610 = dma.done.wait (%p19348_p8), %s292_s11, 1024  }
  0x7e   : > { %13612 = vsyncadd (%p19348_p8), %s292_s11, 4294966272  ;;  %p19349_p0 = pmov %p19347_p4 }
  0x80   : > { %13614 = dma.done.wait (%p19349_p0), [#allocation12], 2048   ;;  %p19350_p11 = pmov %p19349_p0 }
  0x82   : > { %13616 = vsyncadd (%p19350_p11), [#allocation12], 4294965248 }
  0x83   : > { %304 = sfence }
  0x84   : > { %v13895_v0 = vld [vmem:[%s295_s18] sm:$0xff]  ;;  %v13897_v1 = vld [vmem:[%s295_s18 + $0x8] sm:$0xff]  ;;  %v13899_v2 = vld [vmem:[%s295_s18 + $0x10] sm:$0xff]  ;;  %s13901_s22 = sld [smem:[#allocation4 + $0x80]]  ;;  %s12125_s23 = sld [smem:[#allocation4 + $0x81]]  ;;  %vm453_vm0 = vcmask 1043456  }
  0x85   : > { %v13903_v3 = vld [vmem:[%s295_s18 + $0x18] sm:$0xff]  ;;  %v13905_v4 = vld [vmem:[%s295_s18 + $0x20] sm:$0xff]  ;;  %v13907_v5 = vld [vmem:[%s295_s18 + $0x28] sm:$0xff]  ;;  %369 = vst [vmem:[#allocation2 + $0x10] sm:$0xf] %v13897_v1  ;;  %s13910_s30 = sld [smem:[#allocation8 + $0x80]]  ;;  %v352_v6 = vcombine.high %v13897_v1, %v13897_v1  ;;  %v351_v7 = vcombine.high %v13895_v0, %v13895_v0 }
  0x86   : > { %367 = vst [vmem:[#allocation2] sm:$0xf] %v13895_v0  ;;  %371 = vst [vmem:[#allocation2 + $0x20] sm:$0xf] %v13899_v2  ;;  %v13918_v8 = vld [vmem:[%s295_s18 + $0x30] sm:$0xff]  ;;  %v13920_v9 = vld [vmem:[%s295_s18 + $0x38] sm:$0xff] }
  0x87   : > { %s12126_s17 = sld [smem:[#allocation8 + $0x81]]  ;;  %373 = vst [vmem:[#allocation2 + $0x30] sm:$0xf] %v13903_v3  ;;  %375 = vst [vmem:[#allocation2 + $0x40] sm:$0xf] %v13905_v4  ;;  %s12127_s20 = sld [smem:[#allocation4 + $0x82]]  ;;  %v358_v10 = vcombine.high %v13920_v9, %v13920_v9 }
  0x88   : > { %377 = vst [vmem:[#allocation2 + $0x50] sm:$0xf] %v13907_v5  ;;  %s12128_s19 = sld [smem:[#allocation8 + $0x82]]  ;;  %379 = vst [vmem:[#allocation2 + $0x60] sm:$0xf] %v13918_v8  ;;  %s13929_s10 = sld [smem:[#allocation4 + $0x83]] }
  0x89   : > { %381 = vst [vmem:[#allocation2 + $0x70] sm:$0xf] %v13920_v9  ;;  %370 = vst [vmem:[#allocation2 + $0x18] sm:$0xf] %v352_v6  ;;  %s13931_s15 = sld [smem:[#allocation8 + $0x83]]  ;;  %s13933_s12 = sld [smem:[#allocation4 + $0x84]] }
  0x8a   : > { %368 = vst [vmem:[#allocation2 + $0x8] sm:$0xf] %v351_v7  ;;  %s13935_s16 = sld [smem:[#allocation8 + $0x84]]  ;;  %382 = vst [vmem:[#allocation2 + $0x78] sm:$0xf] %v358_v10  ;;  %v467_v11 = vstv %s13901_s22  ;;  %s13938_s11 = sld [smem:[#allocation4 + $0x85]]  ;;  %v475_v15 = vstv %s12125_s23 }
  0x8b   : > { %s13940_s18 = sld [smem:[#allocation8 + $0x85]]  ;;  %v468_v12 = vmul.f32 %v467_v11, %v13895_v0  ;;  %v471_v13 = vstv %s13910_s30  ;;  %s13944_s9 = sld [smem:[#allocation4 + $0x86]]  ;;  %v476_v17 = vmul.f32 %v475_v15, %v13897_v1  ;;  %vm1040_vm5 = vcmask 1042434  }
  0x8c   : > { %s13946_s0 = sld [smem:[#allocation8 + $0x86]]  ;;  %v472_v14 = vmul.f32 %v471_v13, %v13895_v0  ;;  %s13949_s1 = sld [smem:[#allocation4 + $0x87]]  ;;  %vm1041_vm6 = vsmask.f32 2304  ;;  %vm1043_vm7 = vcmask 1046534  }
  0x8d   : > { %v479_v16 = vstv %s12126_s17  ;;  %s13951_s22 = sld [smem:[#allocation8 + $0x87]]  ;;  %v483_v19 = vstv %s12127_s20  ;;  %s13955_s30 = sld [smem:[#allocation4]]  ;;  %v477_v25 = vadd.f32 %v476_v17, %v468_v12  ;;  %vm1044_vm8 = vsmask.f32 6400  ;;  %vm14585_vm9 = vmand %vm1040_vm5, %vm1041_vm6 }
  0x8e   : > { %v480_v18 = vmul.f32 %v479_v16, %v13897_v1  ;;  %v487_v20 = vstv %s12128_s19  ;;  %s13957_s2 = sld [smem:[#allocation8]]  ;;  %v484_v21 = vmul.f32 %v483_v19, %v13899_v2  ;;  %v491_v23 = vstv %s13929_s10  ;;  %s13963_s23 = sld [smem:[#allocation4 + $0x1]]  ;;  %vm1045_vm10 = vmand %vm1043_vm7, %vm1044_vm8 }
  0x8f   : > { %v488_v22 = vmul.f32 %v487_v20, %v13899_v2  ;;  %v495_v24 = vstv %s13931_s15  ;;  %s13965_s17 = sld [smem:[#allocation8 + $0x1]]  ;;  %v492_v27 = vmul.f32 %v491_v23, %v13903_v3  ;;  %s13969_s20 = sld [smem:[#allocation4 + $0x2]]  ;;  %v499_v29 = vstv %s13933_s12  ;;  %vm14617_vm11 = vmor %vm1045_vm10, %vm14585_vm9 }
  0x90   : > { %v481_v26 = vadd.f32 %v480_v18, %v472_v14  ;;  %v496_v28 = vmul.f32 %v495_v24, %v13903_v3  ;;  %s13971_s19 = sld [smem:[#allocation8 + $0x2]]  ;;  %v503_v30 = vstv %s13935_s16  ;;  %v507_v31 = vstv %s13938_s11  ;;  %s13977_s10 = sld [smem:[#allocation4 + $0x3]] }
  0x91   : > { %v511_v32 = vstv %s13940_s18  ;;  %s13979_s15 = sld [smem:[#allocation8 + $0x3]]  ;;  %v485_v33 = vadd.f32 %v484_v21, %v477_v25  ;;  %v500_v35 = vmul.f32 %v499_v29, %v13905_v4  ;;  %v504_v36 = vmul.f32 %v503_v30, %v13905_v4  ;;  %s13989_s12 = sld [smem:[#allocation4 + $0x4]] }
  0x92   : > { %v489_v34 = vadd.f32 %v488_v22, %v481_v26  ;;  %v508_v37 = vmul.f32 %v507_v31, %v13907_v5  ;;  %v512_v38 = vmul.f32 %v511_v32, %v13907_v5  ;;  %v515_v39 = vstv %s13944_s9  ;;  %s13991_s16 = sld [smem:[#allocation8 + $0x4]]  ;;  %s13997_s11 = sld [smem:[#allocation4 + $0x5]] }
  0x93   : > { %v519_v40 = vstv %s13946_s0  ;;  %v493_v41 = vadd.f32 %v492_v27, %v485_v33  ;;  %v516_v43 = vmul.f32 %v515_v39, %v13918_v8  ;;  %v523_v45 = vstv %s13949_s1  ;;  %s14001_s0 = sld [smem:[#allocation8 + $0x5]]  ;;  %s14003_s9 = sld [smem:[#allocation4 + $0x6]] }
  0x94   : > { %v497_v42 = vadd.f32 %v496_v28, %v489_v34  ;;  %v520_v44 = vmul.f32 %v519_v40, %v13918_v8  ;;  %v527_v46 = vstv %s13951_s22  ;;  %v384_v47 = vstv %s13955_s30  ;;  %s14011_s1 = sld [smem:[#allocation8 + $0x6]]  ;;  %s14019_s18 = sld [smem:[#allocation8 + $0x7]] }
  0x95   : > { %v388_v48 = vstv %s13957_s2  ;;  %v501_v49 = vadd.f32 %v500_v35, %v493_v41  ;;  %v524_v51 = vmul.f32 %v523_v45, %v13920_v9  ;;  %v528_v52 = vmul.f32 %v527_v46, %v13920_v9  ;;  %s14013_s2 = sld [smem:[#allocation4 + $0x7]]  ;;  %s14021_s22 = sld [smem:[#allocation4 + $0x380]] }
  0x96   : > { %v505_v50 = vadd.f32 %v504_v36, %v497_v42  ;;  %v385_v53 = vmul.f32 %v384_v47, %v13895_v0  ;;  %v389_v54 = vmul.f32 %v388_v48, %v13895_v0  ;;  %v392_v55 = vstv %s13963_s23  ;;  %s14027_s30 = sld [smem:[#allocation8 + $0x380]]  ;;  %s14031_s23 = sld [smem:[#allocation4 + $0x381]] }
  0x97   : > { %v396_v56 = vstv %s13965_s17  ;;  %v509_v57 = vadd.f32 %v508_v37, %v501_v49  ;;  %v393_v59 = vmul.f32 %v392_v55, %v13897_v1  ;;  %v400_v61 = vstv %s13969_s20  ;;  %s14033_s17 = sld [smem:[#allocation8 + $0x381]]  ;;  %s14040_s20 = sld [smem:[#allocation4 + $0x382]] }
  0x98   : > { %v513_v58 = vadd.f32 %v512_v38, %v505_v50  ;;  %v397_v60 = vmul.f32 %v396_v56, %v13897_v1  ;;  %v404_v62 = vstv %s13971_s19  ;;  %v408_v63 = vstv %s13977_s10  ;;  %s14042_s19 = sld [smem:[#allocation8 + $0x382]]  ;;  %s14050_s10 = sld [smem:[#allocation4 + $0x383]] }
  0x99   : > { %v412_v6 = vstv %s13979_s15  ;;  %v517_v7 = vadd.f32 %v516_v43, %v509_v57  ;;  %v394_v11 = vadd.f32 %v393_v59, %v385_v53  ;;  %v401_v13 = vmul.f32 %v400_v61, %v13899_v2  ;;  %s14052_s15 = sld [smem:[#allocation8 + $0x383]]  ;;  %p19630_p12 = scmp.ne.s32.totalorder %s19341_s14, 0 }
  0x9a   : > { %v521_v10 = vadd.f32 %v520_v44, %v513_v58  ;;  %v398_v12 = vadd.f32 %v397_v60, %v389_v54  ;;  %v405_v14 = vmul.f32 %v404_v62, %v13899_v2  ;;  %v409_v15 = vmul.f32 %v408_v63, %v13903_v3 }
  0x9b   : > { %v413_v16 = vmul.f32 %v412_v6, %v13903_v3  ;;  %v525_v17 = vadd.f32 %v524_v51, %v517_v7  ;;  %v416_v19 = vstv %s13989_s12  ;;  %v420_v20 = vstv %s13991_s16  ;;  %s14058_s12 = sld [smem:[#allocation4 + $0x384]] }
  0x9c   : > { %v529_v18 = vadd.f32 %v528_v52, %v521_v10  ;;  %v402_v21 = vadd.f32 %v401_v13, %v394_v11  ;;  %v406_v22 = vadd.f32 %v405_v14, %v398_v12  ;;  %v417_v23 = vmul.f32 %v416_v19, %v13905_v4  ;;  %s14060_s16 = sld [smem:[#allocation8 + $0x384]] }
  0x9d   : > { %v421_v24 = vmul.f32 %v420_v20, %v13905_v4  ;;  %v424_v26 = vstv %s13997_s11  ;;  %v428_v27 = vstv %s14001_s0  ;;  %v432_v28 = vstv %s14003_s9  ;;  %s14068_s11 = sld [smem:[#allocation4 + $0x385]]  ;;  %s14073_s9 = sld [smem:[#allocation4 + $0x386]] }
  0x9e   : > { %v534_v25 = vcombine.low %v529_v18, %v529_v18  ;;  %v410_v29 = vadd.f32 %v409_v15, %v402_v21  ;;  %v414_v30 = vadd.f32 %v413_v16, %v406_v22  ;;  %v425_v31 = vmul.f32 %v424_v26, %v13907_v5  ;;  %s14070_s0 = sld [smem:[#allocation8 + $0x385]] }
  0x9f   : > { %v429_v32 = vmul.f32 %v428_v27, %v13907_v5  ;;  %v433_v34 = vmul.f32 %v432_v28, %v13918_v8  ;;  %v436_v35 = vstv %s14011_s1  ;;  %v440_v36 = vstv %s14013_s2  ;;  %s14075_s1 = sld [smem:[#allocation8 + $0x386]]  ;;  %s14083_s2 = sld [smem:[#allocation4 + $0x387]] }
  0xa0   : > { %v536_v33 = vsel %vm453_vm0, %v525_v17, %v534_v25  ;;  %v418_v38 = vadd.f32 %v417_v23, %v410_v29  ;;  %v422_v39 = vadd.f32 %v421_v24, %v414_v30  ;;  %v437_v40 = vmul.f32 %v436_v35, %v13918_v8 }
  0xa1   : > { %v540_v37 = vrot.slane %v536_v33, 4  ;;  %v441_v41 = vmul.f32 %v440_v36, %v13920_v9  ;;  %v444_v42 = vstv %s14019_s18  ;;  %v531_v43 = vcombine.high %v525_v17, %v525_v17  ;;  %s14085_s18 = sld [smem:[#allocation8 + $0x387]] }
  0xa2   : > { %v959_v44 = vstv %s14021_s22  ;;  %v426_v45 = vadd.f32 %v425_v31, %v418_v38  ;;  %v430_v46 = vadd.f32 %v429_v32, %v422_v39  ;;  %v445_v47 = vmul.f32 %v444_v42, %v13920_v9  ;;  %s14089_s22 = sld [smem:[#allocation4 + $0x100]] }
  0xa3   : > { %544 = vst [vmem:[#allocation2 + $0x90] ss:$-124 sps:$4 sm:$0xff] %v540_v37   ;;  %v960_v48 = vmul.f32 %v959_v44, %v13895_v0  ;;  %v537_v49 = vsel %vm453_vm0, %v531_v43, %v529_v18  ;;  %v963_v50 = vstv %s14027_s30  ;;  %v967_v51 = vstv %s14031_s23  ;;  %s14091_s30 = sld [smem:[#allocation8 + $0x100]]  ;;  %s14095_s23 = sld [smem:[#allocation4 + $0x101]] }
  0xa4   : > { %v971_v52 = vstv %s14033_s17  ;;  %v434_v53 = vadd.f32 %v433_v34, %v426_v45  ;;  %v438_v54 = vadd.f32 %v437_v40, %v430_v46  ;;  %v541_v55 = vrot.slane %v537_v49, 4  ;;  %s14097_s17 = sld [smem:[#allocation8 + $0x101]] }
  0xa5   : > { %v964_v56 = vmul.f32 %v963_v50, %v13895_v0  ;;  %v968_v57 = vmul.f32 %v967_v51, %v13897_v1  ;;  %v972_v58 = vmul.f32 %v971_v52, %v13897_v1  ;;  %v975_v59 = vstv %s14040_s20  ;;  %s19176_s20 = smov 17  }
  0xa6   : > { %v979_v60 = vstv %s14042_s19  ;;  %v442_v61 = vadd.f32 %v441_v41, %v434_v53  ;;  %v446_v62 = vadd.f32 %v445_v47, %v438_v54  ;;  %545 = vst [vmem:[#allocation2 + $0x98] ss:$-124 sps:$4 sm:$0xff] %v541_v55   ;;  %v976_v63 = vmul.f32 %v975_v59, %v13899_v2  ;;  %s14109_s19 = sld [smem:[#allocation4 + $0x102]] }
  0xa7   : > { %v980_v6 = vmul.f32 %v979_v60, %v13899_v2  ;;  %v969_v7 = vadd.f32 %v968_v57, %v960_v48  ;;  %v973_v10 = vadd.f32 %v972_v58, %v964_v56  ;;  %v983_v11 = vstv %s14050_s10  ;;  %s14111_s10 = sld [smem:[#allocation8 + $0x102]] }
  0xa8   : > { %v987_v12 = vstv %s14052_s15  ;;  %v451_v13 = vcombine.low %v446_v62, %v446_v62  ;;  %v448_v14 = vcombine.high %v442_v61, %v442_v61  ;;  %v984_v15 = vmul.f32 %v983_v11, %v13903_v3  ;;  %s14117_s15 = sld [smem:[#allocation4 + $0x103]] }
  0xa9   : > { %v988_v16 = vmul.f32 %v987_v12, %v13903_v3  ;;  %v977_v18 = vadd.f32 %v976_v63, %v969_v7  ;;  %v981_v19 = vadd.f32 %v980_v6, %v973_v10  ;;  %v991_v20 = vstv %s14058_s12  ;;  %s14119_s12 = sld [smem:[#allocation8 + $0x103]] }
  0xaa   : > { %v14099_v17 = vld [vmem:[#allocation2 + $0x10] sm:$0xff]  ;;  %v995_v21 = vstv %s14060_s16  ;;  %v454_v22 = vsel %vm453_vm0, %v442_v61, %v451_v13  ;;  %v455_v23 = vsel %vm453_vm0, %v448_v14, %v446_v62  ;;  %v992_v24 = vmul.f32 %v991_v20, %v13905_v4  ;;  %s14125_s16 = sld [smem:[#allocation4 + $0x104]] }
  0xab   : > { %1091 = vrot.lane.b32.xlu1 %v14099_v17, %s19176_s20  ;;  %v996_v25 = vmul.f32 %v995_v21, %v13905_v4  ;;  %v458_v26 = vrot.slane %v454_v22, 4  ;;  %v459_v27 = vrot.slane %v455_v23, 4  ;;  %v985_v28 = vadd.f32 %v984_v15, %v977_v18 }
  0xac   : > { %v989_v29 = vadd.f32 %v988_v16, %v981_v19  ;;  %v999_v30 = vstv %s14068_s11  ;;  %v1003_v31 = vstv %s14070_s0  ;;  %v1007_v32 = vstv %s14073_s9  ;;  %s14133_s11 = sld [smem:[#allocation8 + $0x104]]  ;;  %s14137_s0 = sld [smem:[#allocation4 + $0x105]] }
  0xad   : > { %v1011_v33 = vstv %s14075_s1  ;;  %462 = vst [vmem:[#allocation2 + $0x80] ss:$-124 sps:$4 sm:$0xff] %v458_v26   ;;  %v14121_v34 = vld [vmem:[#allocation2 + $0x18] sm:$0xff]  ;;  %463 = vst [vmem:[#allocation2 + $0x88] ss:$-124 sps:$4 sm:$0xff] %v459_v27   ;;  %v993_v35 = vadd.f32 %v992_v24, %v985_v28  ;;  %v1000_v37 = vmul.f32 %v999_v30, %v13907_v5  ;;  %v1004_v38 = vmul.f32 %v1003_v31, %v13907_v5  ;;  %s14139_s9 = sld [smem:[#allocation8 + $0x105]] }
  0xae   : > { %v997_v36 = vadd.f32 %v996_v25, %v989_v29  ;;  %v1008_v39 = vmul.f32 %v1007_v32, %v13918_v8  ;;  %v1012_v40 = vmul.f32 %v1011_v33, %v13918_v8  ;;  %v1015_v41 = vstv %s14083_s2  ;;  %s14147_s1 = sld [smem:[#allocation4 + $0x106]] }
  0xaf   : > { %1093 = vrot.lane.b32.xlu1 %v14121_v34, %s19176_s20  ;;  %v1019_v42 = vstv %s14085_s18  ;;  %v1001_v43 = vadd.f32 %v1000_v37, %v993_v35  ;;  %v1016_v45 = vmul.f32 %v1015_v41, %v13920_v9  ;;  %v549_v47 = vstv %s14089_s22  ;;  %s14149_s2 = sld [smem:[#allocation8 + $0x106]]  ;;  %s14161_s18 = sld [smem:[#allocation4 + $0x107]] }
  0xb0   : > { %v1005_v44 = vadd.f32 %v1004_v38, %v997_v36  ;;  %v1020_v46 = vmul.f32 %v1019_v42, %v13920_v9  ;;  %v553_v48 = vstv %s14091_s30  ;;  %v557_v49 = vstv %s14095_s23  ;;  %s14163_s22 = sld [smem:[#allocation8 + $0x107]]  ;;  %s13642_s30 = smov 16  }
  0xb1   : > { %v561_v50 = vstv %s14097_s17  ;;  %v1009_v51 = vadd.f32 %v1008_v39, %v1001_v43  ;;  %v550_v53 = vmul.f32 %v549_v47, %v13895_v0  ;;  %v554_v54 = vmul.f32 %v553_v48, %v13895_v0  ;;  %s12155_s23 = sld [smem:[#allocation4 + $0x180]] }
  0xb2   : > { %v1013_v52 = vadd.f32 %v1012_v40, %v1005_v44  ;;  %v558_v55 = vmul.f32 %v557_v49, %v13897_v1  ;;  %v562_v56 = vmul.f32 %v561_v50, %v13897_v1  ;;  %v565_v57 = vstv %s14109_s19  ;;  %s12156_s17 = sld [smem:[#allocation8 + $0x180]]  ;;  %s12157_s19 = sld [smem:[#allocation4 + $0x181]] }
  0xb3   : > { %v569_v58 = vstv %s14111_s10  ;;  %v14155_v59 = vadd.f32 %v1016_v45, %v1009_v51  ;;  %v566_v61 = vmul.f32 %v565_v57, %v13899_v2  ;;  %v573_v10 = vstv %s14117_s15  ;;  %s12158_s10 = sld [smem:[#allocation8 + $0x181]]  ;;  %s14201_s15 = sld [smem:[#allocation4 + $0x182]] }
  0xb4   : > { %v14157_v60 = vadd.f32 %v1020_v46, %v1013_v52  ;;  %v570_v62 = vmul.f32 %v569_v58, %v13899_v2  ;;  %v14165_v63 = vld [vmem:[#allocation2] sm:$0xff]  ;;  %v559_v6 = vadd.f32 %v558_v55, %v550_v53  ;;  %v563_v7 = vadd.f32 %v562_v56, %v554_v54  ;;  %v14178_v16 = vld [vmem:[#allocation2 + $0x8] sm:$0xff] }
  0xb5   : > { %v577_v11 = vstv %s14119_s12  ;;  %1087 = vrot.lane.b32.xlu0 %v14165_v63, %s19176_s20  ;;  %1315 = vrot.lane.b32.xlu1 %v14165_v63, %s13642_s30  ;;  %v1023_v12 = vcombine.high %v14155_v59, %v14155_v59  ;;  %v574_v13 = vmul.f32 %v573_v10, %v13903_v3  ;;  %v581_v15 = vstv %s14125_s16  ;;  %s14203_s12 = sld [smem:[#allocation8 + $0x182]]  ;;  %s14205_s16 = sld [smem:[#allocation4 + $0x183]] }
  0xb6   : > { %v578_v14 = vmul.f32 %v577_v11, %v13903_v3  ;;  %v567_v18 = vadd.f32 %v566_v61, %v559_v6  ;;  %v571_v19 = vadd.f32 %v570_v62, %v563_v7  ;;  %v582_v20 = vmul.f32 %v581_v15, %v13905_v4 }
  0xb7   : > { %v585_v21 = vstv %s14133_s11  ;;  %v1029_v22 = vsel %vm453_vm0, %v1023_v12, %v14157_v60  ;;  %v589_v24 = vstv %s14137_s0  ;;  %v593_v25 = vstv %s14139_s9  ;;  %s14207_s11 = sld [smem:[#allocation8 + $0x183]]  ;;  %s14211_s0 = sld [smem:[#allocation4 + $0x184]] }
  0xb8   : > { %v586_v23 = vmul.f32 %v585_v21, %v13905_v4  ;;  %v1033_v26 = vrot.slane %v1029_v22, 4  ;;  %v575_v27 = vadd.f32 %v574_v13, %v567_v18  ;;  %v579_v28 = vadd.f32 %v578_v14, %v571_v19  ;;  %s14217_s9 = sld [smem:[#allocation8 + $0x184]] }
  0xb9   : > { %v590_v29 = vmul.f32 %v589_v24, %v13907_v5  ;;  %1089 = vrot.lane.b32.xlu0 %v14178_v16, %s19176_s20  ;;  %1319 = vrot.lane.b32.xlu1 %v14099_v17, %s13642_s30  ;;  %v594_v30 = vmul.f32 %v593_v25, %v13907_v5  ;;  %v597_v31 = vstv %s14147_s1  ;;  %v601_v32 = vstv %s14149_s2  ;;  %s14219_s1 = sld [smem:[#allocation4 + $0x185]] }
  0xba   : > { %1037 = vst [vmem:[#allocation2 + $0xf8] ss:$-124 sps:$4 sm:$0xff] %v1033_v26   ;;  %v583_v33 = vadd.f32 %v582_v20, %v575_v27  ;;  %v587_v35 = vadd.f32 %v586_v23, %v579_v28  ;;  %v598_v36 = vmul.f32 %v597_v31, %v13918_v8  ;;  %v602_v37 = vmul.f32 %v601_v32, %v13918_v8  ;;  %s14223_s2 = sld [smem:[#allocation8 + $0x185]] }
  0xbb   : > { %v605_v38 = vstv %s14161_s18  ;;  %v609_v39 = vstv %s14163_s22  ;;  %v631_v50 = vstv %s12155_s23  ;;  %v635_v53 = vstv %s12156_s17  ;;  %s19172_s18 = smov 15   ;;  %s14234_s22 = sld [smem:[#allocation4 + $0x186]] }
  0xbc   : > { %v591_v40 = vadd.f32 %v590_v29, %v583_v33  ;;  %v595_v41 = vadd.f32 %v594_v30, %v587_v35  ;;  %v606_v42 = vmul.f32 %v605_v38, %v13920_v9  ;;  %v610_v43 = vmul.f32 %v609_v39, %v13920_v9  ;;  %s14240_s23 = sld [smem:[#allocation8 + $0x186]]  ;;  %s14242_s17 = sld [smem:[#allocation4 + $0x187]] }
  0xbd   : > { %v632_v52 = vmul.f32 %v631_v50, %v13895_v0  ;;  %v636_v55 = vmul.f32 %v635_v53, %v13895_v0  ;;  %v639_v56 = vstv %s12157_s19  ;;  %v643_v57 = vstv %s12158_s10  ;;  %s14246_s19 = sld [smem:[#allocation8 + $0x187]]  ;;  %s13644_s10 = smov 1  }
  0xbe   : > { %v599_v44 = vadd.f32 %v598_v36, %v591_v40  ;;  %v603_v45 = vadd.f32 %v602_v37, %v595_v41  ;;  %v640_v58 = vmul.f32 %v639_v56, %v13897_v1  ;;  %v644_v61 = vmul.f32 %v643_v57, %v13897_v1 }
  0xbf   : > { %v647_v62 = vstv %s14201_s15  ;;  %v651_v6 = vstv %s14203_s12  ;;  %v655_v11 = vstv %s14205_s16  ;;  %v659_v12 = vstv %s14207_s11  ;;  %s13645_s15 = smov 127   ;;  %s12172_s12 = sld [smem:[#allocation8 + $0x200]] }
  0xc0   : > { %v607_v46 = vadd.f32 %v606_v42, %v599_v44  ;;  %v611_v47 = vadd.f32 %v610_v43, %v603_v45  ;;  %v648_v7 = vmul.f32 %v647_v62, %v13899_v2  ;;  %v652_v10 = vmul.f32 %v651_v6, %v13899_v2  ;;  %s12174_s16 = sld [smem:[#allocation8 + $0x201]]  ;;  %s12171_s11 = sld [smem:[#allocation4 + $0x200]] }
  0xc1   : > { %v14209_v48 = vld [vmem:[#allocation2 + $0x78] sm:$0xff]  ;;  %v641_v13 = vadd.f32 %v640_v58, %v632_v52  ;;  %v645_v14 = vadd.f32 %v644_v61, %v636_v55  ;;  %v656_v15 = vmul.f32 %v655_v11, %v13903_v3  ;;  %v663_v18 = vstv %s14211_s0  ;;  %s12173_s0 = sld [smem:[#allocation4 + $0x201]] }
  0xc2   : > { %1117 = vrot.lane.b32.xlu0 %v14209_v48, %s19176_s20  ;;  %1345 = vrot.lane.b32.xlu1 %v14209_v48, %s13642_s30  ;;  %v616_v49 = vcombine.low %v611_v47, %v611_v47  ;;  %v660_v21 = vmul.f32 %v659_v12, %v13903_v3  ;;  %v667_v22 = vstv %s14217_s9  ;;  %v671_v23 = vstv %s14219_s1  ;;  %s12175_s9 = sld [smem:[#allocation4 + $0x202]] }
  0xc3   : > { %v649_v19 = vadd.f32 %v648_v7, %v641_v13  ;;  %v653_v20 = vadd.f32 %v652_v10, %v645_v14  ;;  %v664_v24 = vmul.f32 %v663_v18, %v13905_v4  ;;  %v675_v25 = vstv %s14223_s2  ;;  %s12176_s1 = sld [smem:[#allocation8 + $0x202]]  ;;  %s14295_s2 = sld [smem:[#allocation8 + $0x203]] }
  0xc4   : > { %v618_v51 = vsel %vm453_vm0, %v607_v46, %v616_v49  ;;  %v613_v26 = vcombine.high %v607_v46, %v607_v46  ;;  %v668_v27 = vmul.f32 %v667_v22, %v13905_v4  ;;  %v672_v30 = vmul.f32 %v671_v23, %v13907_v5 }
  0xc5   : > { %v622_v54 = vrot.slane %v618_v51, 4  ;;  %v657_v28 = vadd.f32 %v656_v15, %v649_v19  ;;  %v661_v29 = vadd.f32 %v660_v21, %v653_v20  ;;  %v679_v31 = vstv %s14234_s22  ;;  %s12177_s22 = sld [smem:[#allocation4 + $0x203]] }
  0xc6   : > { %1317 = vrot.lane.b32.xlu0 %v14178_v16, %s13642_s30  ;;  %1544 = vrot.lane.b32.xlu1 %v14178_v16, %s19172_s18  ;;  %v619_v32 = vsel %vm453_vm0, %v613_v26, %v611_v47  ;;  %v676_v33 = vmul.f32 %v675_v25, %v13907_v5  ;;  %v683_v35 = vstv %s14240_s23  ;;  %v687_v36 = vstv %s14242_s17  ;;  %s14297_s23 = sld [smem:[#allocation8 + $0x204]]  ;;  %s13646_s17 = smov 113  }
  0xc7   : > { %626 = vst [vmem:[#allocation2 + $0xa0] ss:$-124 sps:$4 sm:$0xff] %v622_v54   ;;  %v353_v37 = vcombine.high %v13899_v2, %v13899_v2  ;;  %v623_v38 = vrot.slane %v619_v32, 4  ;;  %v665_v39 = vadd.f32 %v664_v24, %v657_v28  ;;  %v680_v40 = vmul.f32 %v679_v31, %v13918_v8 }
  0xc8   : > { %v669_v41 = vadd.f32 %v668_v27, %v661_v29  ;;  %v684_v42 = vmul.f32 %v683_v35, %v13918_v8  ;;  %v691_v43 = vstv %s14246_s19  ;;  %v688_v45 = vmul.f32 %v687_v36, %v13920_v9  ;;  %s14305_s19 = sld [smem:[#allocation4 + $0x204]] }
  0xc9   : > { %372 = vst [vmem:[#allocation2 + $0x28] sm:$0xf] %v353_v37  ;;  %627 = vst [vmem:[#allocation2 + $0xa8] ss:$-124 sps:$4 sm:$0xff] %v623_v38   ;;  %v673_v44 = vadd.f32 %v672_v30, %v665_v39  ;;  %v692_v47 = vmul.f32 %v691_v43, %v13920_v9  ;;  %v354_v49 = vcombine.high %v13903_v3, %v13903_v3  ;;  %v717_v61 = vstv %s12172_s12  ;;  %s12181_s12 = sld [smem:[#allocation4 + $0x205]] }
  0xca   : > { %1321 = vrot.lane.b32.xlu0 %v14121_v34, %s13642_s30  ;;  %1548 = vrot.lane.b32.xlu1 %v14121_v34, %s19172_s18  ;;  %v677_v46 = vadd.f32 %v676_v33, %v669_v41  ;;  %v725_v62 = vstv %s12174_s16  ;;  %v718_v6 = vmul.f32 %v717_v61, %v13895_v0  ;;  %v713_v10 = vstv %s12171_s11  ;;  %s12184_s16 = sld [smem:[#allocation8 + $0x206]] }
  0xcb   : > { %v681_v50 = vadd.f32 %v680_v40, %v673_v44  ;;  %374 = vst [vmem:[#allocation2 + $0x38] sm:$0xf] %v354_v49  ;;  %v726_v7 = vmul.f32 %v725_v62, %v13897_v1  ;;  %v721_v11 = vstv %s12173_s0  ;;  %v714_v12 = vmul.f32 %v713_v10, %v13895_v0  ;;  %s12183_s11 = sld [smem:[#allocation4 + $0x206]]  ;;  %s14320_s0 = sld [smem:[#allocation8 + $0x207]]  ;;  %v14380_v10 = vld [vmem:[#allocation2 + $0x98] sm:$0xf] }
  0xcc   : > { %v685_v51 = vadd.f32 %v684_v42, %v677_v46  ;;  %v722_v13 = vmul.f32 %v721_v11, %v13897_v1  ;;  %v729_v15 = vstv %s12175_s9  ;;  %v733_v19 = vstv %s12176_s1  ;;  %s12185_s9 = sld [smem:[#allocation4 + $0x207]]  ;;  %s19178_s1 = smov 111  }
  0xcd   : > { %v689_v52 = vadd.f32 %v688_v45, %v681_v50  ;;  %v727_v14 = vadd.f32 %v726_v7, %v718_v6  ;;  %v730_v18 = vmul.f32 %v729_v15, %v13899_v2  ;;  %v741_v20 = vstv %s14295_s2  ;;  %v14368_v6 = vld [vmem:[#allocation2 + $0xf8] sm:$0xf]  ;;  %v14374_v7 = vld [vmem:[#allocation2 + $0x88] sm:$0xf]  ;;  %s19351_s2 = smov 15  }
  0xce   : > { %1542 = vrot.lane.b32.xlu0 %v14165_v63, %s19172_s18  ;;  %1769 = vrot.lane.b32.xlu1 %v14165_v63, %s13644_s10  ;;  %v693_v53 = vadd.f32 %v692_v47, %v685_v51  ;;  %v14317_v21 = vld [vmem:[#allocation2 + $0x20] sm:$0xff]  ;;  %v723_v22 = vadd.f32 %v722_v13, %v714_v12  ;;  %v734_v23 = vmul.f32 %v733_v19, %v13899_v2  ;;  %v737_v24 = vstv %s12177_s22  ;;  %s14507_s22 = sld [smem:[#allocation4 + $0x280]] }
  0xcf   : > { %v695_v54 = vcombine.high %v689_v52, %v689_v52  ;;  %v738_v25 = vmul.f32 %v737_v24, %v13903_v3  ;;  %v742_v26 = vmul.f32 %v741_v20, %v13903_v3  ;;  %v749_v27 = vstv %s14297_s23  ;;  %v14416_v11 = vld [vmem:[#allocation2 + $0xa0] sm:$0xf]  ;;  %s14509_s23 = sld [smem:[#allocation8 + $0x280]] }
  0xd0   : > { %v698_v55 = vcombine.low %v693_v53, %v693_v53  ;;  %v731_v28 = vadd.f32 %v730_v18, %v723_v22  ;;  %v735_v29 = vadd.f32 %v734_v23, %v727_v14  ;;  %v745_v30 = vstv %s14305_s19  ;;  %v1138_v19 = vld [vmem:[#allocation11] ss:$8 sm:$0xf]  ;;  %s14515_s19 = sld [smem:[#allocation4 + $0x281]] }
  0xd1   : > { %v701_v56 = vsel %vm453_vm0, %v695_v54, %v693_v53  ;;  %v746_v31 = vmul.f32 %v745_v30, %v13905_v4  ;;  %v750_v36 = vmul.f32 %v749_v27, %v13905_v4  ;;  %v753_v37 = vstv %s12181_s12  ;;  %v1139_v20 = vld [vmem:[#allocation11] ss:$8 sm:$0xf0]  ;;  %v1366_v27 = vld [vmem:[#allocation11 + $0x1] ss:$8 sm:$0xf0] }
  0xd2   : > { %1546 = vrot.lane.b32.xlu0 %v14099_v17, %s19172_s18  ;;  %1773 = vrot.lane.b32.xlu1 %v14099_v17, %s13644_s10  ;;  %v705_v57 = vrot.slane %v701_v56, 4  ;;  %v700_v58 = vsel %vm453_vm0, %v689_v52, %v698_v55  ;;  %v739_v33 = vadd.f32 %v738_v25, %v731_v28  ;;  %v743_v35 = vadd.f32 %v742_v26, %v735_v29  ;;  %v14348_v55 = vld [vmem:[#allocation2 + $0x80] sm:$0xf]  ;;  %s14517_s12 = sld [smem:[#allocation8 + $0x281]] }
  0xd3   : > { %v754_v38 = vmul.f32 %v753_v37, %v13907_v5  ;;  %v765_v40 = vstv %s12184_s16  ;;  %v761_v43 = vstv %s12183_s11  ;;  %v773_v46 = vstv %s14320_s0  ;;  %v1365_v25 = vld [vmem:[#allocation11 + $0x1] ss:$8 sm:$0xf]  ;;  %s14524_s16 = sld [smem:[#allocation4 + $0x282]]  ;;  %s14536_s0 = sld [smem:[#allocation4 + $0x283]] }
  0xd4   : > { %709 = vst [vmem:[#allocation2 + $0xb8] ss:$-124 sps:$4 sm:$0xff] %v705_v57   ;;  %v747_v41 = vadd.f32 %v746_v31, %v739_v33  ;;  %v751_v42 = vadd.f32 %v750_v36, %v743_v35  ;;  %v766_v44 = vmul.f32 %v765_v40, %v13918_v8  ;;  %v762_v45 = vmul.f32 %v761_v43, %v13918_v8  ;;  %s14526_s11 = sld [smem:[#allocation8 + $0x282]] }
  0xd5   : > { %v769_v50 = vstv %s12185_s9  ;;  %v774_v51 = vmul.f32 %v773_v46, %v13920_v9  ;;  %v12993_v12 = vpack.c.bf16 %v14374_v7, %v14348_v55  ;;  %v1119_v18 = vlaneseq  ;;  %s14547_s9 = sld [smem:[#allocation8 + $0x283]] }
  0xd6   : > { %1572 = vrot.lane.b32.xlu0 %v14209_v48, %s19172_s18  ;;  %1799 = vrot.lane.b32.xlu1 %v14209_v48, %s13644_s10  ;;  %v704_v48 = vrot.slane %v700_v58, 4  ;;  %s14307_s18 = sld [smem:[#allocation8 + $0x205]]  ;;  %v755_v47 = vadd.f32 %v754_v38, %v747_v41  ;;  %v770_v52 = vmul.f32 %v769_v50, %v13920_v9  ;;  %v14441_v29 = vor.u32 %v1139_v20, %v1138_v19 }
  0xd7   : > { %3968 = vst [vmem:[#allocation3 + $0x2c0] sm:$0x33] %v12993_v12  ;;  %v14432_v22 = vshrl.u32 %v1119_v18, 7  ;;  %v14436_v26 = vand.u32 127, %v1119_v18  ;;  %v14448_v31 = vor.u32 %v1366_v27, %v1365_v25  ;;  %vm5549_vm5 = vcmask 1045504  }
  0xd8   : > { %708 = vst [vmem:[#allocation2 + $0xb0] ss:$-124 sps:$4 sm:$0xff] %v704_v48   ;;  %v763_v53 = vadd.f32 %v762_v45, %v755_v47  ;;  %v14360_v48 = vld [vmem:[#allocation2 + $0x90] sm:$0xf]  ;;  %vm5550_vm6 = vcmask 1046528   ;;  %vm5545_vm7 = vcmask 891904  }
  0xd9   : > { %v12994_v13 = vpack.c.bf16 %v14380_v10, %v14360_v48  ;;  %v14439_v28 = vsub.s32 0, %v14432_v22  ;;  %v14444_v30 = vsub.s32 1, %v14432_v22  ;;  %vm1121_vm1 = vcmp.lt.s32.totalorder %v14436_v26, 17  ;;  %v1820_v18 = vld [vmem:[#allocation11 + $0x3] ss:$8 sm:$0xf0] }
  0xda   : > { %1771 = vrot.lane.b32.xlu0 %v14178_v16, %s13644_s10  ;;  %2070 = vrot.lane.b32.xlu1 %v14178_v16, %s13645_s15  ;;  %v14350_v56 = vadd.f32 %v770_v52, %v763_v53  ;;  %v14457_v33 = vsub.s32 2, %v14432_v22  ;;  %vm1347_vm2 = vcmp.lt.s32.totalorder %v14436_v26, 16  ;;  %vm1574_vm3 = vcmp.lt.s32.totalorder %v14436_v26, 15 }
  0xdb   : > { %3969 = vst [vmem:[#allocation3 + $0x2c8] sm:$0x33] %v12994_v13  ;;  %19352 = vst [vmem:[#allocation19_spill] sm:$0xff] %v14439_v28  ;;  %v1150_v35 = vrot.slane %v14441_v29, %v14439_v28  ;;  %v1377_v37 = vrot.slane %v14448_v31, %v14439_v28  ;;  %v1154_v41 = vrot.slane %v14441_v29, %v14444_v30  ;;  %v1592_v13 = vld [vmem:[#allocation11 + $0x2] ss:$8 sm:$0xf] }
  0xdc   : > { %v757_v32 = vstv %s14307_s18  ;;  %s13647_s18 = smov 112   ;;  %19353 = vst [vmem:[#allocation20_spill] sm:$0xff] %v14444_v30  ;;  %19355 = vst [vmem:[#allocation22_spill] sm:$0xff] %v14457_v33  ;;  %v1158_v45 = vrot.slane %v14441_v29, %v14457_v33  ;;  %v1385_v47 = vrot.slane %v14448_v31, %v14457_v33  ;;  %vm1801_vm4 = vcmp.lt.s32.totalorder %v14436_v26, 1 }
  0xdd   : > { %v758_v39 = vmul.f32 %v757_v32, %v13907_v5  ;;  %v14454_v32 = vsub.s32 3, %v14432_v22  ;;  %vm2100_vm12 = vcmp.lt.s32.totalorder %v14436_v26, 127  ;;  %vm2327_vm13 = vcmp.lt.s32.totalorder %v14436_v26, 113 }
  0xde   : > { %1775 = vrot.lane.b32.xlu0 %v14121_v34, %s13644_s10  ;;  %2074 = vrot.lane.b32.xlu1 %v14121_v34, %s13645_s15  ;;  %vm2554_vm14 = vcmp.lt.s32.totalorder %v14436_v26, 112  ;;  %vm2781_vm15 = vcmp.lt.s32.totalorder %v14436_v26, 111 }
  0xdf   : > { %v759_v49 = vadd.f32 %v758_v39, %v751_v42  ;;  %19354 = vst [vmem:[#allocation21_spill] sm:$0xff] %v14454_v32  ;;  %v1381_v42 = vrot.slane %v14448_v31, %v14444_v30  ;;  %v1162_v43 = vrot.slane %v14441_v29, %v14454_v32 }
  0xe1   : > { %v767_v54 = vadd.f32 %v766_v44, %v759_v49 }
  0xe2   : > { %2068 = vrot.lane.b32.xlu0 %v14165_v63, %s13645_s15  ;;  %2295 = vrot.lane.b32.xlu1 %v14165_v63, %s13646_s17 }
  0xe3   : > { %v14352_v57 = vadd.f32 %v774_v51, %v767_v54 }
  0xe5   : > { %v780_v58 = vcombine.low %v14352_v57, %v14352_v57 }
  0xe6   : > { %2072 = vrot.lane.b32.xlu0 %v14099_v17, %s13645_s15  ;;  %2299 = vrot.lane.b32.xlu1 %v14099_v17, %s13646_s17 }
  0xe7   : > { %v782_v61 = vsel %vm453_vm0, %v14350_v56, %v780_v58  ;;  %v1389_v58 = vrot.slane %v14448_v31, %v14454_v32 }
  0xe8   : > { %v786_v62 = vrot.slane %v782_v61, 4 }
  0xea   : > { %2076 = vrot.lane.b32.xlu0 %v14317_v21, %s13645_s15  ;;  %2303 = vrot.lane.b32.xlu1 %v14317_v21, %s13646_s17  ;;  %790 = vst [vmem:[#allocation2 + $0xc0] ss:$-124 sps:$4 sm:$0xff] %v786_v62  }
  0xee   : > { %2297 = vrot.lane.b32.xlu0 %v14178_v16, %s13646_s17  ;;  %2524 = vrot.lane.b32.xlu1 %v14178_v16, %s13647_s18 }
  0xf2   : > { %2301 = vrot.lane.b32.xlu0 %v14121_v34, %s13646_s17  ;;  %2528 = vrot.lane.b32.xlu1 %v14121_v34, %s13647_s18 }
  0xf6   : > { %2522 = vrot.lane.b32.xlu0 %v14165_v63, %s13647_s18  ;;  %3216 = vrot.lane.b32.xlu1 %v14348_v55, %s13642_s30 }
  0xfa   : > { %2526 = vrot.lane.b32.xlu0 %v14099_v17, %s13647_s18  ;;  %3220 = vrot.lane.b32.xlu1 %v14360_v48, %s13642_s30 }
  0xfe   : > { %2530 = vrot.lane.b32.xlu0 %v14317_v21, %s13647_s18  ;;  %3246 = vrot.lane.b32.xlu1 %v14368_v6, %s13642_s30 }
 0x102   : > { %3218 = vrot.lane.b32.xlu0 %v14374_v7, %s13642_s30  ;;  %2751 = vrot.lane.b32.xlu1 %v14178_v16, %s19178_s1 }
 0x106   : > { %3222 = vrot.lane.b32.xlu0 %v14380_v10, %s13642_s30  ;;  %2755 = vrot.lane.b32.xlu1 %v14121_v34, %s19178_s1 }
 0x10a   : > { %2749 = vrot.lane.b32.xlu0 %v14165_v63, %s19178_s1  ;;  %2992 = vrot.lane.b32.xlu1 %v14348_v55, %s19176_s20 }
 0x10e   : > { %2753 = vrot.lane.b32.xlu0 %v14099_v17, %s19178_s1  ;;  %2996 = vrot.lane.b32.xlu1 %v14360_v48, %s19176_s20 }
 0x112   : > { %2757 = vrot.lane.b32.xlu0 %v14317_v21, %s19178_s1  ;;  %3022 = vrot.lane.b32.xlu1 %v14368_v6, %s19176_s20 }
 0x116   : > { %2994 = vrot.lane.b32.xlu0 %v14374_v7, %s19176_s20  ;;  %3674 = vrot.lane.b32.xlu1 %v14374_v7, %s13644_s10 }
 0x11a   : > { %2998 = vrot.lane.b32.xlu0 %v14380_v10, %s19176_s20  ;;  %3678 = vrot.lane.b32.xlu1 %v14380_v10, %s13644_s10 }
 0x11d   : > { %v1092_v17 = vpop.permute.xlu1 %1091 }
 0x11e   : > { %3672 = vrot.lane.b32.xlu0 %v14348_v55, %s13644_s10  ;;  %3976 = vrot.lane.b32.xlu1 %v14348_v55, %s13645_s15 }
 0x121   : > { %v14414_v34 = vpop.permute.xlu1 %1093 }
 0x122   : > { %3676 = vrot.lane.b32.xlu0 %v14360_v48, %s13644_s10  ;;  %3980 = vrot.lane.b32.xlu1 %v14360_v48, %s13645_s15  ;;  %v1134_v52 = vsel %vm1121_vm1, %v1092_v17, %v14414_v34 }
 0x126   : > { %3702 = vrot.lane.b32.xlu0 %v14368_v6, %s13644_s10  ;;  %3984 = vrot.lane.b32.xlu1 %v14416_v11, %s13645_s15 }
 0x127   : > { %v1088_v14 = vpop.permute.xlu0 %1087  ;;  %v1316_v15 = vpop.permute.xlu1 %1315 }
 0x12a   : > { %3978 = vrot.lane.b32.xlu0 %v14374_v7, %s13645_s15  ;;  %3450 = vrot.lane.b32.xlu1 %v14374_v7, %s19351_s2 }
 0x12b   : > { %v1090_v23 = vpop.permute.xlu0 %1089  ;;  %v1320_v24 = vpop.permute.xlu1 %1319 }
 0x12c   : > { %v1136_v44 = vsel %vm1121_vm1, %v1088_v14, %v1090_v23  ;;  %v1135_v53 = vsel %vm1121_vm1, %v1090_v23, %v1092_v17  ;;  %v1819_v17 = vld [vmem:[#allocation11 + $0x3] ss:$8 sm:$0xf] }
 0x12d   : > { %v1228_v61 = vmul.f32 %v1154_v41, %v1136_v44  ;;  %v1229_v19 = vmul.f32 %v1158_v45, %v1135_v53 }
 0x12e   : > { %3982 = vrot.lane.b32.xlu0 %v14380_v10, %s13645_s15  ;;  %3454 = vrot.lane.b32.xlu1 %v14380_v10, %s19351_s2 }
 0x132   : > { %3448 = vrot.lane.b32.xlu0 %v14348_v55, %s19351_s2  ;;  %4432 = vrot.lane.b32.xlu1 %v14348_v55, %s13647_s18 }
 0x134   : > { %v14461_v36 = vpop.permute.xlu0 %1117  ;;  %v14466_v38 = vpop.permute.xlu1 %1345 }
 0x135   : > { %19356 = vst [vmem:[#allocation23_spill] sm:$0xff] %v14461_v36  ;;  %19357 = vst [vmem:[#allocation24_spill] sm:$0xff] %v14466_v38  ;;  %v1137_v39 = vsel %vm1121_vm1, %v14461_v36, %v1088_v14  ;;  %v1363_v40 = vsel %vm1347_vm2, %v14466_v38, %v1316_v15  ;;  %v1593_v14 = vld [vmem:[#allocation11 + $0x2] ss:$8 sm:$0xf0] }
 0x136   : > { %3452 = vrot.lane.b32.xlu0 %v14360_v48, %s19351_s2  ;;  %4436 = vrot.lane.b32.xlu1 %v14360_v48, %s13647_s18  ;;  %v1227_v46 = vmul.f32 %v1150_v35, %v1137_v39  ;;  %v1454_v50 = vmul.f32 %v1377_v37, %v1363_v40  ;;  %v14522_v27 = vor.u32 %v1593_v14, %v1592_v13  ;;  %v2118_v14 = vld [vmem:[#allocation11 + $0x4] ss:$8 sm:$0xf] }
 0x138   : > { %v1318_v49 = vpop.permute.xlu0 %1317  ;;  %v14490_v51 = vpop.permute.xlu1 %1544  ;;  %v13294_v39 = vpack.c.bf16 %v1454_v50, %v1227_v46  ;;  %v803_v46 = vstv %s14515_s19  ;;  %v799_v50 = vstv %s14509_s23  ;;  %s14579_s23 = sld [smem:[#allocation8 + $0x284]]  ;;  %s14625_s19 = sld [smem:[#allocation4 + $0x285]] }
 0x139   : > { %v1362_v54 = vsel %vm1347_vm2, %v1316_v15, %v1318_v49  ;;  %v1361_v62 = vsel %vm1347_vm2, %v1318_v49, %v1320_v24  ;;  %v1230_v15 = vmul.f32 %v1162_v43, %v1134_v52  ;;  %v804_v52 = vmul.f32 %v803_v46, %v13897_v1 }
 0x13a   : > { %v1455_v12 = vmul.f32 %v1381_v42, %v1362_v54  ;;  %3478 = vrot.lane.b32.xlu0 %v14368_v6, %s19351_s2  ;;  %4440 = vrot.lane.b32.xlu1 %v14416_v11, %s13647_s18  ;;  %v1456_v6 = vmul.f32 %v1385_v47, %v1361_v62  ;;  %v795_v42 = vstv %s14507_s22  ;;  %s14564_s22 = sld [smem:[#allocation4 + $0x284]]  ;;  %v819_v46 = vstv %s14536_s0  ;;  %s14682_s0 = sld [smem:[#allocation4 + $0x287]] }
 0x13b   : > { %v796_v49 = vmul.f32 %v795_v42, %v13895_v0 }
 0x13c   : > { %v14511_v20 = vpop.permute.xlu0 %1321  ;;  %v14513_v23 = vpop.permute.xlu1 %1548  ;;  %v13293_v37 = vpack.c.bf16 %v1455_v12, %v1228_v61  ;;  %v13296_v45 = vpack.c.bf16 %v1456_v6, %v1229_v19  ;;  %v2119_v6 = vld [vmem:[#allocation11 + $0x4] ss:$8 sm:$0xf0] }
 0x13d   : > { %v1360_v25 = vsel %vm1347_vm2, %v1320_v24, %v14511_v20  ;;  %v14534_v24 = vor.u32 %v1820_v18, %v1819_v17  ;;  %v807_v17 = vstv %s14517_s12  ;;  %v811_v18 = vstv %s14524_s16  ;;  %s14654_s12 = sld [smem:[#allocation8 + $0x285]]  ;;  %s14662_s16 = sld [smem:[#allocation4 + $0x286]] }
 0x13e   : > { %v1457_v35 = vmul.f32 %v1389_v58, %v1360_v25  ;;  %4434 = vrot.lane.b32.xlu0 %v14374_v7, %s13647_s18  ;;  %4210 = vrot.lane.b32.xlu1 %v14374_v7, %s13646_s17  ;;  %v1604_v58 = vrot.slane %v14522_v27, %v14439_v28  ;;  %v800_v25 = vmul.f32 %v799_v50, %v13895_v0 }
 0x13f   : > { %5601 = vmatprep.subr.bf16.mxu0 %v13293_v37  ;;  %v1835_v62 = vrot.slane %v14534_v24, %v14444_v30  ;;  %v1831_v13 = vrot.slane %v14534_v24, %v14439_v28  ;;  %v808_v42 = vmul.f32 %v807_v17, %v13897_v1  ;;  %v14603_v17 = vor.u32 %v2119_v6, %v2118_v14 }
 0x140   : > { %v1543_v40 = vpop.permute.xlu0 %1542  ;;  %v14532_v41 = vpop.permute.xlu1 %1769  ;;  %5602 = vmatpush1.bf16.msra.mxu0 %v13294_v39  ;;  %v13295_v44 = vpack.c.bf16 %v1457_v35, %v1230_v15  ;;  %v815_v15 = vstv %s14526_s11  ;;  %v805_v35 = vadd.f32 %v804_v52, %v796_v49  ;;  %v823_v6 = vstv %s14547_s9  ;;  %s14664_s11 = sld [smem:[#allocation8 + $0x286]]  ;;  %s14691_s9 = sld [smem:[#allocation8 + $0x287]] }
 0x141   : > { %v1589_v49 = vsel %vm1574_vm3, %v1543_v40, %v14490_v51  ;;  %v809_v14 = vadd.f32 %v808_v42, %v800_v25  ;;  %v827_v25 = vstv %s14564_s22  ;;  %s14747_s22 = sld [smem:[#allocation8 + $0x300]] }
 0x142   : > { %4438 = vrot.lane.b32.xlu0 %v14380_v10, %s13647_s18  ;;  %4214 = vrot.lane.b32.xlu1 %v14380_v10, %s13646_s17 }
 0x143   : > { %5642 = vmatprep.subr.bf16.mxu1 %v13295_v44  ;;  %v812_v44 = vmul.f32 %v811_v18, %v13899_v2  ;;  %v1047_v18 = vld [vmem:[#allocation3 + $0x340] sm:$0x44] }
 0x144   : > { %v1547_v54 = vpop.permute.xlu0 %1546  ;;  %v14558_v61 = vpop.permute.xlu1 %1773  ;;  %5643 = vmatpush1.bf16.msra.mxu1 %v13296_v45  ;;  %v816_v45 = vmul.f32 %v815_v15, %v13899_v2  ;;  %v1048_v53 = vsel %vm14617_vm11, 1065369472, %v1047_v18  ;;  %v828_v18 = vmul.f32 %v827_v25, %v13905_v4 }
 0x145   : > { %v1587_v15 = vsel %vm1574_vm3, %v1547_v54, %v14513_v23  ;;  %v1588_v19 = vsel %vm1574_vm3, %v14490_v51, %v1547_v54  ;;  %v813_v51 = vadd.f32 %v812_v44, %v805_v35  ;;  %v820_v54 = vmul.f32 %v819_v46, %v13903_v3  ;;  %1049 = vst [vmem:[#allocation3 + $0x340] sm:$0x44] %v1048_v53 }
 0x146   : > { %4208 = vrot.lane.b32.xlu0 %v14348_v55, %s13646_s17  ;;  %4664 = vrot.lane.b32.xlu1 %v14348_v55, %s19178_s1  ;;  %v817_v55 = vadd.f32 %v816_v45, %v809_v14  ;;  %v19366_v35 = vrot.slane %v14522_v27, %v14457_v33  ;;  %v1050_v45 = vld [vmem:[#allocation3 + $0x348] sm:$0x44] }
 0x148   : > { %v14581_v37 = vpop.permute.xlu0 %1572  ;;  %v14583_v39 = vpop.permute.xlu1 %1799  ;;  %v14637_v44 = vmul.f32 %v19366_v35, %v1588_v19  ;;  %v777_v19 = vcombine.high %v14350_v56, %v14350_v56  ;;  %v19368_v56 = vrot.slane %v14534_v24, %v14457_v33 }
 0x149   : > { %19358 = vst [vmem:[#allocation25_spill] sm:$0xff] %v14581_v37  ;;  %19359 = vst [vmem:[#allocation26_spill] sm:$0xff] %v14583_v39  ;;  %v1590_v50 = vsel %vm1574_vm3, %v14581_v37, %v1543_v40  ;;  %v1817_v52 = vsel %vm1801_vm4, %v14583_v39, %v14532_v41  ;;  %v19362_v40 = vmov 0  ;;  %v824_v37 = vmul.f32 %v823_v6, %v13903_v3 }
 0x14a   : > { %4212 = vrot.lane.b32.xlu0 %v14360_v48, %s13646_s17  ;;  %4668 = vrot.lane.b32.xlu1 %v14360_v48, %s19178_s1  ;;  %v19363_v40 = vsel %vm14617_vm11, 4294967295, %v19362_v40  ;;  %v1681_v12 = vmul.f32 %v1604_v58, %v1590_v50  ;;  %v1908_v43 = vmul.f32 %v1831_v13, %v1817_v52  ;;  %v19365_v58 = vrot.slane %v14522_v27, %v14444_v30 }
 0x14b   : > { %19364 = vst [vmem:[#allocation27_spill] sm:$0xff] %v19363_v40  ;;  %v831_v50 = vstv %s14579_s23  ;;  %v821_v52 = vadd.f32 %v820_v54, %v813_v51  ;;  %v825_v35 = vadd.f32 %v824_v37, %v817_v55  ;;  %v355_v54 = vcombine.high %v13905_v4, %v13905_v4  ;;  %v14694_v37 = vld [vmem:[#allocation2 + $0x38] sm:$0xff]  ;;  %s14761_s23 = sld [smem:[#allocation4 + $0x300]] }
 0x14c   : > { %v1772_v47 = vpop.permute.xlu0 %1771  ;;  %v14627_v48 = vpop.permute.xlu1 %2070  ;;  %v1682_v42 = vmul.f32 %v19365_v58, %v1589_v49  ;;  %v1051_v49 = vsel %vm14617_vm11, 1065369472, %v1050_v45 }
 0x14d   : > { %v1815_v13 = vsel %vm1801_vm4, %v1772_v47, %v14558_v61  ;;  %v1816_v53 = vsel %vm1801_vm4, %v14532_v41, %v1772_v47  ;;  %v19367_v41 = vrot.slane %v14522_v27, %v14454_v32  ;;  %1052 = vst [vmem:[#allocation3 + $0x348] sm:$0x44] %v1051_v49  ;;  %376 = vst [vmem:[#allocation2 + $0x48] sm:$0xf] %v355_v54  ;;  %v843_v54 = vstv %s14662_s16  ;;  %s14773_s16 = sld [smem:[#allocation4 + $0x302]] }
 0x14e   : > { %v1909_v46 = vmul.f32 %v1835_v62, %v1816_v53  ;;  %4216 = vrot.lane.b32.xlu0 %v14416_v11, %s13646_s17  ;;  %4672 = vrot.lane.b32.xlu1 %v14416_v11, %s19178_s1  ;;  %v14659_v62 = vld [vmem:[#allocation2 + $0x28] sm:$0xff]  ;;  %v1910_v14 = vmul.f32 %v19368_v56, %v1815_v13  ;;  %v832_v13 = vmul.f32 %v831_v50, %v13905_v4 }
 0x14f   : > { %v1684_v47 = vmul.f32 %v19367_v41, %v1587_v15  ;;  %v783_v15 = vsel %vm453_vm0, %v777_v19, %v14352_v57  ;;  %v19369_v53 = vrot.slane %v14534_v24, %v14454_v32  ;;  %v829_v55 = vadd.f32 %v828_v18, %v821_v52 }
 0x150   : > { %v14669_v6 = vpop.permute.xlu0 %1775  ;;  %v14671_v58 = vpop.permute.xlu1 %2074  ;;  %v787_v25 = vrot.slane %v783_v15, 4  ;;  %v13297_v57 = vpack.c.bf16 %v1909_v46, %v1682_v42  ;;  %v835_v19 = vstv %s14625_s19  ;;  %v2130_v49 = vrot.slane %v14603_v17, %v14439_v28  ;;  %s14769_s19 = sld [smem:[#allocation4 + $0x301]] }
 0x151   : > { %v1814_v51 = vsel %vm1801_vm4, %v14558_v61, %v14669_v6  ;;  %v13298_v61 = vpack.c.bf16 %v1908_v43, %v1681_v12  ;;  %v2134_v42 = vrot.slane %v14603_v17, %v14444_v30  ;;  %v2138_v12 = vrot.slane %v14603_v17, %v14457_v33 }
 0x152   : > { %v1911_v45 = vmul.f32 %v19369_v53, %v1814_v51  ;;  %4666 = vrot.lane.b32.xlu0 %v14374_v7, %s19178_s1  ;;  %1097 = vrot.lane.b32.xlu1 %v14659_v62, %s19176_s20  ;;  %791 = vst [vmem:[#allocation2 + $0xc8] ss:$-124 sps:$4 sm:$0xff] %v787_v25   ;;  %v356_v46 = vcombine.high %v13907_v5, %v13907_v5  ;;  %v839_v15 = vstv %s14654_s12  ;;  %v847_v25 = vstv %s14664_s11  ;;  %s14771_s12 = sld [smem:[#allocation8 + $0x301]]  ;;  %s14775_s11 = sld [smem:[#allocation8 + $0x302]] }
 0x153   : > { %5603 = vmatprep.subr.bf16.mxu0 %v13297_v57  ;;  %v833_v50 = vadd.f32 %v832_v13, %v825_v35  ;;  %v836_v41 = vmul.f32 %v835_v19, %v13907_v5  ;;  %v13300_v56 = vpack.c.bf16 %v1910_v14, %v14637_v44  ;;  %v840_v35 = vmul.f32 %v839_v15, %v13907_v5 }
 0x154   : > { %v14699_v7 = vpop.permute.xlu0 %2068  ;;  %v14703_v43 = vpop.permute.xlu1 %2295  ;;  %5604 = vmatpush1.bf16.msra.mxu0 %v13298_v61  ;;  %v13299_v18 = vpack.c.bf16 %v1911_v45, %v1684_v47  ;;  %378 = vst [vmem:[#allocation2 + $0x58] sm:$0xf] %v356_v46  ;;  %v2142_v53 = vrot.slane %v14603_v17, %v14454_v32  ;;  %v2346_v47 = vld [vmem:[#allocation11 + $0x5] ss:$8 sm:$0xf0]  ;;  %v844_v44 = vmul.f32 %v843_v54, %v13918_v8  ;;  %v851_v19 = vstv %s14682_s0  ;;  %s14789_s0 = sld [smem:[#allocation4 + $0x303]] }
 0x155   : > { %19370 = vst [vmem:[#allocation28_spill] sm:$0xff] %v14699_v7  ;;  %19371 = vst [vmem:[#allocation29_spill] sm:$0xff] %v14703_v43  ;;  %v2115_v52 = vsel %vm2100_vm12, %v14699_v7, %v14627_v48  ;;  %v837_v51 = vadd.f32 %v836_v41, %v829_v55  ;;  %v848_v14 = vmul.f32 %v847_v25, %v13918_v8  ;;  %v855_v15 = vstv %s14691_s9  ;;  %v14741_v54 = vld [vmem:[#allocation2 + $0x30] sm:$0xff]  ;;  %s14799_s9 = sld [smem:[#allocation8 + $0x303]] }
 0x156   : > { %4670 = vrot.lane.b32.xlu0 %v14380_v10, %s19178_s1  ;;  %1101 = vrot.lane.b32.xlu1 %v14694_v37, %s19176_s20  ;;  %v2345_v10 = vld [vmem:[#allocation11 + $0x5] ss:$8 sm:$0xf]  ;;  %v841_v55 = vadd.f32 %v840_v35, %v833_v50  ;;  %v2207_v46 = vmul.f32 %v2130_v49, %v2115_v52  ;;  %v856_v50 = vmul.f32 %v855_v15, %v13920_v9  ;;  %s14837_s1 = sld [smem:[#allocation8 + $0x305]] }
 0x157   : > { %5644 = vmatprep.subr.bf16.mxu1 %v13299_v18  ;;  %v845_v18 = vadd.f32 %v844_v44, %v837_v51  ;;  %v14743_v25 = vor.u32 %v2346_v47, %v2345_v10  ;;  %v13273_v51 = vld [vmem:[#allocation2 + $0x10] sm:$0xff]  ;;  %v13274_v35 = vld [vmem:[#allocation2 + $0x18] sm:$0xff] }
 0x158   : > { %v2073_v13 = vpop.permute.xlu0 %2072  ;;  %v14725_v57 = vpop.permute.xlu1 %2299  ;;  %5645 = vmatpush1.bf16.msra.mxu1 %v13300_v56  ;;  %v849_v7 = vadd.f32 %v848_v14, %v841_v55  ;;  %v2572_v56 = vld [vmem:[#allocation11 + $0x6] ss:$8 sm:$0xf]  ;;  %v19180_v14 = vmov 0  }
 0x159   : > { %v2113_v45 = vsel %vm2100_vm12, %v2073_v13, %v14671_v58  ;;  %v2114_v61 = vsel %vm2100_vm12, %v14627_v48, %v2073_v13  ;;  %v852_v48 = vmul.f32 %v851_v19, %v13920_v9  ;;  %v2573_v10 = vld [vmem:[#allocation11 + $0x6] ss:$8 sm:$0xf0]  ;;  %5633 = vmatprep.mubr.bf16.mxu0 %v19180_v14  ;;  %5674 = vmatprep.mubr.bf16.mxu1 %v19180_v14 }
 0x15a   : > { %v2208_v41 = vmul.f32 %v2134_v42, %v2114_v61  ;;  %1095 = vrot.lane.b32.xlu0 %v14317_v21, %s19176_s20  ;;  %1325 = vrot.lane.b32.xlu1 %v14659_v62, %s13642_s30  ;;  %v14749_v49 = vmul.f32 %v2138_v12, %v2113_v45  ;;  %v857_v44 = vadd.f32 %v856_v50, %v849_v7  ;;  %v3264_v50 = vld [vmem:[#allocation11 + $0x1] ss:$8 sm:$0xf]  ;;  %v901_v14 = vstv %s14789_s0 }
 0x15b   : > { %v853_v47 = vadd.f32 %v852_v48, %v845_v18 }
 0x15c   : > { %v14751_v42 = vpop.permute.xlu0 %2076  ;;  %v14753_v52 = vpop.permute.xlu1 %2303  ;;  %v13301_v45 = vpack.c.bf16 %v2208_v41, %v14178_v16  ;;  %v862_v61 = vcombine.low %v857_v44, %v857_v44  ;;  %v14782_v16 = vor.u32 %v2573_v10, %v2572_v56  ;;  %v3265_v10 = vld [vmem:[#allocation11 + $0x1] ss:$8 sm:$0xf0]  ;;  %v921_v39 = vstv %s14837_s1  ;;  %s19382_s1 = smov 111  }
 0x15d   : > { %v2112_v13 = vsel %vm2100_vm12, %v14671_v58, %v14751_v42  ;;  %v13302_v58 = vpack.c.bf16 %v2207_v46, %v14165_v63  ;;  %v859_v7 = vcombine.high %v853_v47, %v853_v47  ;;  %v2361_v63 = vrot.slane %v14743_v25, %v14444_v30 }
 0x15e   : > { %v2210_v12 = vmul.f32 %v2142_v53, %v2112_v13  ;;  %1099 = vrot.lane.b32.xlu0 %v14741_v54, %s19176_s20  ;;  %1329 = vrot.lane.b32.xlu1 %v14694_v37, %s13642_s30  ;;  %v2357_v53 = vrot.slane %v14743_v25, %v14439_v28  ;;  %v864_v41 = vsel %vm453_vm0, %v853_v47, %v862_v61  ;;  %s14804_s20 = sld [smem:[#allocation4 + $0x304]] }
 0x15f   : > { %5605 = vmatprep.subr.bf16.mxu0 %v13301_v45  ;;  %v865_v46 = vsel %vm453_vm0, %v859_v7, %v857_v44  ;;  %v13304_v13 = vpack.c.bf16 %v14749_v49, %v13273_v51  ;;  %v868_v47 = vrot.slane %v864_v41, 4  ;;  %v877_v44 = vstv %s14761_s23  ;;  %s14825_s23 = sld [smem:[#allocation4 + $0x305]] }
 0x160   : > { %v2298_v55 = vpop.permute.xlu0 %2297  ;;  %v14780_v19 = vpop.permute.xlu1 %2524  ;;  %5606 = vmatpush1.bf16.msra.mxu0 %v13302_v58  ;;  %v13303_v48 = vpack.c.bf16 %v2210_v12, %v13274_v35  ;;  %v869_v56 = vrot.slane %v865_v46, 4  ;;  %v881_v45 = vstv %s14747_s22  ;;  %v2584_v7 = vrot.slane %v14782_v16, %v14439_v28  ;;  %s14815_s22 = sld [smem:[#allocation8 + $0x304]] }
 0x161   : > { %v2588_v35 = vrot.slane %v14782_v16, %v14444_v30  ;;  %v878_v51 = vmul.f32 %v877_v44, %v13895_v0  ;;  %v2341_v12 = vsel %vm2327_vm13, %v2298_v55, %v14725_v57  ;;  %v2342_v46 = vsel %vm2327_vm13, %v14703_v43, %v2298_v55  ;;  %872 = vst [vmem:[#allocation2 + $0xd0] ss:$-124 sps:$4 sm:$0xff] %v868_v47  }
 0x162   : > { %1323 = vrot.lane.b32.xlu0 %v14317_v21, %s13642_s30  ;;  %1552 = vrot.lane.b32.xlu1 %v14659_v62, %s19351_s2  ;;  %873 = vst [vmem:[#allocation2 + $0xd8] ss:$-124 sps:$4 sm:$0xff] %v869_v56   ;;  %v882_v41 = vmul.f32 %v881_v45, %v13895_v0  ;;  %v2596_v56 = vrot.slane %v14782_v16, %v14454_v32  ;;  %v893_v47 = vstv %s14773_s16  ;;  %v897_v45 = vstv %s14775_s11  ;;  %s14882_s16 = sld [smem:[#allocation4 + $0x307]]  ;;  %s19384_s11 = smov 17  }
 0x163   : > { %5646 = vmatprep.subr.bf16.mxu1 %v13303_v48  ;;  %v885_v48 = vstv %s14769_s19  ;;  %v14833_v44 = vor.u32 %v3265_v10, %v3264_v50  ;;  %v14843_v49 = vmul.f32 %v2357_v53, %v2342_v46  ;;  %v14845_v15 = vmul.f32 %v2361_v63, %v2341_v12  ;;  %s14853_s19 = sld [smem:[#allocation4 + $0x306]] }
 0x164   : > { %v2302_v58 = vpop.permute.xlu0 %2301  ;;  %v14808_v61 = vpop.permute.xlu1 %2528  ;;  %5647 = vmatpush1.bf16.msra.mxu1 %v13304_v13  ;;  %v886_v55 = vmul.f32 %v885_v48, %v13897_v1  ;;  %v889_v13 = vstv %s14771_s12  ;;  %v894_v53 = vmul.f32 %v893_v47, %v13899_v2  ;;  %v898_v63 = vmul.f32 %v897_v45, %v13899_v2  ;;  %s14871_s12 = sld [smem:[#allocation8 + $0x306]] }
 0x165   : > { %v890_v0 = vmul.f32 %v889_v13, %v13897_v1  ;;  %v3275_v10 = vrot.slane %v14833_v44, %v14439_v28  ;;  %v2340_v1 = vsel %vm2327_vm13, %v14725_v57, %v2302_v58  ;;  %v902_v57 = vmul.f32 %v901_v14, %v13903_v3 }
 0x166   : > { %1327 = vrot.lane.b32.xlu0 %v14741_v54, %s13642_s30  ;;  %1556 = vrot.lane.b32.xlu1 %v14694_v37, %s19351_s2  ;;  %v887_v48 = vadd.f32 %v886_v55, %v878_v51  ;;  %v905_v51 = vstv %s14799_s9  ;;  %v909_v46 = vstv %s14804_s20  ;;  %v2339_v47 = vsel %vm2327_vm13, %v2302_v58, %v14753_v52  ;;  %s14896_s20 = sld [smem:[#allocation8 + $0x307]] }
 0x167   : > { %v891_v13 = vadd.f32 %v890_v0, %v882_v41  ;;  %v906_v55 = vmul.f32 %v905_v51, %v13903_v3  ;;  %v910_v0 = vmul.f32 %v909_v46, %v13905_v4  ;;  %v913_v43 = vstv %s14815_s22 }
 0x168   : > { %v14847_v18 = vpop.permute.xlu0 %2522  ;;  %v14849_v50 = vpop.permute.xlu1 %3216  ;;  %v895_v41 = vadd.f32 %v894_v53, %v887_v48  ;;  %v917_v14 = vstv %s14825_s23  ;;  %v19373_v48 = vrot.slane %v14743_v25, %v14457_v33  ;;  %v914_v46 = vmul.f32 %v913_v43, %v13905_v4 }
 0x169   : > { %19372 = vst [vmem:[#allocation30_spill] sm:$0xff] %v14847_v18  ;;  %v2569_v12 = vsel %vm2554_vm14, %v14847_v18, %v14780_v19  ;;  %v899_v2 = vadd.f32 %v898_v63, %v891_v13 }
 0x16a   : > { %1550 = vrot.lane.b32.xlu0 %v14317_v21, %s19351_s2  ;;  %1779 = vrot.lane.b32.xlu1 %v14659_v62, %s13644_s10  ;;  %v2436_v13 = vmul.f32 %v19373_v48, %v2340_v1  ;;  %v903_v53 = vadd.f32 %v902_v57, %v895_v41  ;;  %v2661_v51 = vmul.f32 %v2584_v7, %v2569_v12  ;;  %v929_v48 = vstv %s14871_s12 }
 0x16b   : > { %v907_v63 = vadd.f32 %v906_v55, %v899_v2  ;;  %v918_v57 = vmul.f32 %v917_v14, %v13907_v5  ;;  %v922_v7 = vmul.f32 %v921_v39, %v13907_v5  ;;  %v925_v2 = vstv %s14853_s19  ;;  %s13651_s19 = smov [#allocation13]  }
 0x16c   : > { %v2527_v45 = vpop.permute.xlu0 %2526  ;;  %v14878_v18 = vpop.permute.xlu1 %3220  ;;  %v911_v1 = vadd.f32 %v910_v0, %v903_v53  ;;  %v3279_v0 = vrot.slane %v14833_v44, %v14444_v30  ;;  %v14931_v53 = vld [vmem:[#allocation2 + $0x40] sm:$0xff]  ;;  %s13561_s12 = sshll.u32 %s13651_s19, 4  ;;  %s13562_s12 = int_to_ptr.vmem [resolvable:$false] %s13561_s12 }
 0x16d   : > { %v2568_v3 = vsel %vm2554_vm14, %v14780_v19, %v2527_v45  ;;  %v2567_v19 = vsel %vm2554_vm14, %v2527_v45, %v14808_v61  ;;  %v915_v43 = vadd.f32 %v914_v46, %v907_v63  ;;  %v926_v46 = vmul.f32 %v925_v2, %v13918_v8 }
 0x16e   : > { %v2662_v58 = vmul.f32 %v2588_v35, %v2568_v3  ;;  %1554 = vrot.lane.b32.xlu0 %v14741_v54, %s19351_s2  ;;  %1783 = vrot.lane.b32.xlu1 %v14694_v37, %s13644_s10  ;;  %v19374_v35 = vrot.slane %v14743_v25, %v14454_v32  ;;  %v919_v39 = vadd.f32 %v918_v57, %v911_v1 }
 0x16f   : > { %v13306_v3 = vpack.c.bf16 %v2661_v51, %v14843_v49  ;;  %v923_v63 = vadd.f32 %v922_v7, %v915_v43  ;;  %v930_v1 = vmul.f32 %v929_v48, %v13918_v8  ;;  %v937_v43 = vstv %s14896_s20 }
 0x170   : > { %v2437_v12 = vmul.f32 %v19374_v35, %v2339_v47  ;;  %v14906_v41 = vpop.permute.xlu0 %2530  ;;  %v14908_v4 = vpop.permute.xlu1 %3246  ;;  %v19376_v47 = vrot.slane %v14782_v16, %v14457_v33  ;;  %v927_v51 = vadd.f32 %v926_v46, %v919_v39 }
 0x171   : > { %19375 = vst [vmem:[#allocation31_spill] sm:$0xff] %v14908_v4  ;;  %v2566_v55 = vsel %vm2554_vm14, %v14808_v61, %v14906_v41  ;;  %v3263_v5 = vsel %vm1347_vm2, %v14908_v4, %v14849_v50  ;;  %v13305_v61 = vpack.c.bf16 %v2662_v58, %v14845_v15  ;;  %v3283_v15 = vrot.slane %v14833_v44, %v14457_v33 }
 0x172   : > { %v2663_v45 = vmul.f32 %v19376_v47, %v2567_v19  ;;  %v2664_v14 = vmul.f32 %v2596_v56, %v2566_v55  ;;  %1777 = vrot.lane.b32.xlu0 %v14317_v21, %s13644_s10  ;;  %2080 = vrot.lane.b32.xlu1 %v14741_v54, %s13645_s15  ;;  %v3352_v19 = vmul.f32 %v3275_v10, %v3263_v5  ;;  %v933_v21 = vstv %s14882_s16  ;;  %s13563_s16 = scalar_lea.vmem %s13562_s12, 2048 }
 0x173   : > { %5607 = vmatprep.subr.bf16.mxu0 %v13305_v61  ;;  %v931_v58 = vadd.f32 %v930_v1, %v923_v63  ;;  %v3287_v10 = vrot.slane %v14833_v44, %v14454_v32  ;;  %v934_v55 = vmul.f32 %v933_v21, %v13920_v9  ;;  %v3041_v21 = vld [vmem:[#allocation11] ss:$8 sm:$0xf0] }
 0x174   : > { %v3219_v56 = vpop.permute.xlu0 %3218  ;;  %v14935_v57 = vpop.permute.xlu1 %2751  ;;  %5608 = vmatpush1.bf16.msra.mxu0 %v13306_v3  ;;  %v13307_v35 = vpack.c.bf16 %v2664_v14, %v2437_v12 }
 0x175   : > { %v3262_v49 = vsel %vm1347_vm2, %v14849_v50, %v3219_v56  ;;  %v3261_v2 = vsel %vm1347_vm2, %v3219_v56, %v14878_v18  ;;  %v13308_v50 = vpack.c.bf16 %v2663_v45, %v2436_v13  ;;  %v14963_v14 = vadd.f32 %v934_v55, %v927_v51  ;;  %v15002_v55 = vld [vmem:[#allocation2 + $0xa8] sm:$0xf] }
 0x176   : > { %v3353_v7 = vmul.f32 %v3279_v0, %v3262_v49  ;;  %1781 = vrot.lane.b32.xlu0 %v14741_v54, %s13644_s10  ;;  %2084 = vrot.lane.b32.xlu1 %v14931_v53, %s13645_s15  ;;  %v938_v0 = vmul.f32 %v937_v43, %v13920_v9  ;;  %v3354_v13 = vmul.f32 %v3283_v15, %v3261_v2  ;;  %v2799_v43 = vld [vmem:[#allocation11 + $0x7] ss:$8 sm:$0xf] }
 0x177   : > { %5648 = vmatprep.subr.bf16.mxu1 %v13307_v35  ;;  %v2800_v2 = vld [vmem:[#allocation11 + $0x7] ss:$8 sm:$0xf0] }
 0x178   : > { %v12969_v5 = vpack.c.bf16 %v3353_v7, %v3352_v19  ;;  %v14955_v39 = vpop.permute.xlu0 %3222  ;;  %v14957_v47 = vpop.permute.xlu1 %2755  ;;  %5649 = vmatpush1.bf16.msra.mxu1 %v13308_v50  ;;  %v14965_v61 = vadd.f32 %v938_v0, %v931_v58  ;;  %v3040_v19 = vld [vmem:[#allocation11] ss:$8 sm:$0xf] }
 0x179   : > { %v3260_v12 = vsel %vm1347_vm2, %v14878_v18, %v14955_v39  ;;  %v14983_v51 = vor.u32 %v3041_v21, %v3040_v19  ;;  %v3720_v21 = vld [vmem:[#allocation11 + $0x3] ss:$8 sm:$0xf] }
 0x17a   : > { %v3424_v45 = vrot.slane %v12969_v5, 6  ;;  %v3355_v48 = vmul.f32 %v3287_v10, %v3260_v12  ;;  %2078 = vrot.lane.b32.xlu0 %v14659_v62, %s13645_s15  ;;  %2307 = vrot.lane.b32.xlu1 %v14741_v54, %s13646_s17  ;;  %v944_v9 = vcombine.low %v14965_v61, %v14965_v61 }
 0x17b   : > { %v3051_v7 = vrot.slane %v14983_v51, %v14439_v28  ;;  %v3055_v50 = vrot.slane %v14983_v51, %v14444_v30 }
 0x17c   : > { %3440 = vst [vmem:[#allocation3 + $0x240] sm:$0xcc] %v3424_v45  ;;  %v12970_v3 = vpack.c.bf16 %v3355_v48, %v3354_v13  ;;  %v14973_v18 = vpop.permute.xlu0 %2749  ;;  %v2993_v63 = vpop.permute.xlu1 %2992  ;;  %v946_v46 = vsel %vm453_vm0, %v14963_v14, %v944_v9  ;;  %v15004_v13 = vor.u32 %v2800_v2, %v2799_v43  ;;  %v3059_v48 = vrot.slane %v14983_v51, %v14457_v33 }
 0x17d   : > { %19377 = vst [vmem:[#allocation32_spill] sm:$0xff] %v14973_v18  ;;  %v950_v56 = vrot.slane %v946_v46, 4 }
 0x17e   : > { %v3425_v1 = vrot.slane %v12970_v3, 6  ;;  %2082 = vrot.lane.b32.xlu0 %v14694_v37, %s13645_s15  ;;  %2311 = vrot.lane.b32.xlu1 %v14931_v53, %s13646_s17  ;;  %v3063_v3 = vrot.slane %v14983_v51, %v14454_v32 }
 0x17f   : > { %954 = vst [vmem:[#allocation2 + $0xe0] ss:$-124 sps:$4 sm:$0xff] %v950_v56  }
 0x180   : > { %3441 = vst [vmem:[#allocation3 + $0x248] sm:$0xcc] %v3425_v1  ;;  %v2754_v15 = vpop.permute.xlu0 %2753  ;;  %v2997_v49 = vpop.permute.xlu1 %2996  ;;  %v15019_v1 = vld [vmem:[#allocation2 + $0xb8] sm:$0xf] }
 0x181   : > { %v2795_v43 = vsel %vm2781_vm15, %v14935_v57, %v2754_v15 }
 0x182   : > { %2305 = vrot.lane.b32.xlu0 %v14659_v62, %s13646_s17  ;;  %2534 = vrot.lane.b32.xlu1 %v14741_v54, %s13647_s18 }
 0x184   : > { %v14987_v58 = vpop.permute.xlu0 %2757  ;;  %v14991_v10 = vpop.permute.xlu1 %3022 }
 0x185   : > { %19378 = vst [vmem:[#allocation33_spill] sm:$0xff] %v14991_v10  ;;  %v3039_v35 = vsel %vm1121_vm1, %v14991_v10, %v2993_v63  ;;  %v2823_v10 = vrot.slane %v15004_v13, %v14454_v32 }
 0x186   : > { %2309 = vrot.lane.b32.xlu0 %v14694_v37, %s13646_s17  ;;  %2538 = vrot.lane.b32.xlu1 %v14931_v53, %s13647_s18  ;;  %v3128_v5 = vmul.f32 %v3051_v7, %v3039_v35  ;;  %v3721_v7 = vld [vmem:[#allocation11 + $0x3] ss:$8 sm:$0xf0] }
 0x188   : > { %v2995_v0 = vpop.permute.xlu0 %2994  ;;  %v3675_v12 = vpop.permute.xlu1 %3674 }
 0x189   : > { %v3038_v45 = vsel %vm1121_vm1, %v2993_v63, %v2995_v0  ;;  %v3037_v46 = vsel %vm1121_vm1, %v2995_v0, %v2997_v49  ;;  %v2815_v63 = vrot.slane %v15004_v13, %v14444_v30 }
 0x18a   : > { %v3129_v9 = vmul.f32 %v3055_v50, %v3038_v45  ;;  %2532 = vrot.lane.b32.xlu0 %v14659_v62, %s13647_s18  ;;  %3226 = vrot.lane.b32.xlu1 %v15002_v55, %s13642_s30  ;;  %v2811_v50 = vrot.slane %v15004_v13, %v14439_v28  ;;  %v3130_v0 = vmul.f32 %v3059_v48, %v3037_v46 }
 0x18b   : > { %v2796_v45 = vsel %vm2781_vm15, %v14973_v18, %v14935_v57  ;;  %v15068_v18 = vld [vmem:[#allocation2 + $0xb0] sm:$0xf] }
 0x18c   : > { %v12961_v56 = vpack.c.bf16 %v3129_v9, %v3128_v5  ;;  %v15023_v19 = vpop.permute.xlu0 %2998  ;;  %v15025_v35 = vpop.permute.xlu1 %3678  ;;  %v15043_v9 = vor.u32 %v3721_v7, %v3720_v21  ;;  %v4024_v21 = vld [vmem:[#allocation11 + $0x4] ss:$8 sm:$0xf]  ;;  %v2888_v7 = vmul.f32 %v2811_v50, %v2796_v45 }
 0x18d   : > { %19379 = vst [vmem:[#allocation34_spill] sm:$0xff] %v15025_v35  ;;  %v3036_v2 = vsel %vm1121_vm1, %v2997_v49, %v15023_v19  ;;  %v2889_v49 = vmul.f32 %v2815_v63, %v2795_v43  ;;  %v4025_v63 = vld [vmem:[#allocation11 + $0x4] ss:$8 sm:$0xf0]  ;;  %v2794_v43 = vsel %vm2781_vm15, %v2754_v15, %v14957_v47 }
 0x18e   : > { %3208 = vst [vmem:[#allocation3 + $0x240] sm:$0x33] %v12961_v56  ;;  %v3131_v5 = vmul.f32 %v3063_v3, %v3036_v2  ;;  %2536 = vrot.lane.b32.xlu0 %v14694_v37, %s13647_s18  ;;  %3230 = vrot.lane.b32.xlu1 %v15019_v1, %s13642_s30  ;;  %19380 = vst [vmem:[#allocation35_spill] sm:$0xff] %v15043_v9  ;;  %v2819_v56 = vrot.slane %v15004_v13, %v14457_v33 }
 0x18f   : > { %v2793_v2 = vsel %vm2781_vm15, %v14957_v47, %v14987_v58  ;;  %v3739_v57 = vrot.slane %v15043_v9, %v14457_v33  ;;  %v12953_v50 = vpack.c.bf16 %v2889_v49, %v2888_v7  ;;  %v3731_v47 = vrot.slane %v15043_v9, %v14439_v28 }
 0x190   : > { %v12962_v48 = vpack.c.bf16 %v3131_v5, %v3130_v0  ;;  %v3673_v46 = vpop.permute.xlu0 %3672  ;;  %v15047_v3 = vpop.permute.xlu1 %3976  ;;  %v3743_v0 = vrot.slane %v15043_v9, %v14454_v32  ;;  %v3735_v5 = vrot.slane %v15043_v9, %v14444_v30  ;;  %v2891_v45 = vmul.f32 %v2823_v10, %v2793_v2 }
 0x191   : > { %19381 = vst [vmem:[#allocation36_spill] sm:$0xff] %v15047_v3  ;;  %v3718_v36 = vsel %vm1801_vm4, %v3673_v46, %v3675_v12 }
 0x192   : > { %3209 = vst [vmem:[#allocation3 + $0x248] sm:$0x33] %v12962_v48  ;;  %3224 = vrot.lane.b32.xlu0 %v14416_v11, %s13642_s30  ;;  %2761 = vrot.lane.b32.xlu1 %v14741_v54, %s19382_s1  ;;  %v15072_v48 = vor.u32 %v4025_v63, %v4024_v21  ;;  %v2890_v11 = vmul.f32 %v2819_v56, %v2794_v43 }
 0x193   : > { %v3809_v9 = vmul.f32 %v3735_v5, %v3718_v36 }
 0x194   : > { %v3677_v4 = vpop.permute.xlu0 %3676  ;;  %v3981_v15 = vpop.permute.xlu1 %3980  ;;  %v12954_v56 = vpack.c.bf16 %v2891_v45, %v2890_v11 }
 0x195   : > { %v3716_v54 = vsel %vm1801_vm4, %v3677_v4, %v15025_v35  ;;  %v3717_v38 = vsel %vm1801_vm4, %v3675_v12, %v3677_v4  ;;  %v4961_v49 = vld [vmem:[#allocation3 + $0x240] sm:$0xff]  ;;  %v4035_v12 = vrot.slane %v15072_v48, %v14439_v28 }
 0x196   : > { %v3810_v10 = vmul.f32 %v3739_v57, %v3717_v38  ;;  %v3811_v2 = vmul.f32 %v3743_v0, %v3716_v54  ;;  %3228 = vrot.lane.b32.xlu0 %v15068_v18, %s13642_s30  ;;  %v12444_v7 = vcombine.high %v12953_v50, %v4961_v49  ;;  %v12443_v21 = vcombine.low %v12953_v50, %v4961_v49 }
 0x197   : > { %2765 = vrot.lane.b32.xlu1 %v14931_v53, %s19382_s1  ;;  %v4039_v57 = vrot.slane %v15072_v48, %v14444_v30 }
 0x198   : > { %v12986_v63 = vpack.c.bf16 %v3811_v2, %v3810_v10  ;;  %v15085_v43 = vpop.permute.xlu0 %3702  ;;  %5609 = vmatprep.subr.bf16.mxu0 %v12444_v7  ;;  %v15087_v35 = vpop.permute.xlu1 %3984 }
 0x199   : > { %19383 = vst [vmem:[#allocation37_spill] sm:$0xff] %v15085_v43  ;;  %v3719_v38 = vsel %vm1801_vm4, %v15085_v43, %v3673_v46  ;;  %v4962_v4 = vld [vmem:[#allocation3 + $0x248] sm:$0xff]  ;;  %5610 = vmatpush1.bf16.msra.mxu0 %v12443_v21 }
 0x19a   : > { %v3881_v0 = vrot.slane %v12986_v63, 6  ;;  %v3808_v50 = vmul.f32 %v3731_v47, %v3719_v38  ;;  %2759 = vrot.lane.b32.xlu0 %v14659_v62, %s19382_s1  ;;  %v12446_v45 = vcombine.high %v12954_v56, %v4962_v4  ;;  %v12445_v11 = vcombine.low %v12954_v56, %v4962_v4  ;;  %v3496_v4 = vld [vmem:[#allocation11 + $0x2] ss:$8 sm:$0xf] }
 0x19b   : > { %3002 = vrot.lane.b32.xlu1 %v15002_v55, %s19384_s11  ;;  %v4043_v62 = vrot.slane %v15072_v48, %v14457_v33 }
 0x19c   : > { %3897 = vst [vmem:[#allocation3 + $0x288] sm:$0xcc] %v3881_v0  ;;  %v12985_v36 = vpack.c.bf16 %v3809_v9, %v3808_v50  ;;  %5650 = vmatprep.subr.bf16.mxu1 %v12446_v45  ;;  %v3979_v46 = vpop.permute.xlu0 %3978  ;;  %v3451_v5 = vpop.permute.xlu1 %3450  ;;  %v4047_v9 = vrot.slane %v15072_v48, %v14454_v32  ;;  %v15120_v50 = vld [vmem:[#allocation2 + $0xa0] sm:$0xf] }
 0x19d   : > { %v4021_v54 = vsel %vm2100_vm12, %v3979_v46, %v3981_v15  ;;  %v4022_v47 = vsel %vm2100_vm12, %v15047_v3, %v3979_v46  ;;  %5651 = vmatpush1.bf16.msra.mxu1 %v12445_v11 }
 0x19e   : > { %v3880_v49 = vrot.slane %v12985_v36, 6  ;;  %v4112_v10 = vmul.f32 %v4035_v12, %v4022_v47  ;;  %v4113_v2 = vmul.f32 %v4039_v57, %v4021_v54  ;;  %2763 = vrot.lane.b32.xlu0 %v14694_v37, %s19382_s1  ;;  %v3497_v37 = vld [vmem:[#allocation11 + $0x2] ss:$8 sm:$0xf0] }
 0x19f   : > { %3006 = vrot.lane.b32.xlu1 %v15019_v1, %s19384_s11  ;;  %v15126_v11 = vor.u32 %v3497_v37, %v3496_v4 }
 0x1a0   : > { %3896 = vst [vmem:[#allocation3 + $0x280] sm:$0xcc] %v3880_v49  ;;  %v13001_v7 = vpack.c.bf16 %v4113_v2, %v4112_v10  ;;  %v3983_v21 = vpop.permute.xlu0 %3982  ;;  %v15113_v56 = vpop.permute.xlu1 %3454  ;;  %v4481_v49 = vld [vmem:[#allocation11 + $0x6] ss:$8 sm:$0xf0] }
 0x1a1   : > { %v4019_v63 = vsel %vm2100_vm12, %v3983_v21, %v15087_v35  ;;  %v4020_v38 = vsel %vm2100_vm12, %v3981_v15, %v3983_v21  ;;  %v3515_v54 = vrot.slane %v15126_v11, %v14457_v33  ;;  %v3519_v47 = vrot.slane %v15126_v11, %v14454_v32 }
 0x1a2   : > { %v4184_v12 = vrot.slane %v13001_v7, 6  ;;  %v4114_v57 = vmul.f32 %v4043_v62, %v4020_v38  ;;  %v4115_v0 = vmul.f32 %v4047_v9, %v4019_v63  ;;  %3000 = vrot.lane.b32.xlu0 %v15120_v50, %s19384_s11  ;;  %v4480_v62 = vld [vmem:[#allocation11 + $0x6] ss:$8 sm:$0xf]  ;;  %v3511_v9 = vrot.slane %v15126_v11, %v14444_v30 }
 0x1a3   : > { %3682 = vrot.lane.b32.xlu1 %v15002_v55, %s13644_s10  ;;  %v3507_v4 = vrot.slane %v15126_v11, %v14439_v28  ;;  %v15149_v37 = vor.u32 %v4481_v49, %v4480_v62 }
 0x1a4   : > { %4200 = vst [vmem:[#allocation3 + $0x2c0] sm:$0xcc] %v4184_v12  ;;  %v13002_v45 = vpack.c.bf16 %v4115_v0, %v4114_v57  ;;  %v3449_v36 = vpop.permute.xlu0 %3448  ;;  %v15128_v46 = vpop.permute.xlu1 %4432  ;;  %v12995_v57 = vpack.c.bf16 %v15002_v55, %v15120_v50 }
 0x1a5   : > { %19385 = vst [vmem:[#allocation38_spill] sm:$0xff] %v15128_v46  ;;  %v3494_v12 = vsel %vm1574_vm3, %v3449_v36, %v3451_v5  ;;  %v4491_v49 = vrot.slane %v15149_v37, %v14439_v28 }
 0x1a6   : > { %v4185_v15 = vrot.slane %v13002_v45, 6  ;;  %3004 = vrot.lane.b32.xlu0 %v15068_v18, %s19384_s11  ;;  %3970 = vst [vmem:[#allocation3 + $0x2d0] sm:$0x33] %v12995_v57  ;;  %v3585_v62 = vmul.f32 %v3511_v9, %v3494_v12  ;;  %v4499_v57 = vrot.slane %v15149_v37, %v14457_v33 }
 0x1a7   : > { %3686 = vrot.lane.b32.xlu1 %v15019_v1, %s13644_s10 }
 0x1a8   : > { %4201 = vst [vmem:[#allocation3 + $0x2c8] sm:$0xcc] %v4185_v15  ;;  %v3453_v10 = vpop.permute.xlu0 %3452  ;;  %v4437_v2 = vpop.permute.xlu1 %4436 }
 0x1a9   : > { %v3492_v7 = vsel %vm1574_vm3, %v3453_v10, %v15113_v56  ;;  %v3493_v21 = vsel %vm1574_vm3, %v3451_v5, %v3453_v10  ;;  %v4495_v10 = vrot.slane %v15149_v37, %v14444_v30 }
 0x1aa   : > { %v3586_v63 = vmul.f32 %v3515_v54, %v3493_v21  ;;  %v3587_v38 = vmul.f32 %v3519_v47, %v3492_v7  ;;  %3680 = vrot.lane.b32.xlu0 %v15120_v50, %s13644_s10  ;;  %v15161_v54 = vld [vmem:[#allocation2 + $0xc0] sm:$0xf]  ;;  %v12996_v7 = vpack.c.bf16 %v15019_v1, %v15068_v18 }
 0x1ab   : > { %3988 = vrot.lane.b32.xlu1 %v15068_v18, %s13645_s15 }
 0x1ac   : > { %v12978_v0 = vpack.c.bf16 %v3587_v38, %v3586_v63  ;;  %v15157_v45 = vpop.permute.xlu0 %3478  ;;  %v15159_v15 = vpop.permute.xlu1 %4440  ;;  %3971 = vst [vmem:[#allocation3 + $0x2d8] sm:$0x33] %v12996_v7 }
 0x1ad   : > { %19386 = vst [vmem:[#allocation39_spill] sm:$0xff] %v15157_v45  ;;  %19387 = vst [vmem:[#allocation40_spill] sm:$0xff] %v15159_v15  ;;  %v3495_v47 = vsel %vm1574_vm3, %v15157_v45, %v3449_v36 }
 0x1ae   : > { %3665 = vst [vmem:[#allocation3 + $0x288] sm:$0x33] %v12978_v0  ;;  %v3584_v5 = vmul.f32 %v3507_v4, %v3495_v47  ;;  %3684 = vrot.lane.b32.xlu0 %v15068_v18, %s13644_s10  ;;  %v4503_v0 = vrot.slane %v15149_v37, %v14454_v32  ;;  %v4256_v47 = vld [vmem:[#allocation11 + $0x5] ss:$8 sm:$0xf] }
 0x1af   : > { %3992 = vrot.lane.b32.xlu1 %v15161_v54, %s13645_s15 }
 0x1b0   : > { %v12977_v36 = vpack.c.bf16 %v3585_v62, %v3584_v5  ;;  %v4435_v21 = vpop.permute.xlu0 %4434  ;;  %v4211_v9 = vpop.permute.xlu1 %4210  ;;  %v4257_v62 = vld [vmem:[#allocation11 + $0x5] ss:$8 sm:$0xf0] }
 0x1b1   : > { %v4477_v63 = vsel %vm2554_vm14, %v4435_v21, %v4437_v2  ;;  %v4478_v38 = vsel %vm2554_vm14, %v15128_v46, %v4435_v21 }
 0x1b2   : > { %3664 = vst [vmem:[#allocation3 + $0x280] sm:$0x33] %v12977_v36  ;;  %v4568_v4 = vmul.f32 %v4491_v49, %v4478_v38  ;;  %v4569_v12 = vmul.f32 %v4495_v10, %v4477_v63  ;;  %3986 = vrot.lane.b32.xlu0 %v15002_v55, %s13645_s15  ;;  %v4978_v63 = vld [vmem:[#allocation3 + $0x2c8] sm:$0xff]  ;;  %v15194_v38 = vor.u32 %v4257_v62, %v4256_v47 }
 0x1b3   : > { %3458 = vrot.lane.b32.xlu1 %v15002_v55, %s19351_s2 }
 0x1b4   : > { %v13017_v5 = vpack.c.bf16 %v4569_v12, %v4568_v4  ;;  %v4439_v21 = vpop.permute.xlu0 %4438  ;;  %v4215_v7 = vpop.permute.xlu1 %4214  ;;  %v4267_v47 = vrot.slane %v15194_v38, %v14439_v28 }
 0x1b5   : > { %v4475_v49 = vsel %vm2554_vm14, %v4439_v21, %v15159_v15  ;;  %v4476_v10 = vsel %vm2554_vm14, %v4437_v2, %v4439_v21  ;;  %v4970_v36 = vld [vmem:[#allocation3 + $0x288] sm:$0xff] }
 0x1b6   : > { %v4640_v46 = vrot.slane %v13017_v5, 6  ;;  %v4570_v45 = vmul.f32 %v4499_v57, %v4476_v10  ;;  %v4571_v3 = vmul.f32 %v4503_v0, %v4475_v49  ;;  %3990 = vrot.lane.b32.xlu0 %v15019_v1, %s13645_s15  ;;  %v12462_v4 = vcombine.high %v4970_v36, %v4978_v63  ;;  %v4977_v0 = vld [vmem:[#allocation3 + $0x2c0] sm:$0xff] }
 0x1b7   : > { %v12461_v12 = vcombine.low %v4970_v36, %v4978_v63  ;;  %3462 = vrot.lane.b32.xlu1 %v15019_v1, %s19351_s2  ;;  %v4271_v5 = vrot.slane %v15194_v38, %v14444_v30  ;;  %v4712_v21 = vld [vmem:[#allocation11 + $0x7] ss:$8 sm:$0xf] }
 0x1b8   : > { %4656 = vst [vmem:[#allocation3 + $0x300] sm:$0xcc] %v4640_v46  ;;  %v13018_v43 = vpack.c.bf16 %v4571_v3, %v4570_v45  ;;  %5652 = vmatprep.subr.bf16.mxu1 %v12462_v4  ;;  %v15200_v15 = vpop.permute.xlu0 %4208  ;;  %v15202_v2 = vpop.permute.xlu1 %4664  ;;  %v4713_v49 = vld [vmem:[#allocation11 + $0x7] ss:$8 sm:$0xf0] }
 0x1b9   : > { %19388 = vst [vmem:[#allocation41_spill] sm:$0xff] %v15200_v15  ;;  %19389 = vst [vmem:[#allocation42_spill] sm:$0xff] %v15202_v2  ;;  %5653 = vmatpush1.bf16.msra.mxu1 %v12461_v12  ;;  %v4969_v57 = vld [vmem:[#allocation3 + $0x280] sm:$0xff]  ;;  %v4254_v45 = vsel %vm2327_vm13, %v15200_v15, %v4211_v9  ;;  %v4279_v12 = vrot.slane %v15194_v38, %v14454_v32 }
 0x1ba   : > { %v4641_v62 = vrot.slane %v13018_v43, 6  ;;  %3456 = vrot.lane.b32.xlu0 %v15120_v50, %s19351_s2  ;;  %v12460_v46 = vcombine.high %v4969_v57, %v4977_v0  ;;  %v12459_v3 = vcombine.low %v4969_v57, %v4977_v0  ;;  %v4275_v50 = vrot.slane %v15194_v38, %v14457_v33 }
 0x1bb   : > { %4444 = vrot.lane.b32.xlu1 %v15068_v18, %s13647_s18  ;;  %v4344_v63 = vmul.f32 %v4267_v47, %v4254_v45  ;;  %v15223_v57 = vor.u32 %v4713_v49, %v4712_v21 }
 0x1bc   : > { %4657 = vst [vmem:[#allocation3 + $0x308] sm:$0xcc] %v4641_v62  ;;  %v4213_v10 = vpop.permute.xlu0 %4212  ;;  %5611 = vmatprep.subr.bf16.mxu0 %v12460_v46  ;;  %v4669_v43 = vpop.permute.xlu1 %4668 }
 0x1bd   : > { %v4253_v36 = vsel %vm2327_vm13, %v4211_v9, %v4213_v10  ;;  %5612 = vmatpush1.bf16.msra.mxu0 %v12459_v3  ;;  %v4252_v0 = vsel %vm2327_vm13, %v4213_v10, %v4215_v7  ;;  %v4723_v45 = vrot.slane %v15223_v57, %v14439_v28  ;;  %v4727_v21 = vrot.slane %v15223_v57, %v14444_v30 }
 0x1be   : > { %v4345_v4 = vmul.f32 %v4271_v5, %v4253_v36  ;;  %3460 = vrot.lane.b32.xlu0 %v15068_v18, %s19351_s2  ;;  %v4346_v5 = vmul.f32 %v4275_v50, %v4252_v0  ;;  %v4735_v0 = vrot.slane %v15223_v57, %v14454_v32 }
 0x1bf   : > { %4448 = vrot.lane.b32.xlu1 %v15161_v54, %s13647_s18 }
 0x1c0   : > { %v13009_v62 = vpack.c.bf16 %v4345_v4, %v4344_v63  ;;  %v15229_v46 = vpop.permute.xlu0 %4216  ;;  %v15231_v9 = vpop.permute.xlu1 %4672 }
 0x1c1   : > { %19390 = vst [vmem:[#allocation43_spill] sm:$0xff] %v15231_v9  ;;  %v4251_v47 = vsel %vm2327_vm13, %v4215_v7, %v15229_v46 }
 0x1c2   : > { %4424 = vst [vmem:[#allocation3 + $0x300] sm:$0x33] %v13009_v62  ;;  %v4347_v3 = vmul.f32 %v4279_v12, %v4251_v47  ;;  %4442 = vrot.lane.b32.xlu0 %v15002_v55, %s13647_s18  ;;  %v4731_v12 = vrot.slane %v15223_v57, %v14457_v33  ;;  %v357_v33 = vcombine.high %v13918_v8, %v13918_v8 }
 0x1c3   : > { %4220 = vrot.lane.b32.xlu1 %v15068_v18, %s13646_s17  ;;  %v1026_v8 = vcombine.low %v14157_v60, %v14157_v60 }
 0x1c4   : > { %v13010_v49 = vpack.c.bf16 %v4347_v3, %v4346_v5  ;;  %v4667_v10 = vpop.permute.xlu0 %4666  ;;  %v15244_v36 = vpop.permute.xlu1 %1097  ;;  %380 = vst [vmem:[#allocation2 + $0x68] sm:$0xf] %v357_v33 }
 0x1c5   : > { %v4709_v7 = vsel %vm2781_vm15, %v4667_v10, %v4669_v43  ;;  %v4710_v50 = vsel %vm2781_vm15, %v15202_v2, %v4667_v10 }
 0x1c6   : > { %4425 = vst [vmem:[#allocation3 + $0x308] sm:$0x33] %v13010_v49  ;;  %v4800_v63 = vmul.f32 %v4723_v45, %v4710_v50  ;;  %v4801_v4 = vmul.f32 %v4727_v21, %v4709_v7  ;;  %4446 = vrot.lane.b32.xlu0 %v15019_v1, %s13647_s18  ;;  %v1053_v21 = vld [vmem:[#allocation3 + $0x350] sm:$0x44]  ;;  %v15267_v49 = vsub.s32 4, %v14432_v22  ;;  %v15272_v50 = vsub.s32 5, %v14432_v22 }
 0x1c7   : > { %4224 = vrot.lane.b32.xlu1 %v15161_v54, %s13646_s17 }
 0x1c8   : > { %v13025_v62 = vpack.c.bf16 %v4801_v4, %v4800_v63  ;;  %v4671_v47 = vpop.permute.xlu0 %4670  ;;  %v15259_v5 = vpop.permute.xlu1 %1101  ;;  %19392 = vst [vmem:[#allocation45_spill] sm:$0xff] %v15267_v49  ;;  %19393 = vst [vmem:[#allocation46_spill] sm:$0xff] %v15272_v50 }
 0x1c9   : > { %19391 = vst [vmem:[#allocation44_spill] sm:$0xff] %v15259_v5  ;;  %v4707_v3 = vsel %vm2781_vm15, %v4671_v47, %v15231_v9  ;;  %v4708_v45 = vsel %vm2781_vm15, %v4669_v43, %v4671_v47  ;;  %v1054_v43 = vsel %vm14617_vm11, 1065369472, %v1053_v21  ;;  %v15290_v21 = vsub.s32 7, %v14432_v22 }
 0x1ca   : > { %4880 = vst [vmem:[#allocation3 + $0x340] sm:$0x33] %v13025_v62  ;;  %v4802_v10 = vmul.f32 %v4731_v12, %v4708_v45  ;;  %v4803_v7 = vmul.f32 %v4735_v0, %v4707_v3  ;;  %4218 = vrot.lane.b32.xlu0 %v15002_v55, %s13646_s17  ;;  %1055 = vst [vmem:[#allocation3 + $0x350] sm:$0x44] %v1054_v43  ;;  %v15281_v12 = vsub.s32 6, %v14432_v22  ;;  %v13650_v62 = vmov 65535  }
 0x1cb   : > { %4676 = vrot.lane.b32.xlu1 %v15068_v18, %s19382_s1  ;;  %v1056_v0 = vld [vmem:[#allocation3 + $0x358] sm:$0x44]  ;;  %v5551_v18 = vsel %vm5549_vm5, 4294967295, %v13650_v62  ;;  %v941_v3 = vcombine.high %v14963_v14, %v14963_v14  ;;  %19395 = vst [vmem:[#allocation48_spill] sm:$0xff] %v15290_v21 }
 0x1cc   : > { %v13026_v63 = vpack.c.bf16 %v4803_v7, %v4802_v10  ;;  %v1096_v4 = vpop.permute.xlu0 %1095  ;;  %v15278_v47 = vpop.permute.xlu1 %1325  ;;  %19394 = vst [vmem:[#allocation47_spill] sm:$0xff] %v15281_v12  ;;  %v1057_v45 = vsel %vm14617_vm11, 1065369472, %v1056_v0  ;;  %v1166_v10 = vrot.slane %v14441_v29, %v15267_v49  ;;  %v1170_v7 = vrot.slane %v14441_v29, %v15272_v50  ;;  %v15306_v0 = vld [vmem:[#allocation2 + $0x48] sm:$0xff] }
 0x1cd   : > { %1058 = vst [vmem:[#allocation3 + $0x358] sm:$0x44] %v1057_v45  ;;  %v1132_v14 = vsel %vm1121_vm1, %v1096_v4, %v15244_v36  ;;  %v1133_v43 = vsel %vm1121_vm1, %v14414_v34, %v1096_v4  ;;  %v947_v62 = vsel %vm453_vm0, %v941_v3, %v14965_v61  ;;  %v1174_v2 = vrot.slane %v14441_v29, %v15281_v12  ;;  %v4985_v45 = vld [vmem:[#allocation3 + $0x300] sm:$0xff] }
 0x1ce   : > { %4881 = vst [vmem:[#allocation3 + $0x348] sm:$0x33] %v13026_v63  ;;  %4222 = vrot.lane.b32.xlu0 %v15019_v1, %s13646_s17  ;;  %v15313_v32 = vsel %vm5550_vm6, %v5551_v18, 0  ;;  %v951_v34 = vrot.slane %v947_v62, 4  ;;  %v1393_v4 = vrot.slane %v14448_v31, %v15267_v49  ;;  %v1397_v61 = vrot.slane %v14448_v31, %v15272_v50 }
 0x1cf   : > { %4680 = vrot.lane.b32.xlu1 %v15161_v54, %s19382_s1  ;;  %v1231_v28 = vmul.f32 %v1166_v10, %v1133_v43  ;;  %v1232_v40 = vmul.f32 %v1170_v7, %v1132_v14  ;;  %v1178_v18 = vrot.slane %v14441_v29, %v15290_v21  ;;  %v1405_v10 = vrot.slane %v14448_v31, %v15290_v21  ;;  %v15337_v7 = vld [vmem:[#allocation2 + $0x58] sm:$0xff]  ;;  %v4986_v14 = vld [vmem:[#allocation3 + $0x308] sm:$0xff] }
 0x1d0   : > { %v1100_v22 = vpop.permute.xlu0 %1099  ;;  %v15304_v63 = vpop.permute.xlu1 %1329  ;;  %955 = vst [vmem:[#allocation2 + $0xe8] ss:$-124 sps:$4 sm:$0xff] %v951_v34  }
 0x1d1   : > { %v4993_v15 = vld [vmem:[#allocation3 + $0x340] sm:$0x77]  ;;  %v1130_v33 = vsel %vm1121_vm1, %v1100_v22, %v15259_v5  ;;  %v1131_v60 = vsel %vm1121_vm1, %v15244_v36, %v1100_v22  ;;  %v1028_v36 = vsel %vm453_vm0, %v14155_v59, %v1026_v8 }
 0x1d2   : > { %4674 = vrot.lane.b32.xlu0 %v15002_v55, %s19382_s1  ;;  %v12476_v3 = vcombine.high %v4985_v45, %v4993_v15  ;;  %v12475_v30 = vcombine.low %v4985_v45, %v4993_v15  ;;  %v1401_v15 = vrot.slane %v14448_v31, %v15281_v12  ;;  %v1233_v22 = vmul.f32 %v1174_v2, %v1131_v60  ;;  %v15370_v59 = vld [vmem:[%s19164_s4] sm:$0xf]  ;;  %v15374_v60 = vld [vmem:[#allocation2 + $0x50] sm:$0xff] }
 0x1d3   : > { %1105 = vrot.lane.b32.xlu1 %v15306_v0, %s19384_s11  ;;  %v1032_v2 = vrot.slane %v1028_v36, 4  ;;  %v1851_v36 = vrot.slane %v14534_v24, %v15272_v50 }
 0x1d4   : > { %v1324_v55 = vpop.permute.xlu0 %1323  ;;  %v5557_v62 = vand.u32 %v12476_v3, %v15313_v32  ;;  %v5554_v9 = vand.u32 %v12475_v30, %v15313_v32  ;;  %v15335_v29 = vpop.permute.xlu1 %1552 }
 0x1d5   : > { %v1358_v30 = vsel %vm1347_vm2, %v1324_v55, %v15278_v47  ;;  %v1359_v31 = vsel %vm1347_vm2, %v14511_v20, %v1324_v55  ;;  %v4994_v43 = vld [vmem:[#allocation3 + $0x348] sm:$0x77]  ;;  %v1234_v20 = vmul.f32 %v1178_v18, %v1130_v33  ;;  %1036 = vst [vmem:[#allocation2 + $0xf0] ss:$-124 sps:$4 sm:$0xff] %v1032_v2  }
 0x1d6   : > { %v1458_v45 = vmul.f32 %v1393_v4, %v1359_v31  ;;  %v1459_v34 = vmul.f32 %v1397_v61, %v1358_v30  ;;  %4678 = vrot.lane.b32.xlu0 %v15019_v1, %s19382_s1  ;;  %5613 = vmatprep.subr.bf16.mxu0 %v5557_v62  ;;  %v12478_v3 = vcombine.high %v4986_v14, %v4994_v43 }
 0x1d7   : > { %5614 = vmatpush1.bf16.msra.mxu0 %v5554_v9  ;;  %v12477_v5 = vcombine.low %v4986_v14, %v4994_v43  ;;  %1109 = vrot.lane.b32.xlu1 %v15337_v7, %s19384_s11  ;;  %v1624_v31 = vrot.slane %v14522_v27, %v15272_v50 }
 0x1d8   : > { %v1328_v55 = vpop.permute.xlu0 %1327  ;;  %v5563_v4 = vand.u32 %v12478_v3, %v15313_v32  ;;  %v15358_v61 = vpop.permute.xlu1 %1556  ;;  %v13309_v33 = vpack.c.bf16 %v1459_v34, %v1232_v40  ;;  %v1847_v3 = vrot.slane %v14534_v24, %v15267_v49 }
 0x1d9   : > { %v1356_v1 = vsel %vm1347_vm2, %v1328_v55, %v15304_v63  ;;  %v1357_v9 = vsel %vm1347_vm2, %v15278_v47, %v1328_v55  ;;  %v5560_v62 = vand.u32 %v12477_v5, %v15313_v32  ;;  %v13310_v5 = vpack.c.bf16 %v1458_v45, %v1231_v28 }
 0x1da   : > { %v1460_v18 = vmul.f32 %v1401_v15, %v1357_v9  ;;  %v1461_v8 = vmul.f32 %v1405_v10, %v1356_v1  ;;  %1103 = vrot.lane.b32.xlu0 %v14931_v53, %s19384_s11  ;;  %5654 = vmatprep.subr.bf16.mxu1 %v5563_v4  ;;  %v19396_v15 = vmov 0   ;;  %v1620_v10 = vrot.slane %v14522_v27, %v15267_v49 }
 0x1db   : > { %5655 = vmatpush1.bf16.msra.mxu1 %v5560_v62  ;;  %1333 = vrot.lane.b32.xlu1 %v15306_v0, %s13642_s30  ;;  %v1628_v55 = vrot.slane %v14522_v27, %v15281_v12 }
 0x1dc   : > { %v1551_v47 = vpop.permute.xlu0 %1550  ;;  %v1780_v30 = vpop.permute.xlu1 %1779  ;;  %5683 = vmatprep.subr.bf16.mxu0 %v13309_v33  ;;  %12491 = vmatmul.mubr.msk.bf16.vlgmr.msra.gmra.mrb[0].mxu0 %vm5545_vm7, %v15370_v59  ;;  %v13311_v40 = vpack.c.bf16 %v1461_v8, %v1234_v20  ;;  %v13312_v28 = vpack.c.bf16 %v1460_v18, %v1233_v22 }
 0x1dd   : > { %5684 = vmatpush1.bf16.msra.mxu0 %v13310_v5  ;;  %5715 = vmatprep.mubr.bf16.mxu0 %v19396_v15  ;;  %v1585_v45 = vsel %vm1574_vm3, %v1551_v47, %v15335_v29  ;;  %v1586_v34 = vsel %vm1574_vm3, %v14513_v23, %v1551_v47  ;;  %v1632_v23 = vrot.slane %v14522_v27, %v15290_v21 }
 0x1de   : > { %1107 = vrot.lane.b32.xlu0 %v15374_v60, %s19384_s11  ;;  %12492 = vmatmul.mubr.msk.bf16.vlgmr.msra.gmra.mrb[0].mxu1 %vm5545_vm7, %v15370_v59  ;;  %v1685_v22 = vmul.f32 %v1620_v10, %v1586_v34  ;;  %v1686_v20 = vmul.f32 %v1624_v31, %v1585_v45  ;;  %v1855_v27 = vrot.slane %v14534_v24, %v15281_v12 }
 0x1df   : > { %1337 = vrot.lane.b32.xlu1 %v15337_v7, %s13642_s30  ;;  %5756 = vmatprep.mubr.bf16.mxu1 %v19396_v15  ;;  %v1859_v5 = vrot.slane %v14534_v24, %v15290_v21  ;;  %v2146_v31 = vrot.slane %v14603_v17, %v15267_v49  ;;  %v2150_v24 = vrot.slane %v14603_v17, %v15272_v50 }
 0x1e0   : > { %v1555_v14 = vpop.permute.xlu0 %1554  ;;  %v15392_v43 = vpop.permute.xlu1 %1783  ;;  %5724 = vmatprep.subr.bf16.mxu1 %v13311_v40 }
 0x1e1   : > { %5725 = vmatpush1.bf16.msra.mxu1 %v13312_v28  ;;  %v1583_v9 = vsel %vm1574_vm3, %v1555_v14, %v15358_v61  ;;  %v1584_v62 = vsel %vm1574_vm3, %v15335_v29, %v1555_v14 }
 0x1e2   : > { %1331 = vrot.lane.b32.xlu0 %v14931_v53, %s13642_s30  ;;  %v1687_v29 = vmul.f32 %v1628_v55, %v1584_v62  ;;  %v1688_v47 = vmul.f32 %v1632_v23, %v1583_v9  ;;  %v13277_v9 = vld [vmem:[#allocation2 + $0x28] sm:$0xff] }
 0x1e3   : > { %1560 = vrot.lane.b32.xlu1 %v15306_v0, %s19351_s2 }
 0x1e4   : > { %v1778_v4 = vpop.permute.xlu0 %1777  ;;  %v2081_v1 = vpop.permute.xlu1 %2080 }
 0x1e5   : > { %v1812_v2 = vsel %vm1801_vm4, %v1778_v4, %v1780_v30  ;;  %v1813_v18 = vsel %vm1801_vm4, %v14669_v6, %v1778_v4 }
 0x1e6   : > { %v1912_v8 = vmul.f32 %v1847_v3, %v1813_v18  ;;  %v1913_v33 = vmul.f32 %v1851_v36, %v1812_v2  ;;  %1335 = vrot.lane.b32.xlu0 %v15374_v60, %s13642_s30 }
 0x1e7   : > { %1564 = vrot.lane.b32.xlu1 %v15337_v7, %s19351_s2 }
 0x1e8   : > { %v1782_v40 = vpop.permute.xlu0 %1781  ;;  %v15431_v28 = vpop.permute.xlu1 %2084  ;;  %v13313_v34 = vpack.c.bf16 %v1913_v33, %v1686_v20  ;;  %v13314_v3 = vpack.c.bf16 %v1912_v8, %v1685_v22  ;;  %v2158_v20 = vrot.slane %v14603_v17, %v15290_v21  ;;  %v13276_v22 = vld [vmem:[#allocation2 + $0x20] sm:$0xff] }
 0x1e9   : > { %v1810_v6 = vsel %vm1801_vm4, %v1782_v40, %v15392_v43  ;;  %v1811_v10 = vsel %vm1801_vm4, %v1780_v30, %v1782_v40  ;;  %v2154_v30 = vrot.slane %v14603_v17, %v15281_v12  ;;  %v13279_v40 = vld [vmem:[#allocation2 + $0x30] sm:$0xff] }
 0x1ea   : > { %v1914_v14 = vmul.f32 %v1855_v27, %v1811_v10  ;;  %v1915_v45 = vmul.f32 %v1859_v5, %v1810_v6  ;;  %1558 = vrot.lane.b32.xlu0 %v14931_v53, %s19351_s2  ;;  %5685 = vmatprep.subr.bf16.mxu0 %v13313_v34  ;;  %v13278_v5 = vld [vmem:[#allocation2 + $0x38] sm:$0xff]  ;;  %v2377_v34 = vrot.slane %v14743_v25, %v15272_v50 }
 0x1eb   : > { %1787 = vrot.lane.b32.xlu1 %v15306_v0, %s13644_s10  ;;  %5686 = vmatpush1.bf16.msra.mxu0 %v13314_v3 }
 0x1ec   : > { %v2079_v36 = vpop.permute.xlu0 %2078  ;;  %v2308_v55 = vpop.permute.xlu1 %2307  ;;  %v13315_v18 = vpack.c.bf16 %v1915_v45, %v1688_v47  ;;  %v13316_v8 = vpack.c.bf16 %v1914_v14, %v1687_v29  ;;  %v15470_v14 = vld [vmem:[#allocation2 + $0x60] sm:$0xff] }
 0x1ed   : > { %v2110_v23 = vsel %vm2100_vm12, %v2079_v36, %v2081_v1  ;;  %v2111_v4 = vsel %vm2100_vm12, %v14751_v42, %v2079_v36 }
 0x1ee   : > { %v2211_v62 = vmul.f32 %v2146_v31, %v2111_v4  ;;  %v2212_v2 = vmul.f32 %v2150_v24, %v2110_v23  ;;  %1562 = vrot.lane.b32.xlu0 %v15374_v60, %s19351_s2  ;;  %5726 = vmatprep.subr.bf16.mxu1 %v13315_v18  ;;  %v2600_v4 = vrot.slane %v14782_v16, %v15267_v49 }
 0x1ef   : > { %1791 = vrot.lane.b32.xlu1 %v15337_v7, %s13644_s10  ;;  %5727 = vmatpush1.bf16.msra.mxu1 %v13316_v8 }
 0x1f0   : > { %v2083_v33 = vpop.permute.xlu0 %2082  ;;  %v15459_v27 = vpop.permute.xlu1 %2311  ;;  %v13317_v29 = vpack.c.bf16 %v2212_v2, %v13277_v9  ;;  %v13318_v10 = vpack.c.bf16 %v2211_v62, %v13276_v22  ;;  %v2381_v62 = vrot.slane %v14743_v25, %v15281_v12 }
 0x1f1   : > { %v2108_v17 = vsel %vm2100_vm12, %v2083_v33, %v15431_v28  ;;  %v2109_v42 = vsel %vm2100_vm12, %v2081_v1, %v2083_v33 }
 0x1f2   : > { %v2213_v6 = vmul.f32 %v2154_v30, %v2109_v42  ;;  %v2214_v47 = vmul.f32 %v2158_v20, %v2108_v17  ;;  %1785 = vrot.lane.b32.xlu0 %v14931_v53, %s13644_s10  ;;  %5687 = vmatprep.subr.bf16.mxu0 %v13317_v29  ;;  %v2373_v53 = vrot.slane %v14743_v25, %v15267_v49 }
 0x1f3   : > { %2088 = vrot.lane.b32.xlu1 %v15374_v60, %s13645_s15  ;;  %5688 = vmatpush1.bf16.msra.mxu0 %v13318_v10  ;;  %v2604_v20 = vrot.slane %v14782_v16, %v15272_v50 }
 0x1f4   : > { %v2306_v31 = vpop.permute.xlu0 %2305  ;;  %v2535_v24 = vpop.permute.xlu1 %2534  ;;  %v13319_v1 = vpack.c.bf16 %v2214_v47, %v13278_v5  ;;  %v13320_v45 = vpack.c.bf16 %v2213_v6, %v13279_v40  ;;  %v2612_v6 = vrot.slane %v14782_v16, %v15290_v21 }
 0x1f5   : > { %v2337_v30 = vsel %vm2327_vm13, %v2306_v31, %v2308_v55  ;;  %v2338_v23 = vsel %vm2327_vm13, %v14753_v52, %v2306_v31  ;;  %v2385_v52 = vrot.slane %v14743_v25, %v15290_v21  ;;  %v2608_v25 = vrot.slane %v14782_v16, %v15281_v12 }
 0x1f6   : > { %1789 = vrot.lane.b32.xlu0 %v15374_v60, %s13644_s10  ;;  %5728 = vmatprep.subr.bf16.mxu1 %v13319_v1  ;;  %v2438_v22 = vmul.f32 %v2373_v53, %v2338_v23  ;;  %v2439_v9 = vmul.f32 %v2377_v34, %v2337_v30  ;;  %v3291_v1 = vrot.slane %v14833_v44, %v15267_v49 }
 0x1f7   : > { %2092 = vrot.lane.b32.xlu1 %v15470_v14, %s13645_s15  ;;  %5729 = vmatpush1.bf16.msra.mxu1 %v13320_v45  ;;  %v3295_v16 = vrot.slane %v14833_v44, %v15272_v50 }
 0x1f8   : > { %v2310_v3 = vpop.permute.xlu0 %2309  ;;  %v15480_v36 = vpop.permute.xlu1 %2538 }
 0x1f9   : > { %v2335_v8 = vsel %vm2327_vm13, %v2310_v3, %v15459_v27  ;;  %v2336_v33 = vsel %vm2327_vm13, %v2308_v55, %v2310_v3 }
 0x1fa   : > { %2086 = vrot.lane.b32.xlu0 %v15306_v0, %s13645_s15  ;;  %v2440_v55 = vmul.f32 %v2381_v62, %v2336_v33  ;;  %v2441_v47 = vmul.f32 %v2385_v52, %v2335_v8 }
 0x1fb   : > { %2315 = vrot.lane.b32.xlu1 %v15374_v60, %s13646_s17 }
 0x1fc   : > { %v2533_v2 = vpop.permute.xlu0 %2532  ;;  %v3227_v18 = vpop.permute.xlu1 %3226 }
 0x1fd   : > { %v2564_v17 = vsel %vm2554_vm14, %v2533_v2, %v2535_v24  ;;  %v2565_v42 = vsel %vm2554_vm14, %v14906_v41, %v2533_v2 }
 0x1fe   : > { %v2665_v5 = vmul.f32 %v2600_v4, %v2565_v42  ;;  %v2666_v40 = vmul.f32 %v2604_v20, %v2564_v17  ;;  %2090 = vrot.lane.b32.xlu0 %v15337_v7, %s13645_s15  ;;  %v3299_v20 = vrot.slane %v14833_v44, %v15281_v12 }
 0x1ff   : > { %2319 = vrot.lane.b32.xlu1 %v15470_v14, %s13646_s17 }
 0x200   : > { %v2537_v29 = vpop.permute.xlu0 %2536  ;;  %v15517_v10 = vpop.permute.xlu1 %3230  ;;  %v13321_v34 = vpack.c.bf16 %v2666_v40, %v2439_v9  ;;  %v13322_v3 = vpack.c.bf16 %v2665_v5, %v2438_v22  ;;  %v3303_v22 = vrot.slane %v14833_v44, %v15290_v21 }
 0x201   : > { %v2562_v41 = vsel %vm2554_vm14, %v2537_v29, %v15480_v36  ;;  %v2563_v31 = vsel %vm2554_vm14, %v2535_v24, %v2537_v29 }
 0x202   : > { %v2667_v45 = vmul.f32 %v2608_v25, %v2563_v31  ;;  %v2668_v53 = vmul.f32 %v2612_v6, %v2562_v41  ;;  %2313 = vrot.lane.b32.xlu0 %v15306_v0, %s13646_s17  ;;  %5689 = vmatprep.subr.bf16.mxu0 %v13321_v34 }
 0x203   : > { %2542 = vrot.lane.b32.xlu1 %v15374_v60, %s13647_s18  ;;  %5690 = vmatpush1.bf16.msra.mxu0 %v13322_v3 }
 0x204   : > { %v3225_v30 = vpop.permute.xlu0 %3224  ;;  %v15532_v23 = vpop.permute.xlu1 %2761  ;;  %v13323_v52 = vpack.c.bf16 %v2668_v53, %v2441_v47  ;;  %v13324_v2 = vpack.c.bf16 %v2667_v45, %v2440_v55  ;;  %v15560_v47 = vld [vmem:[#allocation2 + $0xd8] sm:$0xf]  ;;  %v15574_v45 = vld [vmem:[#allocation2 + $0xd0] sm:$0xf] }
 0x205   : > { %v3258_v24 = vsel %vm1347_vm2, %v3225_v30, %v3227_v18  ;;  %v3259_v4 = vsel %vm1347_vm2, %v14955_v39, %v3225_v30  ;;  %v15547_v39 = vld [vmem:[#allocation2 + $0xc8] sm:$0xf] }
 0x206   : > { %v3356_v9 = vmul.f32 %v3291_v1, %v3259_v4  ;;  %v3357_v62 = vmul.f32 %v3295_v16, %v3258_v24  ;;  %2317 = vrot.lane.b32.xlu0 %v15337_v7, %s13646_s17  ;;  %5730 = vmatprep.subr.bf16.mxu1 %v13323_v52  ;;  %v3067_v1 = vrot.slane %v14983_v51, %v15267_v49 }
 0x207   : > { %2546 = vrot.lane.b32.xlu1 %v15470_v14, %s13647_s18  ;;  %5731 = vmatpush1.bf16.msra.mxu1 %v13324_v2  ;;  %v3071_v16 = vrot.slane %v14983_v51, %v15272_v50 }
 0x208   : > { %v12971_v8 = vpack.c.bf16 %v3357_v62, %v3356_v9  ;;  %v3229_v33 = vpop.permute.xlu0 %3228 }
 0x209   : > { %v3256_v44 = vsel %vm1347_vm2, %v3229_v33, %v15517_v10  ;;  %v3257_v17 = vsel %vm1347_vm2, %v3227_v18, %v3229_v33  ;;  %v15554_v42 = vpop.permute.xlu1 %2765 }
 0x20a   : > { %v3426_v5 = vrot.slane %v12971_v8, 6  ;;  %v3358_v40 = vmul.f32 %v3299_v20, %v3257_v17  ;;  %v3359_v25 = vmul.f32 %v3303_v22, %v3256_v44  ;;  %2540 = vrot.lane.b32.xlu0 %v15306_v0, %s13647_s18  ;;  %v3075_v20 = vrot.slane %v14983_v51, %v15281_v12 }
 0x20b   : > { %3234 = vrot.lane.b32.xlu1 %v15547_v39, %s13642_s30  ;;  %v2827_v22 = vrot.slane %v15004_v13, %v15267_v49 }
 0x20c   : > { %3442 = vst [vmem:[#allocation3 + $0x250] sm:$0xcc] %v3426_v5  ;;  %v12972_v6 = vpack.c.bf16 %v3359_v25, %v3358_v40  ;;  %v2760_v55 = vpop.permute.xlu0 %2759  ;;  %v19397_v5 = vld [vmem:[#allocation35_spill] sm:$0xff]  ;;  %v2835_v25 = vrot.slane %v15004_v13, %v15281_v12 }
 0x20d   : > { %v3003_v29 = vpop.permute.xlu1 %3002  ;;  %v2791_v52 = vsel %vm2781_vm15, %v2760_v55, %v15532_v23  ;;  %v2792_v2 = vsel %vm2781_vm15, %v14987_v58, %v2760_v55  ;;  %v3747_v40 = vrot.slane %v19397_v5, %v15267_v49  ;;  %v3751_v58 = vrot.slane %v19397_v5, %v15272_v50 }
 0x20e   : > { %v3427_v41 = vrot.slane %v12972_v6, 6  ;;  %2544 = vrot.lane.b32.xlu0 %v15337_v7, %s13647_s18  ;;  %v2892_v6 = vmul.f32 %v2827_v22, %v2792_v2  ;;  %v4055_v2 = vrot.slane %v15072_v48, %v15272_v50 }
 0x20f   : > { %3238 = vrot.lane.b32.xlu1 %v15560_v47, %s13642_s30 }
 0x210   : > { %3443 = vst [vmem:[#allocation3 + $0x258] sm:$0xcc] %v3427_v41  ;;  %v2764_v18 = vpop.permute.xlu0 %2763 }
 0x211   : > { %v15566_v31 = vpop.permute.xlu1 %3006 }
 0x212   : > { %3232 = vrot.lane.b32.xlu0 %v15161_v54, %s13642_s30 }
 0x213   : > { %2769 = vrot.lane.b32.xlu1 %v15374_v60, %s19382_s1  ;;  %v3079_v60 = vrot.slane %v14983_v51, %v15290_v21 }
 0x214   : > { %v3001_v53 = vpop.permute.xlu0 %3000 }
 0x215   : > { %v3034_v34 = vsel %vm1121_vm1, %v3001_v53, %v3003_v29  ;;  %v3035_v3 = vsel %vm1121_vm1, %v15023_v19, %v3001_v53  ;;  %v3683_v30 = vpop.permute.xlu1 %3682  ;;  %v2831_v19 = vrot.slane %v15004_v13, %v15272_v50 }
 0x216   : > { %v3132_v24 = vmul.f32 %v3067_v1, %v3035_v3  ;;  %v3133_v4 = vmul.f32 %v3071_v16, %v3034_v34  ;;  %3236 = vrot.lane.b32.xlu0 %v15574_v45, %s13642_s30  ;;  %v2790_v16 = vsel %vm2781_vm15, %v15532_v23, %v2764_v18  ;;  %v19398_v34 = vld [vmem:[#allocation34_spill] sm:$0xff]  ;;  %v3759_v23 = vrot.slane %v19397_v5, %v15290_v21 }
 0x217   : > { %2773 = vrot.lane.b32.xlu1 %v15470_v14, %s19382_s1  ;;  %v2893_v55 = vmul.f32 %v2831_v19, %v2791_v52  ;;  %v4051_v52 = vrot.slane %v15072_v48, %v15267_v49 }
 0x218   : > { %v12963_v9 = vpack.c.bf16 %v3133_v4, %v3132_v24  ;;  %v3005_v62 = vpop.permute.xlu0 %3004 }
 0x219   : > { %v3032_v51 = vsel %vm1121_vm1, %v3005_v62, %v15566_v31  ;;  %v3033_v8 = vsel %vm1121_vm1, %v3003_v29, %v3005_v62  ;;  %v15606_v33 = vpop.permute.xlu1 %3686  ;;  %v2839_v29 = vrot.slane %v15004_v13, %v15290_v21 }
 0x21a   : > { %3210 = vst [vmem:[#allocation3 + $0x250] sm:$0x33] %v12963_v9  ;;  %v3134_v44 = vmul.f32 %v3075_v20, %v3033_v8  ;;  %v3135_v17 = vmul.f32 %v3079_v60, %v3032_v51  ;;  %2767 = vrot.lane.b32.xlu0 %v15306_v0, %s19382_s1  ;;  %v2789_v0 = vsel %vm2781_vm15, %v2764_v18, %v15554_v42 }
 0x21b   : > { %3010 = vrot.lane.b32.xlu1 %v15547_v39, %s19384_s11  ;;  %v3755_v20 = vrot.slane %v19397_v5, %v15281_v12  ;;  %v12955_v18 = vpack.c.bf16 %v2893_v55, %v2892_v6  ;;  %v2894_v60 = vmul.f32 %v2835_v25, %v2790_v16  ;;  %v2895_v22 = vmul.f32 %v2839_v29, %v2789_v0 }
 0x21c   : > { %v12964_v41 = vpack.c.bf16 %v3135_v17, %v3134_v44  ;;  %v3681_v1 = vpop.permute.xlu0 %3680  ;;  %v4063_v0 = vrot.slane %v15072_v48, %v15290_v21 }
 0x21d   : > { %v3714_v53 = vsel %vm1801_vm4, %v3681_v1, %v3683_v30  ;;  %v3715_v3 = vsel %vm1801_vm4, %v19398_v34, %v3681_v1  ;;  %v3989_v24 = vpop.permute.xlu1 %3988  ;;  %v4059_v1 = vrot.slane %v15072_v48, %v15281_v12 }
 0x21e   : > { %3211 = vst [vmem:[#allocation3 + $0x258] sm:$0x33] %v12964_v41  ;;  %v3812_v13 = vmul.f32 %v3747_v40, %v3715_v3  ;;  %v3813_v4 = vmul.f32 %v3751_v58, %v3714_v53  ;;  %2771 = vrot.lane.b32.xlu0 %v15337_v7, %s19382_s1 }
 0x21f   : > { %3014 = vrot.lane.b32.xlu1 %v15560_v47, %s19384_s11 }
 0x220   : > { %v12987_v19 = vpack.c.bf16 %v3813_v4, %v3812_v13  ;;  %v3685_v9 = vpop.permute.xlu0 %3684 }
 0x221   : > { %v3712_v62 = vsel %vm1801_vm4, %v3685_v9, %v15606_v33  ;;  %v3713_v7 = vsel %vm1801_vm4, %v3683_v30, %v3685_v9  ;;  %v4963_v51 = vld [vmem:[#allocation3 + $0x250] sm:$0xff]  ;;  %v15648_v8 = vpop.permute.xlu1 %3992  ;;  %v12956_v30 = vpack.c.bf16 %v2895_v22, %v2894_v60 }
 0x222   : > { %v3882_v44 = vrot.slane %v12987_v19, 6  ;;  %v3814_v17 = vmul.f32 %v3755_v20, %v3713_v7  ;;  %v3815_v5 = vmul.f32 %v3759_v23, %v3712_v62  ;;  %3008 = vrot.lane.b32.xlu0 %v15161_v54, %s19384_s11  ;;  %v12447_v40 = vcombine.low %v12955_v18, %v4963_v51 }
 0x223   : > { %v12448_v58 = vcombine.high %v12955_v18, %v4963_v51  ;;  %3690 = vrot.lane.b32.xlu1 %v15547_v39, %s13644_s10  ;;  %v3523_v18 = vrot.slane %v15126_v11, %v15267_v49  ;;  %v3527_v62 = vrot.slane %v15126_v11, %v15272_v50 }
 0x224   : > { %3898 = vst [vmem:[#allocation3 + $0x290] sm:$0xcc] %v3882_v44  ;;  %v12988_v25 = vpack.c.bf16 %v3815_v5, %v3814_v17  ;;  %v3987_v6 = vpop.permute.xlu0 %3986  ;;  %v3531_v17 = vrot.slane %v15126_v11, %v15281_v12 }
 0x225   : > { %v4017_v55 = vsel %vm2100_vm12, %v3987_v6, %v3989_v24  ;;  %v4018_v29 = vsel %vm2100_vm12, %v15087_v35, %v3987_v6  ;;  %5691 = vmatprep.subr.bf16.mxu0 %v12448_v58  ;;  %v4964_v41 = vld [vmem:[#allocation3 + $0x258] sm:$0xff]  ;;  %v3459_v16 = vpop.permute.xlu1 %3458 }
 0x226   : > { %v3883_v53 = vrot.slane %v12988_v25, 6  ;;  %v4116_v34 = vmul.f32 %v4051_v52, %v4018_v29  ;;  %v4117_v3 = vmul.f32 %v4055_v2, %v4017_v55  ;;  %5692 = vmatpush1.bf16.msra.mxu0 %v12447_v40  ;;  %3012 = vrot.lane.b32.xlu0 %v15574_v45, %s19384_s11  ;;  %v12449_v13 = vcombine.low %v12956_v30, %v4964_v41  ;;  %v15684_v2 = vld [vmem:[#allocation2 + $0xe0] sm:$0xf] }
 0x227   : > { %v12450_v4 = vcombine.high %v12956_v30, %v4964_v41  ;;  %3694 = vrot.lane.b32.xlu1 %v15560_v47, %s13644_s10  ;;  %v3535_v30 = vrot.slane %v15126_v11, %v15290_v21 }
 0x228   : > { %3899 = vst [vmem:[#allocation3 + $0x298] sm:$0xcc] %v3883_v53  ;;  %v13003_v35 = vpack.c.bf16 %v4117_v3, %v4116_v34  ;;  %v3991_v20 = vpop.permute.xlu0 %3990  ;;  %v4511_v53 = vrot.slane %v15149_v37, %v15272_v50 }
 0x229   : > { %5732 = vmatprep.subr.bf16.mxu1 %v12450_v4  ;;  %v4015_v48 = vsel %vm2100_vm12, %v3991_v20, %v15648_v8  ;;  %v4016_v23 = vsel %vm2100_vm12, %v3989_v24, %v3991_v20  ;;  %v15674_v60 = vpop.permute.xlu1 %3462  ;;  %v12997_v24 = vpack.c.bf16 %v15547_v39, %v15161_v54 }
 0x22a   : > { %v4186_v22 = vrot.slane %v13003_v35, 6  ;;  %v4118_v19 = vmul.f32 %v4059_v1, %v4016_v23  ;;  %v4119_v9 = vmul.f32 %v4063_v0, %v4015_v48  ;;  %5733 = vmatpush1.bf16.msra.mxu1 %v12449_v13  ;;  %3688 = vrot.lane.b32.xlu0 %v15161_v54, %s13644_s10  ;;  %v4507_v0 = vrot.slane %v15149_v37, %v15267_v49  ;;  %v19399_v13 = vld [vmem:[#allocation40_spill] sm:$0xff] }
 0x22b   : > { %3996 = vrot.lane.b32.xlu1 %v15574_v45, %s13645_s15  ;;  %3972 = vst [vmem:[#allocation3 + $0x2e0] sm:$0x33] %v12997_v24  ;;  %v4515_v23 = vrot.slane %v15149_v37, %v15281_v12  ;;  %v4283_v24 = vrot.slane %v15194_v38, %v15267_v49 }
 0x22c   : > { %4202 = vst [vmem:[#allocation3 + $0x2d0] sm:$0xcc] %v4186_v22  ;;  %v13004_v7 = vpack.c.bf16 %v4119_v9, %v4118_v19  ;;  %v3457_v52 = vpop.permute.xlu0 %3456 }
 0x22d   : > { %v3490_v51 = vsel %vm1574_vm3, %v3457_v52, %v3459_v16  ;;  %v3491_v44 = vsel %vm1574_vm3, %v15113_v56, %v3457_v52  ;;  %v4445_v5 = vpop.permute.xlu1 %4444  ;;  %v12998_v56 = vpack.c.bf16 %v15560_v47, %v15574_v45 }
 0x22e   : > { %v4187_v40 = vrot.slane %v13004_v7, 6  ;;  %v3588_v58 = vmul.f32 %v3523_v18, %v3491_v44  ;;  %v3589_v54 = vmul.f32 %v3527_v62, %v3490_v51  ;;  %3692 = vrot.lane.b32.xlu0 %v15574_v45, %s13644_s10  ;;  %v4519_v18 = vrot.slane %v15149_v37, %v15290_v21 }
 0x22f   : > { %4000 = vrot.lane.b32.xlu1 %v15684_v2, %s13645_s15  ;;  %3973 = vst [vmem:[#allocation3 + $0x2e8] sm:$0x33] %v12998_v56  ;;  %v4287_v7 = vrot.slane %v15194_v38, %v15272_v50 }
 0x230   : > { %4203 = vst [vmem:[#allocation3 + $0x2d8] sm:$0xcc] %v4187_v40  ;;  %v12979_v25 = vpack.c.bf16 %v3589_v54, %v3588_v58  ;;  %v3461_v6 = vpop.permute.xlu0 %3460  ;;  %v13280_v58 = vld [vmem:[#allocation2 + $0xc0] sm:$0xf] }
 0x231   : > { %v3488_v55 = vsel %vm1574_vm3, %v3461_v6, %v15674_v60  ;;  %v3489_v29 = vsel %vm1574_vm3, %v3459_v16, %v3461_v6  ;;  %v15706_v41 = vpop.permute.xlu1 %4448 }
 0x232   : > { %3666 = vst [vmem:[#allocation3 + $0x290] sm:$0x33] %v12979_v25  ;;  %v3590_v11 = vmul.f32 %v3531_v17, %v3489_v29  ;;  %v3591_v1 = vmul.f32 %v3535_v30, %v3488_v55  ;;  %3994 = vrot.lane.b32.xlu0 %v15547_v39, %s13645_s15 }
 0x233   : > { %3466 = vrot.lane.b32.xlu1 %v15547_v39, %s19351_s2  ;;  %v4979_v37 = vld [vmem:[#allocation3 + $0x2d0] sm:$0xff] }
 0x234   : > { %v12980_v34 = vpack.c.bf16 %v3591_v1, %v3590_v11  ;;  %v4443_v16 = vpop.permute.xlu0 %4442  ;;  %v4291_v11 = vrot.slane %v15194_v38, %v15281_v12  ;;  %v4295_v1 = vrot.slane %v15194_v38, %v15290_v21 }
 0x235   : > { %v4473_v3 = vsel %vm2554_vm14, %v4443_v16, %v4445_v5  ;;  %v4474_v4 = vsel %vm2554_vm14, %v19399_v13, %v4443_v16  ;;  %v4221_v35 = vpop.permute.xlu1 %4220 }
 0x236   : > { %3667 = vst [vmem:[#allocation3 + $0x298] sm:$0x33] %v12980_v34  ;;  %v4572_v20 = vmul.f32 %v4507_v0, %v4474_v4  ;;  %v4573_v48 = vmul.f32 %v4511_v53, %v4473_v3  ;;  %3998 = vrot.lane.b32.xlu0 %v15560_v47, %s13645_s15 }
 0x237   : > { %3470 = vrot.lane.b32.xlu1 %v15560_v47, %s19351_s2  ;;  %v4980_v29 = vld [vmem:[#allocation3 + $0x2d8] sm:$0xff] }
 0x238   : > { %v13019_v22 = vpack.c.bf16 %v4573_v48, %v4572_v20  ;;  %v4447_v19 = vpop.permute.xlu0 %4446  ;;  %v4739_v48 = vrot.slane %v15223_v57, %v15267_v49 }
 0x239   : > { %v4471_v9 = vsel %vm2554_vm14, %v4447_v19, %v15706_v41  ;;  %v4472_v62 = vsel %vm2554_vm14, %v4445_v5, %v4447_v19  ;;  %v4971_v52 = vld [vmem:[#allocation3 + $0x290] sm:$0xff]  ;;  %v15738_v51 = vpop.permute.xlu1 %4224  ;;  %v4743_v19 = vrot.slane %v15223_v57, %v15272_v50 }
 0x23a   : > { %v4642_v44 = vrot.slane %v13019_v22, 6  ;;  %v4574_v17 = vmul.f32 %v4515_v23, %v4472_v62  ;;  %v4575_v40 = vmul.f32 %v4519_v18, %v4471_v9  ;;  %3464 = vrot.lane.b32.xlu0 %v13280_v58, %s19351_s2  ;;  %v12463_v54 = vcombine.low %v4971_v52, %v4979_v37 }
 0x23b   : > { %v12464_v30 = vcombine.high %v4971_v52, %v4979_v37  ;;  %4452 = vrot.lane.b32.xlu1 %v15574_v45, %s13647_s18 }
 0x23c   : > { %4658 = vst [vmem:[#allocation3 + $0x310] sm:$0xcc] %v4642_v44  ;;  %v13020_v5 = vpack.c.bf16 %v4575_v40, %v4574_v17  ;;  %v4219_v56 = vpop.permute.xlu0 %4218  ;;  %v4747_v17 = vrot.slane %v15223_v57, %v15281_v12  ;;  %v4751_v40 = vrot.slane %v15223_v57, %v15290_v21 }
 0x23d   : > { %v4249_v25 = vsel %vm2327_vm13, %v4219_v56, %v4221_v35  ;;  %v4250_v6 = vsel %vm2327_vm13, %v15229_v46, %v4219_v56  ;;  %5693 = vmatprep.subr.bf16.mxu0 %v12464_v30  ;;  %v4972_v55 = vld [vmem:[#allocation3 + $0x298] sm:$0xff]  ;;  %v4677_v0 = vpop.permute.xlu1 %4676 }
 0x23e   : > { %v4643_v53 = vrot.slane %v13020_v5, 6  ;;  %v4348_v34 = vmul.f32 %v4283_v24, %v4250_v6  ;;  %v4349_v16 = vmul.f32 %v4287_v7, %v4249_v25  ;;  %5694 = vmatpush1.bf16.msra.mxu0 %v12463_v54  ;;  %3468 = vrot.lane.b32.xlu0 %v15574_v45, %s19351_s2  ;;  %v12465_v3 = vcombine.low %v4972_v55, %v4980_v29  ;;  %v19400_v24 = vld [vmem:[#allocation43_spill] sm:$0xff] }
 0x23f   : > { %v12466_v13 = vcombine.high %v4972_v55, %v4980_v29  ;;  %4456 = vrot.lane.b32.xlu1 %v15684_v2, %s13647_s18  ;;  %v1142_v30 = vld [vmem:[#allocation11 + $0x40] ss:$8 sm:$0xf]  ;;  %v1059_v55 = vld [vmem:[#allocation3 + $0x360] sm:$0x44] }
 0x240   : > { %4659 = vst [vmem:[#allocation3 + $0x318] sm:$0xcc] %v4643_v53  ;;  %v13011_v46 = vpack.c.bf16 %v4349_v16, %v4348_v34  ;;  %v4223_v4 = vpop.permute.xlu0 %4222  ;;  %v1143_v5 = vld [vmem:[#allocation11 + $0x40] ss:$8 sm:$0xf0] }
 0x241   : > { %5734 = vmatprep.subr.bf16.mxu1 %v12466_v13  ;;  %v4247_v38 = vsel %vm2327_vm13, %v4223_v4, %v15738_v51  ;;  %v4248_v20 = vsel %vm2327_vm13, %v4221_v35, %v4223_v4  ;;  %v15763_v23 = vpop.permute.xlu1 %4680  ;;  %v15795_v53 = vor.u32 %v1143_v5, %v1142_v30  ;;  %v1369_v34 = vld [vmem:[#allocation11 + $0x41] ss:$8 sm:$0xf] }
 0x242   : > { %4426 = vst [vmem:[#allocation3 + $0x310] sm:$0x33] %v13011_v46  ;;  %v4350_v18 = vmul.f32 %v4291_v11, %v4248_v20  ;;  %v4351_v22 = vmul.f32 %v4295_v1, %v4247_v38  ;;  %5735 = vmatpush1.bf16.msra.mxu1 %v12465_v3  ;;  %4450 = vrot.lane.b32.xlu0 %v15547_v39, %s13647_s18  ;;  %v1060_v1 = vsel %vm14617_vm11, 1065369472, %v1059_v55  ;;  %v1062_v46 = vld [vmem:[#allocation3 + $0x368] sm:$0x44] }
 0x243   : > { %4228 = vrot.lane.b32.xlu1 %v15574_v45, %s13646_s17  ;;  %v1370_v16 = vld [vmem:[#allocation11 + $0x41] ss:$8 sm:$0xf0]  ;;  %1061 = vst [vmem:[#allocation3 + $0x360] sm:$0x44] %v1060_v1 }
 0x244   : > { %v13012_v9 = vpack.c.bf16 %v4351_v22, %v4350_v18  ;;  %v4675_v35 = vpop.permute.xlu0 %4674  ;;  %v15801_v4 = vor.u32 %v1370_v16, %v1369_v34  ;;  %v1063_v38 = vsel %vm14617_vm11, 1065369472, %v1062_v46  ;;  %v19402_v20 = vld [vmem:[#allocation19_spill] sm:$0xff]  ;;  %v19405_v5 = vld [vmem:[#allocation22_spill] sm:$0xff] }
 0x245   : > { %v4705_v62 = vsel %vm2781_vm15, %v4675_v35, %v4677_v0  ;;  %v4706_v7 = vsel %vm2781_vm15, %v19400_v24, %v4675_v35  ;;  %v1106_v52 = vpop.permute.xlu1 %1105  ;;  %1064 = vst [vmem:[#allocation3 + $0x368] sm:$0x44] %v1063_v38  ;;  %v4259_v11 = vld [vmem:[#allocation11 + $0x45] ss:$8 sm:$0xf] }
 0x246   : > { %4427 = vst [vmem:[#allocation3 + $0x318] sm:$0x33] %v13012_v9  ;;  %v4804_v37 = vmul.f32 %v4739_v48, %v4706_v7  ;;  %v4805_v44 = vmul.f32 %v4743_v19, %v4705_v62  ;;  %4454 = vrot.lane.b32.xlu0 %v15560_v47, %s13647_s18  ;;  %v1182_v48 = vrot.slane %v15795_v53, %v19402_v20  ;;  %v19404_v19 = vld [vmem:[#allocation44_spill] sm:$0xff] }
 0x247   : > { %4232 = vrot.lane.b32.xlu1 %v15684_v2, %s13646_s17  ;;  %v15816_v62 = vld [vmem:[#allocation2 + $0x68] sm:$0xff]  ;;  %v1417_v1 = vrot.slane %v15801_v4, %v19405_v5 }
 0x248   : > { %v13027_v58 = vpack.c.bf16 %v4805_v44, %v4804_v37  ;;  %v4679_v54 = vpop.permute.xlu0 %4678  ;;  %v1409_v44 = vrot.slane %v15801_v4, %v19402_v20 }
 0x249   : > { %v4703_v56 = vsel %vm2781_vm15, %v4679_v54, %v15763_v23  ;;  %v4704_v25 = vsel %vm2781_vm15, %v4677_v0, %v4679_v54  ;;  %v15789_v6 = vpop.permute.xlu1 %1109  ;;  %v4987_v24 = vld [vmem:[#allocation3 + $0x310] sm:$0xff] }
 0x24a   : > { %4882 = vst [vmem:[#allocation3 + $0x350] sm:$0x33] %v13027_v58  ;;  %v4806_v29 = vmul.f32 %v4747_v17, %v4704_v25  ;;  %v4807_v57 = vmul.f32 %v4751_v40, %v4703_v56  ;;  %4226 = vrot.lane.b32.xlu0 %v15547_v39, %s13646_s17  ;;  %v1190_v56 = vrot.slane %v15795_v53, %v19405_v5  ;;  %v19406_v25 = vld [vmem:[#allocation21_spill] sm:$0xff] }
 0x24b   : > { %4684 = vrot.lane.b32.xlu1 %v15574_v45, %s19382_s1  ;;  %v19403_v45 = vld [vmem:[#allocation20_spill] sm:$0xff]  ;;  %v1194_v55 = vrot.slane %v15795_v53, %v19406_v25  ;;  %v1421_v34 = vrot.slane %v15801_v4, %v19406_v25 }
 0x24c   : > { %v13028_v0 = vpack.c.bf16 %v4807_v57, %v4806_v29  ;;  %v1104_v3 = vpop.permute.xlu0 %1103  ;;  %v1186_v18 = vrot.slane %v15795_v53, %v19403_v45  ;;  %v1413_v17 = vrot.slane %v15801_v4, %v19403_v45 }
 0x24d   : > { %v1334_v13 = vpop.permute.xlu1 %1333  ;;  %v1128_v22 = vsel %vm1121_vm1, %v1104_v3, %v1106_v52  ;;  %v1129_v9 = vsel %vm1121_vm1, %v19404_v19, %v1104_v3  ;;  %v4988_v38 = vld [vmem:[#allocation3 + $0x318] sm:$0xff] }
 0x24e   : > { %4883 = vst [vmem:[#allocation3 + $0x358] sm:$0x33] %v13028_v0  ;;  %4230 = vrot.lane.b32.xlu0 %v15560_v47, %s13646_s17  ;;  %v1235_v54 = vmul.f32 %v1182_v48, %v1129_v9  ;;  %v1236_v30 = vmul.f32 %v1186_v18, %v1128_v22 }
 0x24f   : > { %4688 = vrot.lane.b32.xlu1 %v15684_v2, %s19382_s1 }
 0x250   : > { %v1108_v35 = vpop.permute.xlu0 %1107 }
 0x251   : > { %v4995_v7 = vld [vmem:[#allocation3 + $0x350] sm:$0x77]  ;;  %v15818_v37 = vpop.permute.xlu1 %1337  ;;  %v1126_v16 = vsel %vm1121_vm1, %v1108_v35, %v15789_v6  ;;  %v1127_v0 = vsel %vm1121_vm1, %v1106_v52, %v1108_v35 }
 0x252   : > { %4682 = vrot.lane.b32.xlu0 %v15547_v39, %s19382_s1  ;;  %v12479_v40 = vcombine.low %v4987_v24, %v4995_v7  ;;  %v12480_v58 = vcombine.high %v4987_v24, %v4995_v7  ;;  %v1237_v35 = vmul.f32 %v1190_v56, %v1127_v0  ;;  %v1238_v24 = vmul.f32 %v1194_v55, %v1126_v16  ;;  %v15867_v56 = vld [vmem:[#allocation2 + $0x70] sm:$0xff] }
 0x253   : > { %1113 = vrot.lane.b32.xlu1 %v15816_v62, %s19384_s11  ;;  %v1824_v16 = vld [vmem:[#allocation11 + $0x43] ss:$8 sm:$0xf0] }
 0x254   : > { %v1332_v39 = vpop.permute.xlu0 %1331  ;;  %v5569_v29 = vand.u32 %v12480_v58, %v15313_v32  ;;  %v5566_v57 = vand.u32 %v12479_v40, %v15313_v32  ;;  %v1596_v40 = vld [vmem:[#allocation11 + $0x42] ss:$8 sm:$0xf] }
 0x255   : > { %v1354_v3 = vsel %vm1347_vm2, %v1332_v39, %v1334_v13  ;;  %v1355_v46 = vsel %vm1347_vm2, %v15304_v63, %v1332_v39  ;;  %v4996_v48 = vld [vmem:[#allocation3 + $0x358] sm:$0x77]  ;;  %v15848_v18 = vpop.permute.xlu1 %1560 }
 0x256   : > { %v1462_v22 = vmul.f32 %v1409_v44, %v1355_v46  ;;  %v1463_v19 = vmul.f32 %v1413_v17, %v1354_v3  ;;  %4686 = vrot.lane.b32.xlu0 %v15560_v47, %s19382_s1  ;;  %5695 = vmatprep.subr.bf16.mxu0 %v5569_v29  ;;  %v12481_v9 = vcombine.low %v4988_v38, %v4996_v48  ;;  %v1597_v58 = vld [vmem:[#allocation11 + $0x42] ss:$8 sm:$0xf0] }
 0x257   : > { %5696 = vmatpush1.bf16.msra.mxu0 %v5566_v57  ;;  %v12482_v52 = vcombine.high %v4988_v38, %v4996_v48  ;;  %1339 = vrot.lane.b32.xlu1 %v15470_v14, %s13642_s30  ;;  %v15871_v3 = vor.u32 %v1597_v58, %v1596_v40 }
 0x258   : > { %v1336_v7 = vpop.permute.xlu0 %1335  ;;  %v5572_v63 = vand.u32 %v12481_v9, %v15313_v32  ;;  %v13325_v55 = vpack.c.bf16 %v1463_v19, %v1236_v30  ;;  %v13326_v0 = vpack.c.bf16 %v1462_v22, %v1235_v54 }
 0x259   : > { %v1352_v44 = vsel %vm1347_vm2, %v1336_v7, %v15818_v37  ;;  %v1353_v17 = vsel %vm1347_vm2, %v1334_v13, %v1336_v7  ;;  %v5575_v47 = vand.u32 %v12482_v52, %v15313_v32  ;;  %v15861_v39 = vpop.permute.xlu1 %1564  ;;  %v1823_v13 = vld [vmem:[#allocation11 + $0x43] ss:$8 sm:$0xf]  ;;  %v1636_v54 = vrot.slane %v15871_v3, %v19402_v20 }
 0x25a   : > { %v1464_v29 = vmul.f32 %v1417_v1, %v1353_v17  ;;  %v1465_v57 = vmul.f32 %v1421_v34, %v1352_v44  ;;  %1111 = vrot.lane.b32.xlu0 %v15470_v14, %s19384_s11  ;;  %12493 = vmatmul.mubr.msk.bf16.vlgmr.msra.gmra.mrb[4].mxu0 %vm5545_vm7, %v15370_v59  ;;  %v15876_v30 = vor.u32 %v1824_v16, %v1823_v13 }
 0x25b   : > { %5736 = vmatprep.subr.bf16.mxu1 %v5575_v47  ;;  %1343 = vrot.lane.b32.xlu1 %v15867_v56, %s13642_s30  ;;  %v1640_v48 = vrot.slane %v15871_v3, %v19403_v45  ;;  %v1648_v17 = vrot.slane %v15871_v3, %v19406_v25 }
 0x25c   : > { %5737 = vmatpush1.bf16.msra.mxu1 %v5572_v63  ;;  %v1559_v1 = vpop.permute.xlu0 %1558  ;;  %5765 = vmatprep.subr.bf16.mxu0 %v13325_v55  ;;  %v13327_v46 = vpack.c.bf16 %v1465_v57, %v1238_v24  ;;  %v13328_v38 = vpack.c.bf16 %v1464_v29, %v1237_v35  ;;  %v2123_v35 = vld [vmem:[#allocation11 + $0x44] ss:$8 sm:$0xf0]  ;;  %v1863_v24 = vrot.slane %v15876_v30, %v19402_v20 }
 0x25d   : > { %v1788_v34 = vpop.permute.xlu1 %1787  ;;  %5766 = vmatpush1.bf16.msra.mxu0 %v13326_v0  ;;  %5797 = vmatprep.mubr.bf16.mxu0 %v19396_v15  ;;  %v1581_v19 = vsel %vm1574_vm3, %v1559_v1, %v15848_v18  ;;  %v1582_v9 = vsel %vm1574_vm3, %v15358_v61, %v1559_v1  ;;  %v1867_v7 = vrot.slane %v15876_v30, %v19403_v45 }
 0x25e   : > { %1115 = vrot.lane.b32.xlu0 %v15867_v56, %s19384_s11  ;;  %5806 = vmatprep.subr.bf16.mxu1 %v13327_v46  ;;  %v1644_v63 = vrot.slane %v15871_v3, %v19405_v5  ;;  %v1689_v61 = vmul.f32 %v1636_v54, %v1582_v9  ;;  %v1690_v44 = vmul.f32 %v1640_v48, %v1581_v19 }
 0x25f   : > { %1568 = vrot.lane.b32.xlu1 %v15816_v62, %s19351_s2  ;;  %12494 = vmatmul.mubr.msk.bf16.vlgmr.msra.gmra.mrb[4].mxu1 %vm5545_vm7, %v15370_v59  ;;  %v2122_v59 = vld [vmem:[#allocation11 + $0x44] ss:$8 sm:$0xf]  ;;  %v1871_v1 = vrot.slane %v15876_v30, %v19405_v5  ;;  %v1875_v46 = vrot.slane %v15876_v30, %v19406_v25 }
 0x260   : > { %v1563_v22 = vpop.permute.xlu0 %1562  ;;  %5807 = vmatpush1.bf16.msra.mxu1 %v13328_v38  ;;  %5838 = vmatprep.mubr.bf16.mxu1 %v19396_v15  ;;  %v15907_v40 = vor.u32 %v2123_v35, %v2122_v59 }
 0x261   : > { %v15892_v52 = vpop.permute.xlu1 %1791  ;;  %v1579_v58 = vsel %vm1574_vm3, %v1563_v22, %v15861_v39  ;;  %v1580_v29 = vsel %vm1574_vm3, %v15848_v18, %v1563_v22 }
 0x262   : > { %1341 = vrot.lane.b32.xlu0 %v15816_v62, %s13642_s30  ;;  %v1691_v18 = vmul.f32 %v1644_v63, %v1580_v29  ;;  %v1692_v38 = vmul.f32 %v1648_v17, %v1579_v58  ;;  %v2166_v22 = vrot.slane %v15907_v40, %v19403_v45  ;;  %v13282_v58 = vld [vmem:[#allocation2 + $0x48] sm:$0xff] }
 0x263   : > { %1793 = vrot.lane.b32.xlu1 %v15470_v14, %s13644_s10 }
 0x264   : > { %v1786_v47 = vpop.permute.xlu0 %1785 }
 0x265   : > { %v1808_v57 = vsel %vm1801_vm4, %v1786_v47, %v1788_v34  ;;  %v1809_v55 = vsel %vm1801_vm4, %v15392_v43, %v1786_v47  ;;  %v2089_v13 = vpop.permute.xlu1 %2088  ;;  %v2174_v47 = vrot.slane %v15907_v40, %v19406_v25 }
 0x266   : > { %v1916_v16 = vmul.f32 %v1863_v24, %v1809_v55  ;;  %v1917_v0 = vmul.f32 %v1867_v7, %v1808_v57  ;;  %1566 = vrot.lane.b32.xlu0 %v15470_v14, %s19351_s2  ;;  %v2162_v14 = vrot.slane %v15907_v40, %v19402_v20 }
 0x267   : > { %1797 = vrot.lane.b32.xlu1 %v15867_v56, %s13644_s10 }
 0x268   : > { %v1790_v54 = vpop.permute.xlu0 %1789  ;;  %v13329_v35 = vpack.c.bf16 %v1917_v0, %v1690_v44  ;;  %v13330_v24 = vpack.c.bf16 %v1916_v16, %v1689_v61  ;;  %v13281_v61 = vld [vmem:[#allocation2 + $0x40] sm:$0xff] }
 0x269   : > { %v1806_v43 = vsel %vm1801_vm4, %v1790_v54, %v15892_v52  ;;  %v1807_v48 = vsel %vm1801_vm4, %v1788_v34, %v1790_v54  ;;  %v15937_v19 = vpop.permute.xlu1 %2092  ;;  %v2170_v34 = vrot.slane %v15907_v40, %v19405_v5  ;;  %v2350_v54 = vld [vmem:[#allocation11 + $0x45] ss:$8 sm:$0xf0] }
 0x26a   : > { %v1918_v9 = vmul.f32 %v1871_v1, %v1807_v48  ;;  %v1919_v59 = vmul.f32 %v1875_v46, %v1806_v43  ;;  %1570 = vrot.lane.b32.xlu0 %v15867_v56, %s19351_s2  ;;  %5767 = vmatprep.subr.bf16.mxu0 %v13329_v35  ;;  %v2349_v46 = vld [vmem:[#allocation11 + $0x45] ss:$8 sm:$0xf]  ;;  %v2577_v35 = vld [vmem:[#allocation11 + $0x46] ss:$8 sm:$0xf0] }
 0x26b   : > { %2096 = vrot.lane.b32.xlu1 %v15867_v56, %s13645_s15  ;;  %5768 = vmatpush1.bf16.msra.mxu0 %v13330_v24  ;;  %v13283_v48 = vld [vmem:[#allocation2 + $0x58] sm:$0xff]  ;;  %v15969_v24 = vor.u32 %v2350_v54, %v2349_v46 }
 0x26c   : > { %v2087_v7 = vpop.permute.xlu0 %2086  ;;  %v13331_v55 = vpack.c.bf16 %v1919_v59, %v1692_v38  ;;  %v13332_v16 = vpack.c.bf16 %v1918_v9, %v1691_v18  ;;  %v13284_v38 = vld [vmem:[#allocation2 + $0x50] sm:$0xff]  ;;  %v15965_v59 = vld [vmem:[#allocation2 + $0x78] sm:$0xff] }
 0x26d   : > { %v2106_v63 = vsel %vm2100_vm12, %v2087_v7, %v2089_v13  ;;  %v2107_v17 = vsel %vm2100_vm12, %v15431_v28, %v2087_v7  ;;  %v2316_v44 = vpop.permute.xlu1 %2315  ;;  %v2397_v54 = vrot.slane %v15969_v24, %v19405_v5 }
 0x26e   : > { %v2215_v29 = vmul.f32 %v2162_v14, %v2107_v17  ;;  %v2216_v57 = vmul.f32 %v2166_v22, %v2106_v63  ;;  %1795 = vrot.lane.b32.xlu0 %v15816_v62, %s13644_s10  ;;  %5808 = vmatprep.subr.bf16.mxu1 %v13331_v55 }
 0x26f   : > { %2321 = vrot.lane.b32.xlu1 %v15816_v62, %s13646_s17  ;;  %5809 = vmatpush1.bf16.msra.mxu1 %v13332_v16 }
 0x270   : > { %v2091_v0 = vpop.permute.xlu0 %2090  ;;  %v13333_v22 = vpack.c.bf16 %v2216_v57, %v13282_v58  ;;  %v13334_v9 = vpack.c.bf16 %v2215_v29, %v13281_v61  ;;  %v2389_v61 = vrot.slane %v15969_v24, %v19402_v20  ;;  %v2393_v58 = vrot.slane %v15969_v24, %v19403_v45 }
 0x271   : > { %v2104_v28 = vsel %vm2100_vm12, %v2091_v0, %v15937_v19  ;;  %v2105_v1 = vsel %vm2100_vm12, %v2089_v13, %v2091_v0  ;;  %v15961_v43 = vpop.permute.xlu1 %2319  ;;  %v2576_v13 = vld [vmem:[#allocation11 + $0x46] ss:$8 sm:$0xf]  ;;  %v3267_v0 = vld [vmem:[#allocation11 + $0x41] ss:$8 sm:$0xf] }
 0x272   : > { %v2217_v18 = vmul.f32 %v2170_v34, %v2105_v1  ;;  %v2218_v14 = vmul.f32 %v2174_v47, %v2104_v28  ;;  %2094 = vrot.lane.b32.xlu0 %v15816_v62, %s13645_s15  ;;  %5769 = vmatprep.subr.bf16.mxu0 %v13333_v22  ;;  %v15973_v34 = vor.u32 %v2577_v35, %v2576_v13  ;;  %v3268_v28 = vld [vmem:[#allocation11 + $0x41] ss:$8 sm:$0xf0] }
 0x273   : > { %2325 = vrot.lane.b32.xlu1 %v15965_v59, %s13646_s17  ;;  %5770 = vmatpush1.bf16.msra.mxu0 %v13334_v9  ;;  %v16002_v22 = vld [vmem:[#allocation2 + $0xf0] sm:$0xf] }
 0x274   : > { %v2314_v7 = vpop.permute.xlu0 %2313  ;;  %v13335_v17 = vpack.c.bf16 %v2218_v14, %v13283_v48  ;;  %v13336_v47 = vpack.c.bf16 %v2217_v18, %v13284_v38  ;;  %v2616_v1 = vrot.slane %v15973_v34, %v19402_v20  ;;  %v2620_v46 = vrot.slane %v15973_v34, %v19403_v45 }
 0x275   : > { %v2543_v63 = vpop.permute.xlu1 %2542  ;;  %v2333_v57 = vsel %vm2327_vm13, %v2314_v7, %v2316_v44  ;;  %v2334_v55 = vsel %vm2327_vm13, %v15459_v27, %v2314_v7  ;;  %v2401_v38 = vrot.slane %v15969_v24, %v19406_v25  ;;  %v16000_v14 = vor.u32 %v3268_v28, %v3267_v0 }
 0x276   : > { %2098 = vrot.lane.b32.xlu0 %v15965_v59, %s13645_s15  ;;  %5810 = vmatprep.subr.bf16.mxu1 %v13335_v17  ;;  %v2442_v27 = vmul.f32 %v2389_v61, %v2334_v55  ;;  %v2443_v48 = vmul.f32 %v2393_v58, %v2333_v57  ;;  %v2624_v58 = vrot.slane %v15973_v34, %v19405_v5 }
 0x277   : > { %2550 = vrot.lane.b32.xlu1 %v15867_v56, %s13647_s18  ;;  %5811 = vmatpush1.bf16.msra.mxu1 %v13336_v47  ;;  %19407 = vst [vmem:[#allocation35_spill] sm:$0xff] %v16000_v14  ;;  %v2628_v57 = vrot.slane %v15973_v34, %v19406_v25  ;;  %v3307_v28 = vrot.slane %v16000_v14, %v19402_v20 }
 0x278   : > { %v2318_v29 = vpop.permute.xlu0 %2317 }
 0x279   : > { %v15986_v16 = vpop.permute.xlu1 %2546  ;;  %v2331_v9 = vsel %vm2327_vm13, %v2318_v29, %v15961_v43  ;;  %v2332_v13 = vsel %vm2327_vm13, %v2316_v44, %v2318_v29 }
 0x27a   : > { %2323 = vrot.lane.b32.xlu0 %v15867_v56, %s13646_s17  ;;  %v2444_v44 = vmul.f32 %v2397_v54, %v2332_v13  ;;  %v2445_v29 = vmul.f32 %v2401_v38, %v2331_v9  ;;  %v16035_v9 = vld [vmem:[#allocation2 + $0xe8] sm:$0xf] }
 0x27b   : > { %3240 = vrot.lane.b32.xlu1 %v15684_v2, %s13642_s30 }
 0x27c   : > { %v2541_v18 = vpop.permute.xlu0 %2540 }
 0x27d   : > { %v2560_v35 = vsel %vm2554_vm14, %v2541_v18, %v2543_v63  ;;  %v2561_v7 = vsel %vm2554_vm14, %v15480_v36, %v2541_v18  ;;  %v3235_v17 = vpop.permute.xlu1 %3234 }
 0x27e   : > { %v2669_v47 = vmul.f32 %v2616_v1, %v2561_v7  ;;  %v2670_v61 = vmul.f32 %v2620_v46, %v2560_v35  ;;  %2548 = vrot.lane.b32.xlu0 %v15816_v62, %s13647_s18  ;;  %v3311_v1 = vrot.slane %v16000_v14, %v19403_v45 }
 0x27f   : > { %3244 = vrot.lane.b32.xlu1 %v16002_v22, %s13642_s30 }
 0x280   : > { %v2545_v55 = vpop.permute.xlu0 %2544  ;;  %v13337_v54 = vpack.c.bf16 %v2670_v61, %v2443_v48  ;;  %v13338_v38 = vpack.c.bf16 %v2669_v47, %v2442_v27  ;;  %v3319_v27 = vrot.slane %v16000_v14, %v19406_v25 }
 0x281   : > { %v2558_v36 = vsel %vm2554_vm14, %v2545_v55, %v15986_v16  ;;  %v2559_v0 = vsel %vm2554_vm14, %v2543_v63, %v2545_v55  ;;  %v16031_v46 = vpop.permute.xlu1 %3238 }
 0x282   : > { %19408 = vst [vmem:[#allocation34_spill] sm:$0xff] %v16031_v46  ;;  %v2671_v18 = vmul.f32 %v2624_v58, %v2559_v0  ;;  %v2672_v35 = vmul.f32 %v2628_v57, %v2558_v36  ;;  %2552 = vrot.lane.b32.xlu0 %v15965_v59, %s13647_s18  ;;  %5771 = vmatprep.subr.bf16.mxu0 %v13337_v54 }
 0x283   : > { %2777 = vrot.lane.b32.xlu1 %v15867_v56, %s19382_s1  ;;  %v3315_v58 = vrot.slane %v16000_v14, %v19405_v5  ;;  %5772 = vmatpush1.bf16.msra.mxu0 %v13338_v38 }
 0x284   : > { %v3233_v63 = vpop.permute.xlu0 %3232  ;;  %v13339_v61 = vpack.c.bf16 %v2672_v35, %v2445_v29  ;;  %v13340_v57 = vpack.c.bf16 %v2671_v18, %v2444_v44  ;;  %v3043_v44 = vld [vmem:[#allocation11 + $0x40] ss:$8 sm:$0xf] }
 0x285   : > { %v3254_v13 = vsel %vm1347_vm2, %v3233_v63, %v3235_v17  ;;  %v3255_v7 = vsel %vm1347_vm2, %v15517_v10, %v3233_v63  ;;  %v16048_v48 = vpop.permute.xlu1 %2769  ;;  %v3044_v18 = vld [vmem:[#allocation11 + $0x40] ss:$8 sm:$0xf0] }
 0x286   : > { %v3360_v47 = vmul.f32 %v3307_v28, %v3255_v7  ;;  %v3361_v56 = vmul.f32 %v3311_v1, %v3254_v13  ;;  %3242 = vrot.lane.b32.xlu0 %v16035_v9, %s13642_s30  ;;  %5812 = vmatprep.subr.bf16.mxu1 %v13339_v61  ;;  %v2804_v7 = vld [vmem:[#allocation11 + $0x47] ss:$8 sm:$0xf0] }
 0x287   : > { %3016 = vrot.lane.b32.xlu1 %v15684_v2, %s19384_s11  ;;  %5813 = vmatpush1.bf16.msra.mxu1 %v13340_v57  ;;  %v3723_v57 = vld [vmem:[#allocation11 + $0x43] ss:$8 sm:$0xf] }
 0x288   : > { %v12973_v10 = vpack.c.bf16 %v3361_v56, %v3360_v47  ;;  %v3237_v55 = vpop.permute.xlu0 %3236 }
 0x289   : > { %v3252_v36 = vsel %vm1347_vm2, %v3237_v55, %v16031_v46  ;;  %v3253_v0 = vsel %vm1347_vm2, %v3235_v17, %v3237_v55  ;;  %v16059_v28 = vpop.permute.xlu1 %2773  ;;  %v16067_v17 = vor.u32 %v3044_v18, %v3043_v44 }
 0x28a   : > { %v3428_v1 = vrot.slane %v12973_v10, 6  ;;  %v3362_v54 = vmul.f32 %v3315_v58, %v3253_v0  ;;  %v3363_v29 = vmul.f32 %v3319_v27, %v3252_v36  ;;  %2775 = vrot.lane.b32.xlu0 %v15816_v62, %s19382_s1  ;;  %v2803_v62 = vld [vmem:[#allocation11 + $0x47] ss:$8 sm:$0xf] }
 0x28b   : > { %3020 = vrot.lane.b32.xlu1 %v16002_v22, %s19384_s11  ;;  %19409 = vst [vmem:[#allocation40_spill] sm:$0xff] %v16067_v17  ;;  %v3083_v47 = vrot.slane %v16067_v17, %v19402_v20  ;;  %v3087_v56 = vrot.slane %v16067_v17, %v19403_v45  ;;  %v16079_v61 = vor.u32 %v2804_v7, %v2803_v62  ;;  %v3724_v10 = vld [vmem:[#allocation11 + $0x43] ss:$8 sm:$0xf0] }
 0x28c   : > { %3444 = vst [vmem:[#allocation3 + $0x260] sm:$0xcc] %v3428_v1  ;;  %v12974_v35 = vpack.c.bf16 %v3363_v29, %v3362_v54  ;;  %v2768_v38 = vpop.permute.xlu0 %2767  ;;  %v3091_v1 = vrot.slane %v16067_v17, %v19405_v5  ;;  %v3095_v18 = vrot.slane %v16067_v17, %v19406_v25  ;;  %v16098_v62 = vld [vmem:[#allocation2 + $0xf8] sm:$0xf] }
 0x28d   : > { %v3011_v63 = vpop.permute.xlu1 %3010  ;;  %19410 = vst [vmem:[#allocation43_spill] sm:$0xff] %v16079_v61  ;;  %v4028_v17 = vld [vmem:[#allocation11 + $0x44] ss:$8 sm:$0xf0] }
 0x28e   : > { %v3429_v13 = vrot.slane %v12974_v35, 6  ;;  %2779 = vrot.lane.b32.xlu0 %v15965_v59, %s19382_s1  ;;  %v16094_v35 = vor.u32 %v3724_v10, %v3723_v57  ;;  %v13000_v57 = vpack.c.bf16 %v16098_v62, %v16002_v22  ;;  %v2787_v10 = vsel %vm2781_vm15, %v2768_v38, %v16048_v48 }
 0x28f   : > { %3698 = vrot.lane.b32.xlu1 %v16035_v9, %s13644_s10 }
 0x290   : > { %3445 = vst [vmem:[#allocation3 + $0x268] sm:$0xcc] %v3429_v13  ;;  %v2772_v58 = vpop.permute.xlu0 %2771  ;;  %v2843_v13 = vrot.slane %v16079_v61, %v19402_v20  ;;  %3975 = vst [vmem:[#allocation3 + $0x2f8] sm:$0x33] %v13000_v57 }
 0x291   : > { %v16071_v27 = vpop.permute.xlu1 %3014  ;;  %v2786_v57 = vsel %vm2781_vm15, %v16048_v48, %v2772_v58  ;;  %v3775_v48 = vrot.slane %v16094_v35, %v19406_v25 }
 0x292   : > { %3018 = vrot.lane.b32.xlu0 %v16035_v9, %s19384_s11 }
 0x293   : > { %4002 = vrot.lane.b32.xlu1 %v16035_v9, %s13645_s15 }
 0x294   : > { %v3009_v55 = vpop.permute.xlu0 %3008 }
 0x295   : > { %v3030_v36 = vsel %vm1121_vm1, %v3009_v55, %v3011_v63  ;;  %v3031_v0 = vsel %vm1121_vm1, %v15566_v31, %v3009_v55  ;;  %v3691_v54 = vpop.permute.xlu1 %3690  ;;  %v2847_v31 = vrot.slane %v16079_v61, %v19403_v45  ;;  %v2788_v55 = vsel %vm2781_vm15, %v15554_v42, %v2768_v38 }
 0x296   : > { %v3136_v29 = vmul.f32 %v3083_v47, %v3031_v0  ;;  %v3137_v44 = vmul.f32 %v3087_v56, %v3030_v36  ;;  %3696 = vrot.lane.b32.xlu0 %v15684_v2, %s13644_s10  ;;  %v12999_v56 = vpack.c.bf16 %v16035_v9, %v15684_v2  ;;  %v3763_v42 = vrot.slane %v16094_v35, %v19402_v20 }
 0x297   : > { %4006 = vrot.lane.b32.xlu1 %v16098_v62, %s13645_s15  ;;  %v3767_v38 = vrot.slane %v16094_v35, %v19403_v45 }
 0x298   : > { %v12965_v7 = vpack.c.bf16 %v3137_v44, %v3136_v29  ;;  %v3013_v47 = vpop.permute.xlu0 %3012  ;;  %v4027_v44 = vld [vmem:[#allocation11 + $0x44] ss:$8 sm:$0xf]  ;;  %3974 = vst [vmem:[#allocation3 + $0x2f0] sm:$0x33] %v12999_v56  ;;  %v2785_v56 = vsel %vm2781_vm15, %v2772_v58, %v16059_v28 }
 0x299   : > { %v3028_v36 = vsel %vm1121_vm1, %v3013_v47, %v16071_v27  ;;  %v3029_v0 = vsel %vm1121_vm1, %v3011_v63, %v3013_v47  ;;  %v16119_v29 = vpop.permute.xlu1 %3694  ;;  %v2851_v63 = vrot.slane %v16079_v61, %v19405_v5  ;;  %v2855_v47 = vrot.slane %v16079_v61, %v19406_v25 }
 0x29a   : > { %19411 = vst [vmem:[#allocation27_spill] sm:$0xff] %v16119_v29  ;;  %3212 = vst [vmem:[#allocation3 + $0x260] sm:$0x33] %v12965_v7  ;;  %v3138_v46 = vmul.f32 %v3091_v1, %v3029_v0  ;;  %v3139_v14 = vmul.f32 %v3095_v18, %v3028_v36  ;;  %3700 = vrot.lane.b32.xlu0 %v16002_v22, %s13644_s10  ;;  %v2896_v1 = vmul.f32 %v2843_v13, %v2788_v55 }
 0x29b   : > { %3474 = vrot.lane.b32.xlu1 %v16035_v9, %s19351_s2  ;;  %v2897_v18 = vmul.f32 %v2847_v31, %v2787_v10  ;;  %v16133_v0 = vor.u32 %v4028_v17, %v4027_v44  ;;  %v3771_v17 = vrot.slane %v16094_v35, %v19405_v5  ;;  %v2898_v10 = vmul.f32 %v2851_v63, %v2786_v57  ;;  %v3499_v63 = vld [vmem:[#allocation11 + $0x42] ss:$8 sm:$0xf] }
 0x29c   : > { %v12966_v7 = vpack.c.bf16 %v3139_v14, %v3138_v46  ;;  %v3689_v36 = vpop.permute.xlu0 %3688  ;;  %v2899_v55 = vmul.f32 %v2855_v47, %v2785_v56  ;;  %v3500_v57 = vld [vmem:[#allocation11 + $0x42] ss:$8 sm:$0xf0] }
 0x29d   : > { %v3710_v61 = vsel %vm1801_vm4, %v3689_v36, %v3691_v54  ;;  %v3711_v13 = vsel %vm1801_vm4, %v15606_v33, %v3689_v36  ;;  %v3997_v31 = vpop.permute.xlu1 %3996  ;;  %v12957_v58 = vpack.c.bf16 %v2897_v18, %v2896_v1 }
 0x29e   : > { %3213 = vst [vmem:[#allocation3 + $0x268] sm:$0x33] %v12966_v7  ;;  %v3816_v14 = vmul.f32 %v3763_v42, %v3711_v13  ;;  %v3817_v46 = vmul.f32 %v3767_v38, %v3710_v61  ;;  %4004 = vrot.lane.b32.xlu0 %v16002_v22, %s13645_s15  ;;  %v4067_v38 = vrot.slane %v16133_v0, %v19402_v20 }
 0x29f   : > { %4458 = vrot.lane.b32.xlu1 %v16035_v9, %s13647_s18  ;;  %v4071_v7 = vrot.slane %v16133_v0, %v19403_v45 }
 0x2a0   : > { %v12989_v33 = vpack.c.bf16 %v3817_v46, %v3816_v14  ;;  %v3693_v44 = vpop.permute.xlu0 %3692 }
 0x2a1   : > { %v3708_v61 = vsel %vm1801_vm4, %v3693_v44, %v16119_v29  ;;  %v3709_v42 = vsel %vm1801_vm4, %v3691_v54, %v3693_v44  ;;  %v4965_v36 = vld [vmem:[#allocation3 + $0x260] sm:$0xff]  ;;  %v16163_v13 = vpop.permute.xlu1 %4000  ;;  %v12958_v54 = vpack.c.bf16 %v2899_v55, %v2898_v10  ;;  %v4075_v29 = vrot.slane %v16133_v0, %v19405_v5 }
 0x2a2   : > { %v3884_v47 = vrot.slane %v12989_v33, 6  ;;  %v3818_v1 = vmul.f32 %v3771_v17, %v3709_v42  ;;  %v3819_v18 = vmul.f32 %v3775_v48, %v3708_v61  ;;  %3472 = vrot.lane.b32.xlu0 %v15684_v2, %s19351_s2  ;;  %v12451_v56 = vcombine.low %v12957_v58, %v4965_v36 }
 0x2a3   : > { %v12452_v14 = vcombine.high %v12957_v58, %v4965_v36  ;;  %4462 = vrot.lane.b32.xlu1 %v16098_v62, %s13647_s18  ;;  %v4079_v58 = vrot.slane %v16133_v0, %v19406_v25  ;;  %v16178_v10 = vor.u32 %v3500_v57, %v3499_v63 }
 0x2a4   : > { %3900 = vst [vmem:[#allocation3 + $0x2a0] sm:$0xcc] %v3884_v47  ;;  %v12990_v46 = vpack.c.bf16 %v3819_v18, %v3818_v1  ;;  %v3995_v44 = vpop.permute.xlu0 %3994 }
 0x2a5   : > { %v4013_v17 = vsel %vm2100_vm12, %v3995_v44, %v3997_v31  ;;  %v4014_v2 = vsel %vm2100_vm12, %v15648_v8, %v3995_v44  ;;  %5773 = vmatprep.subr.bf16.mxu0 %v12452_v14  ;;  %v4966_v48 = vld [vmem:[#allocation3 + $0x268] sm:$0xff]  ;;  %v3467_v33 = vpop.permute.xlu1 %3466 }
 0x2a6   : > { %v3885_v55 = vrot.slane %v12990_v46, 6  ;;  %v4120_v61 = vmul.f32 %v4067_v38, %v4014_v2  ;;  %v4121_v42 = vmul.f32 %v4071_v7, %v4013_v17  ;;  %5774 = vmatpush1.bf16.msra.mxu0 %v12451_v56  ;;  %3476 = vrot.lane.b32.xlu0 %v16002_v22, %s19351_s2  ;;  %v12453_v36 = vcombine.low %v12958_v54, %v4966_v48  ;;  %v4483_v56 = vld [vmem:[#allocation11 + $0x46] ss:$8 sm:$0xf] }
 0x2a7   : > { %v12454_v47 = vcombine.high %v12958_v54, %v4966_v48  ;;  %4236 = vrot.lane.b32.xlu1 %v16002_v22, %s13646_s17  ;;  %v3539_v7 = vrot.slane %v16178_v10, %v19402_v20  ;;  %v3543_v46 = vrot.slane %v16178_v10, %v19403_v45  ;;  %v4484_v44 = vld [vmem:[#allocation11 + $0x46] ss:$8 sm:$0xf0]  ;;  %v3547_v48 = vrot.slane %v16178_v10, %v19405_v5 }
 0x2a8   : > { %3901 = vst [vmem:[#allocation3 + $0x2a8] sm:$0xcc] %v3885_v55  ;;  %v13005_v8 = vpack.c.bf16 %v4121_v42, %v4120_v61  ;;  %v3999_v1 = vpop.permute.xlu0 %3998  ;;  %v16206_v55 = vor.u32 %v4484_v44, %v4483_v56 }
 0x2a9   : > { %5814 = vmatprep.subr.bf16.mxu1 %v12454_v47  ;;  %v4011_v63 = vsel %vm2100_vm12, %v3999_v1, %v16163_v13  ;;  %v4012_v38 = vsel %vm2100_vm12, %v3997_v31, %v3999_v1  ;;  %v16191_v18 = vpop.permute.xlu1 %3470  ;;  %v3551_v47 = vrot.slane %v16178_v10, %v19406_v25  ;;  %v1068_v1 = vld [vmem:[#allocation3 + $0x378] sm:$0x44] }
 0x2aa   : > { %v4188_v57 = vrot.slane %v13005_v8, 6  ;;  %v4122_v14 = vmul.f32 %v4075_v29, %v4012_v38  ;;  %v4123_v54 = vmul.f32 %v4079_v58, %v4011_v63  ;;  %5815 = vmatpush1.bf16.msra.mxu1 %v12453_v36  ;;  %4460 = vrot.lane.b32.xlu0 %v16002_v22, %s13647_s18  ;;  %v1065_v8 = vld [vmem:[#allocation3 + $0x370] sm:$0x44]  ;;  %v1069_v38 = vsel %vm14617_vm11, 1065369472, %v1068_v1 }
 0x2ab   : > { %4690 = vrot.lane.b32.xlu1 %v16035_v9, %s19382_s1  ;;  %v1066_v63 = vsel %vm14617_vm11, 1065369472, %v1065_v8  ;;  %1070 = vst [vmem:[#allocation3 + $0x378] sm:$0x44] %v1069_v38 }
 0x2ac   : > { %4204 = vst [vmem:[#allocation3 + $0x2e0] sm:$0xcc] %v4188_v57  ;;  %v13006_v31 = vpack.c.bf16 %v4123_v54, %v4122_v14  ;;  %v3465_v17 = vpop.permute.xlu0 %3464  ;;  %1067 = vst [vmem:[#allocation3 + $0x370] sm:$0x44] %v1066_v63  ;;  %v4523_v54 = vrot.slane %v16206_v55, %v19402_v20  ;;  %v4531_v63 = vrot.slane %v16206_v55, %v19405_v5 }
 0x2ad   : > { %v3486_v2 = vsel %vm1574_vm3, %v3465_v17, %v3467_v33  ;;  %v3487_v29 = vsel %vm1574_vm3, %v15674_v60, %v3465_v17  ;;  %v4453_v58 = vpop.permute.xlu1 %4452 }
 0x2ae   : > { %v4189_v61 = vrot.slane %v13006_v31, 6  ;;  %v3592_v42 = vmul.f32 %v3539_v7, %v3487_v29  ;;  %v3593_v36 = vmul.f32 %v3543_v46, %v3486_v2  ;;  %4234 = vrot.lane.b32.xlu0 %v16035_v9, %s13646_s17  ;;  %v4527_v2 = vrot.slane %v16206_v55, %v19403_v45  ;;  %v4260_v29 = vld [vmem:[#allocation11 + $0x45] ss:$8 sm:$0xf0] }
 0x2af   : > { %4694 = vrot.lane.b32.xlu1 %v16098_v62, %s19382_s1  ;;  %v16214_v60 = vpop.f32.mrb[0].mxu0 }
 0x2b0   : > { %19412 = vst [vmem:[#allocation44_spill] sm:$0xff] %v16214_v60  ;;  %4205 = vst [vmem:[#allocation3 + $0x2e8] sm:$0xcc] %v4189_v61  ;;  %v12981_v7 = vpack.c.bf16 %v3593_v36, %v3592_v42  ;;  %v3469_v56 = vpop.permute.xlu0 %3468  ;;  %v5637_v9 = vpop.f32.mrb[1].mxu0 }
 0x2b1   : > { %v3484_v57 = vsel %vm1574_vm3, %v3469_v56, %v16191_v18  ;;  %v3485_v14 = vsel %vm1574_vm3, %v3467_v33, %v3469_v56  ;;  %v16227_v46 = vpop.permute.xlu1 %4456  ;;  %v5676_v44 = vpop.f32.mrb[0].mxu1  ;;  %v5946_v42 = vmul.f32 0.1, %v5637_v9  ;;  %vm5930_vm8 = vcmp.gt.f32.partialorder %v5637_v9, 0.0 }
 0x2b2   : > { %3668 = vst [vmem:[#allocation3 + $0x2a0] sm:$0x33] %v12981_v7  ;;  %v3594_v31 = vmul.f32 %v3547_v48, %v3485_v14  ;;  %v3595_v17 = vmul.f32 %v3551_v47, %v3484_v57  ;;  %4238 = vrot.lane.b32.xlu0 %v16098_v62, %s13646_s17  ;;  %vm5931_vm0 = vcmp.gt.f32.partialorder %v5676_v44, 0.0  ;;  %v5678_v61 = vpop.f32.mrb[1].mxu1  ;;  %v5639_v33 = vpop.f32.mrb[2].mxu0  ;;  %v16240_v7 = vor.u32 %v4260_v29, %v4259_v11 }
 0x2b3   : > { %v5947_v36 = vmul.f32 0.1, %v5676_v44  ;;  %v5640_v48 = vpop.f32.mrb[3].mxu0  ;;  %v5680_v57 = vpop.f32.mrb[2].mxu1  ;;  %v5948_v11 = vmul.f32 0.1, %v5678_v61 }
 0x2b4   : > { %v12982_v8 = vpack.c.bf16 %v3595_v17, %v3594_v31  ;;  %v4451_v1 = vpop.permute.xlu0 %4450  ;;  %v4535_v17 = vrot.slane %v16206_v55, %v19406_v25  ;;  %v5681_v33 = vpop.f32.mrb[3].mxu1  ;;  %vm5932_vm9 = vcmp.gt.f32.partialorder %v5678_v61, 0.0 }
 0x2b5   : > { %v4469_v47 = vsel %vm2554_vm14, %v4451_v1, %v4453_v58  ;;  %v4470_v62 = vsel %vm2554_vm14, %v15706_v41, %v4451_v1  ;;  %v4229_v38 = vpop.permute.xlu1 %4228  ;;  %v16242_v56 = vsel %vm5931_vm0, %v5676_v44, %v5947_v36  ;;  %v16250_v41 = vsel %vm5930_vm8, %v5637_v9, %v5946_v42  ;;  %v4981_v9 = vld [vmem:[#allocation3 + $0x2e0] sm:$0xff] }
 0x2b6   : > { %3669 = vst [vmem:[#allocation3 + $0x2a8] sm:$0x33] %v12982_v8  ;;  %v4576_v14 = vmul.f32 %v4523_v54, %v4470_v62  ;;  %v4577_v31 = vmul.f32 %v4527_v2, %v4469_v47  ;;  %4692 = vrot.lane.b32.xlu0 %v16002_v22, %s19382_s1  ;;  %6013 = vrot.lane.b32.xlu1 %v16242_v56, %s19384_s11  ;;  %19413 = vst [vmem:[#allocation49_spill] sm:$0xff] %v16250_v41  ;;  %v4715_v1 = vld [vmem:[#allocation11 + $0x47] ss:$8 sm:$0xf] }
 0x2b7   : > { %v4299_v2 = vrot.slane %v16240_v7, %v19402_v20  ;;  %v4303_v36 = vrot.slane %v16240_v7, %v19403_v45 }
 0x2b8   : > { %v13021_v29 = vpack.c.bf16 %v4577_v31, %v4576_v14  ;;  %v4455_v44 = vpop.permute.xlu0 %4454  ;;  %v4716_v14 = vld [vmem:[#allocation11 + $0x47] ss:$8 sm:$0xf0]  ;;  %v16268_v31 = vsel %vm5932_vm9, %v5678_v61, %v5948_v11  ;;  %v4311_v61 = vrot.slane %v16240_v7, %v19406_v25 }
 0x2b9   : > { %v4467_v54 = vsel %vm2554_vm14, %v4455_v44, %v16227_v46  ;;  %v4468_v22 = vsel %vm2554_vm14, %v4453_v58, %v4455_v44  ;;  %v4973_v8 = vld [vmem:[#allocation3 + $0x2a0] sm:$0xff]  ;;  %v16261_v42 = vpop.permute.xlu1 %4232  ;;  %19414 = vst [vmem:[#allocation50_spill] sm:$0xff] %v16268_v31 }
 0x2ba   : > { %v4644_v48 = vrot.slane %v13021_v29, 6  ;;  %v4578_v47 = vmul.f32 %v4531_v63, %v4468_v22  ;;  %v4579_v62 = vmul.f32 %v4535_v17, %v4467_v54  ;;  %v12467_v57 = vcombine.low %v4973_v8, %v4981_v9  ;;  %6011 = vrot.lane.b32.xlu0 %v16250_v41, %s19384_s11  ;;  %6235 = vrot.lane.b32.xlu1 %v16250_v41, %s13642_s30  ;;  %v4982_v22 = vld [vmem:[#allocation3 + $0x2e8] sm:$0xff] }
 0x2bb   : > { %v12468_v58 = vcombine.high %v4973_v8, %v4981_v9  ;;  %v4307_v29 = vrot.slane %v16240_v7, %v19405_v5  ;;  %v16279_v8 = vor.u32 %v4716_v14, %v4715_v1 }
 0x2bc   : > { %4660 = vst [vmem:[#allocation3 + $0x320] sm:$0xcc] %v4644_v48  ;;  %v13022_v33 = vpack.c.bf16 %v4579_v62, %v4578_v47  ;;  %v4227_v44 = vpop.permute.xlu0 %4226 }
 0x2bd   : > { %v4245_v63 = vsel %vm2327_vm13, %v4227_v44, %v4229_v38  ;;  %v4246_v17 = vsel %vm2327_vm13, %v15738_v51, %v4227_v44  ;;  %5775 = vmatprep.subr.bf16.mxu0 %v12468_v58  ;;  %v4974_v54 = vld [vmem:[#allocation3 + $0x2a8] sm:$0xff]  ;;  %v4685_v11 = vpop.permute.xlu1 %4684  ;;  %v4759_v44 = vrot.slane %v16279_v8, %v19403_v45 }
 0x2be   : > { %v4645_v9 = vrot.slane %v13022_v33, 6  ;;  %v4352_v48 = vmul.f32 %v4299_v2, %v4246_v17  ;;  %v4353_v47 = vmul.f32 %v4303_v36, %v4245_v63  ;;  %5776 = vmatpush1.bf16.msra.mxu0 %v12467_v57  ;;  %v12469_v62 = vcombine.low %v4974_v54, %v4982_v22  ;;  %6015 = vrot.lane.b32.xlu0 %v16268_v31, %s19384_s11 }
 0x2bf   : > { %v12470_v60 = vcombine.high %v4974_v54, %v4982_v22  ;;  %6239 = vrot.lane.b32.xlu1 %v16268_v31, %s13642_s30  ;;  %v4755_v36 = vrot.slane %v16279_v8, %v19402_v20 }
 0x2c0   : > { %4661 = vst [vmem:[#allocation3 + $0x328] sm:$0xcc] %v4645_v9  ;;  %v13013_v51 = vpack.c.bf16 %v4353_v47, %v4352_v48  ;;  %v4231_v58 = vpop.permute.xlu0 %4230  ;;  %v4767_v9 = vrot.slane %v16279_v8, %v19406_v25 }
 0x2c1   : > { %5816 = vmatprep.subr.bf16.mxu1 %v12470_v60  ;;  %v4243_v1 = vsel %vm2327_vm13, %v4231_v58, %v16261_v42  ;;  %v4244_v2 = vsel %vm2327_vm13, %v4229_v38, %v4231_v58  ;;  %v16292_v57 = vpop.permute.xlu1 %4688 }
 0x2c2   : > { %4428 = vst [vmem:[#allocation3 + $0x320] sm:$0x33] %v13013_v51  ;;  %v4354_v14 = vmul.f32 %v4307_v29, %v4244_v2  ;;  %v4355_v33 = vmul.f32 %v4311_v61, %v4243_v1  ;;  %5817 = vmatpush1.bf16.msra.mxu1 %v12469_v62  ;;  %6237 = vrot.lane.b32.xlu0 %v16242_v56, %s13642_s30 }
 0x2c3   : > { %6461 = vrot.lane.b32.xlu1 %v16242_v56, %s19351_s2  ;;  %v4763_v61 = vrot.slane %v16279_v8, %v19405_v5 }
 0x2c4   : > { %v13014_v60 = vpack.c.bf16 %v4355_v33, %v4354_v14  ;;  %v4683_v38 = vpop.permute.xlu0 %4682  ;;  %v1202_v33 = vrot.slane %v15795_v53, %v15272_v50 }
 0x2c5   : > { %v4701_v63 = vsel %vm2781_vm15, %v4683_v38, %v4685_v11  ;;  %v4702_v29 = vsel %vm2781_vm15, %v15763_v23, %v4683_v38  ;;  %v1114_v17 = vpop.permute.xlu1 %1113 }
 0x2c6   : > { %4429 = vst [vmem:[#allocation3 + $0x328] sm:$0x33] %v13014_v60  ;;  %v4808_v54 = vmul.f32 %v4755_v36, %v4702_v29  ;;  %v4809_v22 = vmul.f32 %v4759_v44, %v4701_v63  ;;  %6459 = vrot.lane.b32.xlu0 %v16250_v41, %s19351_s2  ;;  %v1425_v44 = vrot.slane %v15801_v4, %v15267_v49 }
 0x2c7   : > { %6683 = vrot.lane.b32.xlu1 %v16250_v41, %s13644_s10  ;;  %v1206_v60 = vrot.slane %v15795_v53, %v15281_v12  ;;  %v1210_v29 = vrot.slane %v15795_v53, %v15290_v21 }
 0x2c8   : > { %v13029_v48 = vpack.c.bf16 %v4809_v22, %v4808_v54  ;;  %v4687_v47 = vpop.permute.xlu0 %4686  ;;  %v1437_v22 = vrot.slane %v15801_v4, %v15290_v21 }
 0x2c9   : > { %v4699_v23 = vsel %vm2781_vm15, %v4687_v47, %v16292_v57  ;;  %v4700_v62 = vsel %vm2781_vm15, %v4685_v11, %v4687_v47  ;;  %v1340_v51 = vpop.permute.xlu1 %1339  ;;  %v1198_v11 = vrot.slane %v15795_v53, %v15267_v49  ;;  %v4989_v47 = vld [vmem:[#allocation3 + $0x320] sm:$0xff] }
 0x2ca   : > { %4884 = vst [vmem:[#allocation3 + $0x360] sm:$0x33] %v13029_v48  ;;  %v4810_v58 = vmul.f32 %v4763_v61, %v4700_v62  ;;  %v4811_v1 = vmul.f32 %v4767_v9, %v4699_v23  ;;  %6463 = vrot.lane.b32.xlu0 %v16268_v31, %s19351_s2  ;;  %v1351_v63 = vsel %vm1347_vm2, %v15818_v37, %v1340_v51  ;;  %v19415_v9 = vld [vmem:[#allocation24_spill] sm:$0xff]  ;;  %v19416_v62 = vld [vmem:[#allocation23_spill] sm:$0xff] }
 0x2cb   : > { %6687 = vrot.lane.b32.xlu1 %v16268_v31, %s13644_s10  ;;  %v1433_v37 = vrot.slane %v15801_v4, %v15281_v12  ;;  %v1466_v45 = vmul.f32 %v1425_v44, %v1351_v63 }
 0x2cc   : > { %v13030_v2 = vpack.c.bf16 %v4811_v1, %v4810_v58  ;;  %v1112_v36 = vpop.permute.xlu0 %1111 }
 0x2cd   : > { %v1344_v14 = vpop.permute.xlu1 %1343  ;;  %v1125_v38 = vsel %vm1121_vm1, %v15789_v6, %v1112_v36  ;;  %v1124_v61 = vsel %vm1121_vm1, %v1112_v36, %v1114_v17  ;;  %v1429_v6 = vrot.slane %v15801_v4, %v15272_v50 }
 0x2ce   : > { %4885 = vst [vmem:[#allocation3 + $0x368] sm:$0x33] %v13030_v2  ;;  %6685 = vrot.lane.b32.xlu0 %v16242_v56, %s13644_s10  ;;  %v1348_v48 = vsel %vm1347_vm2, %v1344_v14, %v19415_v9  ;;  %v1239_v9 = vmul.f32 %v1198_v11, %v1125_v38  ;;  %v1240_v4 = vmul.f32 %v1202_v33, %v1124_v61  ;;  %v4990_v11 = vld [vmem:[#allocation3 + $0x328] sm:$0xff] }
 0x2cf   : > { %6983 = vrot.lane.b32.xlu1 %v16268_v31, %s13645_s15  ;;  %v1469_v20 = vmul.f32 %v1437_v22, %v1348_v48 }
 0x2d0   : > { %v1116_v54 = vpop.permute.xlu0 %1115 }
 0x2d1   : > { %v4997_v23 = vld [vmem:[#allocation3 + $0x360] sm:$0x77]  ;;  %v1569_v53 = vpop.permute.xlu1 %1568  ;;  %v1122_v58 = vsel %vm1121_vm1, %v1116_v54, %v19416_v62  ;;  %v1123_v1 = vsel %vm1121_vm1, %v1114_v17, %v1116_v54 }
 0x2d2   : > { %v12483_v2 = vcombine.low %v4989_v47, %v4997_v23  ;;  %v12484_v36 = vcombine.high %v4989_v47, %v4997_v23  ;;  %6981 = vrot.lane.b32.xlu0 %v16242_v56, %s13645_s15  ;;  %v1241_v25 = vmul.f32 %v1206_v60, %v1123_v1  ;;  %v1242_v5 = vmul.f32 %v1210_v29, %v1122_v58 }
 0x2d3   : > { %7205 = vrot.lane.b32.xlu1 %v16242_v56, %s13646_s17  ;;  %v13343_v58 = vpack.c.bf16 %v1466_v45, %v1239_v9  ;;  %v1664_v1 = vrot.slane %v15871_v3, %v15290_v21 }
 0x2d4   : > { %v1342_v41 = vpop.permute.xlu0 %1341  ;;  %v5581_v31 = vand.u32 %v12484_v36, %v15313_v32  ;;  %v5578_v62 = vand.u32 %v12483_v2, %v15313_v32  ;;  %v1891_v36 = vrot.slane %v15876_v30, %v15290_v21 }
 0x2d5   : > { %v1349_v17 = vsel %vm1347_vm2, %v1342_v41, %v1344_v14  ;;  %v1350_v54 = vsel %vm1347_vm2, %v1340_v51, %v1342_v41  ;;  %v4998_v44 = vld [vmem:[#allocation3 + $0x368] sm:$0x77]  ;;  %v1794_v38 = vpop.permute.xlu1 %1793  ;;  %v1652_v14 = vrot.slane %v15871_v3, %v15267_v49  ;;  %v1656_v41 = vrot.slane %v15871_v3, %v15272_v50  ;;  %v16377_v51 = vld [vmem:[%s19164_s4] sm:$0xf] }
 0x2d6   : > { %v1467_v63 = vmul.f32 %v1429_v6, %v1350_v54  ;;  %v1468_v47 = vmul.f32 %v1433_v37, %v1349_v17  ;;  %5777 = vmatprep.subr.bf16.mxu0 %v5581_v31  ;;  %v12485_v33 = vcombine.low %v4990_v11, %v4998_v44  ;;  %v12486_v22 = vcombine.high %v4990_v11, %v4998_v44  ;;  %v19418_v11 = vld [vmem:[#allocation25_spill] sm:$0xff] }
 0x2d7   : > { %5778 = vmatpush1.bf16.msra.mxu0 %v5578_v62  ;;  %v1879_v31 = vrot.slane %v15876_v30, %v15267_v49  ;;  %v1660_v6 = vrot.slane %v15871_v3, %v15281_v12  ;;  %v13341_v37 = vpack.c.bf16 %v1469_v20, %v1242_v5  ;;  %v19417_v62 = vld [vmem:[#allocation26_spill] sm:$0xff]  ;;  %v1883_v54 = vrot.slane %v15876_v30, %v15272_v50 }
 0x2d8   : > { %v1567_v61 = vpop.permute.xlu0 %1566  ;;  %v5587_v48 = vand.u32 %v12486_v22, %v15313_v32  ;;  %v5584_v60 = vand.u32 %v12485_v33, %v15313_v32  ;;  %v13342_v23 = vpack.c.bf16 %v1467_v63, %v1240_v4  ;;  %v13344_v3 = vpack.c.bf16 %v1468_v47, %v1241_v25 }
 0x2d9   : > { %v1798_v29 = vpop.permute.xlu1 %1797  ;;  %v1577_v9 = vsel %vm1574_vm3, %v1567_v61, %v1569_v53  ;;  %v1578_v4 = vsel %vm1574_vm3, %v15861_v39, %v1567_v61  ;;  %v1887_v44 = vrot.slane %v15876_v30, %v15281_v12  ;;  %v1805_v63 = vsel %vm1801_vm4, %v15892_v52, %v1794_v38 }
 0x2da   : > { %12495 = vmatmul.mubr.msk.bf16.vlgmr.msra.gmra.mrb[8].mxu0 %vm5545_vm7, %v16377_v51  ;;  %5818 = vmatprep.subr.bf16.mxu1 %v5587_v48  ;;  %v1802_v17 = vsel %vm1801_vm4, %v1798_v29, %v19417_v62  ;;  %v2178_v39 = vrot.slane %v15907_v40, %v15267_v49  ;;  %v1693_v22 = vmul.f32 %v1652_v14, %v1578_v4  ;;  %v13288_v62 = vld [vmem:[#allocation2 + $0x60] sm:$0xff] }
 0x2db   : > { %5819 = vmatpush1.bf16.msra.mxu1 %v5584_v60  ;;  %5879 = vmatprep.mubr.bf16.mxu0 %v19396_v15  ;;  %v1923_v47 = vmul.f32 %v1891_v36, %v1802_v17  ;;  %v1694_v30 = vmul.f32 %v1656_v41, %v1577_v9  ;;  %v1920_v52 = vmul.f32 %v1879_v31, %v1805_v63  ;;  %v13289_v17 = vld [vmem:[#allocation2 + $0x68] sm:$0xff] }
 0x2dc   : > { %v1571_v2 = vpop.permute.xlu0 %1570  ;;  %5888 = vmatprep.subr.bf16.mxu1 %v13341_v37  ;;  %5847 = vmatprep.subr.bf16.mxu0 %v13342_v23  ;;  %v19419_v9 = vld [vmem:[#allocation28_spill] sm:$0xff] }
 0x2dd   : > { %v1575_v20 = vsel %vm1574_vm3, %v1571_v2, %v19418_v11  ;;  %v1576_v45 = vsel %vm1574_vm3, %v1569_v53, %v1571_v2  ;;  %v2097_v5 = vpop.permute.xlu1 %2096  ;;  %5848 = vmatpush1.bf16.msra.mxu0 %v13343_v58  ;;  %v13347_v11 = vpack.c.bf16 %v1920_v52, %v1693_v22  ;;  %v2405_v22 = vrot.slane %v15969_v24, %v15267_v49 }
 0x2de   : > { %12496 = vmatmul.mubr.msk.bf16.vlgmr.msra.gmra.mrb[8].mxu1 %vm5545_vm7, %v16377_v51  ;;  %v1695_v25 = vmul.f32 %v1660_v6, %v1576_v45  ;;  %v1696_v53 = vmul.f32 %v1664_v1, %v1575_v20  ;;  %v2182_v6 = vrot.slane %v15907_v40, %v15272_v50  ;;  %v2186_v1 = vrot.slane %v15907_v40, %v15281_v12 }
 0x2df   : > { %5889 = vmatpush1.bf16.msra.mxu1 %v13344_v3  ;;  %5920 = vmatprep.mubr.bf16.mxu1 %v19396_v15 }
 0x2e0   : > { %v1796_v33 = vpop.permute.xlu0 %1795  ;;  %v13345_v36 = vpack.c.bf16 %v1923_v47, %v1696_v53 }
 0x2e1   : > { %v1803_v61 = vsel %vm1801_vm4, %v1796_v33, %v1798_v29  ;;  %v1804_v48 = vsel %vm1801_vm4, %v1794_v38, %v1796_v33  ;;  %v2322_v60 = vpop.permute.xlu1 %2321  ;;  %v2190_v38 = vrot.slane %v15907_v40, %v15290_v21  ;;  %v13290_v40 = vld [vmem:[#allocation2 + $0x70] sm:$0xff] }
 0x2e2   : > { %v1921_v37 = vmul.f32 %v1883_v54, %v1804_v48  ;;  %v1922_v23 = vmul.f32 %v1887_v44, %v1803_v61  ;;  %5890 = vmatprep.subr.bf16.mxu1 %v13345_v36  ;;  %v2636_v61 = vrot.slane %v15973_v34, %v15272_v50  ;;  %v2330_v52 = vsel %vm2327_vm13, %v15961_v43, %v2322_v60 }
 0x2e4   : > { %v2095_v58 = vpop.permute.xlu0 %2094  ;;  %v13346_v54 = vpack.c.bf16 %v1921_v37, %v1694_v30  ;;  %v13348_v20 = vpack.c.bf16 %v1922_v23, %v1695_v25  ;;  %v2409_v25 = vrot.slane %v15969_v24, %v15272_v50  ;;  %v2632_v30 = vrot.slane %v15973_v34, %v15267_v49 }
 0x2e5   : > { %v2102_v14 = vsel %vm2100_vm12, %v2095_v58, %v2097_v5  ;;  %v2103_v29 = vsel %vm2100_vm12, %v15937_v19, %v2095_v58  ;;  %v2326_v41 = vpop.permute.xlu1 %2325  ;;  %v2417_v23 = vrot.slane %v15969_v24, %v15290_v21 }
 0x2e6   : > { %v2219_v31 = vmul.f32 %v2178_v39, %v2103_v29  ;;  %v2220_v2 = vmul.f32 %v2182_v6, %v2102_v14  ;;  %5849 = vmatprep.subr.bf16.mxu0 %v13346_v54  ;;  %5891 = vmatpush1.bf16.msra.mxu1 %v13348_v20  ;;  %v2413_v6 = vrot.slane %v15969_v24, %v15281_v12  ;;  %v19420_v29 = vld [vmem:[#allocation29_spill] sm:$0xff] }
 0x2e7   : > { %5850 = vmatpush1.bf16.msra.mxu0 %v13347_v11  ;;  %v2640_v14 = vrot.slane %v15973_v34, %v15281_v12 }
 0x2e8   : > { %v2099_v45 = vpop.permute.xlu0 %2098  ;;  %v13349_v53 = vpack.c.bf16 %v2220_v2, %v13289_v17  ;;  %v13350_v47 = vpack.c.bf16 %v2219_v31, %v13288_v62  ;;  %v2446_v31 = vmul.f32 %v2405_v22, %v2330_v52  ;;  %v2644_v62 = vrot.slane %v15973_v34, %v15290_v21  ;;  %v19421_v17 = vld [vmem:[#allocation35_spill] sm:$0xff] }
 0x2e9   : > { %v2101_v3 = vsel %vm2100_vm12, %v2097_v5, %v2099_v45  ;;  %v2116_v19 = vsel %vm2100_vm12, %v2099_v45, %v19419_v9  ;;  %v2551_v4 = vpop.permute.xlu1 %2550  ;;  %v3323_v54 = vrot.slane %v19421_v17, %v15267_v49  ;;  %v3327_v11 = vrot.slane %v19421_v17, %v15272_v50  ;;  %v19422_v9 = vld [vmem:[#allocation30_spill] sm:$0xff]  ;;  %v19423_v34 = vld [vmem:[#allocation31_spill] sm:$0xff] }
 0x2ea   : > { %v2221_v44 = vmul.f32 %v2186_v1, %v2101_v3  ;;  %v2222_v63 = vmul.f32 %v2190_v38, %v2116_v19  ;;  %5851 = vmatprep.subr.bf16.mxu0 %v13349_v53 }
 0x2eb   : > { %5852 = vmatpush1.bf16.msra.mxu0 %v13350_v47 }
 0x2ec   : > { %v2324_v33 = vpop.permute.xlu0 %2323  ;;  %v13351_v48 = vpack.c.bf16 %v2222_v63, %v15965_v59  ;;  %v13352_v37 = vpack.c.bf16 %v2221_v44, %v13290_v40  ;;  %v2343_v59 = vsel %vm2327_vm13, %v2326_v41, %v19420_v29  ;;  %v3331_v44 = vrot.slane %v19421_v17, %v15281_v12 }
 0x2ed   : > { %v2329_v5 = vsel %vm2327_vm13, %v2322_v60, %v2324_v33  ;;  %v3241_v39 = vpop.permute.xlu1 %3240  ;;  %v2328_v43 = vsel %vm2327_vm13, %v2324_v33, %v2326_v41  ;;  %v3335_v41 = vrot.slane %v19421_v17, %v15290_v21  ;;  %v2449_v20 = vmul.f32 %v2417_v23, %v2343_v59 }
 0x2ee   : > { %v2447_v58 = vmul.f32 %v2409_v25, %v2329_v5  ;;  %5892 = vmatprep.subr.bf16.mxu1 %v13351_v48  ;;  %v2448_v45 = vmul.f32 %v2413_v6, %v2328_v43  ;;  %v19424_v5 = vld [vmem:[#allocation34_spill] sm:$0xff] }
 0x2ef   : > { %5893 = vmatpush1.bf16.msra.mxu1 %v13352_v37 }
 0x2f0   : > { %v2549_v1 = vpop.permute.xlu0 %2548 }
 0x2f1   : > { %v2556_v60 = vsel %vm2554_vm14, %v2549_v1, %v2551_v4  ;;  %v2557_v24 = vsel %vm2554_vm14, %v15986_v16, %v2549_v1  ;;  %v3245_v38 = vpop.permute.xlu1 %3244 }
 0x2f2   : > { %v2673_v2 = vmul.f32 %v2632_v30, %v2557_v24  ;;  %v2674_v36 = vmul.f32 %v2636_v61, %v2556_v60  ;;  %v3248_v40 = vsel %vm1347_vm2, %v3245_v38, %v19423_v34 }
 0x2f3   : > { %v3367_v22 = vmul.f32 %v3335_v41, %v3248_v40 }
 0x2f4   : > { %v2553_v16 = vpop.permute.xlu0 %2552  ;;  %v13353_v25 = vpack.c.bf16 %v2674_v36, %v2447_v58  ;;  %v13354_v33 = vpack.c.bf16 %v2673_v2, %v2446_v31  ;;  %v19426_v2 = vld [vmem:[#allocation33_spill] sm:$0xff] }
 0x2f5   : > { %v2555_v3 = vsel %vm2554_vm14, %v2551_v4, %v2553_v16  ;;  %v2570_v19 = vsel %vm2554_vm14, %v2553_v16, %v19422_v9  ;;  %v2778_v63 = vpop.permute.xlu1 %2777  ;;  %v3251_v4 = vsel %vm1347_vm2, %v19424_v5, %v3241_v39  ;;  %v3779_v9 = vrot.slane %v16094_v35, %v15267_v49 }
 0x2f6   : > { %v2675_v53 = vmul.f32 %v2640_v14, %v2555_v3  ;;  %v2676_v47 = vmul.f32 %v2644_v62, %v2570_v19  ;;  %5853 = vmatprep.subr.bf16.mxu0 %v13353_v25  ;;  %v3364_v37 = vmul.f32 %v3323_v54, %v3251_v4 }
 0x2f7   : > { %5854 = vmatpush1.bf16.msra.mxu0 %v13354_v33 }
 0x2f8   : > { %v3243_v30 = vpop.permute.xlu0 %3242  ;;  %v13355_v58 = vpack.c.bf16 %v2676_v47, %v2449_v20  ;;  %v13356_v1 = vpack.c.bf16 %v2675_v53, %v2448_v45  ;;  %v3783_v53 = vrot.slane %v16094_v35, %v15272_v50 }
 0x2f9   : > { %v3249_v61 = vsel %vm1347_vm2, %v3243_v30, %v3245_v38  ;;  %v3250_v48 = vsel %vm1347_vm2, %v3241_v39, %v3243_v30  ;;  %v3017_v52 = vpop.permute.xlu1 %3016  ;;  %v19425_v39 = vld [vmem:[#allocation40_spill] sm:$0xff] }
 0x2fa   : > { %v3365_v23 = vmul.f32 %v3327_v11, %v3250_v48  ;;  %v3366_v6 = vmul.f32 %v3331_v44, %v3249_v61  ;;  %5894 = vmatprep.subr.bf16.mxu1 %v13355_v58  ;;  %v3111_v31 = vrot.slane %v19425_v39, %v15290_v21  ;;  %v3099_v17 = vrot.slane %v19425_v39, %v15267_v49  ;;  %v19429_v58 = vld [vmem:[#allocation27_spill] sm:$0xff] }
 0x2fb   : > { %5895 = vmatpush1.bf16.msra.mxu1 %v13356_v1  ;;  %v3103_v54 = vrot.slane %v19425_v39, %v15272_v50  ;;  %v3107_v41 = vrot.slane %v19425_v39, %v15281_v12  ;;  %v3027_v11 = vsel %vm1121_vm1, %v16071_v27, %v3017_v52  ;;  %v19427_v27 = vld [vmem:[#allocation43_spill] sm:$0xff]  ;;  %v3787_v48 = vrot.slane %v16094_v35, %v15281_v12 }
 0x2fc   : > { %v12975_v14 = vpack.c.bf16 %v3365_v23, %v3364_v37  ;;  %v12976_v29 = vpack.c.bf16 %v3367_v22, %v3366_v6  ;;  %v2776_v59 = vpop.permute.xlu0 %2775  ;;  %v3140_v34 = vmul.f32 %v3099_v17, %v3027_v11  ;;  %v2859_v47 = vrot.slane %v19427_v27, %v15267_v49  ;;  %v19428_v37 = vld [vmem:[#allocation32_spill] sm:$0xff] }
 0x2fd   : > { %v3021_v43 = vpop.permute.xlu1 %3020  ;;  %v2863_v25 = vrot.slane %v19427_v27, %v15272_v50  ;;  %v2867_v33 = vrot.slane %v19427_v27, %v15281_v12  ;;  %v2871_v5 = vrot.slane %v19427_v27, %v15290_v21  ;;  %v2784_v4 = vsel %vm2781_vm15, %v16059_v28, %v2776_v59 }
 0x2fe   : > { %v3430_v60 = vrot.slane %v12975_v14, 6  ;;  %v3431_v24 = vrot.slane %v12976_v29, 6  ;;  %v3024_v36 = vsel %vm1121_vm1, %v3021_v43, %v19426_v2  ;;  %v2783_v14 = vsel %vm2781_vm15, %v2776_v59, %v2778_v63 }
 0x2ff   : > { %v3143_v20 = vmul.f32 %v3111_v31, %v3024_v36  ;;  %v4087_v39 = vrot.slane %v16133_v0, %v15272_v50  ;;  %v4091_v31 = vrot.slane %v16133_v0, %v15281_v12 }
 0x300   : > { %3446 = vst [vmem:[#allocation3 + $0x270] sm:$0xcc] %v3430_v60  ;;  %3447 = vst [vmem:[#allocation3 + $0x278] sm:$0xcc] %v3431_v24  ;;  %v2780_v38 = vpop.permute.xlu0 %2779  ;;  %v3791_v60 = vrot.slane %v16094_v35, %v15290_v21  ;;  %v4083_v24 = vrot.slane %v16133_v0, %v15267_v49 }
 0x301   : > { %v3699_v62 = vpop.permute.xlu1 %3698  ;;  %v2797_v23 = vsel %vm2781_vm15, %v2780_v38, %v19428_v37 }
 0x302   : > { %v2903_v2 = vmul.f32 %v2871_v5, %v2797_v23 }
 0x304   : > { %v3019_v45 = vpop.permute.xlu0 %3018 }
 0x305   : > { %v3025_v16 = vsel %vm1121_vm1, %v3019_v45, %v3021_v43  ;;  %v3026_v3 = vsel %vm1121_vm1, %v3017_v52, %v3019_v45  ;;  %v4003_v19 = vpop.permute.xlu1 %4002  ;;  %v2782_v52 = vsel %vm2781_vm15, %v2778_v63, %v2780_v38  ;;  %v4095_v38 = vrot.slane %v16133_v0, %v15290_v21 }
 0x306   : > { %v3141_v40 = vmul.f32 %v3103_v54, %v3026_v3  ;;  %v3142_v44 = vmul.f32 %v3107_v41, %v3025_v16  ;;  %v2900_v63 = vmul.f32 %v2859_v47, %v2784_v4  ;;  %v2902_v59 = vmul.f32 %v2867_v33, %v2782_v52  ;;  %v19430_v41 = vld [vmem:[#allocation37_spill] sm:$0xff] }
 0x307   : > { %v2901_v54 = vmul.f32 %v2863_v25, %v2783_v14  ;;  %v4010_v0 = vsel %vm2100_vm12, %v16163_v13, %v4003_v19  ;;  %v3559_v47 = vrot.slane %v16178_v10, %v15272_v50 }
 0x308   : > { %v12967_v22 = vpack.c.bf16 %v3141_v40, %v3140_v34  ;;  %v12968_v30 = vpack.c.bf16 %v3143_v20, %v3142_v44  ;;  %v3697_v61 = vpop.permute.xlu0 %3696  ;;  %v19431_v20 = vld [vmem:[#allocation36_spill] sm:$0xff]  ;;  %v3555_v40 = vrot.slane %v16178_v10, %v15267_v49  ;;  %v12960_v44 = vpack.c.bf16 %v2903_v2, %v2902_v59 }
 0x309   : > { %v3706_v6 = vsel %vm1801_vm4, %v3697_v61, %v3699_v62  ;;  %v3707_v28 = vsel %vm1801_vm4, %v19429_v58, %v3697_v61  ;;  %v4007_v1 = vpop.permute.xlu1 %4006  ;;  %v12959_v25 = vpack.c.bf16 %v2901_v54, %v2900_v63  ;;  %v4124_v33 = vmul.f32 %v4083_v24, %v4010_v0 }
 0x30a   : > { %3214 = vst [vmem:[#allocation3 + $0x270] sm:$0x33] %v12967_v22  ;;  %3215 = vst [vmem:[#allocation3 + $0x278] sm:$0x33] %v12968_v30  ;;  %v3820_v29 = vmul.f32 %v3779_v9, %v3707_v28  ;;  %v3821_v43 = vmul.f32 %v3783_v53, %v3706_v6  ;;  %v4023_v45 = vsel %vm2100_vm12, %v4007_v1, %v19431_v20 }
 0x30b   : > { %v4127_v27 = vmul.f32 %v4095_v38, %v4023_v45  ;;  %v4547_v0 = vrot.slane %v16206_v55, %v15281_v12 }
 0x30c   : > { %v12991_v36 = vpack.c.bf16 %v3821_v43, %v3820_v29  ;;  %v3701_v17 = vpop.permute.xlu0 %3700 }
 0x30d   : > { %v3704_v35 = vsel %vm1801_vm4, %v3701_v17, %v19430_v41  ;;  %v3705_v11 = vsel %vm1801_vm4, %v3699_v62, %v3701_v17  ;;  %v3475_v16 = vpop.permute.xlu1 %3474  ;;  %v19432_v17 = vld [vmem:[#allocation39_spill] sm:$0xff]  ;;  %v19433_v41 = vld [vmem:[#allocation38_spill] sm:$0xff] }
 0x30e   : > { %v3886_v3 = vrot.slane %v12991_v36, 6  ;;  %v3822_v9 = vmul.f32 %v3787_v48, %v3705_v11  ;;  %v3823_v34 = vmul.f32 %v3791_v60, %v3704_v35  ;;  %v3567_v60 = vrot.slane %v16178_v10, %v15290_v21 }
 0x30f   : > { %v4551_v36 = vrot.slane %v16206_v55, %v15290_v21 }
 0x310   : > { %3902 = vst [vmem:[#allocation3 + $0x2b0] sm:$0xcc] %v3886_v3  ;;  %v12992_v53 = vpack.c.bf16 %v3823_v34, %v3822_v9  ;;  %v4005_v62 = vpop.permute.xlu0 %4004  ;;  %v4543_v3 = vrot.slane %v16206_v55, %v15272_v50 }
 0x311   : > { %v4008_v5 = vsel %vm2100_vm12, %v4005_v62, %v4007_v1  ;;  %v4009_v13 = vsel %vm2100_vm12, %v4003_v19, %v4005_v62  ;;  %v4968_v4 = vld [vmem:[#allocation3 + $0x278] sm:$0xff]  ;;  %v4967_v22 = vld [vmem:[#allocation3 + $0x270] sm:$0xff]  ;;  %v4459_v30 = vpop.permute.xlu1 %4458  ;;  %v3563_v1 = vrot.slane %v16178_v10, %v15281_v12 }
 0x312   : > { %v3887_v61 = vrot.slane %v12992_v53, 6  ;;  %v4125_v48 = vmul.f32 %v4087_v39, %v4009_v13  ;;  %v4126_v52 = vmul.f32 %v4091_v31, %v4008_v5  ;;  %v12457_v37 = vcombine.low %v12960_v44, %v4968_v4 }
 0x313   : > { %v12458_v23 = vcombine.high %v12960_v44, %v4968_v4  ;;  %v12455_v6 = vcombine.low %v12959_v25, %v4967_v22  ;;  %v12456_v58 = vcombine.high %v12959_v25, %v4967_v22  ;;  %v4466_v9 = vsel %vm2554_vm14, %v16227_v46, %v4459_v30 }
 0x314   : > { %3903 = vst [vmem:[#allocation3 + $0x2b8] sm:$0xcc] %v3887_v61  ;;  %v13007_v28 = vpack.c.bf16 %v4125_v48, %v4124_v33  ;;  %v13008_v14 = vpack.c.bf16 %v4127_v27, %v4126_v52  ;;  %v3473_v29 = vpop.permute.xlu0 %3472  ;;  %v4315_v27 = vrot.slane %v16240_v7, %v15267_v49  ;;  %v4319_v46 = vrot.slane %v16240_v7, %v15272_v50 }
 0x315   : > { %5896 = vmatprep.subr.bf16.mxu1 %v12458_v23  ;;  %v3482_v19 = vsel %vm1574_vm3, %v3473_v29, %v3475_v16  ;;  %v3483_v43 = vsel %vm1574_vm3, %v16191_v18, %v3473_v29  ;;  %5855 = vmatprep.subr.bf16.mxu0 %v12456_v58  ;;  %v4463_v24 = vpop.permute.xlu1 %4462  ;;  %v4539_v18 = vrot.slane %v16206_v55, %v15267_v49 }
 0x316   : > { %v4190_v38 = vrot.slane %v13007_v28, 6  ;;  %v4191_v39 = vrot.slane %v13008_v14, 6  ;;  %v3596_v31 = vmul.f32 %v3555_v40, %v3483_v43  ;;  %v3597_v63 = vmul.f32 %v3559_v47, %v3482_v19  ;;  %5856 = vmatpush1.bf16.msra.mxu0 %v12455_v6  ;;  %5897 = vmatpush1.bf16.msra.mxu1 %v12457_v37 }
 0x317   : > { %v4479_v35 = vsel %vm2554_vm14, %v4463_v24, %v19433_v41  ;;  %v4580_v47 = vmul.f32 %v4539_v18, %v4466_v9  ;;  %v4327_v61 = vrot.slane %v16240_v7, %v15290_v21  ;;  %v4783_v43 = vrot.slane %v16279_v8, %v15290_v21 }
 0x318   : > { %4206 = vst [vmem:[#allocation3 + $0x2f0] sm:$0xcc] %v4190_v38  ;;  %4207 = vst [vmem:[#allocation3 + $0x2f8] sm:$0xcc] %v4191_v39  ;;  %v12983_v59 = vpack.c.bf16 %v3597_v63, %v3596_v31  ;;  %v3477_v2 = vpop.permute.xlu0 %3476  ;;  %v19435_v39 = vld [vmem:[#allocation42_spill] sm:$0xff] }
 0x319   : > { %v3480_v10 = vsel %vm1574_vm3, %v3477_v2, %v19432_v17  ;;  %v3481_v54 = vsel %vm1574_vm3, %v3475_v16, %v3477_v2  ;;  %v4237_v11 = vpop.permute.xlu1 %4236  ;;  %v4583_v16 = vmul.f32 %v4551_v36, %v4479_v35  ;;  %v4779_v2 = vrot.slane %v16279_v8, %v15281_v12 }
 0x31a   : > { %3670 = vst [vmem:[#allocation3 + $0x2b0] sm:$0x33] %v12983_v59  ;;  %v3598_v20 = vmul.f32 %v3563_v1, %v3481_v54  ;;  %v3599_v45 = vmul.f32 %v3567_v60, %v3480_v10 }
 0x31c   : > { %v12984_v34 = vpack.c.bf16 %v3599_v45, %v3598_v20  ;;  %v4461_v40 = vpop.permute.xlu0 %4460  ;;  %v6057_v45 = vld [vmem:[#allocation11] ss:$8 sm:$0xf] }
 0x31d   : > { %v4464_v44 = vsel %vm2554_vm14, %v4461_v40, %v4463_v24  ;;  %v4465_v53 = vsel %vm2554_vm14, %v4459_v30, %v4461_v40  ;;  %v4691_v62 = vpop.permute.xlu1 %4690  ;;  %v4323_v30 = vrot.slane %v16240_v7, %v15281_v12  ;;  %v4775_v7 = vrot.slane %v16279_v8, %v15272_v50  ;;  %v19434_v24 = vld [vmem:[#allocation41_spill] sm:$0xff] }
 0x31e   : > { %3671 = vst [vmem:[#allocation3 + $0x2b8] sm:$0x33] %v12984_v34  ;;  %v4581_v55 = vmul.f32 %v4543_v3, %v4465_v53  ;;  %v4582_v25 = vmul.f32 %v4547_v0, %v4464_v44  ;;  %v4698_v54 = vsel %vm2781_vm15, %v16292_v57, %v4691_v62  ;;  %v6058_v3 = vld [vmem:[#allocation11] ss:$8 sm:$0xf0] }
 0x31f   : > { %v4983_v58 = vld [vmem:[#allocation3 + $0x2f0] sm:$0xff]  ;;  %v4984_v59 = vld [vmem:[#allocation3 + $0x2f8] sm:$0xff]  ;;  %v16634_v40 = vor.u32 %v6058_v3, %v6057_v45 }
 0x320   : > { %v13023_v33 = vpack.c.bf16 %v4581_v55, %v4580_v47  ;;  %v13024_v5 = vpack.c.bf16 %v4583_v16, %v4582_v25  ;;  %v4235_v13 = vpop.permute.xlu0 %4234  ;;  %v6281_v47 = vld [vmem:[#allocation11 + $0x1] ss:$8 sm:$0xf] }
 0x321   : > { %v4241_v4 = vsel %vm2327_vm13, %v4235_v13, %v4237_v11  ;;  %v4242_v22 = vsel %vm2327_vm13, %v16261_v42, %v4235_v13  ;;  %v4975_v48 = vld [vmem:[#allocation3 + $0x2b0] sm:$0xff]  ;;  %v4695_v28 = vpop.permute.xlu1 %4694  ;;  %v4771_v42 = vrot.slane %v16279_v8, %v15267_v49 }
 0x322   : > { %v4646_v52 = vrot.slane %v13023_v33, 6  ;;  %v4647_v37 = vrot.slane %v13024_v5, 6  ;;  %v4356_v23 = vmul.f32 %v4315_v27, %v4242_v22  ;;  %v4357_v6 = vmul.f32 %v4319_v46, %v4241_v4  ;;  %v6282_v55 = vld [vmem:[#allocation11 + $0x1] ss:$8 sm:$0xf0] }
 0x323   : > { %v12471_v14 = vcombine.low %v4975_v48, %v4983_v58  ;;  %v12472_v29 = vcombine.high %v4975_v48, %v4983_v58  ;;  %v4711_v31 = vsel %vm2781_vm15, %v4695_v28, %v19435_v39  ;;  %v4812_v9 = vmul.f32 %v4771_v42, %v4698_v54  ;;  %v19436_v33 = vld [vmem:[#allocation22_spill] sm:$0xff]  ;;  %v19437_v13 = vld [vmem:[#allocation21_spill] sm:$0xff] }
 0x324   : > { %4662 = vst [vmem:[#allocation3 + $0x330] sm:$0xcc] %v4646_v52  ;;  %4663 = vst [vmem:[#allocation3 + $0x338] sm:$0xcc] %v4647_v37  ;;  %v13015_v1 = vpack.c.bf16 %v4357_v6, %v4356_v23  ;;  %v4239_v19 = vpop.permute.xlu0 %4238  ;;  %v4815_v35 = vmul.f32 %v4783_v43, %v4711_v31  ;;  %v6076_v5 = vrot.slane %v16634_v40, %v19436_v33  ;;  %v19441_v31 = vld [vmem:[#allocation50_spill] sm:$0xff] }
 0x325   : > { %v4240_v60 = vsel %vm2327_vm13, %v4237_v11, %v4239_v19  ;;  %v4255_v38 = vsel %vm2327_vm13, %v4239_v19, %v19434_v24  ;;  %5857 = vmatprep.subr.bf16.mxu0 %v12472_v29  ;;  %v4976_v63 = vld [vmem:[#allocation3 + $0x2b8] sm:$0xff]  ;;  %v6080_v4 = vrot.slane %v16634_v40, %v19437_v13  ;;  %v16646_v22 = vor.u32 %v6282_v55, %v6281_v47 }
 0x326   : > { %4430 = vst [vmem:[#allocation3 + $0x330] sm:$0x33] %v13015_v1  ;;  %v4358_v36 = vmul.f32 %v4323_v30, %v4240_v60  ;;  %v4359_v18 = vmul.f32 %v4327_v61, %v4255_v38  ;;  %5858 = vmatpush1.bf16.msra.mxu0 %v12471_v14  ;;  %v12473_v17 = vcombine.low %v4976_v63, %v4984_v59  ;;  %v6505_v58 = vld [vmem:[#allocation11 + $0x2] ss:$8 sm:$0xf] }
 0x327   : > { %v12474_v10 = vcombine.high %v4976_v63, %v4984_v59  ;;  %v6506_v14 = vld [vmem:[#allocation11 + $0x2] ss:$8 sm:$0xf0]  ;;  %v6300_v19 = vrot.slane %v16646_v22, %v19436_v33  ;;  %v6304_v43 = vrot.slane %v16646_v22, %v19437_v13 }
 0x328   : > { %v13016_v41 = vpack.c.bf16 %v4359_v18, %v4358_v36  ;;  %v4693_v11 = vpop.permute.xlu0 %4692  ;;  %v6014_v20 = vpop.permute.xlu1 %6013  ;;  %v16682_v36 = vor.u32 %v6506_v14, %v6505_v58 }
 0x329   : > { %5898 = vmatprep.subr.bf16.mxu1 %v12474_v10  ;;  %v4696_v8 = vsel %vm2781_vm15, %v4693_v11, %v4695_v28  ;;  %v4697_v0 = vsel %vm2781_vm15, %v4691_v62, %v4693_v11  ;;  %v6730_v11 = vld [vmem:[#allocation11 + $0x3] ss:$8 sm:$0xf0] }
 0x32a   : > { %5899 = vmatpush1.bf16.msra.mxu1 %v12473_v17  ;;  %4431 = vst [vmem:[#allocation3 + $0x338] sm:$0x33] %v13016_v41  ;;  %v4813_v34 = vmul.f32 %v4775_v7, %v4697_v0  ;;  %v4814_v16 = vmul.f32 %v4779_v2, %v4696_v8  ;;  %v6524_v47 = vrot.slane %v16682_v36, %v19436_v33 }
 0x32c   : > { %v13031_v57 = vpack.c.bf16 %v4813_v34, %v4812_v9  ;;  %v13032_v44 = vpack.c.bf16 %v4815_v35, %v4814_v16  ;;  %v16636_v53 = vpop.permute.xlu0 %6011  ;;  %v16638_v27 = vpop.permute.xlu1 %6235  ;;  %v6729_v35 = vld [vmem:[#allocation11 + $0x3] ss:$8 sm:$0xf] }
 0x32d   : > { %v5717_v25 = vpop.f32.mrb[4].mxu0  ;;  %v6054_v48 = vsel %vm1121_vm1, %v16636_v53, %v6014_v20  ;;  %v4991_v7 = vld [vmem:[#allocation3 + $0x330] sm:$0xff] }
 0x32e   : > { %4886 = vst [vmem:[#allocation3 + $0x370] sm:$0x33] %v13031_v57  ;;  %4887 = vst [vmem:[#allocation3 + $0x378] sm:$0x33] %v13032_v44  ;;  %vm5933_vm10 = vcmp.gt.f32.partialorder %v5717_v25, 0.0  ;;  %v16640_v46 = vpop.f32.mrb[5].mxu0  ;;  %v16664_v29 = vmul.f32 %v6076_v5, %v6054_v48  ;;  %v16694_v57 = vor.u32 %v6730_v11, %v6729_v35 }
 0x32f   : > { %v5949_v62 = vmul.f32 0.1, %v5717_v25  ;;  %v5721_v30 = vpop.f32.mrb[6].mxu0  ;;  %v5950_v48 = vmul.f32 0.1, %v16640_v46  ;;  %vm5934_vm5 = vcmp.gt.f32.partialorder %v16640_v46, 0.0 }
 0x330   : > { %v16653_v52 = vpop.permute.xlu0 %6015  ;;  %v5722_v37 = vpop.f32.mrb[7].mxu0  ;;  %v6752_v58 = vrot.slane %v16694_v57, %v19437_v13 }
 0x331   : > { %v16648_v61 = vsel %vm5933_vm10, %v5717_v25, %v5949_v62  ;;  %19439 = vst [vmem:[#allocation23_spill] sm:$0xff] %v16653_v52  ;;  %v6053_v23 = vsel %vm1121_vm1, %v6014_v20, %v16653_v52  ;;  %v16662_v6 = vpop.permute.xlu1 %6239  ;;  %v4992_v38 = vld [vmem:[#allocation3 + $0x338] sm:$0xff]  ;;  %v6528_v25 = vrot.slane %v16682_v36, %v19437_v13 }
 0x332   : > { %19438 = vst [vmem:[#allocation24_spill] sm:$0xff] %v16648_v61  ;;  %6985 = vrot.lane.b32.xlu0 %v16648_v61, %s13645_s15  ;;  %7209 = vrot.lane.b32.xlu1 %v16648_v61, %s13646_s17  ;;  %19440 = vst [vmem:[#allocation26_spill] sm:$0xff] %v16662_v6  ;;  %v5758_v28 = vpop.f32.mrb[4].mxu1  ;;  %v6148_v1 = vmul.f32 %v6080_v4, %v6053_v23  ;;  %v6748_v23 = vrot.slane %v16694_v57, %v19436_v33 }
 0x333   : > { %v16666_v42 = vpop.f32.mrb[5].mxu1  ;;  %v5951_v44 = vmul.f32 0.1, %v5758_v28  ;;  %vm5935_vm11 = vcmp.gt.f32.partialorder %v5758_v28, 0.0 }
 0x334   : > { %v6238_v60 = vpop.permute.xlu0 %6237  ;;  %v5762_v18 = vpop.f32.mrb[6].mxu1  ;;  %vm5936_vm6 = vcmp.gt.f32.partialorder %v16666_v42, 0.0 }
 0x335   : > { %v4999_v24 = vld [vmem:[#allocation3 + $0x370] sm:$0x77]  ;;  %v5000_v39 = vld [vmem:[#allocation3 + $0x378] sm:$0x77]  ;;  %v6277_v63 = vsel %vm1347_vm2, %v6238_v60, %v16662_v6  ;;  %v6278_v59 = vsel %vm1347_vm2, %v16638_v27, %v6238_v60  ;;  %v6462_v2 = vpop.permute.xlu1 %6461  ;;  %v5763_v3 = vpop.f32.mrb[7].mxu1  ;;  %v16724_v14 = vsel %vm5935_vm11, %v5758_v28, %v5951_v44 }
 0x336   : > { %7207 = vrot.lane.b32.xlu0 %v19441_v31, %s13646_s17  ;;  %7431 = vrot.lane.b32.xlu1 %v19441_v31, %s13647_s18  ;;  %v12487_v17 = vcombine.low %v4991_v7, %v4999_v24  ;;  %v12488_v10 = vcombine.high %v4991_v7, %v4999_v24  ;;  %v12489_v54 = vcombine.low %v4992_v38, %v5000_v39  ;;  %v5952_v60 = vmul.f32 0.1, %v16666_v42  ;;  %v7249_v3 = vld [vmem:[#allocation11 + $0x5] ss:$8 sm:$0xf] }
 0x337   : > { %v12490_v41 = vcombine.high %v4992_v38, %v5000_v39  ;;  %v6371_v20 = vmul.f32 %v6300_v19, %v6278_v59  ;;  %v6372_v45 = vmul.f32 %v6304_v43, %v6277_v63  ;;  %v7025_v59 = vld [vmem:[#allocation11 + $0x4] ss:$8 sm:$0xf] }
 0x338   : > { %v5593_v8 = vand.u32 %v12488_v10, %v15313_v32  ;;  %v5590_v9 = vand.u32 %v12487_v17, %v15313_v32  ;;  %v5596_v34 = vand.u32 %v12489_v54, %v15313_v32  ;;  %v16688_v16 = vpop.permute.xlu0 %6459 }
 0x339   : > { %v5599_v0 = vand.u32 %v12490_v41, %v15313_v32  ;;  %v16698_v55 = vpop.permute.xlu1 %6683  ;;  %v6502_v62 = vsel %vm1574_vm3, %v16688_v16, %v6462_v2  ;;  %v13357_v5 = vpack.c.bf16 %v6372_v45, %v6148_v1  ;;  %v13358_v30 = vpack.c.bf16 %v6371_v20, %v16664_v29 }
 0x33a   : > { %7429 = vrot.lane.b32.xlu0 %v16242_v56, %s13647_s18  ;;  %7653 = vrot.lane.b32.xlu1 %v16242_v56, %s19382_s1  ;;  %v6595_v29 = vmul.f32 %v6524_v47, %v6502_v62 }
 0x33b   : > { %5859 = vmatprep.subr.bf16.mxu0 %v5593_v8  ;;  %5900 = vmatprep.subr.bf16.mxu1 %v5599_v0  ;;  %v7250_v8 = vld [vmem:[#allocation11 + $0x5] ss:$8 sm:$0xf0] }
 0x33c   : > { %5860 = vmatpush1.bf16.msra.mxu0 %v5590_v9  ;;  %5901 = vmatpush1.bf16.msra.mxu1 %v5596_v34  ;;  %v16705_v4 = vpop.permute.xlu0 %6463  ;;  %v7473_v9 = vld [vmem:[#allocation11 + $0x6] ss:$8 sm:$0xf]  ;;  %v16797_v47 = vor.u32 %v7250_v8, %v7249_v3 }
 0x33d   : > { %19442 = vst [vmem:[#allocation25_spill] sm:$0xff] %v16705_v4  ;;  %v6501_v37 = vsel %vm1574_vm3, %v6462_v2, %v16705_v4  ;;  %8622 = vmatprep.subr.bf16.mxu1 %v13357_v5  ;;  %v16728_v19 = vpop.permute.xlu1 %6687  ;;  %v7026_v2 = vld [vmem:[#allocation11 + $0x4] ss:$8 sm:$0xf0] }
 0x33e   : > { %7433 = vrot.lane.b32.xlu0 %v16648_v61, %s13647_s18  ;;  %7657 = vrot.lane.b32.xlu1 %v16648_v61, %s19382_s1  ;;  %v6596_v1 = vmul.f32 %v6528_v25, %v6501_v37  ;;  %19443 = vst [vmem:[#allocation28_spill] sm:$0xff] %v16728_v19  ;;  %v16777_v18 = vor.u32 %v7026_v2, %v7025_v59  ;;  %v7474_v34 = vld [vmem:[#allocation11 + $0x6] ss:$8 sm:$0xf0]  ;;  %19448 = vst [vmem:[#allocation34_spill] sm:$0xff] %v16797_v47 }
 0x33f   : > { %12497 = vmatmul.mubr.msk.bf16.vlgmr.msra.gmra.mrb[12].mxu0 %vm5545_vm7, %v16377_v51  ;;  %12498 = vmatmul.mubr.msk.bf16.vlgmr.msra.gmra.mrb[12].mxu1 %vm5545_vm7, %v16377_v51  ;;  %v16734_v51 = vsel %vm5934_vm5, %v16640_v46, %v5950_v48  ;;  %v16751_v46 = vsel %vm5936_vm6, %v16666_v42, %v5952_v60  ;;  %v16799_v5 = vor.u32 %v7474_v34, %v7473_v9  ;;  %v6284_v4 = vld [vmem:[#allocation11 + $0x41] ss:$8 sm:$0xf] }
 0x340   : > { %8654 = vmatprep.mubr.bf16.mxu1 %v19396_v15  ;;  %v6686_v43 = vpop.permute.xlu0 %6685  ;;  %8623 = vmatpush1.bf16.msra.mxu1 %v13358_v30  ;;  %19444 = vst [vmem:[#allocation29_spill] sm:$0xff] %v16734_v51  ;;  %19445 = vst [vmem:[#allocation35_spill] sm:$0xff] %v16777_v18  ;;  %v7044_v54 = vrot.slane %v16777_v18, %v19436_v33  ;;  %v7048_v35 = vrot.slane %v16777_v18, %v19437_v13 }
 0x341   : > { %8613 = vmatprep.mubr.bf16.mxu0 %v19396_v15  ;;  %v6725_v28 = vsel %vm1801_vm4, %v6686_v43, %v16728_v19  ;;  %v6726_v7 = vsel %vm1801_vm4, %v16698_v55, %v6686_v43  ;;  %v6984_v42 = vpop.permute.xlu1 %6983  ;;  %v7268_v37 = vrot.slane %v16797_v47, %v19436_v33 }
 0x342   : > { %7655 = vrot.lane.b32.xlu0 %v19441_v31, %s19382_s1  ;;  %6021 = vrot.lane.b32.xlu1 %v16724_v14, %s19384_s11  ;;  %v6819_v24 = vmul.f32 %v6748_v23, %v6726_v7  ;;  %v6820_v38 = vmul.f32 %v6752_v58, %v6725_v28  ;;  %v7272_v23 = vrot.slane %v16797_v47, %v19437_v13  ;;  %v7697_v58 = vld [vmem:[#allocation11 + $0x7] ss:$8 sm:$0xf] }
 0x344   : > { %v13359_v39 = vpack.c.bf16 %v6820_v38, %v6596_v1  ;;  %v13360_v63 = vpack.c.bf16 %v6819_v24, %v6595_v29  ;;  %v16779_v17 = vpop.permute.xlu0 %6981  ;;  %v7698_v29 = vld [vmem:[#allocation11 + $0x7] ss:$8 sm:$0xf0]  ;;  %v7496_v24 = vrot.slane %v16799_v5, %v19437_v13 }
 0x345   : > { %v16781_v10 = vpop.permute.xlu1 %7205  ;;  %v7021_v41 = vsel %vm2100_vm12, %v16779_v17, %v6984_v42  ;;  %v16824_v38 = vor.u32 %v7698_v29, %v7697_v58 }
 0x346   : > { %6243 = vrot.lane.b32.xlu1 %v16734_v51, %s13642_s30  ;;  %6019 = vrot.lane.b32.xlu0 %v16734_v51, %s19384_s11  ;;  %v7115_v11 = vmul.f32 %v7044_v54, %v7021_v41 }
 0x347   : > { %8624 = vmatprep.subr.bf16.mxu1 %v13359_v39  ;;  %v7720_v9 = vrot.slane %v16824_v38, %v19437_v13 }
 0x348   : > { %8625 = vmatpush1.bf16.msra.mxu1 %v13360_v63  ;;  %v13362_v48 = vpack.c.bf16 %v7115_v11, %v16242_v56 }
 0x34a   : > { %6247 = vrot.lane.b32.xlu1 %v16751_v46, %s13642_s30  ;;  %6023 = vrot.lane.b32.xlu0 %v16751_v46, %s19384_s11 }
 0x34e   : > { %6469 = vrot.lane.b32.xlu1 %v16724_v14, %s19351_s2  ;;  %6245 = vrot.lane.b32.xlu0 %v16724_v14, %s13642_s30 }
 0x352   : > { %6691 = vrot.lane.b32.xlu1 %v16734_v51, %s13644_s10  ;;  %6467 = vrot.lane.b32.xlu0 %v16734_v51, %s19351_s2 }
 0x356   : > { %6695 = vrot.lane.b32.xlu1 %v16751_v46, %s13644_s10  ;;  %6471 = vrot.lane.b32.xlu0 %v16751_v46, %s19351_s2 }
 0x35a   : > { %6991 = vrot.lane.b32.xlu1 %v16751_v46, %s13645_s15  ;;  %6693 = vrot.lane.b32.xlu0 %v16724_v14, %s13644_s10 }
 0x35e   : > { %7213 = vrot.lane.b32.xlu1 %v16724_v14, %s13646_s17  ;;  %6989 = vrot.lane.b32.xlu0 %v16724_v14, %s13645_s15 }
 0x3a4   : > { %v16790_v20 = vpop.permute.xlu0 %6985  ;;  %v16792_v45 = vpop.permute.xlu1 %7209 }
 0x3a5   : > { %19446 = vst [vmem:[#allocation30_spill] sm:$0xff] %v16790_v20  ;;  %19447 = vst [vmem:[#allocation31_spill] sm:$0xff] %v16792_v45  ;;  %v7020_v0 = vsel %vm2100_vm12, %v6984_v42, %v16790_v20 }
 0x3a6   : > { %v7116_v44 = vmul.f32 %v7048_v35, %v7020_v0  ;;  %v7716_v0 = vrot.slane %v16824_v38, %v19436_v33 }
 0x3a8   : > { %v7208_v25 = vpop.permute.xlu0 %7207  ;;  %v7432_v62 = vpop.permute.xlu1 %7431  ;;  %v13361_v30 = vpack.c.bf16 %v7116_v44, %v19441_v31  ;;  %v7492_v31 = vrot.slane %v16799_v5, %v19436_v33 }
 0x3a9   : > { %v7244_v1 = vsel %vm2327_vm13, %v7208_v25, %v16792_v45  ;;  %v7245_v43 = vsel %vm2327_vm13, %v16781_v10, %v7208_v25 }
 0x3aa   : > { %8626 = vmatprep.subr.bf16.mxu1 %v13361_v30  ;;  %v7339_v63 = vmul.f32 %v7268_v37, %v7245_v43  ;;  %v7340_v42 = vmul.f32 %v7272_v23, %v7244_v1 }
 0x3ab   : > { %8627 = vmatpush1.bf16.msra.mxu1 %v13362_v48 }
 0x3ac   : > { %v16815_v56 = vpop.permute.xlu0 %7429  ;;  %v16817_v28 = vpop.permute.xlu1 %7653 }
 0x3ad   : > { %v7469_v7 = vsel %vm2554_vm14, %v16815_v56, %v7432_v62  ;;  %v5799_v60 = vpop.f32.mrb[8].mxu0 }
 0x3ae   : > { %vm5937_vm0 = vcmp.gt.f32.partialorder %v5799_v60, 0.0  ;;  %v5953_v39 = vmul.f32 0.1, %v5799_v60  ;;  %v16826_v59 = vpop.f32.mrb[9].mxu0  ;;  %v7563_v2 = vmul.f32 %v7492_v31, %v7469_v7 }
 0x3af   : > { %v5803_v3 = vpop.f32.mrb[10].mxu0  ;;  %vm5938_vm9 = vcmp.gt.f32.partialorder %v16826_v59, 0.0 }
 0x3b0   : > { %v16828_v54 = vpop.permute.xlu0 %7433  ;;  %v16830_v41 = vsel %vm5937_vm0, %v5799_v60, %v5953_v39  ;;  %v16835_v11 = vpop.permute.xlu1 %7657  ;;  %v13364_v31 = vpack.c.bf16 %v7563_v2, %v7339_v63  ;;  %v7955_v3 = vld [vmem:[#allocation3 + $0x288] sm:$0xff]  ;;  %v6096_v63 = vrot.slane %v16634_v40, %v15290_v21 }
 0x3b1   : > { %19449 = vst [vmem:[#allocation40_spill] sm:$0xff] %v16828_v54  ;;  %19450 = vst [vmem:[#allocation33_spill] sm:$0xff] %v16830_v41  ;;  %v7468_v35 = vsel %vm2554_vm14, %v7432_v62, %v16828_v54  ;;  %7217 = vrot.lane.b32.xlu1 %v16830_v41, %s13646_s17  ;;  %6993 = vrot.lane.b32.xlu0 %v16830_v41, %s13645_s15  ;;  %v5840_v34 = vpop.f32.mrb[8].mxu1  ;;  %v5804_v44 = vpop.f32.mrb[11].mxu0 }
 0x3b2   : > { %19451 = vst [vmem:[#allocation43_spill] sm:$0xff] %v16835_v11  ;;  %v7564_v8 = vmul.f32 %v7496_v24, %v7468_v35  ;;  %v16845_v25 = vpop.f32.mrb[9].mxu1  ;;  %v7947_v24 = vld [vmem:[#allocation3 + $0x248] sm:$0xff]  ;;  %v5955_v2 = vmul.f32 0.1, %v5840_v34  ;;  %vm5939_vm8 = vcmp.gt.f32.partialorder %v5840_v34, 0.0 }
 0x3b3   : > { %v5844_v30 = vpop.f32.mrb[10].mxu1  ;;  %v7963_v44 = vld [vmem:[#allocation3 + $0x2c8] sm:$0xff]  ;;  %vm5940_vm10 = vcmp.gt.f32.partialorder %v16845_v25, 0.0 }
 0x3b4   : > { %v7656_v62 = vpop.permute.xlu0 %7655  ;;  %v5845_v23 = vpop.f32.mrb[11].mxu1  ;;  %v13363_v43 = vpack.c.bf16 %v7564_v8, %v7340_v42  ;;  %v6092_v42 = vrot.slane %v16634_v40, %v15281_v12 }
 0x3b5   : > { %v7692_v48 = vsel %vm2781_vm15, %v7656_v62, %v16835_v11  ;;  %v7693_v37 = vsel %vm2781_vm15, %v16817_v28, %v7656_v62  ;;  %v6022_v58 = vpop.permute.xlu1 %6021  ;;  %7439 = vrot.lane.b32.xlu1 %v16751_v46, %s13647_s18  ;;  %7215 = vrot.lane.b32.xlu0 %v16751_v46, %s13646_s17  ;;  %v7971_v62 = vld [vmem:[#allocation3 + $0x308] sm:$0xff] }
 0x3b6   : > { %v7787_v29 = vmul.f32 %v7716_v0, %v7693_v37  ;;  %v7788_v1 = vmul.f32 %v7720_v9, %v7692_v48  ;;  %8628 = vmatprep.subr.bf16.mxu1 %v13363_v43  ;;  %v7979_v0 = vld [vmem:[#allocation3 + $0x348] sm:$0x77]  ;;  %v12654_v48 = vcombine.high %v7955_v3, %v7963_v44 }
 0x3b7   : > { %8629 = vmatpush1.bf16.msra.mxu1 %v13364_v31  ;;  %v12670_v37 = vcombine.high %v7971_v62, %v7979_v0  ;;  %v12669_v54 = vcombine.low %v7971_v62, %v7979_v0  ;;  %v6544_v62 = vrot.slane %v16682_v36, %v15290_v21 }
 0x3b8   : > { %v13098_v7 = vpack.c.bf16 %v7788_v1, %v7787_v29  ;;  %v16857_v60 = vpop.permute.xlu0 %6019  ;;  %v6316_v1 = vrot.slane %v16646_v22, %v15281_v12 }
 0x3b9   : > { %19452 = vst [vmem:[#allocation32_spill] sm:$0xff] %v16857_v60  ;;  %v16859_v39 = vpop.permute.xlu1 %6243  ;;  %7661 = vrot.lane.b32.xlu1 %v16724_v14, %s19382_s1  ;;  %7437 = vrot.lane.b32.xlu0 %v16724_v14, %s13647_s18  ;;  %v6050_v9 = vsel %vm1121_vm1, %v16857_v60, %v6022_v58  ;;  %v8543_v11 = vand.u32 %v12670_v37, %v15313_v32  ;;  %v16931_v37 = vld [vmem:[%s19165_s5] sm:$0xf] }
 0x3ba   : > { %v12638_v35 = vcombine.high %v13098_v7, %v7947_v24  ;;  %v12637_v8 = vcombine.low %v13098_v7, %v7947_v24  ;;  %v6151_v43 = vmul.f32 %v6092_v42, %v6050_v9  ;;  %v6320_v7 = vrot.slane %v16646_v22, %v15290_v21 }
 0x3bb   : > { %v16887_v24 = vsel %vm5939_vm8, %v5840_v34, %v5955_v2  ;;  %v5956_v2 = vmul.f32 0.1, %v16845_v25  ;;  %v8540_v9 = vand.u32 %v12669_v54, %v15313_v32 }
 0x3bc   : > { %8630 = vmatprep.subr.bf16.mxu1 %v12638_v35  ;;  %v16872_v30 = vpop.permute.xlu0 %6023  ;;  %v5954_v35 = vmul.f32 0.1, %v16826_v59 }
 0x3bd   : > { %19453 = vst [vmem:[#allocation27_spill] sm:$0xff] %v16872_v30  ;;  %v16874_v23 = vpop.permute.xlu1 %6247  ;;  %v6049_v29 = vsel %vm1121_vm1, %v6022_v58, %v16872_v30  ;;  %7665 = vrot.lane.b32.xlu1 %v16830_v41, %s19382_s1  ;;  %7441 = vrot.lane.b32.xlu0 %v16830_v41, %s13647_s18  ;;  %v12653_v58 = vcombine.low %v7955_v3, %v7963_v44 }
 0x3be   : > { %19454 = vst [vmem:[#allocation37_spill] sm:$0xff] %v16874_v23  ;;  %v6152_v31 = vmul.f32 %v6096_v63, %v6049_v29  ;;  %8631 = vmatpush1.bf16.msra.mxu1 %v12637_v8  ;;  %v16903_v0 = vsel %vm5938_vm9, %v16826_v59, %v5954_v35  ;;  %v6540_v59 = vrot.slane %v16682_v36, %v15281_v12 }
 0x3bf   : > { %8632 = vmatprep.subr.bf16.mxu1 %v12654_v48  ;;  %19455 = vst [vmem:[#allocation36_spill] sm:$0xff] %v16903_v0  ;;  %v6768_v35 = vrot.slane %v16694_v57, %v15290_v21 }
 0x3c0   : > { %v6246_v30 = vpop.permute.xlu0 %6245 }
 0x3c1   : > { %v6470_v20 = vpop.permute.xlu1 %6469  ;;  %v6273_v42 = vsel %vm1347_vm2, %v6246_v30, %v16874_v23  ;;  %v6274_v34 = vsel %vm1347_vm2, %v16859_v39, %v6246_v30  ;;  %6029 = vrot.lane.b32.xlu1 %v16887_v24, %s19384_s11  ;;  %7663 = vrot.lane.b32.xlu0 %v16751_v46, %s19382_s1 }
 0x3c2   : > { %v6375_v3 = vmul.f32 %v6316_v1, %v6274_v34  ;;  %v6376_v63 = vmul.f32 %v6320_v7, %v6273_v42  ;;  %8633 = vmatpush1.bf16.msra.mxu1 %v12653_v58 }
 0x3c3   : > { %8634 = vmatprep.subr.bf16.mxu1 %v8543_v11  ;;  %v16921_v11 = vsel %vm5940_vm10, %v16845_v25, %v5956_v2  ;;  %v6764_v25 = vrot.slane %v16694_v57, %v15281_v12 }
 0x3c4   : > { %v16907_v8 = vpop.permute.xlu0 %6467  ;;  %v13365_v30 = vpack.c.bf16 %v6376_v63, %v6152_v31  ;;  %v13366_v29 = vpack.c.bf16 %v6375_v3, %v6151_v43 }
 0x3c5   : > { %19456 = vst [vmem:[#allocation39_spill] sm:$0xff] %v16907_v8  ;;  %6251 = vrot.lane.b32.xlu1 %v16903_v0, %s13642_s30  ;;  %6027 = vrot.lane.b32.xlu0 %v16903_v0, %s19384_s11  ;;  %v16914_v44 = vpop.permute.xlu1 %6691  ;;  %v6498_v54 = vsel %vm1574_vm3, %v16907_v8, %v6470_v20  ;;  %v6285_v8 = vld [vmem:[#allocation11 + $0x41] ss:$8 sm:$0xf0] }
 0x3c6   : > { %19457 = vst [vmem:[#allocation38_spill] sm:$0xff] %v16914_v44  ;;  %8635 = vmatpush1.bf16.msra.mxu1 %v8540_v9  ;;  %v6599_v31 = vmul.f32 %v6540_v59, %v6498_v54  ;;  %v19460_v9 = vld [vmem:[#allocation44_spill] sm:$0xff] }
 0x3c7   : > { %8704 = vmatprep.subr.bf16.mxu1 %v13365_v30  ;;  %v5945_v59 = vmul.f32 0.1, %v19460_v9  ;;  %vm5929_vm11 = vcmp.gt.f32.partialorder %v19460_v9, 0.0 }
 0x3c8   : > { %v16926_v48 = vpop.permute.xlu0 %6471 }
 0x3c9   : > { %19458 = vst [vmem:[#allocation41_spill] sm:$0xff] %v16926_v48  ;;  %v6497_v1 = vsel %vm1574_vm3, %v6470_v20, %v16926_v48  ;;  %6255 = vrot.lane.b32.xlu1 %v16921_v11, %s13642_s30  ;;  %6031 = vrot.lane.b32.xlu0 %v16921_v11, %s19384_s11  ;;  %v16946_v43 = vpop.permute.xlu1 %6695  ;;  %v7508_v48 = vrot.slane %v16799_v5, %v15281_v12 }
 0x3ca   : > { %v6600_v7 = vmul.f32 %v6544_v62, %v6497_v1  ;;  %12684 = vmatmul.mubr.msk.bf16.vlgmr.msra.gmra.mrb[16].mxu1 %vm5545_vm7, %v16931_v37  ;;  %19459 = vst [vmem:[#allocation42_spill] sm:$0xff] %v16946_v43  ;;  %v16974_v62 = vsel %vm5929_vm11, %v19460_v9, %v5945_v59  ;;  %v7060_v9 = vrot.slane %v16777_v18, %v15281_v12 }
 0x3cb   : > { %8705 = vmatpush1.bf16.msra.mxu1 %v13366_v29  ;;  %8736 = vmatprep.mubr.bf16.mxu1 %v19396_v15 }
 0x3cc   : > { %v6694_v20 = vpop.permute.xlu0 %6693 }
 0x3cd   : > { %v6721_v58 = vsel %vm1801_vm4, %v6694_v20, %v16946_v43  ;;  %v6722_v42 = vsel %vm1801_vm4, %v16914_v44, %v6694_v20  ;;  %6477 = vrot.lane.b32.xlu1 %v16887_v24, %s19351_s2  ;;  %6253 = vrot.lane.b32.xlu0 %v16887_v24, %s13642_s30 }
 0x3ce   : > { %v6823_v34 = vmul.f32 %v6764_v25, %v6722_v42  ;;  %v6824_v3 = vmul.f32 %v6768_v35, %v6721_v58 }
 0x3d0   : > { %v13367_v63 = vpack.c.bf16 %v6824_v3, %v6600_v7  ;;  %v13368_v2 = vpack.c.bf16 %v6823_v34, %v6599_v31  ;;  %v6992_v34 = vpop.permute.xlu1 %6991 }
 0x3d1   : > { %6699 = vrot.lane.b32.xlu1 %v16903_v0, %s13644_s10  ;;  %6475 = vrot.lane.b32.xlu0 %v16903_v0, %s19351_s2 }
 0x3d2   : > { %8706 = vmatprep.subr.bf16.mxu1 %v13367_v63 }
 0x3d3   : > { %8707 = vmatpush1.bf16.msra.mxu1 %v13368_v2  ;;  %v17006_v2 = vpop.permute.xlu0 %6989 }
 0x3d4   : > { %v17004_v63 = vpop.permute.xlu1 %7213  ;;  %19463 = vst [vmem:[#allocation51_spill] sm:$0xff] %v17006_v2  ;;  %v7017_v59 = vsel %vm2100_vm12, %v17006_v2, %v6992_v34  ;;  %v19468_v2 = vld [vmem:[#allocation49_spill] sm:$0xff] }
 0x3d5   : > { %6703 = vrot.lane.b32.xlu1 %v16921_v11, %s13644_s10  ;;  %6479 = vrot.lane.b32.xlu0 %v16921_v11, %s19351_s2  ;;  %19462 = vst [vmem:[#allocation44_spill] sm:$0xff] %v17004_v63 }
 0x3d9   : > { %6999 = vrot.lane.b32.xlu1 %v16921_v11, %s13645_s15  ;;  %6701 = vrot.lane.b32.xlu0 %v16887_v24, %s13644_s10 }
 0x3dd   : > { %6009 = vrot.lane.b32.xlu1 %v16974_v62, %s19384_s11  ;;  %6997 = vrot.lane.b32.xlu0 %v16887_v24, %s13645_s15 }
 0x3e1   : > { %6233 = vrot.lane.b32.xlu1 %v16974_v62, %s13642_s30 }
 0x3e5   : > { %7221 = vrot.lane.b32.xlu1 %v16887_v24, %s13646_s17 }
 0x412   : > { %v5881_v30 = vpop.f32.mrb[12].mxu0  ;;  %v16984_v54 = vpop.f32.mrb[12].mxu1 }
 0x413   : > { %vm5941_vm5 = vcmp.gt.f32.partialorder %v5881_v30, 0.0  ;;  %v5957_v29 = vmul.f32 0.1, %v5881_v30  ;;  %v16986_v1 = vpop.f32.mrb[13].mxu0  ;;  %v5924_v25 = vpop.f32.mrb[13].mxu1  ;;  %vm5943_vm0 = vcmp.gt.f32.partialorder %v16984_v54, 0.0 }
 0x414   : > { %v5926_v7 = vpop.f32.mrb[14].mxu1  ;;  %v5885_v35 = vpop.f32.mrb[14].mxu0  ;;  %vm5944_vm6 = vcmp.gt.f32.partialorder %v5924_v25, 0.0  ;;  %v5960_v20 = vmul.f32 0.1, %v5924_v25  ;;  %vm5942_vm8 = vcmp.gt.f32.partialorder %v16986_v1, 0.0 }
 0x415   : > { %v16988_v31 = vsel %vm5941_vm5, %v5881_v30, %v5957_v29  ;;  %v5886_v58 = vpop.f32.mrb[15].mxu0  ;;  %v5927_v42 = vpop.f32.mrb[15].mxu1  ;;  %v7064_v30 = vrot.slane %v16777_v18, %v15290_v21  ;;  %v7119_v29 = vmul.f32 %v7060_v9, %v7017_v59  ;;  %v7284_v9 = vrot.slane %v16797_v47, %v15281_v12 }
 0x416   : > { %19461 = vst [vmem:[#allocation50_spill] sm:$0xff] %v16988_v31  ;;  %7225 = vrot.lane.b32.xlu1 %v16988_v31, %s13646_s17  ;;  %7001 = vrot.lane.b32.xlu0 %v16988_v31, %s13645_s15  ;;  %v16994_v3 = vsel %vm5944_vm6, %v5924_v25, %v5960_v20  ;;  %v7288_v59 = vrot.slane %v16797_v47, %v15290_v21 }
 0x41a   : > { %7447 = vrot.lane.b32.xlu1 %v16921_v11, %s13647_s18  ;;  %6039 = vrot.lane.b32.xlu0 %v16994_v3, %s19384_s11 }
 0x41e   : > { %6457 = vrot.lane.b32.xlu1 %v16974_v62, %s19351_s2  ;;  %6263 = vrot.lane.b32.xlu0 %v16994_v3, %s13642_s30 }
 0x422   : > { %6681 = vrot.lane.b32.xlu1 %v16974_v62, %s13644_s10  ;;  %7223 = vrot.lane.b32.xlu0 %v16921_v11, %s13646_s17 }
 0x423   : > { %v17019_v25 = vpop.permute.xlu1 %7217  ;;  %v17021_v7 = vpop.permute.xlu0 %6993 }
 0x424   : > { %19464 = vst [vmem:[#allocation52_spill] sm:$0xff] %v17019_v25  ;;  %19465 = vst [vmem:[#allocation53_spill] sm:$0xff] %v17021_v7  ;;  %v7016_v35 = vsel %vm2100_vm12, %v6992_v34, %v17021_v7  ;;  %v13370_v7 = vpack.c.bf16 %v7119_v29, %v16724_v14  ;;  %v7512_v14 = vrot.slane %v16799_v5, %v15290_v21 }
 0x425   : > { %v7120_v20 = vmul.f32 %v7064_v30, %v7016_v35 }
 0x426   : > { %7669 = vrot.lane.b32.xlu1 %v16887_v24, %s19382_s1  ;;  %7445 = vrot.lane.b32.xlu0 %v16887_v24, %s13647_s18 }
 0x427   : > { %v7440_v58 = vpop.permute.xlu1 %7439  ;;  %v7216_v42 = vpop.permute.xlu0 %7215  ;;  %v13369_v34 = vpack.c.bf16 %v7120_v20, %v16751_v46 }
 0x428   : > { %v7240_v30 = vsel %vm2327_vm13, %v7216_v42, %v17019_v25  ;;  %v7241_v35 = vsel %vm2327_vm13, %v17004_v63, %v7216_v42 }
 0x429   : > { %8708 = vmatprep.subr.bf16.mxu1 %v13369_v34  ;;  %v7343_v20 = vmul.f32 %v7284_v9, %v7241_v35  ;;  %v7344_v25 = vmul.f32 %v7288_v59, %v7240_v30  ;;  %v7732_v9 = vrot.slane %v16824_v38, %v15281_v12  ;;  %v6060_v30 = vld [vmem:[#allocation11 + $0x40] ss:$8 sm:$0xf] }
 0x42a   : > { %7673 = vrot.lane.b32.xlu1 %v16988_v31, %s19382_s1  ;;  %7449 = vrot.lane.b32.xlu0 %v16988_v31, %s13647_s18  ;;  %v6061_v35 = vld [vmem:[#allocation11 + $0x40] ss:$8 sm:$0xf0] }
 0x42b   : > { %v17046_v43 = vpop.permute.xlu1 %7661  ;;  %v17050_v23 = vpop.permute.xlu0 %7437  ;;  %8709 = vmatpush1.bf16.msra.mxu1 %v13370_v7 }
 0x42c   : > { %19466 = vst [vmem:[#allocation54_spill] sm:$0xff] %v17046_v43  ;;  %19467 = vst [vmem:[#allocation55_spill] sm:$0xff] %v17050_v23  ;;  %v7465_v46 = vsel %vm2554_vm14, %v17050_v23, %v7440_v58 }
 0x42d   : > { %v7567_v29 = vmul.f32 %v7508_v48, %v7465_v46  ;;  %v7736_v48 = vrot.slane %v16824_v38, %v15290_v21 }
 0x42e   : > { %6979 = vrot.lane.b32.xlu1 %v19468_v2, %s13645_s15  ;;  %6487 = vrot.lane.b32.xlu0 %v16994_v3, %s19351_s2 }
 0x42f   : > { %v17061_v42 = vpop.permute.xlu1 %7665  ;;  %v17063_v34 = vpop.permute.xlu0 %7441  ;;  %v13372_v19 = vpack.c.bf16 %v7567_v29, %v7343_v20 }
 0x430   : > { %19469 = vst [vmem:[#allocation49_spill] sm:$0xff] %v17061_v42  ;;  %19470 = vst [vmem:[#allocation56_spill] sm:$0xff] %v17063_v34  ;;  %v7464_v7 = vsel %vm2554_vm14, %v7440_v58, %v17063_v34 }
 0x431   : > { %v7568_v59 = vmul.f32 %v7512_v14, %v7464_v7  ;;  %v17082_v7 = vor.u32 %v6061_v35, %v6060_v30  ;;  %v7957_v30 = vld [vmem:[#allocation3 + $0x298] sm:$0xff]  ;;  %v17095_v35 = vor.u32 %v6285_v8, %v6284_v4 }
 0x432   : > { %7203 = vrot.lane.b32.xlu1 %v19468_v2, %s13646_s17  ;;  %6711 = vrot.lane.b32.xlu0 %v16994_v3, %s13644_s10  ;;  %v7965_v4 = vld [vmem:[#allocation3 + $0x2d8] sm:$0xff] }
 0x433   : > { %v6030_v46 = vpop.permute.xlu1 %6029  ;;  %v7664_v23 = vpop.permute.xlu0 %7663  ;;  %v13371_v63 = vpack.c.bf16 %v7568_v59, %v7344_v25  ;;  %v7981_v25 = vld [vmem:[#allocation3 + $0x358] sm:$0x77] }
 0x434   : > { %v7688_v58 = vsel %vm2781_vm15, %v7664_v23, %v17061_v42  ;;  %v7689_v14 = vsel %vm2781_vm15, %v17046_v43, %v7664_v23  ;;  %v5959_v23 = vmul.f32 0.1, %v16984_v54  ;;  %v7973_v59 = vld [vmem:[#allocation3 + $0x318] sm:$0xff]  ;;  %v12657_v43 = vcombine.low %v7957_v30, %v7965_v4 }
 0x435   : > { %v7791_v34 = vmul.f32 %v7732_v9, %v7689_v14  ;;  %v7792_v45 = vmul.f32 %v7736_v48, %v7688_v58  ;;  %8710 = vmatprep.subr.bf16.mxu1 %v13371_v63  ;;  %v6108_v9 = vrot.slane %v17082_v7, %v19436_v33  ;;  %v7949_v48 = vld [vmem:[#allocation3 + $0x258] sm:$0xff]  ;;  %v6332_v14 = vrot.slane %v17095_v35, %v19436_v33 }
 0x436   : > { %7427 = vrot.lane.b32.xlu1 %v19468_v2, %s13647_s18  ;;  %7671 = vrot.lane.b32.xlu0 %v16921_v11, %s19382_s1  ;;  %v17112_v58 = vsel %vm5943_vm0, %v16984_v54, %v5959_v23  ;;  %v6336_v54 = vrot.slane %v17095_v35, %v19437_v13  ;;  %v6508_v23 = vld [vmem:[#allocation11 + $0x42] ss:$8 sm:$0xf] }
 0x437   : > { %v13100_v44 = vpack.c.bf16 %v7792_v45, %v7791_v34  ;;  %v17088_v42 = vpop.permute.xlu1 %6251  ;;  %v17090_v52 = vpop.permute.xlu0 %6027  ;;  %8711 = vmatpush1.bf16.msra.mxu1 %v13372_v19  ;;  %v6112_v19 = vrot.slane %v17082_v7, %v19437_v13  ;;  %v12658_v34 = vcombine.high %v7957_v30, %v7965_v4  ;;  %v6733_v4 = vld [vmem:[#allocation11 + $0x43] ss:$8 sm:$0xf0] }
 0x438   : > { %19471 = vst [vmem:[#allocation57_spill] sm:$0xff] %v17088_v42  ;;  %19472 = vst [vmem:[#allocation58_spill] sm:$0xff] %v17090_v52  ;;  %v6046_v20 = vsel %vm1121_vm1, %v17090_v52, %v6030_v46 }
 0x439   : > { %v12641_v45 = vcombine.low %v13100_v44, %v7949_v48  ;;  %v12642_v63 = vcombine.high %v13100_v44, %v7949_v48  ;;  %v12674_v48 = vcombine.high %v7973_v59, %v7981_v25 }
 0x43a   : > { %7651 = vrot.lane.b32.xlu1 %v19468_v2, %s19382_s1  ;;  %6977 = vrot.lane.b32.xlu0 %v16974_v62, %s13645_s15 }
 0x43b   : > { %v17107_v8 = vpop.permute.xlu1 %6255  ;;  %8712 = vmatprep.subr.bf16.mxu1 %v12642_v63  ;;  %v17109_v29 = vpop.permute.xlu0 %6031  ;;  %v6155_v63 = vmul.f32 %v6108_v9, %v6046_v20 }
 0x43c   : > { %19473 = vst [vmem:[#allocation59_spill] sm:$0xff] %v17107_v8  ;;  %19474 = vst [vmem:[#allocation60_spill] sm:$0xff] %v17109_v29  ;;  %8713 = vmatpush1.bf16.msra.mxu1 %v12641_v45  ;;  %v6045_v44 = vsel %vm1121_vm1, %v6030_v46, %v17109_v29  ;;  %v6509_v45 = vld [vmem:[#allocation11 + $0x42] ss:$8 sm:$0xf0]  ;;  %v12673_v46 = vcombine.low %v7973_v59, %v7981_v25 }
 0x43d   : > { %v6156_v52 = vmul.f32 %v6112_v19, %v6045_v44  ;;  %8714 = vmatprep.subr.bf16.mxu1 %v12658_v34  ;;  %v8555_v19 = vand.u32 %v12674_v48, %v15313_v32  ;;  %v17132_v20 = vor.u32 %v6509_v45, %v6508_v23  ;;  %v6732_v25 = vld [vmem:[#allocation11 + $0x43] ss:$8 sm:$0xf] }
 0x43e   : > { %6037 = vrot.lane.b32.xlu1 %v17112_v58, %s19384_s11  ;;  %7201 = vrot.lane.b32.xlu0 %v16974_v62, %s13646_s17  ;;  %v8552_v34 = vand.u32 %v12673_v46, %v15313_v32  ;;  %v17144_v48 = vor.u32 %v6733_v4, %v6732_v25 }
 0x43f   : > { %v6478_v29 = vpop.permute.xlu1 %6477  ;;  %v6254_v60 = vpop.permute.xlu0 %6253  ;;  %v6556_v44 = vrot.slane %v17132_v20, %v19436_v33 }
 0x440   : > { %8715 = vmatpush1.bf16.msra.mxu1 %v12657_v43  ;;  %v6269_v6 = vsel %vm1347_vm2, %v6254_v60, %v17107_v8  ;;  %v6270_v9 = vsel %vm1347_vm2, %v17088_v42, %v6254_v60  ;;  %v5958_v60 = vmul.f32 0.1, %v16986_v1 }
 0x441   : > { %v6379_v30 = vmul.f32 %v6332_v14, %v6270_v9  ;;  %v6380_v43 = vmul.f32 %v6336_v54, %v6269_v6  ;;  %8716 = vmatprep.subr.bf16.mxu1 %v8555_v19  ;;  %v6560_v6 = vrot.slane %v17132_v20, %v19437_v13 }
 0x442   : > { %6261 = vrot.lane.b32.xlu1 %v17112_v58, %s13642_s30  ;;  %7425 = vrot.lane.b32.xlu0 %v16974_v62, %s13647_s18  ;;  %v17163_v9 = vsel %vm5942_vm8, %v16986_v1, %v5958_v60  ;;  %v6784_v1 = vrot.slane %v17144_v48, %v19437_v13 }
 0x443   : > { %v17139_v59 = vpop.permute.xlu0 %6475  ;;  %v17147_v23 = vpop.permute.xlu1 %6699  ;;  %v13373_v14 = vpack.c.bf16 %v6380_v43, %v6156_v52  ;;  %v13374_v54 = vpack.c.bf16 %v6379_v30, %v6155_v63  ;;  %19478 = vst [vmem:[#allocation64_spill] sm:$0xff] %v17163_v9  ;;  %v6780_v52 = vrot.slane %v17144_v48, %v19436_v33 }
 0x444   : > { %19475 = vst [vmem:[#allocation61_spill] sm:$0xff] %v17139_v59  ;;  %8717 = vmatpush1.bf16.msra.mxu1 %v8552_v34  ;;  %19476 = vst [vmem:[#allocation62_spill] sm:$0xff] %v17147_v23  ;;  %v6494_v45 = vsel %vm1574_vm3, %v17139_v59, %v6478_v29 }
 0x445   : > { %8786 = vmatprep.subr.bf16.mxu1 %v13373_v14  ;;  %v6603_v63 = vmul.f32 %v6556_v44, %v6494_v45  ;;  %v7028_v45 = vld [vmem:[#allocation11 + $0x44] ss:$8 sm:$0xf] }
 0x446   : > { %6485 = vrot.lane.b32.xlu1 %v17112_v58, %s19351_s2  ;;  %7649 = vrot.lane.b32.xlu0 %v16974_v62, %s19382_s1 }
 0x447   : > { %v17158_v46 = vpop.permute.xlu0 %6479  ;;  %12686 = vmatmul.mubr.msk.bf16.vlgmr.msra.gmra.mrb[20].mxu1 %vm5545_vm7, %v16931_v37  ;;  %v17177_v43 = vpop.permute.xlu1 %6703 }
 0x448   : > { %19477 = vst [vmem:[#allocation63_spill] sm:$0xff] %v17158_v46  ;;  %v6493_v19 = vsel %vm1574_vm3, %v6478_v29, %v17158_v46  ;;  %8787 = vmatpush1.bf16.msra.mxu1 %v13374_v54  ;;  %8818 = vmatprep.mubr.bf16.mxu1 %v19396_v15  ;;  %19479 = vst [vmem:[#allocation65_spill] sm:$0xff] %v17177_v43 }
 0x449   : > { %v6604_v30 = vmul.f32 %v6560_v6, %v6493_v19  ;;  %v7029_v19 = vld [vmem:[#allocation11 + $0x44] ss:$8 sm:$0xf0] }
 0x44a   : > { %6709 = vrot.lane.b32.xlu1 %v17112_v58, %s13644_s10  ;;  %6035 = vrot.lane.b32.xlu0 %v17163_v9, %s19384_s11 }
 0x44b   : > { %v6702_v29 = vpop.permute.xlu0 %6701  ;;  %v7000_v14 = vpop.permute.xlu1 %6999 }
 0x44c   : > { %v6717_v25 = vsel %vm1801_vm4, %v6702_v29, %v17177_v43  ;;  %v6718_v4 = vsel %vm1801_vm4, %v17147_v23, %v6702_v29  ;;  %v19484_v43 = vld [vmem:[#allocation19_spill] sm:$0xff] }
 0x44d   : > { %v6827_v34 = vmul.f32 %v6780_v52, %v6718_v4  ;;  %v6828_v60 = vmul.f32 %v6784_v1, %v6717_v25  ;;  %v6068_v46 = vrot.slane %v16634_v40, %v19484_v43 }
 0x44e   : > { %7007 = vrot.lane.b32.xlu1 %v16994_v3, %s13645_s15  ;;  %6259 = vrot.lane.b32.xlu0 %v17163_v9, %s13642_s30 }
 0x44f   : > { %v13375_v44 = vpack.c.bf16 %v6828_v60, %v6604_v30  ;;  %v13376_v6 = vpack.c.bf16 %v6827_v34, %v6603_v63  ;;  %v6010_v54 = vpop.permute.xlu1 %6009  ;;  %v17237_v63 = vor.u32 %v7029_v19, %v7028_v45  ;;  %v17245_v1 = vpop.permute.xlu0 %6997 }
 0x450   : > { %19481 = vst [vmem:[#allocation67_spill] sm:$0xff] %v17245_v1  ;;  %v7013_v4 = vsel %vm2100_vm12, %v17245_v1, %v7000_v14 }
 0x451   : > { %8788 = vmatprep.subr.bf16.mxu1 %v13375_v44  ;;  %v7076_v29 = vrot.slane %v17237_v63, %v19436_v33  ;;  %v7080_v25 = vrot.slane %v17237_v63, %v19437_v13 }
 0x452   : > { %6241 = vrot.lane.b32.xlu1 %v16648_v61, %s13642_s30  ;;  %6483 = vrot.lane.b32.xlu0 %v17163_v9, %s19351_s2 }
 0x453   : > { %8789 = vmatpush1.bf16.msra.mxu1 %v13376_v6  ;;  %v6234_v52 = vpop.permute.xlu1 %6233  ;;  %v7123_v6 = vmul.f32 %v7076_v29, %v7013_v4 }
 0x454   : > { %v6279_v1 = vsel %vm1347_vm2, %v6234_v52, %v16638_v27  ;;  %v7477_v27 = vld [vmem:[#allocation11 + $0x46] ss:$8 sm:$0xf0] }
 0x456   : > { %7231 = vrot.lane.b32.xlu1 %v16994_v3, %s13646_s17  ;;  %6707 = vrot.lane.b32.xlu0 %v17163_v9, %s13644_s10 }
 0x457   : > { %v17243_v30 = vpop.permute.xlu1 %7221 }
 0x458   : > { %19480 = vst [vmem:[#allocation66_spill] sm:$0xff] %v17243_v30 }
 0x45a   : > { %7455 = vrot.lane.b32.xlu1 %v16994_v3, %s13647_s18  ;;  %7005 = vrot.lane.b32.xlu0 %v17112_v58, %s13645_s15 }
 0x45e   : > { %6689 = vrot.lane.b32.xlu1 %v16648_v61, %s13644_s10  ;;  %6017 = vrot.lane.b32.xlu0 %v16648_v61, %s19384_s11 }
 0x462   : > { %7679 = vrot.lane.b32.xlu1 %v16994_v3, %s19382_s1  ;;  %7229 = vrot.lane.b32.xlu0 %v17112_v58, %s13646_s17 }
 0x466   : > { %7211 = vrot.lane.b32.xlu1 %v16734_v51, %s13646_s17  ;;  %7453 = vrot.lane.b32.xlu0 %v17112_v58, %s13647_s18 }
 0x46a   : > { %7659 = vrot.lane.b32.xlu1 %v16734_v51, %s19382_s1  ;;  %6465 = vrot.lane.b32.xlu0 %v16648_v61, %s19351_s2 }
 0x46e   : > { %6249 = vrot.lane.b32.xlu1 %v16830_v41, %s13642_s30  ;;  %7677 = vrot.lane.b32.xlu0 %v17112_v58, %s19382_s1 }
 0x472   : > { %6697 = vrot.lane.b32.xlu1 %v16830_v41, %s13644_s10  ;;  %6987 = vrot.lane.b32.xlu0 %v16734_v51, %s13645_s15 }
 0x476   : > { %7219 = vrot.lane.b32.xlu1 %v16903_v0, %s13646_s17  ;;  %7435 = vrot.lane.b32.xlu0 %v16734_v51, %s13647_s18 }
 0x47a   : > { %7667 = vrot.lane.b32.xlu1 %v16903_v0, %s19382_s1  ;;  %6025 = vrot.lane.b32.xlu0 %v16830_v41, %s19384_s11 }
 0x47e   : > { %6257 = vrot.lane.b32.xlu1 %v16988_v31, %s13642_s30  ;;  %6473 = vrot.lane.b32.xlu0 %v16830_v41, %s19351_s2  ;;  %v19485_v41 = vld [vmem:[#allocation20_spill] sm:$0xff] }
 0x47f   : > { %v6296_v29 = vrot.slane %v16646_v22, %v19485_v41 }
 0x482   : > { %6705 = vrot.lane.b32.xlu1 %v16988_v31, %s13644_s10  ;;  %6995 = vrot.lane.b32.xlu0 %v16903_v0, %s13645_s15 }
 0x486   : > { %7227 = vrot.lane.b32.xlu1 %v17163_v9, %s13646_s17  ;;  %7443 = vrot.lane.b32.xlu0 %v16903_v0, %s13647_s18  ;;  %v6072_v0 = vrot.slane %v16634_v40, %v19485_v41 }
 0x488   : > { %v17258_v34 = vpop.permute.xlu1 %7225  ;;  %v17260_v60 = vpop.permute.xlu0 %7001 }
 0x489   : > { %19482 = vst [vmem:[#allocation68_spill] sm:$0xff] %v17258_v34  ;;  %19483 = vst [vmem:[#allocation69_spill] sm:$0xff] %v17260_v60  ;;  %v7012_v44 = vsel %vm2100_vm12, %v7000_v14, %v17260_v60  ;;  %v6055_v60 = vsel %vm1121_vm1, %v6010_v54, %v16636_v53  ;;  %v7476_v53 = vld [vmem:[#allocation11 + $0x46] ss:$8 sm:$0xf] }
 0x48a   : > { %v7124_v45 = vmul.f32 %v7080_v25, %v7012_v44  ;;  %7675 = vrot.lane.b32.xlu1 %v17163_v9, %s19382_s1  ;;  %6033 = vrot.lane.b32.xlu0 %v16988_v31, %s19384_s11  ;;  %v6292_v25 = vrot.slane %v16646_v22, %v19484_v43  ;;  %v13378_v44 = vpack.c.bf16 %v7123_v6, %v16887_v24 }
 0x48b   : > { %v6146_v24 = vmul.f32 %v6072_v0, %v6055_v60  ;;  %v6370_v6 = vmul.f32 %v6296_v29, %v6279_v1 }
 0x48c   : > { %v7448_v19 = vpop.permute.xlu1 %7447  ;;  %v17271_v8 = vpop.permute.xlu0 %6039  ;;  %v13377_v4 = vpack.c.bf16 %v7124_v45, %v16921_v11  ;;  %v7252_v11 = vld [vmem:[#allocation11 + $0x45] ss:$8 sm:$0xf] }
 0x48d   : > { %v6056_v14 = vsel %vm1121_vm1, %v17271_v8, %v6010_v54  ;;  %v7253_v45 = vld [vmem:[#allocation11 + $0x45] ss:$8 sm:$0xf0] }
 0x48e   : > { %6481 = vrot.lane.b32.xlu0 %v16988_v31, %s19351_s2  ;;  %v6145_v23 = vmul.f32 %v6068_v46, %v6056_v14  ;;  %8790 = vmatprep.subr.bf16.mxu1 %v13377_v4  ;;  %v17299_v54 = vor.u32 %v7253_v45, %v7252_v11  ;;  %v17303_v4 = vor.u32 %v7477_v27, %v7476_v53 }
 0x48f   : > { %8791 = vmatpush1.bf16.msra.mxu1 %v13378_v44 }
 0x490   : > { %v6458_v59 = vpop.permute.xlu1 %6457  ;;  %v17292_v42 = vpop.permute.xlu0 %6263  ;;  %v7300_v0 = vrot.slane %v17299_v54, %v19436_v33 }
 0x491   : > { %v6280_v31 = vsel %vm1347_vm2, %v17292_v42, %v6234_v52  ;;  %v13379_v52 = vpack.c.bf16 %v6370_v6, %v6146_v24 }
 0x492   : > { %v6369_v61 = vmul.f32 %v6292_v25, %v6280_v31  ;;  %7003 = vrot.lane.b32.xlu0 %v17163_v9, %s13645_s15  ;;  %v7304_v31 = vrot.slane %v17299_v54, %v19437_v13 }
 0x493   : > { %8581 = vmatprep.subr.bf16.mxu0 %v13379_v52  ;;  %v7701_v52 = vld [vmem:[#allocation11 + $0x47] ss:$8 sm:$0xf0] }
 0x494   : > { %v6682_v46 = vpop.permute.xlu1 %6681  ;;  %v7224_v14 = vpop.permute.xlu0 %7223  ;;  %v13380_v51 = vpack.c.bf16 %v6369_v61, %v6145_v23  ;;  %v7524_v61 = vrot.slane %v17303_v4, %v19436_v33  ;;  %v7528_v23 = vrot.slane %v17303_v4, %v19437_v13 }
 0x495   : > { %v7236_v29 = vsel %vm2327_vm13, %v7224_v14, %v17258_v34  ;;  %v7237_v25 = vsel %vm2327_vm13, %v17243_v30, %v7224_v14  ;;  %v7700_v14 = vld [vmem:[#allocation11 + $0x47] ss:$8 sm:$0xf]  ;;  %v6516_v34 = vrot.slane %v16682_v36, %v19484_v43 }
 0x496   : > { %7451 = vrot.lane.b32.xlu0 %v17163_v9, %s13647_s18  ;;  %8582 = vmatpush1.bf16.msra.mxu0 %v13380_v51  ;;  %v7347_v11 = vmul.f32 %v7300_v0, %v7237_v25  ;;  %v7348_v45 = vmul.f32 %v7304_v31, %v7236_v29  ;;  %v6520_v0 = vrot.slane %v16682_v36, %v19485_v41 }
 0x497   : > { %v17342_v29 = vor.u32 %v7701_v52, %v7700_v14  ;;  %v6740_v25 = vrot.slane %v16694_v57, %v19484_v43 }
 0x498   : > { %v17309_v1 = vpop.permute.xlu1 %7669  ;;  %v17311_v60 = vpop.permute.xlu0 %7445 }
 0x499   : > { %19486 = vst [vmem:[#allocation70_spill] sm:$0xff] %v17309_v1  ;;  %19487 = vst [vmem:[#allocation71_spill] sm:$0xff] %v17311_v60  ;;  %v7461_v44 = vsel %vm2554_vm14, %v17311_v60, %v7448_v19 }
 0x49a   : > { %v7571_v53 = vmul.f32 %v7524_v61, %v7461_v44  ;;  %v6503_v44 = vsel %vm1574_vm3, %v6458_v59, %v16688_v16 }
 0x49c   : > { %v17326_v24 = vpop.permute.xlu1 %7673  ;;  %v17328_v6 = vpop.permute.xlu0 %7449 }
 0x49d   : > { %19488 = vst [vmem:[#allocation72_spill] sm:$0xff] %v17326_v24  ;;  %19489 = vst [vmem:[#allocation73_spill] sm:$0xff] %v17328_v6  ;;  %v7460_v51 = vsel %vm2554_vm14, %v7448_v19, %v17328_v6  ;;  %v6744_v19 = vrot.slane %v16694_v57, %v19485_v41 }
 0x49e   : > { %v7572_v27 = vmul.f32 %v7528_v23, %v7460_v51  ;;  %v13382_v23 = vpack.c.bf16 %v7571_v53, %v7347_v11  ;;  %v6727_v51 = vsel %vm1801_vm4, %v6682_v46, %v16698_v55  ;;  %v7748_v11 = vrot.slane %v17342_v29, %v19436_v33 }
 0x49f   : > { %v6818_v53 = vmul.f32 %v6744_v19, %v6727_v51  ;;  %v7036_v19 = vrot.slane %v16777_v18, %v19484_v43 }
 0x4a0   : > { %v6980_v9 = vpop.permute.xlu1 %6979  ;;  %v17335_v30 = vpop.permute.xlu0 %6487  ;;  %v13381_v61 = vpack.c.bf16 %v7572_v27, %v7348_v45  ;;  %v6594_v45 = vmul.f32 %v6520_v0, %v6503_v44  ;;  %v7040_v27 = vrot.slane %v16777_v18, %v19485_v41 }
 0x4a1   : > { %v6504_v31 = vsel %vm1574_vm3, %v17335_v30, %v6458_v59  ;;  %v7752_v59 = vrot.slane %v17342_v29, %v19437_v13  ;;  %v7959_v13 = vld [vmem:[#allocation3 + $0x2a8] sm:$0xff] }
 0x4a2   : > { %v6593_v6 = vmul.f32 %v6516_v34, %v6504_v31  ;;  %8792 = vmatprep.subr.bf16.mxu1 %v13381_v61 }
 0x4a3   : > { %8793 = vmatpush1.bf16.msra.mxu1 %v13382_v23  ;;  %v7022_v23 = vsel %vm2100_vm12, %v6980_v9, %v16779_v17 }
 0x4a4   : > { %v7204_v60 = vpop.permute.xlu1 %7203  ;;  %v17354_v14 = vpop.permute.xlu0 %6711 }
 0x4a5   : > { %v6728_v52 = vsel %vm1801_vm4, %v17354_v14, %v6682_v46 }
 0x4a6   : > { %v6817_v16 = vmul.f32 %v6740_v25, %v6728_v52  ;;  %v13383_v25 = vpack.c.bf16 %v6818_v53, %v6594_v45 }
 0x4a8   : > { %v7428_v55 = vpop.permute.xlu1 %7427  ;;  %v7672_v34 = vpop.permute.xlu0 %7671  ;;  %v13384_v44 = vpack.c.bf16 %v6817_v16, %v6593_v6  ;;  %8583 = vmatprep.subr.bf16.mxu0 %v13383_v25  ;;  %v7975_v6 = vld [vmem:[#allocation3 + $0x328] sm:$0xff] }
 0x4a9   : > { %v7684_v31 = vsel %vm2781_vm15, %v7672_v34, %v17326_v24  ;;  %v7685_v46 = vsel %vm2781_vm15, %v17309_v1, %v7672_v34  ;;  %v7983_v34 = vld [vmem:[#allocation3 + $0x368] sm:$0x77] }
 0x4aa   : > { %v7795_v61 = vmul.f32 %v7748_v11, %v7685_v46  ;;  %v7796_v0 = vmul.f32 %v7752_v59, %v7684_v31  ;;  %8584 = vmatpush1.bf16.msra.mxu0 %v13384_v44  ;;  %v7951_v59 = vld [vmem:[#allocation3 + $0x268] sm:$0xff]  ;;  %v7114_v31 = vmul.f32 %v7040_v27, %v7022_v23  ;;  %v12678_v25 = vcombine.high %v7975_v6, %v7983_v34 }
 0x4ab   : > { %v7967_v24 = vld [vmem:[#allocation3 + $0x2e8] sm:$0xff]  ;;  %v7484_v23 = vrot.slane %v16799_v5, %v19484_v43 }
 0x4ac   : > { %v13102_v51 = vpack.c.bf16 %v7796_v0, %v7795_v61  ;;  %v7652_v52 = vpop.permute.xlu1 %7651  ;;  %v17376_v33 = vpop.permute.xlu0 %6977  ;;  %v12662_v17 = vcombine.high %v7959_v13, %v7967_v24  ;;  %v7260_v61 = vrot.slane %v16797_v47, %v19484_v43  ;;  %v13385_v44 = vpack.c.bf16 %v7114_v31, %v19468_v2 }
 0x4ad   : > { %v7023_v11 = vsel %vm2100_vm12, %v17376_v33, %v6980_v9  ;;  %v7264_v9 = vrot.slane %v16797_v47, %v19485_v41  ;;  %v8567_v2 = vand.u32 %v12678_v25, %v15313_v32 }
 0x4ae   : > { %v7113_v45 = vmul.f32 %v7036_v19, %v7023_v11  ;;  %v12645_v53 = vcombine.low %v13102_v51, %v7951_v59  ;;  %v12646_v46 = vcombine.high %v13102_v51, %v7951_v59  ;;  %v7488_v19 = vrot.slane %v16799_v5, %v19485_v41  ;;  %8585 = vmatprep.subr.bf16.mxu0 %v13385_v44 }
 0x4af   : > { %v7246_v11 = vsel %vm2327_vm13, %v7204_v60, %v16781_v10  ;;  %v7470_v59 = vsel %vm2554_vm14, %v7428_v55, %v16815_v56 }
 0x4b0   : > { %v17381_v16 = vpop.permute.xlu1 %6037  ;;  %v17385_v0 = vpop.permute.xlu0 %7201  ;;  %8794 = vmatprep.subr.bf16.mxu1 %v12646_v46  ;;  %v13386_v51 = vpack.c.bf16 %v7113_v45, %v16974_v62  ;;  %v12677_v46 = vcombine.low %v7975_v6, %v7983_v34  ;;  %v7712_v62 = vrot.slane %v16824_v38, %v19485_v41  ;;  %v7338_v56 = vmul.f32 %v7264_v9, %v7246_v11 }
 0x4b1   : > { %v7247_v27 = vsel %vm2327_vm13, %v17385_v0, %v7204_v60  ;;  %8795 = vmatpush1.bf16.msra.mxu1 %v12645_v53  ;;  %v12661_v53 = vcombine.low %v7959_v13, %v7967_v24  ;;  %v7562_v13 = vmul.f32 %v7488_v19, %v7470_v59  ;;  %v7708_v24 = vrot.slane %v16824_v38, %v19484_v43  ;;  %v8656_v45 = vpop.f32.mrb[16].mxu1 }
 0x4b2   : > { %8796 = vmatprep.subr.bf16.mxu1 %v12662_v17  ;;  %v7337_v1 = vmul.f32 %v7260_v61, %v7247_v27  ;;  %8586 = vmatpush1.bf16.msra.mxu0 %v13386_v51  ;;  %v7694_v34 = vsel %vm2781_vm15, %v7652_v52, %v16817_v28  ;;  %v8564_v31 = vand.u32 %v12677_v46, %v15313_v32  ;;  %vm8911_vm9 = vcmp.gt.f32.partialorder %v8656_v45, 0.0 }
 0x4b3   : > { %v7786_v25 = vmul.f32 %v7712_v62, %v7694_v34  ;;  %v13387_v27 = vpack.c.bf16 %v7562_v13, %v7338_v56  ;;  %v7954_v62 = vld [vmem:[#allocation3 + $0x280] sm:$0xff]  ;;  %v6352_v13 = vrot.slane %v17095_v35, %v15290_v21 }
 0x4b4   : > { %v17404_v47 = vpop.permute.xlu1 %6261  ;;  %v17406_v18 = vpop.permute.xlu0 %7425 }
 0x4b5   : > { %v7471_v10 = vsel %vm2554_vm14, %v17406_v18, %v7428_v55  ;;  %8797 = vmatpush1.bf16.msra.mxu1 %v12661_v53  ;;  %v8927_v55 = vmul.f32 0.1, %v8656_v45  ;;  %v6124_v53 = vrot.slane %v17082_v7, %v15281_v12  ;;  %8587 = vmatprep.subr.bf16.mxu0 %v13387_v27 }
 0x4b6   : > { %v7561_v60 = vmul.f32 %v7484_v23, %v7471_v10  ;;  %8798 = vmatprep.subr.bf16.mxu1 %v8567_v2  ;;  %v8658_v23 = vpop.f32.mrb[17].mxu1  ;;  %v7946_v2 = vld [vmem:[#allocation3 + $0x240] sm:$0xff] }
 0x4b7   : > { %v17427_v28 = vsel %vm8911_vm9, %v8656_v45, %v8927_v55  ;;  %vm8912_vm10 = vcmp.gt.f32.partialorder %v8658_v23, 0.0  ;;  %v8928_v44 = vmul.f32 0.1, %v8658_v23  ;;  %v8660_v51 = vpop.f32.mrb[18].mxu1  ;;  %v7978_v10 = vld [vmem:[#allocation3 + $0x340] sm:$0x77]  ;;  %v6265_v45 = vsel %vm1347_vm2, %v17404_v47, %v17292_v42 }
 0x4b8   : > { %v17420_v17 = vpop.permute.xlu1 %6485  ;;  %v17422_v6 = vpop.permute.xlu0 %7649  ;;  %v13388_v19 = vpack.c.bf16 %v7561_v60, %v7337_v1  ;;  %8959 = vst [vmem:[#allocation2 + $0x10] sm:$0xff] %v17427_v28  ;;  %v6128_v1 = vrot.slane %v17082_v7, %v15290_v21  ;;  %v6348_v60 = vrot.slane %v17095_v35, %v15281_v12  ;;  %9217 = vrot.lane.b32.xlu1 %v17427_v28, %s13642_s30  ;;  %v7962_v55 = vld [vmem:[#allocation3 + $0x2c0] sm:$0xff] }
 0x4b9   : > { %v7695_v61 = vsel %vm2781_vm15, %v17422_v6, %v7652_v52  ;;  %8799 = vmatpush1.bf16.msra.mxu1 %v8564_v31  ;;  %v17446_v56 = vsel %vm8912_vm10, %v8658_v23, %v8928_v44  ;;  %v6041_v31 = vsel %vm1121_vm1, %v17381_v16, %v17271_v8  ;;  %8993 = vrot.lane.b32.xlu0 %v17427_v28, %s19384_s11 }
 0x4ba   : > { %v7785_v9 = vmul.f32 %v7708_v24, %v7695_v61  ;;  %8588 = vmatpush1.bf16.msra.mxu0 %v13388_v19  ;;  %8960 = vst [vmem:[#allocation2 + $0x18] sm:$0xff] %v17446_v56  ;;  %v7970_v61 = vld [vmem:[#allocation3 + $0x300] sm:$0xff]  ;;  %v12652_v23 = vcombine.high %v7954_v62, %v7962_v55  ;;  %v6160_v44 = vmul.f32 %v6128_v1, %v6041_v31 }
 0x4bb   : > { %v12668_v8 = vcombine.high %v7970_v61, %v7978_v10  ;;  %v6384_v51 = vmul.f32 %v6352_v13, %v6265_v45  ;;  %v6800_v13 = vrot.slane %v17144_v48, %v15290_v21 }
 0x4bc   : > { %v13097_v11 = vpack.c.bf16 %v7786_v25, %v7785_v9  ;;  %v17429_v59 = vpop.permute.xlu1 %6709  ;;  %v17433_v46 = vpop.permute.xlu0 %6035  ;;  %12688 = vmatmul.mubr.msk.bf16.vlgmr.msra.gmra.mrb[24].mxu1 %vm5545_vm7, %v16931_v37  ;;  %v13138_v25 = vpack.c.bf16 %v17446_v56, %v17427_v28  ;;  %9665 = vrot.lane.b32.xlu1 %v17427_v28, %s13644_s10 }
 0x4bd   : > { %v6042_v52 = vsel %vm1121_vm1, %v17433_v46, %v17381_v16  ;;  %8900 = vmatprep.mubr.bf16.mxu1 %v19396_v15  ;;  %v8661_v37 = vpop.f32.mrb[19].mxu1  ;;  %v12667_v16 = vcombine.low %v7970_v61, %v7978_v10  ;;  %9441 = vrot.lane.b32.xlu0 %v17427_v28, %s19351_s2  ;;  %v6713_v31 = vsel %vm1801_vm4, %v17429_v59, %v17354_v14 }
 0x4be   : > { %v12635_v24 = vcombine.low %v13097_v11, %v7946_v2  ;;  %v12636_v34 = vcombine.high %v13097_v11, %v7946_v2  ;;  %v6159_v9 = vmul.f32 %v6124_v53, %v6042_v52  ;;  %9950 = vst [vmem:[#allocation3 + $0x108] sm:$0xff] %v13138_v25  ;;  %v12651_v53 = vcombine.low %v7954_v62, %v7962_v55 }
 0x4bf   : > { %v6572_v2 = vrot.slane %v17132_v20, %v15281_v12  ;;  %v8534_v10 = vand.u32 %v12667_v16, %v15313_v32  ;;  %v6576_v62 = vrot.slane %v17132_v20, %v15290_v21  ;;  %v6308_v16 = vrot.slane %v16646_v22, %v15267_v49 }
 0x4c0   : > { %v7008_v27 = vpop.permute.xlu1 %7007  ;;  %v17467_v19 = vpop.permute.xlu0 %6259  ;;  %8589 = vmatprep.subr.bf16.mxu0 %v12636_v34  ;;  %v6489_v34 = vsel %vm1574_vm3, %v17420_v17, %v17335_v30  ;;  %10185 = vrot.lane.b32.xlu1 %v17427_v28, %s13646_s17  ;;  %v7096_v30 = vrot.slane %v17237_v63, %v15290_v21 }
 0x4c1   : > { %v6266_v42 = vsel %vm1347_vm2, %v17467_v19, %v17404_v47  ;;  %8590 = vmatpush1.bf16.msra.mxu0 %v12635_v24  ;;  %v8537_v47 = vand.u32 %v12668_v8, %v15313_v32  ;;  %v13389_v24 = vpack.c.bf16 %v6384_v51, %v6160_v44  ;;  %9961 = vrot.lane.b32.xlu0 %v17427_v28, %s13645_s15 }
 0x4c2   : > { %v6383_v11 = vmul.f32 %v6348_v60, %v6266_v42  ;;  %8591 = vmatprep.subr.bf16.mxu0 %v12652_v23  ;;  %v6796_v60 = vrot.slane %v17144_v48, %v15281_v12  ;;  %v7092_v8 = vrot.slane %v17237_v63, %v15281_v12  ;;  %v7024_v42 = vsel %vm2100_vm12, %v7008_v27, %v17376_v33  ;;  %v17533_v33 = vld [vmem:[%s19165_s5] sm:$0xf] }
 0x4c3   : > { %8868 = vmatprep.subr.bf16.mxu1 %v13389_v24  ;;  %v19491_v24 = vld [vmem:[#allocation32_spill] sm:$0xff] }
 0x4c4   : > { %v6242_v52 = vpop.permute.xlu1 %6241  ;;  %v17479_v37 = vpop.permute.xlu0 %6483  ;;  %v13390_v45 = vpack.c.bf16 %v6383_v11, %v6159_v9  ;;  %v6832_v9 = vmul.f32 %v6800_v13, %v6713_v31  ;;  %10633 = vrot.lane.b32.xlu1 %v17427_v28, %s19382_s1  ;;  %v6084_v11 = vrot.slane %v16634_v40, %v15267_v49 }
 0x4c5   : > { %v6490_v1 = vsel %vm1574_vm3, %v17479_v37, %v17420_v17  ;;  %8592 = vmatpush1.bf16.msra.mxu0 %v12651_v53  ;;  %v6608_v17 = vmul.f32 %v6576_v62, %v6489_v34  ;;  %10409 = vrot.lane.b32.xlu0 %v17427_v28, %s13647_s18  ;;  %v6275_v28 = vsel %vm1347_vm2, %v6242_v52, %v16859_v39  ;;  %v19490_v53 = vld [vmem:[#allocation26_spill] sm:$0xff]  ;;  %v19492_v34 = vld [vmem:[#allocation23_spill] sm:$0xff] }
 0x4c6   : > { %8593 = vmatprep.subr.bf16.mxu0 %v8537_v47  ;;  %v6607_v55 = vmul.f32 %v6572_v2, %v6490_v1  ;;  %8869 = vmatpush1.bf16.msra.mxu1 %v13390_v45  ;;  %v6088_v47 = vrot.slane %v16634_v40, %v15272_v50  ;;  %v7128_v1 = vmul.f32 %v7096_v30, %v7024_v42 }
 0x4c7   : > { %v13391_v62 = vpack.c.bf16 %v6832_v9, %v6608_v17  ;;  %v7544_v9 = vrot.slane %v17303_v4, %v15290_v21 }
 0x4c8   : > { %v7232_v61 = vpop.permute.xlu1 %7231  ;;  %v17505_v25 = vpop.permute.xlu0 %6707  ;;  %8995 = vrot.lane.b32.xlu1 %v17446_v56, %s19384_s11  ;;  %v13393_v30 = vpack.c.bf16 %v7128_v1, %v16994_v3  ;;  %v19494_v1 = vld [vmem:[#allocation28_spill] sm:$0xff] }
 0x4c9   : > { %v6714_v14 = vsel %vm1801_vm4, %v17505_v25, %v17429_v59  ;;  %8594 = vmatpush1.bf16.msra.mxu0 %v8534_v10  ;;  %v6312_v59 = vrot.slane %v16646_v22, %v15272_v50  ;;  %v6276_v22 = vsel %vm1347_vm2, %v19490_v53, %v6242_v52  ;;  %9219 = vrot.lane.b32.xlu0 %v17446_v56, %s13642_s30 }
 0x4ca   : > { %v6831_v23 = vmul.f32 %v6796_v60, %v6714_v14  ;;  %v6373_v39 = vmul.f32 %v6308_v16, %v6276_v22  ;;  %8870 = vmatprep.subr.bf16.mxu1 %v13391_v62  ;;  %v7320_v16 = vrot.slane %v17299_v54, %v15290_v21  ;;  %v6756_v53 = vrot.slane %v16694_v57, %v15267_v49 }
 0x4cb   : > { %v6374_v52 = vmul.f32 %v6312_v59, %v6275_v28  ;;  %v7248_v28 = vsel %vm2327_vm13, %v7232_v61, %v17385_v0  ;;  %v6760_v22 = vrot.slane %v16694_v57, %v15272_v50  ;;  %v6532_v57 = vrot.slane %v16682_v36, %v15267_v49 }
 0x4cc   : > { %v7456_v44 = vpop.permute.xlu1 %7455  ;;  %v17526_v51 = vpop.permute.xlu0 %7005  ;;  %12683 = vmatmul.mubr.msk.bf16.vlgmr.msra.gmra.mrb[16].mxu0 %vm5545_vm7, %v17533_v33  ;;  %v13392_v13 = vpack.c.bf16 %v6831_v23, %v6607_v55  ;;  %9443 = vrot.lane.b32.xlu1 %v17446_v56, %s19351_s2  ;;  %v7316_v23 = vrot.slane %v17299_v54, %v15281_v12 }
 0x4cd   : > { %v7009_v2 = vsel %vm2100_vm12, %v17526_v51, %v7008_v27  ;;  %8695 = vmatprep.mubr.bf16.mxu0 %v19396_v15  ;;  %9667 = vrot.lane.b32.xlu0 %v17446_v56, %s13644_s10  ;;  %v7472_v59 = vsel %vm2554_vm14, %v7456_v44, %v17406_v18  ;;  %v19493_v18 = vld [vmem:[#allocation38_spill] sm:$0xff] }
 0x4ce   : > { %v7127_v10 = vmul.f32 %v7092_v8, %v7009_v2  ;;  %8871 = vmatpush1.bf16.msra.mxu1 %v13392_v13 }
 0x4cf   : > { %8872 = vmatprep.subr.bf16.mxu1 %v13393_v30 }
 0x4d0   : > { %v6018_v60 = vpop.permute.xlu0 %6017  ;;  %v6690_v27 = vpop.permute.xlu1 %6689  ;;  %v13394_v14 = vpack.c.bf16 %v7127_v10, %v17112_v58  ;;  %v7540_v58 = vrot.slane %v17303_v4, %v15281_v12  ;;  %9963 = vrot.lane.b32.xlu1 %v17446_v56, %s13645_s15 }
 0x4d1   : > { %v6051_v40 = vsel %vm1121_vm1, %v6018_v60, %v19491_v24  ;;  %v6052_v31 = vsel %vm1121_vm1, %v19492_v34, %v6018_v60  ;;  %10187 = vrot.lane.b32.xlu0 %v17446_v56, %s13646_s17  ;;  %v6724_v10 = vsel %vm1801_vm4, %v19494_v1, %v6690_v27 }
 0x4d2   : > { %v6149_v45 = vmul.f32 %v6084_v11, %v6052_v31  ;;  %v6150_v55 = vmul.f32 %v6088_v47, %v6051_v40  ;;  %8873 = vmatpush1.bf16.msra.mxu1 %v13394_v14  ;;  %v6723_v47 = vsel %vm1801_vm4, %v6690_v27, %v19493_v18  ;;  %v6821_v60 = vmul.f32 %v6756_v53, %v6724_v10  ;;  %v19495_v40 = vld [vmem:[#allocation39_spill] sm:$0xff]  ;;  %v19496_v31 = vld [vmem:[#allocation25_spill] sm:$0xff] }
 0x4d3   : > { %v6822_v27 = vmul.f32 %v6760_v22, %v6723_v47  ;;  %v7728_v10 = vrot.slane %v16824_v38, %v15272_v50 }
 0x4d4   : > { %v17565_v17 = vpop.permute.xlu0 %7229  ;;  %v13395_v8 = vpack.c.bf16 %v6374_v52, %v6150_v55  ;;  %v13396_v42 = vpack.c.bf16 %v6373_v39, %v6149_v45  ;;  %v7680_v11 = vpop.permute.xlu1 %7679  ;;  %v6536_v39 = vrot.slane %v16682_v36, %v15272_v50  ;;  %v7352_v52 = vmul.f32 %v7320_v16, %v7248_v28  ;;  %10411 = vrot.lane.b32.xlu1 %v17446_v56, %s13647_s18 }
 0x4d5   : > { %v7233_v3 = vsel %vm2327_vm13, %v17565_v17, %v7232_v61  ;;  %v7576_v61 = vmul.f32 %v7544_v9, %v7472_v59  ;;  %10635 = vrot.lane.b32.xlu0 %v17446_v56, %s19382_s1  ;;  %v7768_v36 = vrot.slane %v17342_v29, %v15290_v21  ;;  %v7764_v56 = vrot.slane %v17342_v29, %v15281_v12 }
 0x4d6   : > { %8663 = vmatprep.subr.bf16.mxu0 %v13395_v8  ;;  %v7351_v62 = vmul.f32 %v7316_v23, %v7233_v3  ;;  %v7696_v14 = vsel %vm2781_vm15, %v7680_v11, %v17422_v6  ;;  %v19497_v8 = vld [vmem:[#allocation35_spill] sm:$0xff]  ;;  %v19498_v6 = vld [vmem:[#allocation34_spill] sm:$0xff] }
 0x4d7   : > { %8664 = vmatpush1.bf16.msra.mxu0 %v13396_v42  ;;  %v13397_v9 = vpack.c.bf16 %v7576_v61, %v7352_v52  ;;  %v7052_v42 = vrot.slane %v19497_v8, %v15267_v49  ;;  %v7800_v16 = vmul.f32 %v7768_v36, %v7696_v14  ;;  %v7056_v28 = vrot.slane %v19497_v8, %v15272_v50 }
 0x4d8   : > { %v17592_v2 = vpop.permute.xlu0 %7453  ;;  %v7276_v22 = vrot.slane %v19498_v6, %v15267_v49  ;;  %v7280_v18 = vrot.slane %v19498_v6, %v15272_v50  ;;  %v7500_v61 = vrot.slane %v16799_v5, %v15267_v49 }
 0x4d9   : > { %v7457_v0 = vsel %vm2554_vm14, %v17592_v2, %v7456_v44  ;;  %v7212_v44 = vpop.permute.xlu1 %7211  ;;  %8874 = vmatprep.subr.bf16.mxu1 %v13397_v9 }
 0x4da   : > { %v7575_v13 = vmul.f32 %v7540_v58, %v7457_v0 }
 0x4dc   : > { %v6466_v24 = vpop.permute.xlu0 %6465  ;;  %v13398_v23 = vpack.c.bf16 %v7575_v13, %v7351_v62  ;;  %v7504_v13 = vrot.slane %v16799_v5, %v15272_v50  ;;  %v19503_v5 = vld [vmem:[#allocation54_spill] sm:$0xff] }
 0x4dd   : > { %v6499_v34 = vsel %vm1574_vm3, %v6466_v24, %v19495_v40  ;;  %v6500_v45 = vsel %vm1574_vm3, %v19496_v31, %v6466_v24  ;;  %v7660_v47 = vpop.permute.xlu1 %7659  ;;  %v19501_v24 = vld [vmem:[#allocation51_spill] sm:$0xff]  ;;  %v19502_v40 = vld [vmem:[#allocation30_spill] sm:$0xff] }
 0x4de   : > { %v6597_v55 = vmul.f32 %v6532_v57, %v6500_v45  ;;  %v6598_v30 = vmul.f32 %v6536_v39, %v6499_v34  ;;  %8875 = vmatpush1.bf16.msra.mxu1 %v13398_v23  ;;  %v7961_v57 = vld [vmem:[#allocation3 + $0x2b8] sm:$0xff]  ;;  %v19499_v39 = vld [vmem:[#allocation44_spill] sm:$0xff]  ;;  %v7690_v31 = vsel %vm2781_vm15, %v7660_v47, %v19503_v5  ;;  %v19504_v45 = vld [vmem:[#allocation43_spill] sm:$0xff] }
 0x4df   : > { %v7242_v52 = vsel %vm2327_vm13, %v7212_v44, %v19499_v39  ;;  %v7691_v36 = vsel %vm2781_vm15, %v19504_v45, %v7660_v47  ;;  %v7790_v6 = vmul.f32 %v7728_v10, %v7690_v31  ;;  %v19506_v39 = vld [vmem:[#allocation40_spill] sm:$0xff]  ;;  %v7948_v31 = vld [vmem:[#allocation3 + $0x250] sm:$0xff] }
 0x4e0   : > { %v17624_v3 = vpop.permute.xlu0 %7677  ;;  %v13399_v53 = vpack.c.bf16 %v6822_v27, %v6598_v30  ;;  %v13400_v1 = vpack.c.bf16 %v6821_v60, %v6597_v55  ;;  %v19500_v27 = vld [vmem:[#allocation31_spill] sm:$0xff] }
 0x4e1   : > { %v7681_v58 = vsel %vm2781_vm15, %v17624_v3, %v7680_v11  ;;  %v7724_v11 = vrot.slane %v16824_v38, %v15267_v49  ;;  %v7243_v60 = vsel %vm2327_vm13, %v19500_v27, %v7212_v44  ;;  %v7953_v44 = vld [vmem:[#allocation3 + $0x278] sm:$0xff] }
 0x4e2   : > { %v7799_v59 = vmul.f32 %v7764_v56, %v7681_v58  ;;  %8665 = vmatprep.subr.bf16.mxu0 %v13399_v53  ;;  %v7969_v56 = vld [vmem:[#allocation3 + $0x2f8] sm:$0xff]  ;;  %v7341_v8 = vmul.f32 %v7276_v22, %v7243_v60  ;;  %v19507_v22 = vld [vmem:[#allocation29_spill] sm:$0xff] }
 0x4e3   : > { %8666 = vmatpush1.bf16.msra.mxu0 %v13400_v1  ;;  %v12666_v23 = vcombine.high %v7961_v57, %v7969_v56  ;;  %v7985_v58 = vld [vmem:[#allocation3 + $0x378] sm:$0x77]  ;;  %v7789_v53 = vmul.f32 %v7724_v11, %v7691_v36  ;;  %v19505_v1 = vld [vmem:[#allocation55_spill] sm:$0xff] }
 0x4e4   : > { %v13104_v62 = vpack.c.bf16 %v7800_v16, %v7799_v59  ;;  %v6988_v0 = vpop.permute.xlu0 %6987  ;;  %v7342_v16 = vmul.f32 %v7280_v18, %v7242_v52  ;;  %v19508_v52 = vld [vmem:[#allocation24_spill] sm:$0xff] }
 0x4e5   : > { %v7018_v38 = vsel %vm2100_vm12, %v6988_v0, %v19501_v24  ;;  %v7019_v34 = vsel %vm2100_vm12, %v19502_v40, %v6988_v0  ;;  %v13099_v60 = vpack.c.bf16 %v7790_v6, %v7789_v53  ;;  %v12665_v24 = vcombine.low %v7961_v57, %v7969_v56  ;;  %v6250_v40 = vpop.permute.xlu1 %6249  ;;  %v19509_v56 = vld [vmem:[#allocation58_spill] sm:$0xff] }
 0x4e6   : > { %v7117_v55 = vmul.f32 %v7052_v42, %v7019_v34  ;;  %v7118_v30 = vmul.f32 %v7056_v28, %v7018_v38  ;;  %v12649_v14 = vcombine.low %v13104_v62, %v7953_v44  ;;  %v12650_v9 = vcombine.high %v13104_v62, %v7953_v44  ;;  %v7977_v28 = vld [vmem:[#allocation3 + $0x338] sm:$0xff]  ;;  %v7980_v44 = vld [vmem:[#allocation3 + $0x350] sm:$0x77] }
 0x4e7   : > { %v12682_v62 = vcombine.high %v7977_v28, %v7985_v58  ;;  %v12681_v38 = vcombine.low %v7977_v28, %v7985_v58  ;;  %v12640_v36 = vcombine.high %v13099_v60, %v7948_v31  ;;  %v6100_v57 = vrot.slane %v17082_v7, %v19484_v43  ;;  %v7964_v58 = vld [vmem:[#allocation3 + $0x2d0] sm:$0xff] }
 0x4e8   : > { %v7436_v59 = vpop.permute.xlu0 %7435  ;;  %8876 = vmatprep.subr.bf16.mxu1 %v12650_v9  ;;  %v13401_v18 = vpack.c.bf16 %v7118_v30, %v19507_v22  ;;  %v13402_v11 = vpack.c.bf16 %v7117_v55, %v19508_v52  ;;  %v7956_v55 = vld [vmem:[#allocation3 + $0x290] sm:$0xff]  ;;  %v6104_v30 = vrot.slane %v17082_v7, %v19485_v41  ;;  %v19510_v9 = vld [vmem:[#allocation27_spill] sm:$0xff]  ;;  %v6552_v52 = vrot.slane %v17132_v20, %v19485_v41 }
 0x4e9   : > { %v7466_v0 = vsel %vm2554_vm14, %v7436_v59, %v19505_v1  ;;  %v7467_v42 = vsel %vm2554_vm14, %v19506_v39, %v7436_v59  ;;  %8877 = vmatpush1.bf16.msra.mxu1 %v12649_v14  ;;  %v8579_v34 = vand.u32 %v12682_v62, %v15313_v32  ;;  %v8576_v45 = vand.u32 %v12681_v38, %v15313_v32  ;;  %v6698_v59 = vpop.permute.xlu1 %6697  ;;  %v7972_v1 = vld [vmem:[#allocation3 + $0x310] sm:$0xff] }
 0x4ea   : > { %v7565_v47 = vmul.f32 %v7500_v61, %v7467_v42  ;;  %v7566_v27 = vmul.f32 %v7504_v13, %v7466_v0  ;;  %8878 = vmatprep.subr.bf16.mxu1 %v12666_v23  ;;  %8667 = vmatprep.subr.bf16.mxu0 %v13401_v18  ;;  %v12655_v53 = vcombine.low %v7956_v55, %v7964_v58  ;;  %v19511_v0 = vld [vmem:[#allocation57_spill] sm:$0xff] }
 0x4eb   : > { %8668 = vmatpush1.bf16.msra.mxu0 %v13402_v11  ;;  %v12656_v6 = vcombine.high %v7956_v55, %v7964_v58  ;;  %v6271_v39 = vsel %vm1347_vm2, %v6250_v40, %v19511_v0  ;;  %v19512_v42 = vld [vmem:[#allocation37_spill] sm:$0xff]  ;;  %v6548_v18 = vrot.slane %v17132_v20, %v19484_v43  ;;  %v19516_v55 = vld [vmem:[#allocation42_spill] sm:$0xff]  ;;  %v7516_v0 = vrot.slane %v17303_v4, %v19484_v43 }
 0x4ec   : > { %v6026_v10 = vpop.permute.xlu0 %6025  ;;  %v13403_v5 = vpack.c.bf16 %v7566_v27, %v7342_v16  ;;  %v13404_v61 = vpack.c.bf16 %v7565_v47, %v7341_v8  ;;  %v6324_v8 = vrot.slane %v17095_v35, %v19484_v43  ;;  %v6328_v16 = vrot.slane %v17095_v35, %v19485_v41  ;;  %v19514_v38 = vld [vmem:[#allocation41_spill] sm:$0xff] }
 0x4ed   : > { %8879 = vmatpush1.bf16.msra.mxu1 %v12665_v24  ;;  %v6047_v14 = vsel %vm1121_vm1, %v6026_v10, %v19509_v56  ;;  %v6048_v23 = vsel %vm1121_vm1, %v19510_v9, %v6026_v10  ;;  %v6272_v28 = vsel %vm1347_vm2, %v19512_v42, %v6250_v40  ;;  %v12639_v47 = vcombine.low %v13099_v60, %v7948_v31  ;;  %v19513_v10 = vld [vmem:[#allocation61_spill] sm:$0xff] }
 0x4ee   : > { %8880 = vmatprep.subr.bf16.mxu1 %v8579_v34  ;;  %8669 = vmatprep.subr.bf16.mxu0 %v13403_v5  ;;  %v12672_v27 = vcombine.high %v7972_v1, %v7980_v44  ;;  %v6153_v62 = vmul.f32 %v6100_v57, %v6048_v23  ;;  %v6154_v22 = vmul.f32 %v6104_v30, %v6047_v14  ;;  %v19517_v23 = vld [vmem:[#allocation67_spill] sm:$0xff] }
 0x4ef   : > { %8670 = vmatpush1.bf16.msra.mxu0 %v13404_v61  ;;  %v12671_v40 = vcombine.low %v7972_v1, %v7980_v44  ;;  %v6377_v34 = vmul.f32 %v6324_v8, %v6272_v28  ;;  %v6378_v5 = vmul.f32 %v6328_v16, %v6271_v39  ;;  %v6772_v61 = vrot.slane %v17144_v48, %v19484_v43  ;;  %v7220_v44 = vpop.permute.xlu1 %7219  ;;  %v19518_v8 = vld [vmem:[#allocation53_spill] sm:$0xff] }
 0x4f0   : > { %v6474_v13 = vpop.permute.xlu0 %6473  ;;  %8671 = vmatprep.subr.bf16.mxu0 %v12640_v36  ;;  %v6776_v31 = vrot.slane %v17144_v48, %v19485_v41  ;;  %v7068_v57 = vrot.slane %v17237_v63, %v19484_v43  ;;  %v8549_v30 = vand.u32 %v12672_v27, %v15313_v32  ;;  %v7072_v9 = vrot.slane %v17237_v63, %v19485_v41 }
 0x4f1   : > { %8881 = vmatpush1.bf16.msra.mxu1 %v8576_v45  ;;  %v6495_v24 = vsel %vm1574_vm3, %v6474_v13, %v19513_v10  ;;  %v6496_v60 = vsel %vm1574_vm3, %v19514_v38, %v6474_v13  ;;  %v19515_v45 = vld [vmem:[#allocation62_spill] sm:$0xff]  ;;  %v6720_v13 = vsel %vm1801_vm4, %v19516_v55, %v6698_v59  ;;  %v7520_v39 = vrot.slane %v17303_v4, %v19485_v41 }
 0x4f2   : > { %v6719_v36 = vsel %vm1801_vm4, %v6698_v59, %v19515_v45  ;;  %v6601_v56 = vmul.f32 %v6548_v18, %v6496_v60  ;;  %v6602_v14 = vmul.f32 %v6552_v52, %v6495_v24  ;;  %v6825_v59 = vmul.f32 %v6772_v61, %v6720_v13  ;;  %v19519_v18 = vld [vmem:[#allocation71_spill] sm:$0xff] }
 0x4f3   : > { %8672 = vmatpush1.bf16.msra.mxu0 %v12639_v47  ;;  %v8546_v42 = vand.u32 %v12671_v40, %v15313_v32  ;;  %v13405_v27 = vpack.c.bf16 %v6378_v5, %v6154_v22  ;;  %v7292_v10 = vrot.slane %v17299_v54, %v19484_v43  ;;  %v7296_v24 = vrot.slane %v17299_v54, %v19485_v41  ;;  %v7668_v60 = vpop.permute.xlu1 %7667  ;;  %v19521_v22 = vld [vmem:[#allocation66_spill] sm:$0xff]  ;;  %v19522_v5 = vld [vmem:[#allocation52_spill] sm:$0xff] }
 0x4f4   : > { %v6996_v11 = vpop.permute.xlu0 %6995  ;;  %12690 = vmatmul.mubr.msk.bf16.vlgmr.msra.gmra.mrb[28].mxu1 %vm5545_vm7, %v17533_v33  ;;  %8673 = vmatprep.subr.bf16.mxu0 %v12656_v6  ;;  %v6826_v6 = vmul.f32 %v6776_v31, %v6719_v36  ;;  %v7740_v38 = vrot.slane %v17342_v29, %v19484_v43  ;;  %v7238_v40 = vsel %vm2327_vm13, %v7220_v44, %v19521_v22 }
 0x4f5   : > { %11634 = vmatprep.mubr.bf16.mxu1 %v19396_v15  ;;  %v7014_v58 = vsel %vm2100_vm12, %v6996_v11, %v19517_v23  ;;  %v7015_v16 = vsel %vm2100_vm12, %v19518_v8, %v6996_v11  ;;  %v7239_v61 = vsel %vm2327_vm13, %v19522_v5, %v7220_v44  ;;  %v7744_v31 = vrot.slane %v17342_v29, %v19485_v41 }
 0x4f6   : > { %v7121_v28 = vmul.f32 %v7068_v57, %v7015_v16  ;;  %v7122_v47 = vmul.f32 %v7072_v9, %v7014_v58  ;;  %v13406_v45 = vpack.c.bf16 %v6377_v34, %v6153_v62  ;;  %v13407_v13 = vpack.c.bf16 %v6826_v6, %v6602_v14  ;;  %v19523_v57 = vld [vmem:[#allocation70_spill] sm:$0xff]  ;;  %v19524_v9 = vld [vmem:[#allocation49_spill] sm:$0xff] }
 0x4f7   : > { %8674 = vmatpush1.bf16.msra.mxu0 %v12655_v53  ;;  %v19520_v53 = vld [vmem:[#allocation56_spill] sm:$0xff]  ;;  %v7687_v23 = vsel %vm2781_vm15, %v19524_v9, %v7668_v60  ;;  %v7345_v44 = vmul.f32 %v7292_v10, %v7239_v61  ;;  %v7346_v58 = vmul.f32 %v7296_v24, %v7238_v40  ;;  %v13408_v62 = vpack.c.bf16 %v6825_v59, %v6601_v56  ;;  %v19526_v6 = vld [vmem:[#allocation33_spill] sm:$0xff]  ;;  %v7982_v10 = vld [vmem:[#allocation3 + $0x360] sm:$0x77] }
 0x4f8   : > { %v7444_v1 = vpop.permute.xlu0 %7443  ;;  %8675 = vmatprep.subr.bf16.mxu0 %v8549_v30  ;;  %v7686_v30 = vsel %vm2781_vm15, %v7668_v60, %v19523_v57  ;;  %v7793_v34 = vmul.f32 %v7740_v38, %v7687_v23  ;;  %v6116_v56 = vrot.slane %v17082_v7, %v15267_v49  ;;  %v6120_v59 = vrot.slane %v17082_v7, %v15272_v50  ;;  %v7966_v24 = vld [vmem:[#allocation3 + $0x2e0] sm:$0xff]  ;;  %v19527_v38 = vld [vmem:[#allocation60_spill] sm:$0xff] }
 0x4f9   : > { %v7462_v52 = vsel %vm2554_vm14, %v7444_v1, %v19519_v18  ;;  %v7463_v11 = vsel %vm2554_vm14, %v19520_v53, %v7444_v1  ;;  %v7794_v8 = vmul.f32 %v7744_v31, %v7686_v30  ;;  %v19525_v1 = vld [vmem:[#allocation36_spill] sm:$0xff]  ;;  %v7974_v40 = vld [vmem:[#allocation3 + $0x320] sm:$0xff]  ;;  %v6340_v5 = vrot.slane %v17095_v35, %v15267_v49 }
 0x4fa   : > { %v7569_v36 = vmul.f32 %v7516_v0, %v7463_v11  ;;  %v7570_v55 = vmul.f32 %v7520_v39, %v7462_v52  ;;  %v13409_v14 = vpack.c.bf16 %v7122_v47, %v19525_v1  ;;  %v13410_v0 = vpack.c.bf16 %v7121_v28, %v19526_v6  ;;  %v7958_v52 = vld [vmem:[#allocation3 + $0x2a0] sm:$0xff] }
 0x4fb   : > { %8676 = vmatpush1.bf16.msra.mxu0 %v8546_v42  ;;  %v13101_v39 = vpack.c.bf16 %v7794_v8, %v7793_v34  ;;  %v6258_v42 = vpop.permute.xlu1 %6257  ;;  %v7950_v11 = vld [vmem:[#allocation3 + $0x260] sm:$0xff]  ;;  %v12660_v22 = vcombine.high %v7958_v52, %v7966_v24  ;;  %v6344_v61 = vrot.slane %v17095_v35, %v15272_v50  ;;  %v6564_v31 = vrot.slane %v17132_v20, %v15267_v49 }
 0x4fc   : > { %8745 = vmatprep.subr.bf16.mxu0 %v13405_v27  ;;  %v6034_v16 = vpop.permute.xlu0 %6033  ;;  %v13411_v27 = vpack.c.bf16 %v7570_v55, %v7346_v58  ;;  %v13412_v53 = vpack.c.bf16 %v7569_v36, %v7345_v44  ;;  %v19528_v36 = vld [vmem:[#allocation59_spill] sm:$0xff] }
 0x4fd   : > { %v12644_v47 = vcombine.high %v13101_v39, %v7950_v11  ;;  %v6043_v28 = vsel %vm1121_vm1, %v6034_v16, %v17433_v46  ;;  %v6044_v60 = vsel %vm1121_vm1, %v19527_v38, %v6034_v16  ;;  %v6267_v46 = vsel %vm1347_vm2, %v6258_v42, %v17467_v19  ;;  %v19529_v23 = vld [vmem:[#allocation63_spill] sm:$0xff] }
 0x4fe   : > { %12685 = vmatmul.mubr.msk.bf16.vlgmr.msra.gmra.mrb[20].mxu0 %vm5545_vm7, %v17533_v33  ;;  %v6268_v55 = vsel %vm1347_vm2, %v19528_v36, %v6258_v42  ;;  %v12643_v57 = vcombine.low %v13101_v39, %v7950_v11  ;;  %v6157_v30 = vmul.f32 %v6116_v56, %v6044_v60  ;;  %v6158_v35 = vmul.f32 %v6120_v59, %v6043_v28  ;;  %v19531_v11 = vld [vmem:[#allocation69_spill] sm:$0xff] }
 0x4ff   : > { %8746 = vmatpush1.bf16.msra.mxu0 %v13406_v45  ;;  %8777 = vmatprep.mubr.bf16.mxu0 %v19396_v15  ;;  %v6706_v7 = vpop.permute.xlu1 %6705  ;;  %v12676_v45 = vcombine.high %v7974_v40, %v7982_v10  ;;  %v6788_v19 = vrot.slane %v17144_v48, %v15267_v49  ;;  %v6381_v34 = vmul.f32 %v6340_v5, %v6268_v55 }
 0x500   : > { %8747 = vmatprep.subr.bf16.mxu0 %v13407_v13  ;;  %v6482_v18 = vpop.permute.xlu0 %6481  ;;  %v6568_v13 = vrot.slane %v17132_v20, %v15272_v50  ;;  %v12675_v20 = vcombine.low %v7974_v40, %v7982_v10  ;;  %v6382_v8 = vmul.f32 %v6344_v61, %v6267_v46  ;;  %v6715_v16 = vsel %vm1801_vm4, %v6706_v7, %v17505_v25 }
 0x501   : > { %v6491_v9 = vsel %vm1574_vm3, %v6482_v18, %v17479_v37  ;;  %v6492_v44 = vsel %vm1574_vm3, %v19529_v23, %v6482_v18  ;;  %v19530_v37 = vld [vmem:[#allocation65_spill] sm:$0xff]  ;;  %v7088_v42 = vrot.slane %v17237_v63, %v15272_v50  ;;  %v7312_v59 = vrot.slane %v17299_v54, %v15272_v50 }
 0x502   : > { %v6716_v1 = vsel %vm1801_vm4, %v19530_v37, %v6706_v7  ;;  %v6606_v6 = vmul.f32 %v6568_v13, %v6491_v9  ;;  %v7536_v38 = vrot.slane %v17303_v4, %v15272_v50  ;;  %v13413_v60 = vpack.c.bf16 %v6382_v8, %v6158_v35 }
 0x503   : > { %8748 = vmatpush1.bf16.msra.mxu0 %v13408_v62  ;;  %v6792_v62 = vrot.slane %v17144_v48, %v15272_v50  ;;  %v7228_v39 = vpop.permute.xlu1 %7227  ;;  %v7084_v48 = vrot.slane %v17237_v63, %v15267_v49  ;;  %v6829_v18 = vmul.f32 %v6788_v19, %v6716_v1  ;;  %v8558_v63 = vand.u32 %v12675_v20, %v15313_v32  ;;  %v19536_v1 = vld [vmem:[#allocation50_spill] sm:$0xff] }
 0x504   : > { %8749 = vmatprep.subr.bf16.mxu0 %v13409_v14  ;;  %v7004_v58 = vpop.permute.xlu0 %7003  ;;  %v17803_v14 = vmul.f32 %v6564_v31, %v6492_v44  ;;  %v7234_v7 = vsel %vm2327_vm13, %v7228_v39, %v17565_v17  ;;  %v19533_v31 = vld [vmem:[#allocation68_spill] sm:$0xff] }
 0x505   : > { %v6830_v25 = vmul.f32 %v6792_v62, %v6715_v16  ;;  %v7011_v10 = vsel %vm2100_vm12, %v19531_v11, %v7004_v58  ;;  %v19534_v44 = vld [vmem:[#allocation72_spill] sm:$0xff]  ;;  %v7350_v62 = vmul.f32 %v7312_v59, %v7234_v7  ;;  %v7976_v11 = vld [vmem:[#allocation3 + $0x330] sm:$0xff] }
 0x506   : > { %v19535_v16 = vld [vmem:[#allocation64_spill] sm:$0xff] }
 0x507   : > { %8750 = vmatpush1.bf16.msra.mxu0 %v13410_v0  ;;  %v12659_v0 = vcombine.low %v7958_v52, %v7966_v24  ;;  %v7308_v52 = vrot.slane %v17299_v54, %v15267_v49  ;;  %v7125_v24 = vmul.f32 %v7084_v48, %v7011_v10  ;;  %v19532_v54 = vld [vmem:[#allocation73_spill] sm:$0xff]  ;;  %v13415_v36 = vpack.c.bf16 %v6830_v25, %v6606_v6 }
 0x508   : > { %8751 = vmatprep.subr.bf16.mxu0 %v13411_v27  ;;  %v8561_v27 = vand.u32 %v12676_v45, %v15313_v32  ;;  %v7452_v56 = vpop.permute.xlu0 %7451  ;;  %v7676_v45 = vpop.permute.xlu1 %7675  ;;  %v7952_v48 = vld [vmem:[#allocation3 + $0x270] sm:$0xff] }
 0x509   : > { %v7458_v40 = vsel %vm2554_vm14, %v7452_v56, %v17592_v2  ;;  %v7459_v5 = vsel %vm2554_vm14, %v19532_v54, %v7452_v56  ;;  %v13414_v2 = vpack.c.bf16 %v6381_v34, %v6157_v30  ;;  %v7682_v23 = vsel %vm2781_vm15, %v7676_v45, %v17624_v3 }
 0x50a   : > { %v7574_v35 = vmul.f32 %v7536_v38, %v7458_v40  ;;  %v13416_v34 = vpack.c.bf16 %v6829_v18, %v17803_v14  ;;  %v13418_v6 = vpack.c.bf16 %v7125_v24, %v19536_v1  ;;  %v7984_v18 = vld [vmem:[#allocation3 + $0x370] sm:$0x77] }
 0x50b   : > { %8752 = vmatpush1.bf16.msra.mxu0 %v13412_v53  ;;  %v7010_v53 = vsel %vm2100_vm12, %v7004_v58, %v17526_v51  ;;  %v7532_v51 = vrot.slane %v17303_v4, %v15267_v49  ;;  %v7235_v4 = vsel %vm2327_vm13, %v19533_v31, %v7228_v39  ;;  %v7683_v58 = vsel %vm2781_vm15, %v19534_v44, %v7676_v45 }
 0x50c   : > { %8753 = vmatprep.subr.bf16.mxu0 %v12644_v47  ;;  %v7756_v47 = vrot.slane %v17342_v29, %v15267_v49  ;;  %v7126_v28 = vmul.f32 %v7088_v42, %v7010_v53  ;;  %v7349_v19 = vmul.f32 %v7308_v52, %v7235_v4  ;;  %v13419_v39 = vpack.c.bf16 %v7574_v35, %v7350_v62  ;;  %v7968_v53 = vld [vmem:[#allocation3 + $0x2f0] sm:$0xff] }
 0x50d   : > { %v12680_v52 = vcombine.high %v7976_v11, %v7984_v18 }
 0x50e   : > { %v7797_v3 = vmul.f32 %v7756_v47, %v7683_v58  ;;  %v13417_v37 = vpack.c.bf16 %v7126_v28, %v19535_v16 }
 0x50f   : > { %8754 = vmatpush1.bf16.msra.mxu0 %v12643_v57  ;;  %v7573_v57 = vmul.f32 %v7532_v51, %v7459_v5  ;;  %v8573_v59 = vand.u32 %v12680_v52, %v15313_v32 }
 0x510   : > { %8755 = vmatprep.subr.bf16.mxu0 %v12660_v22  ;;  %v7760_v22 = vrot.slane %v17342_v29, %v15272_v50  ;;  %v10454_v50 = vld [vmem:[#allocation11 + $0x6] ss:$8 sm:$0xf0] }
 0x511   : > { %v13420_v14 = vpack.c.bf16 %v7573_v57, %v7349_v19 }
 0x512   : > { %v7798_v8 = vmul.f32 %v7760_v22, %v7682_v23 }
 0x513   : > { %8756 = vmatpush1.bf16.msra.mxu0 %v12659_v0 }
 0x514   : > { %8757 = vmatprep.subr.bf16.mxu0 %v8561_v27  ;;  %v13103_v0 = vpack.c.bf16 %v7798_v8, %v7797_v3  ;;  %v7960_v27 = vld [vmem:[#allocation3 + $0x2b0] sm:$0xff] }
 0x515   : > { %v12664_v10 = vcombine.high %v7960_v27, %v7968_v53  ;;  %v12663_v56 = vcombine.low %v7960_v27, %v7968_v53 }
 0x516   : > { %v12648_v42 = vcombine.high %v13103_v0, %v7952_v48  ;;  %v12647_v25 = vcombine.low %v13103_v0, %v7952_v48 }
 0x517   : > { %8758 = vmatpush1.bf16.msra.mxu0 %v8558_v63  ;;  %v12679_v63 = vcombine.low %v7976_v11, %v7984_v18 }
 0x518   : > { %8827 = vmatprep.subr.bf16.mxu0 %v13413_v60 }
 0x519   : > { %v8570_v47 = vand.u32 %v12679_v63, %v15313_v32 }
 0x51a   : > { %v8738_v61 = vpop.f32.mrb[20].mxu1  ;;  %12687 = vmatmul.mubr.msk.bf16.vlgmr.msra.gmra.mrb[24].mxu0 %vm5545_vm7, %v17533_v33 }
 0x51b   : > { %vm8915_vm11 = vcmp.gt.f32.partialorder %v8738_v61, 0.0  ;;  %v8931_v29 = vmul.f32 0.1, %v8738_v61  ;;  %v8740_v46 = vpop.f32.mrb[21].mxu1  ;;  %8828 = vmatpush1.bf16.msra.mxu0 %v13414_v2  ;;  %8859 = vmatprep.mubr.bf16.mxu0 %v19396_v15 }
 0x51c   : > { %vm8916_vm5 = vcmp.gt.f32.partialorder %v8740_v46, 0.0  ;;  %v8932_v55 = vmul.f32 0.1, %v8740_v46  ;;  %v8742_v13 = vpop.f32.mrb[22].mxu1  ;;  %8829 = vmatprep.subr.bf16.mxu0 %v13415_v36 }
 0x51d   : > { %v8947_v17 = vsel %vm8915_vm11, %v8738_v61, %v8931_v29  ;;  %v8743_v9 = vpop.f32.mrb[23].mxu1 }
 0x51e   : > { %8963 = vst [vmem:[#allocation2 + $0x30] sm:$0xff] %v8947_v17  ;;  %v8948_v30 = vsel %vm8916_vm5, %v8740_v46, %v8932_v55  ;;  %9969 = vrot.lane.b32.xlu1 %v8947_v17, %s13645_s15  ;;  %9001 = vrot.lane.b32.xlu0 %v8947_v17, %s19384_s11 }
 0x51f   : > { %8964 = vst [vmem:[#allocation2 + $0x38] sm:$0xff] %v8948_v30  ;;  %v13140_v20 = vpack.c.bf16 %v8948_v30, %v8947_v17  ;;  %8830 = vmatpush1.bf16.msra.mxu0 %v13416_v34 }
 0x520   : > { %8831 = vmatprep.subr.bf16.mxu0 %v13417_v37 }
 0x521   : > { %9952 = vst [vmem:[#allocation3 + $0x118] sm:$0xff] %v13140_v20 }
 0x522   : > { %10193 = vrot.lane.b32.xlu1 %v8947_v17, %s13646_s17  ;;  %9225 = vrot.lane.b32.xlu0 %v8947_v17, %s13642_s30 }
 0x523   : > { %8832 = vmatpush1.bf16.msra.mxu0 %v13418_v6 }
 0x524   : > { %8833 = vmatprep.subr.bf16.mxu0 %v13419_v39 }
 0x526   : > { %10417 = vrot.lane.b32.xlu1 %v8947_v17, %s13647_s18  ;;  %9449 = vrot.lane.b32.xlu0 %v8947_v17, %s19351_s2 }
 0x527   : > { %8834 = vmatpush1.bf16.msra.mxu0 %v13420_v14 }
 0x528   : > { %8835 = vmatprep.subr.bf16.mxu0 %v12648_v42 }
 0x52a   : > { %10641 = vrot.lane.b32.xlu1 %v8947_v17, %s19382_s1  ;;  %9673 = vrot.lane.b32.xlu0 %v8947_v17, %s13644_s10  ;;  %v17910_v36 = vpop.permute.xlu1 %9217 }
 0x52b   : > { %8836 = vmatpush1.bf16.msra.mxu0 %v12647_v25  ;;  %v17908_v2 = vpop.permute.xlu0 %8993 }
 0x52c   : > { %8837 = vmatprep.subr.bf16.mxu0 %v12664_v10 }
 0x52e   : > { %9003 = vrot.lane.b32.xlu1 %v8948_v30, %s19384_s11  ;;  %9971 = vrot.lane.b32.xlu0 %v8948_v30, %s13645_s15  ;;  %v17922_v13 = vpop.permute.xlu1 %9665 }
 0x52f   : > { %8838 = vmatpush1.bf16.msra.mxu0 %v12663_v56  ;;  %v17916_v55 = vpop.permute.xlu0 %9441 }
 0x530   : > { %8839 = vmatprep.subr.bf16.mxu0 %v8573_v59 }
 0x532   : > { %9227 = vrot.lane.b32.xlu1 %v8948_v30, %s13642_s30  ;;  %10195 = vrot.lane.b32.xlu0 %v8948_v30, %s13646_s17  ;;  %v17930_v35 = vpop.permute.xlu1 %10185 }
 0x533   : > { %8840 = vmatpush1.bf16.msra.mxu0 %v8570_v47  ;;  %v17928_v57 = vpop.permute.xlu0 %9961 }
 0x536   : > { %9451 = vrot.lane.b32.xlu1 %v8948_v30, %s19351_s2  ;;  %10419 = vrot.lane.b32.xlu0 %v8948_v30, %s13647_s18  ;;  %v17938_v9 = vpop.permute.xlu1 %10633 }
 0x537   : > { %12689 = vmatmul.mubr.msk.bf16.vlgmr.msra.gmra.mrb[28].mxu0 %vm5545_vm7, %v17533_v33  ;;  %v17936_v17 = vpop.permute.xlu0 %10409 }
 0x538   : > { %11593 = vmatprep.mubr.bf16.mxu0 %v19396_v15 }
 0x53a   : > { %9675 = vrot.lane.b32.xlu1 %v8948_v30, %s13644_s10  ;;  %10643 = vrot.lane.b32.xlu0 %v8948_v30, %s19382_s1  ;;  %v17942_v58 = vpop.permute.xlu1 %8995 }
 0x53b   : > { %v17940_v23 = vpop.permute.xlu0 %9219  ;;  %19540 = vst [vmem:[#allocation38_spill] sm:$0xff] %v17942_v58  ;;  %v9033_v15 = vsel %vm1121_vm1, %v17908_v2, %v17942_v58 }
 0x53c   : > { %19539 = vst [vmem:[#allocation23_spill] sm:$0xff] %v17940_v23 }
 0x53e   : > { %v17958_v1 = vpop.permute.xlu1 %9443 }
 0x53f   : > { %v17954_v16 = vpop.permute.xlu0 %9667  ;;  %19543 = vst [vmem:[#allocation25_spill] sm:$0xff] %v17958_v1 }
 0x540   : > { %19542 = vst [vmem:[#allocation39_spill] sm:$0xff] %v17954_v16  ;;  %v9705_v49 = vsel %vm1801_vm4, %v17922_v13, %v17954_v16 }
 0x542   : > { %v17966_v39 = vpop.permute.xlu1 %9963 }
 0x543   : > { %v17964_v6 = vpop.permute.xlu0 %10187 }
 0x546   : > { %v17980_v10 = vpop.permute.xlu1 %10411 }
 0x547   : > { %v17978_v11 = vpop.permute.xlu0 %10635 }
 0x58f   : > { %v8820_v51 = vpop.f32.mrb[24].mxu1 }
 0x590   : > { %vm8919_vm6 = vcmp.gt.f32.partialorder %v8820_v51, 0.0  ;;  %v8935_v24 = vmul.f32 0.1, %v8820_v51  ;;  %v8822_v28 = vpop.f32.mrb[25].mxu1  ;;  %v17986_v52 = vpop.permute.xlu0 %9001 }
 0x591   : > { %vm8920_vm0 = vcmp.gt.f32.partialorder %v8822_v28, 0.0  ;;  %v8936_v38 = vmul.f32 0.1, %v8822_v28  ;;  %v8824_v60 = vpop.f32.mrb[26].mxu1  ;;  %19546 = vst [vmem:[#allocation44_spill] sm:$0xff] %v17986_v52  ;;  %v17988_v56 = vpop.permute.xlu1 %9969 }
 0x592   : > { %v17874_v22 = vsel %vm8919_vm6, %v8820_v51, %v8935_v24  ;;  %v8825_v40 = vpop.f32.mrb[27].mxu1  ;;  %19547 = vst [vmem:[#allocation31_spill] sm:$0xff] %v17988_v56  ;;  %v19569_v56 = vld [vmem:[#allocation22_spill] sm:$0xff] }
 0x593   : > { %8967 = vst [vmem:[#allocation2 + $0x50] sm:$0xff] %v17874_v22  ;;  %v17877_v54 = vsel %vm8920_vm0, %v8822_v28, %v8936_v38  ;;  %9009 = vrot.lane.b32.xlu0 %v17874_v22, %s19384_s11 }
 0x594   : > { %8968 = vst [vmem:[#allocation2 + $0x58] sm:$0xff] %v17877_v54  ;;  %9011 = vrot.lane.b32.xlu1 %v17877_v54, %s19384_s11  ;;  %v13142_v33 = vpack.c.bf16 %v17877_v54, %v17874_v22  ;;  %v17998_v63 = vpop.permute.xlu0 %9225 }
 0x595   : > { %19548 = vst [vmem:[#allocation51_spill] sm:$0xff] %v17998_v63  ;;  %v18000_v59 = vpop.permute.xlu1 %10193 }
 0x596   : > { %9954 = vst [vmem:[#allocation3 + $0x128] sm:$0xff] %v13142_v33  ;;  %19549 = vst [vmem:[#allocation30_spill] sm:$0xff] %v18000_v59  ;;  %v10229_v59 = vld [vmem:[#allocation11 + $0x5] ss:$8 sm:$0xf] }
 0x598   : > { %v18006_v47 = vpop.permute.xlu0 %9449 }
 0x599   : > { %19550 = vst [vmem:[#allocation54_spill] sm:$0xff] %v18006_v47  ;;  %v18008_v51 = vpop.permute.xlu1 %10417 }
 0x59a   : > { %19551 = vst [vmem:[#allocation43_spill] sm:$0xff] %v18008_v51  ;;  %v19566_v51 = vld [vmem:[#allocation21_spill] sm:$0xff] }
 0x59c   : > { %v18018_v60 = vpop.permute.xlu0 %9673 }
 0x59d   : > { %19552 = vst [vmem:[#allocation55_spill] sm:$0xff] %v18018_v60 }
 0x59f   : > { %v8615_v5 = vpop.f32.mrb[16].mxu0 }
 0x5a0   : > { %vm8909_vm8 = vcmp.gt.f32.partialorder %v8615_v5, 0.0  ;;  %v8925_v61 = vmul.f32 0.1, %v8615_v5  ;;  %v8617_v7 = vpop.f32.mrb[17].mxu0 }
 0x5a1   : > { %vm8910_vm9 = vcmp.gt.f32.partialorder %v8617_v7, 0.0  ;;  %v8926_v31 = vmul.f32 0.1, %v8617_v7  ;;  %v8619_v4 = vpop.f32.mrb[18].mxu0 }
 0x5a2   : > { %v17886_v45 = vsel %vm8909_vm8, %v8615_v5, %v8925_v61  ;;  %v8620_v29 = vpop.f32.mrb[19].mxu0  ;;  %v18020_v5 = vpop.permute.xlu1 %10641 }
 0x5a3   : > { %19537 = vst [vmem:[#allocation26_spill] sm:$0xff] %v17886_v45  ;;  %8957 = vst [vmem:[#allocation2] sm:$0xff] %v17886_v45  ;;  %v17889_v46 = vsel %vm8910_vm9, %v8617_v7, %v8926_v31  ;;  %9213 = vrot.lane.b32.xlu1 %v17886_v45, %s13642_s30  ;;  %8989 = vrot.lane.b32.xlu0 %v17886_v45, %s19384_s11  ;;  %v18030_v29 = vpop.permute.xlu0 %9971 }
 0x5a4   : > { %19538 = vst [vmem:[#allocation32_spill] sm:$0xff] %v17889_v46  ;;  %8958 = vst [vmem:[#allocation2 + $0x8] sm:$0xff] %v17889_v46 }
 0x5a5   : > { %19553 = vst [vmem:[#allocation40_spill] sm:$0xff] %v18020_v5  ;;  %19554 = vst [vmem:[#allocation29_spill] sm:$0xff] %v18030_v29 }
 0x5a7   : > { %9661 = vrot.lane.b32.xlu1 %v17886_v45, %s13644_s10  ;;  %9437 = vrot.lane.b32.xlu0 %v17886_v45, %s19351_s2 }
 0x5ab   : > { %10181 = vrot.lane.b32.xlu1 %v17886_v45, %s13646_s17  ;;  %9957 = vrot.lane.b32.xlu0 %v17886_v45, %s13645_s15 }
 0x5af   : > { %10629 = vrot.lane.b32.xlu1 %v17886_v45, %s19382_s1  ;;  %10405 = vrot.lane.b32.xlu0 %v17886_v45, %s13647_s18  ;;  %v10453_v45 = vld [vmem:[#allocation11 + $0x6] ss:$8 sm:$0xf] }
 0x5b3   : > { %9215 = vrot.lane.b32.xlu0 %v17889_v46, %s13642_s30  ;;  %8991 = vrot.lane.b32.xlu1 %v17889_v46, %s19384_s11 }
 0x5b7   : > { %9663 = vrot.lane.b32.xlu0 %v17889_v46, %s13644_s10  ;;  %9439 = vrot.lane.b32.xlu1 %v17889_v46, %s19351_s2 }
 0x5bb   : > { %10183 = vrot.lane.b32.xlu0 %v17889_v46, %s13646_s17  ;;  %9959 = vrot.lane.b32.xlu1 %v17889_v46, %s13645_s15 }
 0x5bf   : > { %10631 = vrot.lane.b32.xlu0 %v17889_v46, %s19382_s1  ;;  %10407 = vrot.lane.b32.xlu1 %v17889_v46, %s13647_s18 }
 0x5c7   : > { %v8902_v44 = vpop.f32.mrb[28].mxu1 }
 0x5c8   : > { %vm8923_vm10 = vcmp.gt.f32.partialorder %v8902_v44, 0.0  ;;  %v8939_v30 = vmul.f32 0.1, %v8902_v44  ;;  %v8904_v19 = vpop.f32.mrb[29].mxu1 }
 0x5c9   : > { %vm8924_vm11 = vcmp.gt.f32.partialorder %v8904_v19, 0.0  ;;  %v8940_v62 = vmul.f32 0.1, %v8904_v19  ;;  %v8906_v20 = vpop.f32.mrb[30].mxu1 }
 0x5ca   : > { %v17944_v34 = vsel %vm8923_vm10, %v8902_v44, %v8939_v30  ;;  %v8907_v3 = vpop.f32.mrb[31].mxu1  ;;  %v18032_v44 = vpop.permute.xlu1 %9003 }
 0x5cb   : > { %8971 = vst [vmem:[#allocation2 + $0x70] sm:$0xff] %v17944_v34  ;;  %v17947_v8 = vsel %vm8924_vm11, %v8904_v19, %v8940_v62  ;;  %19555 = vst [vmem:[#allocation24_spill] sm:$0xff] %v18032_v44  ;;  %v18040_v30 = vpop.permute.xlu0 %10195 }
 0x5cc   : > { %19541 = vst [vmem:[#allocation28_spill] sm:$0xff] %v17947_v8  ;;  %8972 = vst [vmem:[#allocation2 + $0x78] sm:$0xff] %v17947_v8  ;;  %9019 = vrot.lane.b32.xlu0 %v17947_v8, %s19384_s11  ;;  %9243 = vrot.lane.b32.xlu1 %v17947_v8, %s13642_s30  ;;  %v13144_v37 = vpack.c.bf16 %v17947_v8, %v17944_v34 }
 0x5cd   : > { %19556 = vst [vmem:[#allocation58_spill] sm:$0xff] %v18040_v30  ;;  %v10230_v30 = vld [vmem:[#allocation11 + $0x5] ss:$8 sm:$0xf0] }
 0x5ce   : > { %9956 = vst [vmem:[#allocation3 + $0x138] sm:$0xff] %v13144_v37  ;;  %v18042_v19 = vpop.permute.xlu1 %9227  ;;  %v18156_v63 = vor.u32 %v10230_v30, %v10229_v59 }
 0x5cf   : > { %19557 = vst [vmem:[#allocation27_spill] sm:$0xff] %v18042_v19  ;;  %v18047_v62 = vpop.permute.xlu0 %10419 }
 0x5d0   : > { %9467 = vrot.lane.b32.xlu0 %v17947_v8, %s19351_s2  ;;  %9691 = vrot.lane.b32.xlu1 %v17947_v8, %s13644_s10  ;;  %19558 = vst [vmem:[#allocation57_spill] sm:$0xff] %v18047_v62 }
 0x5d1   : > { %v8697_v0 = vpop.f32.mrb[20].mxu0 }
 0x5d2   : > { %vm8913_vm5 = vcmp.gt.f32.partialorder %v8697_v0, 0.0  ;;  %v8929_v14 = vmul.f32 0.1, %v8697_v0  ;;  %v8699_v48 = vpop.f32.mrb[21].mxu0  ;;  %v18049_v20 = vpop.permute.xlu1 %9451 }
 0x5d3   : > { %vm8914_vm6 = vcmp.gt.f32.partialorder %v8699_v48, 0.0  ;;  %v8930_v42 = vmul.f32 0.1, %v8699_v48  ;;  %v8701_v27 = vpop.f32.mrb[22].mxu0  ;;  %19559 = vst [vmem:[#allocation37_spill] sm:$0xff] %v18049_v20  ;;  %v18057_v3 = vpop.permute.xlu0 %10643 }
 0x5d4   : > { %v17968_v18 = vsel %vm8913_vm5, %v8697_v0, %v8929_v14  ;;  %v8702_v25 = vpop.f32.mrb[23].mxu0  ;;  %19560 = vst [vmem:[#allocation61_spill] sm:$0xff] %v18057_v3  ;;  %v9710_v3 = vld [vmem:[#allocation11 + $0x3] ss:$8 sm:$0xf0] }
 0x5d5   : > { %19544 = vst [vmem:[#allocation35_spill] sm:$0xff] %v17968_v18  ;;  %8961 = vst [vmem:[#allocation2 + $0x20] sm:$0xff] %v17968_v18  ;;  %v17971_v53 = vsel %vm8914_vm6, %v8699_v48, %v8930_v42  ;;  %10189 = vrot.lane.b32.xlu1 %v17968_v18, %s13646_s17  ;;  %9965 = vrot.lane.b32.xlu0 %v17968_v18, %s13645_s15 }
 0x5d6   : > { %19545 = vst [vmem:[#allocation34_spill] sm:$0xff] %v17971_v53  ;;  %8962 = vst [vmem:[#allocation2 + $0x28] sm:$0xff] %v17971_v53  ;;  %v18059_v37 = vpop.permute.xlu1 %9675 }
 0x5d7   : > { %19561 = vst [vmem:[#allocation41_spill] sm:$0xff] %v18059_v37 }
 0x5d9   : > { %10637 = vrot.lane.b32.xlu1 %v17968_v18, %s19382_s1  ;;  %10413 = vrot.lane.b32.xlu0 %v17968_v18, %s13647_s18 }
 0x5dd   : > { %8997 = vrot.lane.b32.xlu0 %v17968_v18, %s19384_s11  ;;  %8999 = vrot.lane.b32.xlu1 %v17971_v53, %s19384_s11 }
 0x5e1   : > { %9221 = vrot.lane.b32.xlu0 %v17968_v18, %s13642_s30  ;;  %9223 = vrot.lane.b32.xlu1 %v17971_v53, %s13642_s30 }
 0x5e5   : > { %9445 = vrot.lane.b32.xlu0 %v17968_v18, %s19351_s2  ;;  %9447 = vrot.lane.b32.xlu1 %v17971_v53, %s19351_s2 }
 0x5e9   : > { %9669 = vrot.lane.b32.xlu0 %v17968_v18, %s13644_s10  ;;  %9671 = vrot.lane.b32.xlu1 %v17971_v53, %s13644_s10 }
 0x5ed   : > { %v8779_v24 = vpop.f32.mrb[24].mxu0  ;;  %9967 = vrot.lane.b32.xlu0 %v17971_v53, %s13645_s15  ;;  %9235 = vrot.lane.b32.xlu1 %v17877_v54, %s13642_s30 }
 0x5ee   : > { %vm8917_vm0 = vcmp.gt.f32.partialorder %v8779_v24, 0.0  ;;  %v8933_v28 = vmul.f32 0.1, %v8779_v24  ;;  %v8781_v38 = vpop.f32.mrb[25].mxu0 }
 0x5ef   : > { %vm8918_vm8 = vcmp.gt.f32.partialorder %v8781_v38, 0.0  ;;  %v8934_v40 = vmul.f32 0.1, %v8781_v38  ;;  %v8783_v33 = vpop.f32.mrb[26].mxu0 }
 0x5f0   : > { %v8949_v61 = vsel %vm8917_vm0, %v8779_v24, %v8933_v28  ;;  %v8784_v7 = vpop.f32.mrb[27].mxu0 }
 0x5f1   : > { %8965 = vst [vmem:[#allocation2 + $0x40] sm:$0xff] %v8949_v61  ;;  %v18022_v31 = vsel %vm8918_vm8, %v8781_v38, %v8934_v40  ;;  %10191 = vrot.lane.b32.xlu0 %v17971_v53, %s13646_s17  ;;  %9459 = vrot.lane.b32.xlu1 %v17877_v54, %s19351_s2 }
 0x5f2   : > { %8966 = vst [vmem:[#allocation2 + $0x48] sm:$0xff] %v18022_v31  ;;  %v13141_v4 = vpack.c.bf16 %v18022_v31, %v8949_v61 }
 0x5f4   : > { %9953 = vst [vmem:[#allocation3 + $0x120] sm:$0xff] %v13141_v4 }
 0x5f5   : > { %10415 = vrot.lane.b32.xlu0 %v17971_v53, %s13647_s18  ;;  %9973 = vrot.lane.b32.xlu1 %v8949_v61, %s13645_s15 }
 0x5f9   : > { %10639 = vrot.lane.b32.xlu0 %v17971_v53, %s19382_s1  ;;  %10197 = vrot.lane.b32.xlu1 %v8949_v61, %s13646_s17 }
 0x5fd   : > { %9233 = vrot.lane.b32.xlu0 %v17874_v22, %s13642_s30  ;;  %10421 = vrot.lane.b32.xlu1 %v8949_v61, %s13647_s18 }
 0x601   : > { %9457 = vrot.lane.b32.xlu0 %v17874_v22, %s19351_s2  ;;  %10645 = vrot.lane.b32.xlu1 %v8949_v61, %s19382_s1 }
 0x605   : > { %9005 = vrot.lane.b32.xlu0 %v8949_v61, %s19384_s11  ;;  %9683 = vrot.lane.b32.xlu1 %v17877_v54, %s13644_s10  ;;  %v18064_v14 = vpop.permute.xlu0 %9009 }
 0x606   : > { %19562 = vst [vmem:[#allocation62_spill] sm:$0xff] %v18064_v14  ;;  %v18066_v27 = vpop.permute.xlu1 %9011  ;;  %v9486_v14 = vld [vmem:[#allocation11 + $0x2] ss:$8 sm:$0xf0] }
 0x607   : > { %19563 = vst [vmem:[#allocation42_spill] sm:$0xff] %v18066_v27  ;;  %v9709_v27 = vld [vmem:[#allocation11 + $0x3] ss:$8 sm:$0xf] }
 0x608   : > { %v18110_v53 = vor.u32 %v9710_v3, %v9709_v27  ;;  %v10005_v3 = vld [vmem:[#allocation11 + $0x4] ss:$8 sm:$0xf] }
 0x609   : > { %9229 = vrot.lane.b32.xlu0 %v8949_v61, %s13642_s30  ;;  %9007 = vrot.lane.b32.xlu1 %v18022_v31, %s19384_s11  ;;  %v10006_v27 = vld [vmem:[#allocation11 + $0x4] ss:$8 sm:$0xf0] }
 0x60a   : > { %v8861_v0 = vpop.f32.mrb[28].mxu0  ;;  %v9732_v58 = vrot.slane %v18110_v53, %v19566_v51  ;;  %v18146_v46 = vor.u32 %v10006_v27, %v10005_v3  ;;  %v9728_v52 = vrot.slane %v18110_v53, %v19569_v56 }
 0x60b   : > { %vm8921_vm9 = vcmp.gt.f32.partialorder %v8861_v0, 0.0  ;;  %v8937_v48 = vmul.f32 0.1, %v8861_v0  ;;  %v8863_v42 = vpop.f32.mrb[29].mxu0 }
 0x60c   : > { %vm8922_vm10 = vcmp.gt.f32.partialorder %v8863_v42, 0.0  ;;  %v8938_v25 = vmul.f32 0.1, %v8863_v42  ;;  %v8865_v24 = vpop.f32.mrb[30].mxu0  ;;  %v9800_v30 = vmul.f32 %v9732_v58, %v9705_v49 }
 0x60d   : > { %v18068_v28 = vsel %vm8921_vm9, %v8861_v0, %v8937_v48  ;;  %v8866_v38 = vpop.f32.mrb[31].mxu0  ;;  %9453 = vrot.lane.b32.xlu0 %v8949_v61, %s19351_s2  ;;  %9231 = vrot.lane.b32.xlu1 %v18022_v31, %s13642_s30  ;;  %v9037_v0 = vld [vmem:[#allocation11] ss:$8 sm:$0xf] }
 0x60e   : > { %8969 = vst [vmem:[#allocation2 + $0x60] sm:$0xff] %v18068_v28  ;;  %v18074_v40 = vsel %vm8922_vm10, %v8863_v42, %v8938_v25  ;;  %v9038_v48 = vld [vmem:[#allocation11] ss:$8 sm:$0xf0] }
 0x60f   : > { %8970 = vst [vmem:[#allocation2 + $0x68] sm:$0xff] %v18074_v40  ;;  %v13143_v33 = vpack.c.bf16 %v18074_v40, %v18068_v28  ;;  %v9262_v24 = vld [vmem:[#allocation11 + $0x1] ss:$8 sm:$0xf0]  ;;  %v18094_v38 = vor.u32 %v9038_v48, %v9037_v0 }
 0x611   : > { %9955 = vst [vmem:[#allocation3 + $0x130] sm:$0xff] %v13143_v33  ;;  %9677 = vrot.lane.b32.xlu0 %v8949_v61, %s13644_s10  ;;  %9455 = vrot.lane.b32.xlu1 %v18022_v31, %s19351_s2  ;;  %v9261_v61 = vld [vmem:[#allocation11 + $0x1] ss:$8 sm:$0xf]  ;;  %v9060_v0 = vrot.slane %v18094_v38, %v19566_v51  ;;  %v9056_v60 = vrot.slane %v18094_v38, %v19569_v56 }
 0x612   : > { %v9485_v33 = vld [vmem:[#allocation11 + $0x2] ss:$8 sm:$0xf]  ;;  %v18104_v18 = vor.u32 %v9262_v24, %v9261_v61 }
 0x613   : > { %v18108_v48 = vor.u32 %v9486_v14, %v9485_v33  ;;  %v9257_v33 = vsel %vm1347_vm2, %v17910_v36, %v17940_v23  ;;  %v9128_v37 = vmul.f32 %v9060_v0, %v9033_v15  ;;  %v9481_v23 = vsel %vm1574_vm3, %v17916_v55, %v17958_v1  ;;  %v10677_v15 = vld [vmem:[#allocation11 + $0x7] ss:$8 sm:$0xf] }
 0x614   : > { %v9284_v14 = vrot.slane %v18104_v18, %v19566_v51  ;;  %v9280_v29 = vrot.slane %v18104_v18, %v19569_v56  ;;  %v10678_v0 = vld [vmem:[#allocation11 + $0x7] ss:$8 sm:$0xf0] }
 0x615   : > { %v18082_v7 = vpop.permute.xlu1 %9213  ;;  %v18084_v4 = vpop.permute.xlu0 %8989  ;;  %9681 = vrot.lane.b32.xlu0 %v17874_v22, %s13644_s10  ;;  %9679 = vrot.lane.b32.xlu1 %v18022_v31, %s13644_s10  ;;  %v9508_v8 = vrot.slane %v18108_v48, %v19566_v51  ;;  %v18172_v44 = vor.u32 %v10678_v0, %v10677_v15 }
 0x616   : > { %v9352_v1 = vmul.f32 %v9284_v14, %v9257_v33  ;;  %v9504_v14 = vrot.slane %v18108_v48, %v19569_v56  ;;  %v18170_v33 = vor.u32 %v10454_v50, %v10453_v45  ;;  %v10244_v45 = vrot.slane %v18156_v63, %v19485_v41 }
 0x617   : > { %v9576_v59 = vmul.f32 %v9508_v8, %v9481_v23  ;;  %v10016_v23 = vrot.slane %v18146_v46, %v19484_v43  ;;  %v10688_v15 = vrot.slane %v18172_v44, %v19484_v43 }
 0x619   : > { %v18090_v42 = vpop.permute.xlu1 %9661  ;;  %v18092_v25 = vpop.permute.xlu0 %9437  ;;  %9975 = vrot.lane.b32.xlu0 %v18022_v31, %s13645_s15  ;;  %9977 = vrot.lane.b32.xlu1 %v17874_v22, %s13645_s15 }
 0x61d   : > { %v18100_v5 = vpop.permute.xlu1 %10181  ;;  %v18102_v62 = vpop.permute.xlu0 %9957  ;;  %9979 = vrot.lane.b32.xlu0 %v17877_v54, %s13645_s15  ;;  %10201 = vrot.lane.b32.xlu1 %v17874_v22, %s13646_s17 }
 0x61e   : > { %19564 = vst [vmem:[#allocation67_spill] sm:$0xff] %v18100_v5  ;;  %19565 = vst [vmem:[#allocation53_spill] sm:$0xff] %v18102_v62 }
 0x621   : > { %v18120_v61 = vpop.permute.xlu1 %10629  ;;  %v18122_v24 = vpop.permute.xlu0 %10405  ;;  %10199 = vrot.lane.b32.xlu0 %v18022_v31, %s13646_s17  ;;  %10425 = vrot.lane.b32.xlu1 %v17874_v22, %s13647_s18 }
 0x622   : > { %19567 = vst [vmem:[#allocation71_spill] sm:$0xff] %v18120_v61  ;;  %19568 = vst [vmem:[#allocation56_spill] sm:$0xff] %v18122_v24 }
 0x625   : > { %v18152_v47 = vpop.permute.xlu0 %9215  ;;  %v18154_v20 = vpop.permute.xlu1 %8991  ;;  %10203 = vrot.lane.b32.xlu0 %v17877_v54, %s13646_s17  ;;  %9981 = vrot.lane.b32.xlu1 %v18068_v28, %s13645_s15 }
 0x626   : > { %v9258_v3 = vsel %vm1347_vm2, %v18152_v47, %v17910_v36  ;;  %v9034_v27 = vsel %vm1121_vm1, %v18154_v20, %v17908_v2 }
 0x627   : > { %v9351_v16 = vmul.f32 %v9280_v29, %v9258_v3  ;;  %v9127_v19 = vmul.f32 %v9056_v60, %v9034_v27  ;;  %v10240_v60 = vrot.slane %v18156_v63, %v19484_v43  ;;  %v10020_v29 = vrot.slane %v18146_v46, %v19485_v41 }
 0x628   : > { %v13422_v3 = vpack.c.bf16 %v9352_v1, %v9128_v37 }
 0x629   : > { %v18178_v2 = vpop.permute.xlu0 %9663  ;;  %v18180_v36 = vpop.permute.xlu1 %9439  ;;  %v13421_v0 = vpack.c.bf16 %v9351_v16, %v9127_v19  ;;  %10423 = vrot.lane.b32.xlu0 %v18022_v31, %s13647_s18  ;;  %10205 = vrot.lane.b32.xlu1 %v18068_v28, %s13646_s17 }
 0x62a   : > { %v9706_v49 = vsel %vm1801_vm4, %v18178_v2, %v17922_v13  ;;  %v9482_v50 = vsel %vm1574_vm3, %v18180_v36, %v17916_v55  ;;  %v10692_v13 = vrot.slane %v18172_v44, %v19485_v41  ;;  %v10464_v55 = vrot.slane %v18170_v33, %v19484_v43  ;;  %11602 = vmatprep.subr.bf16.mxu1 %v13422_v3  ;;  %v10950_v3 = vld [vmem:[#allocation3 + $0x300] sm:$0xff] }
 0x62b   : > { %v9799_v58 = vmul.f32 %v9728_v52, %v9706_v49  ;;  %v9575_v8 = vmul.f32 %v9504_v14, %v9482_v50  ;;  %v10468_v14 = vrot.slane %v18170_v33, %v19485_v41  ;;  %11603 = vmatpush1.bf16.msra.mxu1 %v13421_v0 }
 0x62d   : > { %v10184_v52 = vpop.permute.xlu0 %10183  ;;  %v9960_v27 = vpop.permute.xlu1 %9959  ;;  %v13423_v21 = vpack.c.bf16 %v9799_v58, %v9575_v8  ;;  %10427 = vrot.lane.b32.xlu0 %v17877_v54, %s13647_s18  ;;  %10429 = vrot.lane.b32.xlu1 %v18068_v28, %s13647_s18 }
 0x62e   : > { %v10226_v49 = vsel %vm2327_vm13, %v10184_v52, %v17930_v35  ;;  %v10227_v16 = vsel %vm2327_vm13, %v18100_v5, %v10184_v52  ;;  %v10002_v1 = vsel %vm2100_vm12, %v9960_v27, %v17928_v57  ;;  %v10003_v19 = vsel %vm2100_vm12, %v18102_v62, %v9960_v27 }
 0x62f   : > { %v18222_v37 = vmul.f32 %v10240_v60, %v10227_v16  ;;  %v18224_v50 = vmul.f32 %v10244_v45, %v10226_v49  ;;  %v18226_v51 = vmul.f32 %v10016_v23, %v10003_v19  ;;  %v18228_v12 = vmul.f32 %v10020_v29, %v10002_v1  ;;  %v18256_v49 = vld [vmem:[#allocation3 + $0x280] sm:$0xff]  ;;  %v18258_v16 = vld [vmem:[#allocation3 + $0x288] sm:$0xff] }
 0x630   : > { %v13424_v52 = vpack.c.bf16 %v9800_v30, %v9576_v59  ;;  %v9276_v19 = vrot.slane %v18104_v18, %v19485_v41  ;;  %v9500_v1 = vrot.slane %v18108_v48, %v19485_v41 }
 0x631   : > { %v10632_v5 = vpop.permute.xlu0 %10631  ;;  %v10408_v27 = vpop.permute.xlu1 %10407  ;;  %10647 = vrot.lane.b32.xlu0 %v18022_v31, %s19382_s1  ;;  %10649 = vrot.lane.b32.xlu1 %v17874_v22, %s19382_s1  ;;  %v18266_v31 = vld [vmem:[#allocation3 + $0x2c0] sm:$0xff] }
 0x632   : > { %v10674_v60 = vsel %vm2781_vm15, %v10632_v5, %v17938_v9  ;;  %v10675_v45 = vsel %vm2781_vm15, %v18120_v61, %v10632_v5  ;;  %v10450_v59 = vsel %vm2554_vm14, %v10408_v27, %v17936_v17  ;;  %v10451_v30 = vsel %vm2554_vm14, %v18122_v24, %v10408_v27  ;;  %11604 = vmatprep.subr.bf16.mxu1 %v13424_v52  ;;  %v10958_v5 = vld [vmem:[#allocation3 + $0x340] sm:$0x77] }
 0x633   : > { %v10765_v23 = vmul.f32 %v10688_v15, %v10675_v45  ;;  %v10766_v58 = vmul.f32 %v10692_v13, %v10674_v60  ;;  %v18246_v8 = vmul.f32 %v10464_v55, %v10451_v30  ;;  %v18248_v29 = vmul.f32 %v10468_v14, %v10450_v59  ;;  %11605 = vmatpush1.bf16.msra.mxu1 %v13423_v21  ;;  %v18264_v13 = vld [vmem:[#allocation3 + $0x348] sm:$0x77] }
 0x634   : > { %v12859_v15 = vcombine.low %v10950_v3, %v10958_v5  ;;  %v12860_v21 = vcombine.high %v10950_v3, %v10958_v5  ;;  %v18268_v55 = vld [vmem:[#allocation3 + $0x2c8] sm:$0xff]  ;;  %v9259_v45 = vsel %vm1347_vm2, %v18082_v7, %v18152_v47  ;;  %v9048_v47 = vrot.slane %v18094_v38, %v19484_v43 }
 0x635   : > { %v18250_v0 = vpack.c.bf16 %v10766_v58, %v10765_v23  ;;  %10651 = vrot.lane.b32.xlu0 %v17877_v54, %s19382_s1  ;;  %10653 = vrot.lane.b32.xlu1 %v18068_v28, %s19382_s1  ;;  %v18276_v54 = vld [vmem:[#allocation3 + $0x308] sm:$0xff]  ;;  %v10024_v23 = vrot.slane %v18146_v46, %v19569_v56  ;;  %v9052_v58 = vrot.slane %v18094_v38, %v19485_v41 }
 0x636   : > { %v18283_v27 = vand.u32 %v12859_v15, %v15313_v32  ;;  %v18296_v59 = vand.u32 %v12860_v21, %v15313_v32  ;;  %v12862_v30 = vcombine.high %v18276_v54, %v18264_v13  ;;  %v9272_v5 = vrot.slane %v18104_v18, %v19484_v43 }
 0x637   : > { %v10001_v3 = vsel %vm2100_vm12, %v17928_v57, %v17966_v39  ;;  %v10248_v15 = vrot.slane %v18156_v63, %v19569_v56  ;;  %v9035_v21 = vsel %vm1121_vm1, %v18084_v4, %v18154_v20  ;;  %v9724_v60 = vrot.slane %v18110_v53, %v19485_v41 }
 0x638   : > { %v9350_v14 = vmul.f32 %v9276_v19, %v9259_v45  ;;  %v9496_v57 = vrot.slane %v18108_v48, %v19484_v43  ;;  %v9720_v61 = vrot.slane %v18110_v53, %v19484_v43  ;;  %v9707_v20 = vsel %vm1801_vm4, %v18090_v42, %v18178_v2 }
 0x639   : > { %9013 = vrot.lane.b32.xlu0 %v18068_v28, %s19384_s11  ;;  %9015 = vrot.lane.b32.xlu1 %v18074_v40, %s19384_s11  ;;  %v9126_v24 = vmul.f32 %v9052_v58, %v9035_v21  ;;  %v9483_v2 = vsel %vm1574_vm3, %v18092_v25, %v18180_v36  ;;  %v10449_v58 = vsel %vm2554_vm14, %v17936_v17, %v17980_v10 }
 0x63a   : > { %v10696_v21 = vrot.slane %v18172_v44, %v19569_v56  ;;  %v10673_v36 = vsel %vm2781_vm15, %v17938_v9, %v17978_v11 }
 0x63d   : > { %9017 = vrot.lane.b32.xlu0 %v17944_v34, %s19384_s11  ;;  %9237 = vrot.lane.b32.xlu1 %v18068_v28, %s13642_s30 }
 0x63e   : > { %v18322_v22 = vpop.permute.xlu0 %9019  ;;  %v18324_v52 = vpop.permute.xlu1 %9243 }
 0x63f   : > { %19570 = vst [vmem:[#allocation66_spill] sm:$0xff] %v18322_v22  ;;  %19571 = vst [vmem:[#allocation52_spill] sm:$0xff] %v18324_v52  ;;  %v9036_v19 = vsel %vm1121_vm1, %v18322_v22, %v18084_v4  ;;  %v9260_v45 = vsel %vm1347_vm2, %v18324_v52, %v18082_v7  ;;  %v10225_v4 = vsel %vm2327_vm13, %v17930_v35, %v17964_v6 }
 0x640   : > { %v9125_v62 = vmul.f32 %v9048_v47, %v9036_v19  ;;  %v9349_v41 = vmul.f32 %v9272_v5, %v9260_v45  ;;  %v10472_v7 = vrot.slane %v18170_v33, %v19569_v56  ;;  %v9798_v47 = vmul.f32 %v9724_v60, %v9707_v20  ;;  %v19575_v56 = vld [vmem:[#allocation47_spill] sm:$0xff] }
 0x641   : > { %v9574_v19 = vmul.f32 %v9500_v1, %v9483_v2  ;;  %9239 = vrot.lane.b32.xlu0 %v18074_v40, %s13642_s30  ;;  %9241 = vrot.lane.b32.xlu1 %v17944_v34, %s13642_s30  ;;  %v13426_v1 = vpack.c.bf16 %v9350_v14, %v9126_v24  ;;  %v10095_v2 = vmul.f32 %v10024_v23, %v10001_v3  ;;  %v19577_v3 = vld [vmem:[#allocation24_spill] sm:$0xff] }
 0x642   : > { %v18366_v5 = vpop.permute.xlu0 %9467  ;;  %v18368_v35 = vpop.permute.xlu1 %9691  ;;  %v13425_v20 = vpack.c.bf16 %v9349_v41, %v9125_v62  ;;  %v18382_v52 = vmul.f32 %v10248_v15, %v10225_v4  ;;  %v18384_v22 = vmul.f32 %v10472_v7, %v10449_v58  ;;  %v19576_v41 = vld [vmem:[#allocation21_spill] sm:$0xff]  ;;  %v19578_v15 = vld [vmem:[#allocation44_spill] sm:$0xff]  ;;  %v19579_v4 = vld [vmem:[#allocation27_spill] sm:$0xff] }
 0x643   : > { %19572 = vst [vmem:[#allocation70_spill] sm:$0xff] %v18366_v5  ;;  %19573 = vst [vmem:[#allocation49_spill] sm:$0xff] %v18368_v35  ;;  %v9484_v45 = vsel %vm1574_vm3, %v18366_v5, %v18092_v25  ;;  %v9708_v17 = vsel %vm1801_vm4, %v18368_v35, %v18090_v42  ;;  %v18387_v25 = vand.u32 %v12862_v30, %v15313_v32  ;;  %v19574_v42 = vld [vmem:[#allocation48_spill] sm:$0xff]  ;;  %11561 = vmatprep.subr.bf16.mxu0 %v13426_v1  ;;  %v19580_v7 = vld [vmem:[#allocation51_spill] sm:$0xff] }
 0x644   : > { %v9573_v9 = vmul.f32 %v9496_v57, %v9484_v45  ;;  %v9797_v60 = vmul.f32 %v9720_v61, %v9708_v17  ;;  %v10767_v5 = vmul.f32 %v10696_v21, %v10673_v36  ;;  %v9076_v35 = vrot.slane %v18094_v38, %v19574_v42  ;;  %11562 = vmatpush1.bf16.msra.mxu0 %v13425_v20  ;;  %v19581_v21 = vld [vmem:[#allocation37_spill] sm:$0xff]  ;;  %v19582_v36 = vld [vmem:[#allocation54_spill] sm:$0xff] }
 0x645   : > { %9461 = vrot.lane.b32.xlu0 %v18068_v28, %s19351_s2  ;;  %9463 = vrot.lane.b32.xlu1 %v18074_v40, %s19351_s2  ;;  %v10252_v62 = vrot.slane %v18156_v63, %v19576_v41  ;;  %v10028_v61 = vrot.slane %v18146_v46, %v19576_v41  ;;  %v9300_v24 = vrot.slane %v18104_v18, %v19574_v42 }
 0x646   : > { %v9524_v14 = vrot.slane %v18108_v48, %v19574_v42  ;;  %v13427_v30 = vpack.c.bf16 %v9797_v60, %v9573_v9  ;;  %v13428_v23 = vpack.c.bf16 %v9798_v47, %v9574_v19  ;;  %v9029_v57 = vsel %vm1121_vm1, %v19578_v15, %v19577_v3 }
 0x647   : > { %v9253_v58 = vsel %vm1347_vm2, %v19580_v7, %v19579_v4  ;;  %v9477_v45 = vsel %vm1574_vm3, %v19582_v36, %v19581_v21  ;;  %v18419_v9 = vpop.permute.xlu1 %10189  ;;  %v18421_v47 = vpop.permute.xlu0 %9965  ;;  %v10700_v20 = vrot.slane %v18172_v44, %v19576_v41  ;;  %v10476_v1 = vrot.slane %v18170_v33, %v19576_v41  ;;  %v19584_v41 = vld [vmem:[#allocation45_spill] sm:$0xff] }
 0x648   : > { %v10224_v19 = vsel %vm2327_vm13, %v17964_v6, %v18419_v9  ;;  %v10000_v60 = vsel %vm2100_vm12, %v17966_v39, %v18421_v47  ;;  %11563 = vmatprep.subr.bf16.mxu0 %v13428_v23  ;;  %v19583_v6 = vld [vmem:[#allocation32_spill] sm:$0xff]  ;;  %v18443_v39 = vmul.f32 %v9076_v35, %v9029_v57  ;;  %v18445_v4 = vmul.f32 %v9300_v24, %v9253_v58  ;;  %v19586_v24 = vld [vmem:[#allocation26_spill] sm:$0xff] }
 0x649   : > { %v18435_v43 = vmul.f32 %v10252_v62, %v10224_v19  ;;  %v10096_v17 = vmul.f32 %v10028_v61, %v10000_v60  ;;  %9465 = vrot.lane.b32.xlu0 %v17944_v34, %s19351_s2  ;;  %9685 = vrot.lane.b32.xlu1 %v18068_v28, %s13644_s10  ;;  %v13429_v21 = vpack.c.bf16 %v18228_v12, %v19583_v6  ;;  %v19585_v60 = vld [vmem:[#allocation46_spill] sm:$0xff] }
 0x64a   : > { %v18447_v3 = vmul.f32 %v9524_v14, %v9477_v45  ;;  %v9064_v62 = vrot.slane %v18094_v38, %v19584_v41  ;;  %11564 = vmatpush1.bf16.msra.mxu0 %v13427_v30  ;;  %v9068_v28 = vrot.slane %v18094_v38, %v19585_v60  ;;  %v9072_v12 = vrot.slane %v18094_v38, %v19575_v56  ;;  %v10887_v38 = vld [vmem:[#allocation3 + $0x108] sm:$0xff] }
 0x64b   : > { %v13146_v61 = vpack.c.bf16 %v10096_v17, %v10095_v2  ;;  %v18451_v23 = vpop.permute.xlu1 %10637  ;;  %v18453_v19 = vpop.permute.xlu0 %10413  ;;  %11565 = vmatprep.subr.bf16.mxu0 %v13429_v21  ;;  %v13430_v14 = vpack.c.bf16 %v18226_v51, %v19586_v24  ;;  %v9288_v30 = vrot.slane %v18104_v18, %v19584_v41  ;;  %v9296_v51 = vrot.slane %v18104_v18, %v19575_v56 }
 0x64c   : > { %v10672_v35 = vsel %vm2781_vm15, %v17978_v11, %v18451_v23  ;;  %v10448_v2 = vsel %vm2554_vm14, %v17980_v10, %v18453_v19  ;;  %v13431_v11 = vpack.c.bf16 %v18248_v29, %v18224_v50  ;;  %v9292_v10 = vrot.slane %v18104_v18, %v19585_v60  ;;  %v10926_v29 = vld [vmem:[#allocation3 + $0x240] sm:$0xff] }
 0x64d   : > { %v10768_v57 = vmul.f32 %v10700_v20, %v10672_v35  ;;  %v10544_v58 = vmul.f32 %v10476_v1, %v10448_v2  ;;  %9687 = vrot.lane.b32.xlu0 %v18074_v40, %s13644_s10  ;;  %9689 = vrot.lane.b32.xlu1 %v17944_v34, %s13644_s10  ;;  %v12797_v21 = vcombine.low %v10887_v38, %v13146_v61  ;;  %v19587_v35 = vld [vmem:[#allocation38_spill] sm:$0xff] }
 0x64e   : > { %11566 = vmatpush1.bf16.msra.mxu0 %v13430_v14  ;;  %v12798_v45 = vcombine.high %v10887_v38, %v13146_v61  ;;  %v13432_v6 = vpack.c.bf16 %v18246_v8, %v18222_v37  ;;  %v9512_v50 = vrot.slane %v18108_v48, %v19584_v41  ;;  %v12828_v61 = vcombine.high %v18250_v0, %v10926_v29  ;;  %v10927_v38 = vld [vmem:[#allocation3 + $0x248] sm:$0xff] }
 0x64f   : > { %v13170_v17 = vpack.c.bf16 %v10768_v57, %v10767_v5  ;;  %v8998_v20 = vpop.permute.xlu0 %8997  ;;  %v9000_v1 = vpop.permute.xlu1 %8999  ;;  %11567 = vmatprep.subr.bf16.mxu0 %v13431_v11  ;;  %v13433_v14 = vpack.c.bf16 %v18384_v22, %v18382_v52  ;;  %v12827_v11 = vcombine.low %v18250_v0, %v10926_v29  ;;  %v19589_v0 = vld [vmem:[#allocation28_spill] sm:$0xff]  ;;  %v9736_v29 = vrot.slane %v18110_v53, %v19584_v41 }
 0x650   : > { %v9032_v2 = vsel %vm1121_vm1, %v19587_v35, %v8998_v20  ;;  %v9030_v18 = vsel %vm1121_vm1, %v9000_v1, %v19578_v15  ;;  %v9031_v5 = vsel %vm1121_vm1, %v8998_v20, %v9000_v1  ;;  %11606 = vmatprep.subr.bf16.mxu1 %v12798_v45  ;;  %v9516_v15 = vrot.slane %v18108_v48, %v19585_v60  ;;  %v19588_v45 = vld [vmem:[#allocation23_spill] sm:$0xff]  ;;  %v19590_v1 = vld [vmem:[#allocation41_spill] sm:$0xff] }
 0x651   : > { %v18494_v37 = vmul.f32 %v9064_v62, %v9032_v2  ;;  %v18496_v8 = vmul.f32 %v9068_v28, %v9031_v5  ;;  %v18498_v24 = vmul.f32 %v9072_v12, %v9030_v18  ;;  %9983 = vrot.lane.b32.xlu0 %v18074_v40, %s13645_s15  ;;  %9985 = vrot.lane.b32.xlu1 %v17944_v34, %s13645_s15  ;;  %v19593_v18 = vld [vmem:[#allocation25_spill] sm:$0xff] }
 0x652   : > { %11607 = vmatpush1.bf16.msra.mxu1 %v12797_v21  ;;  %11568 = vmatpush1.bf16.msra.mxu0 %v13432_v6  ;;  %v13434_v62 = vpack.c.bf16 %v10544_v58, %v18435_v43  ;;  %v9520_v12 = vrot.slane %v18108_v48, %v19575_v56  ;;  %v12830_v22 = vcombine.high %v13170_v17, %v10927_v38  ;;  %v19591_v6 = vld [vmem:[#allocation55_spill] sm:$0xff] }
 0x653   : > { %v9222_v28 = vpop.permute.xlu0 %9221  ;;  %v9224_v57 = vpop.permute.xlu1 %9223  ;;  %11569 = vmatprep.subr.bf16.mxu0 %v12828_v61  ;;  %v9744_v35 = vrot.slane %v18110_v53, %v19575_v56  ;;  %v19592_v2 = vcombine.high %v18256_v49, %v18266_v31 }
 0x654   : > { %v9256_v20 = vsel %vm1347_vm2, %v19588_v45, %v9222_v28  ;;  %v9254_v21 = vsel %vm1347_vm2, %v9224_v57, %v19580_v7  ;;  %v9255_v43 = vsel %vm1347_vm2, %v9222_v28, %v9224_v57  ;;  %11608 = vmatprep.subr.bf16.mxu1 %v13434_v62  ;;  %v9701_v7 = vsel %vm1801_vm4, %v19591_v6, %v19590_v1  ;;  %v19594_v45 = vld [vmem:[#allocation29_spill] sm:$0xff] }
 0x655   : > { %v18520_v52 = vmul.f32 %v9288_v30, %v9256_v20  ;;  %v9354_v48 = vmul.f32 %v9292_v10, %v9255_v43  ;;  %v18522_v58 = vmul.f32 %v9296_v51, %v9254_v21  ;;  %9987 = vrot.lane.b32.xlu0 %v19589_v0, %s13645_s15  ;;  %10207 = vrot.lane.b32.xlu1 %v18074_v40, %s13646_s17  ;;  %v19595_v20 = vld [vmem:[#allocation31_spill] sm:$0xff] }
 0x656   : > { %v9740_v30 = vrot.slane %v18110_v53, %v19585_v60  ;;  %11609 = vmatpush1.bf16.msra.mxu1 %v13433_v14  ;;  %11570 = vmatpush1.bf16.msra.mxu0 %v12827_v11  ;;  %v12829_v62 = vcombine.low %v13170_v17, %v10927_v38  ;;  %v19596_v21 = vrot.slane %v18110_v53, %v19574_v42  ;;  %v19599_v53 = vld [vmem:[#allocation39_spill] sm:$0xff] }
 0x657   : > { %v9446_v10 = vpop.permute.xlu0 %9445  ;;  %v9448_v51 = vpop.permute.xlu1 %9447  ;;  %11610 = vmatprep.subr.bf16.mxu1 %v12830_v22  ;;  %11571 = vmatprep.subr.bf16.mxu0 %v19592_v2  ;;  %v10036_v43 = vrot.slane %v18146_v46, %v19585_v60  ;;  %v19598_v22 = vcombine.high %v18258_v16, %v18268_v55 }
 0x658   : > { %v9480_v5 = vsel %vm1574_vm3, %v19593_v18, %v9446_v10  ;;  %v9478_v61 = vsel %vm1574_vm3, %v9448_v51, %v19582_v36  ;;  %v9479_v14 = vsel %vm1574_vm3, %v9446_v10, %v9448_v51  ;;  %v9997_v36 = vsel %vm2100_vm12, %v19595_v20, %v19594_v45 }
 0x659   : > { %v18549_v28 = vmul.f32 %v9512_v50, %v9480_v5  ;;  %v9578_v57 = vmul.f32 %v9516_v15, %v9479_v14  ;;  %v18551_v11 = vmul.f32 %v9520_v12, %v9478_v61  ;;  %10209 = vrot.lane.b32.xlu0 %v17944_v34, %s13646_s17  ;;  %10211 = vrot.lane.b32.xlu1 %v19589_v0, %s13646_s17 }
 0x65a   : > { %v18564_v17 = vmul.f32 %v19596_v21, %v9701_v7  ;;  %v10032_v50 = vrot.slane %v18146_v46, %v19584_v41  ;;  %11611 = vmatpush1.bf16.msra.mxu1 %v12829_v62  ;;  %v19597_v15 = vcombine.low %v18256_v49, %v18266_v31  ;;  %v13435_v10 = vpack.c.bf16 %v9354_v48, %v18496_v8 }
 0x65b   : > { %v9670_v12 = vpop.permute.xlu0 %9669  ;;  %v9672_v38 = vpop.permute.xlu1 %9671  ;;  %11612 = vmatprep.subr.bf16.mxu1 %v19598_v22  ;;  %v19601_v8 = vcombine.low %v18258_v16, %v18268_v55  ;;  %v19602_v48 = vcombine.low %v18276_v54, %v18264_v13  ;;  %v10256_v61 = vrot.slane %v18156_v63, %v19584_v41  ;;  %v18615_v16 = vld [vmem:[%s19166_s6] sm:$0x3]  ;;  %v10260_v54 = vrot.slane %v18156_v63, %v19585_v60 }
 0x65c   : > { %11572 = vmatpush1.bf16.msra.mxu0 %v19597_v15  ;;  %v9704_v7 = vsel %vm1801_vm4, %v19599_v53, %v9670_v12  ;;  %v9702_v49 = vsel %vm1801_vm4, %v9672_v38, %v19591_v6  ;;  %v9703_v31 = vsel %vm1801_vm4, %v9670_v12, %v9672_v38  ;;  %v10264_v6 = vrot.slane %v18156_v63, %v19575_v56 }
 0x65d   : > { %11573 = vmatprep.subr.bf16.mxu0 %v18296_v59  ;;  %v9801_v51 = vmul.f32 %v9736_v29, %v9704_v7  ;;  %v9802_v2 = vmul.f32 %v9740_v30, %v9703_v31  ;;  %v18586_v18 = vmul.f32 %v9744_v35, %v9702_v49  ;;  %10431 = vrot.lane.b32.xlu0 %v18074_v40, %s13647_s18  ;;  %v19605_v12 = vmov 0   ;;  %v19607_v49 = vld [vmem:[#allocation43_spill] sm:$0xff] }
 0x65e   : > { %10433 = vrot.lane.b32.xlu1 %v17944_v34, %s13647_s18  ;;  %v19600_v59 = vrot.slane %v18146_v46, %v19575_v56  ;;  %11613 = vmatpush1.bf16.msra.mxu1 %v19601_v8  ;;  %v11520_v29 = vand.u32 %v19602_v48, %v15313_v32  ;;  %v13437_v62 = vpack.c.bf16 %v18445_v4, %v18443_v39 }
 0x65f   : > { %v9968_v30 = vpop.permute.xlu0 %9967  ;;  %v18607_v35 = vpop.permute.xlu1 %9235  ;;  %11614 = vmatprep.subr.bf16.mxu1 %v18387_v25  ;;  %v10480_v21 = vrot.slane %v18170_v33, %v19584_v41  ;;  %v10044_v4 = vrot.slane %v18146_v46, %v19574_v42  ;;  %v13440_v46 = vpack.c.bf16 %v9801_v51, %v18549_v28  ;;  %v10704_v22 = vrot.slane %v18172_v44, %v19584_v41 }
 0x660   : > { %v18595_v5 = vmul.f32 %v19600_v59, %v9997_v36  ;;  %11574 = vmatpush1.bf16.msra.mxu0 %v18283_v27  ;;  %v9998_v55 = vsel %vm2100_vm12, %v9968_v30, %v19595_v20  ;;  %v9999_v13 = vsel %vm2100_vm12, %v18421_v47, %v9968_v30  ;;  %v13436_v27 = vpack.c.bf16 %v18520_v52, %v18494_v37  ;;  %v19603_v20 = vld [vmem:[#allocation58_spill] sm:$0xff]  ;;  %v19610_v30 = vld [vmem:[#allocation40_spill] sm:$0xff] }
 0x661   : > { %11643 = vmatprep.subr.bf16.mxu0 %v13435_v10  ;;  %v10097_v25 = vmul.f32 %v10032_v50, %v9999_v13  ;;  %v10098_v14 = vmul.f32 %v10036_v43, %v9998_v55  ;;  %10435 = vrot.lane.b32.xlu0 %v19589_v0, %s13647_s18  ;;  %v19604_v36 = vld [vmem:[#allocation30_spill] sm:$0xff]  ;;  %v13438_v37 = vpack.c.bf16 %v9802_v2, %v9578_v57  ;;  %v19608_v2 = vld [vmem:[#allocation35_spill] sm:$0xff]  ;;  %s19629_s18 = sshll.u32 %s13881_s21, 6 }
 0x662   : > { %10655 = vrot.lane.b32.xlu1 %v18074_v40, %s19382_s1  ;;  %v10221_v47 = vsel %vm2327_vm13, %v19604_v36, %v19603_v20  ;;  %11615 = vmatpush1.bf16.msra.mxu1 %v11520_v29  ;;  %v10484_v40 = vrot.slane %v18170_v33, %v19585_v60  ;;  %v13439_v57 = vpack.c.bf16 %v18522_v58, %v18498_v24  ;;  %v19606_v58 = vld [vmem:[#allocation34_spill] sm:$0xff]  ;;  %s19101_s2 = scalar_lea.vmem [#allocation13], %s19629_s18 }
 0x663   : > { %12875 = vmatmul.mubr.msk.bf16.vlgmr.msra.gmra.mrb[32].mxu0 %vm5545_vm7, %v18615_v16  ;;  %v10192_v52 = vpop.permute.xlu0 %10191  ;;  %v18641_v50 = vpop.permute.xlu1 %9459  ;;  %11684 = vmatprep.subr.bf16.mxu1 %v13437_v62  ;;  %v13441_v24 = vpack.c.bf16 %v18564_v17, %v18447_v3  ;;  %v13442_v53 = vpack.c.bf16 %v10098_v14, %v19606_v58  ;;  %v13443_v28 = vpack.c.bf16 %v18586_v18, %v18551_v11  ;;  %v10889_v14 = vld [vmem:[#allocation3 + $0x118] sm:$0xff]  ;;  %s11992_s11 = sshll.u32 %s19101_s2, 4  ;;  %s19117_s11 = int_to_ptr.vmem [resolvable:$true] %s11992_s11 }
 0x664   : > { %11644 = vmatpush1.bf16.msra.mxu0 %v13436_v27  ;;  %v10222_v39 = vsel %vm2327_vm13, %v10192_v52, %v19604_v36  ;;  %v10223_v15 = vsel %vm2327_vm13, %v18419_v9, %v10192_v52  ;;  %11675 = vmatprep.mubr.bf16.mxu0 %v19605_v12  ;;  %v10708_v9 = vrot.slane %v18172_v44, %v19585_v60  ;;  %v10928_v52 = vld [vmem:[#allocation3 + $0x250] sm:$0xff]  ;;  %s13557_s23 = scalar_lea.vmem %s19117_s11, 1024  ;;  %p13564_p1 = scmp.lt.s32.totalorder %s19117_s11, %s13562_s12 }
 0x665   : > { %11645 = vmatprep.subr.bf16.mxu0 %v13438_v37  ;;  %v10321_v38 = vmul.f32 %v10256_v61, %v10223_v15  ;;  %v10322_v43 = vmul.f32 %v10260_v54, %v10222_v39  ;;  %10657 = vrot.lane.b32.xlu0 %v17944_v34, %s19382_s1  ;;  %v13444_v11 = vpack.c.bf16 %v10097_v25, %v19608_v2  ;;  %v10944_v39 = vld [vmem:[#allocation3 + $0x2d0] sm:$0xff]  ;;  %p13558_p13 = scmp.ne.s32.totalorder %s19117_s11, %s13557_s23  ;;  %p13565_p2 = scmp.lt.s32.totalorder %s13563_s16, %s13557_s23 }
 0x666   : > { %10659 = vrot.lane.b32.xlu1 %v19589_v0, %s19382_s1  ;;  %12876 = vmatmul.mubr.msk.bf16.vlgmr.msra.gmra.mrb[32].mxu1 %vm5545_vm7, %v18615_v16  ;;  %v10268_v0 = vrot.slane %v18156_v63, %v19574_v42  ;;  %v18688_v18 = vmul.f32 %v10264_v6, %v10221_v47  ;;  %v10488_v59 = vrot.slane %v18170_v33, %v19575_v56  ;;  %v10960_v15 = vld [vmem:[#allocation3 + $0x350] sm:$0x77]  ;;  %s13177_s1 = sshll.u32 %s13713_s28, 10  ;;  %s11978_s28 = scalar_lea.sflag [#allocation6], %s13881_s21 }
 0x667   : > { %v10416_v34 = vpop.permute.xlu0 %10415  ;;  %v18670_v7 = vpop.permute.xlu1 %9973  ;;  %11685 = vmatpush1.bf16.msra.mxu1 %v13439_v57  ;;  %11716 = vmatprep.mubr.bf16.mxu1 %v19605_v12  ;;  %v9040_v57 = vld [vmem:[#allocation11 + $0x40] ss:$8 sm:$0xf]  ;;  %s19115_s22 = scalar_lea.hbm %s19167_s7, %s13177_s1  ;;  %p13559_p3 = pnand %p13558_p13, %p19630_p12 }
 0x668   : > { %11646 = vmatpush1.bf16.msra.mxu0 %v13440_v46  ;;  %v10446_v31 = vsel %vm2554_vm14, %v10416_v34, %v19607_v49  ;;  %v10447_v3 = vsel %vm2554_vm14, %v18453_v19, %v10416_v34  ;;  %v9996_v17 = vsel %vm2100_vm12, %v19594_v45, %v18670_v7  ;;  %11686 = vmatprep.subr.bf16.mxu1 %v13441_v24  ;;  %v19609_v19 = vld [vmem:[#allocation57_spill] sm:$0xff]  ;;  %v18727_v34 = vld [vmem:[#allocation3 + $0x298] sm:$0xff]  ;;  %p13566_p6 = por %p13565_p2, %p13564_p1 }
 0x669   : > { %11647 = vmatprep.subr.bf16.mxu0 %v13442_v53  ;;  %v10545_v63 = vmul.f32 %v10480_v21, %v10447_v3  ;;  %v10546_v10 = vmul.f32 %v10484_v40, %v10446_v31  ;;  %v10100_v51 = vmul.f32 %v10044_v4, %v9996_v17  ;;  %v10445_v8 = vsel %vm2554_vm14, %v19607_v49, %v19609_v19  ;;  %v10936_v4 = vld [vmem:[#allocation3 + $0x290] sm:$0xff]  ;;  %p13560_p7 = pneg %p13559_p3 }
 0x66a   : > { %v10547_v40 = vmul.f32 %v10488_v59, %v10445_v8  ;;  %v10716_v46 = vrot.slane %v18172_v44, %v19574_v42  ;;  %v10952_v53 = vld [vmem:[#allocation3 + $0x310] sm:$0xff] }
 0x66b   : > { %v13148_v45 = vpack.c.bf16 %v10100_v51, %v18595_v5  ;;  %v10640_v48 = vpop.permute.xlu0 %10639  ;;  %v18697_v29 = vpop.permute.xlu1 %10197  ;;  %11687 = vmatpush1.bf16.msra.mxu1 %v13443_v28  ;;  %v10492_v5 = vrot.slane %v18170_v33, %v19574_v42  ;;  %v13445_v25 = vpack.c.bf16 %v10545_v63, %v10321_v38  ;;  %v13446_v62 = vpack.c.bf16 %v10546_v10, %v10322_v43  ;;  %v9041_v38 = vld [vmem:[#allocation11 + $0x40] ss:$8 sm:$0xf0]  ;;  %v9264_v28 = vld [vmem:[#allocation11 + $0x41] ss:$8 sm:$0xf]  ;;  %p13567_p5 = pnand %p13566_p6, %p13560_p7 }
 0x66c   : > { %11648 = vmatpush1.bf16.msra.mxu0 %v13444_v11  ;;  %v10670_v6 = vsel %vm2781_vm15, %v10640_v48, %v19610_v30  ;;  %v10671_v61 = vsel %vm2781_vm15, %v18451_v23, %v10640_v48  ;;  %v10220_v55 = vsel %vm2327_vm13, %v19603_v20, %v18697_v29  ;;  %v10712_v20 = vrot.slane %v18172_v44, %v19575_v56  ;;  %v9265_v49 = vld [vmem:[#allocation11 + $0x41] ss:$8 sm:$0xf0]  ;;  %v9488_v10 = vld [vmem:[#allocation11 + $0x42] ss:$8 sm:$0xf] }
 0x66d   : > { %v10769_v13 = vmul.f32 %v10704_v22, %v10671_v61  ;;  %v10770_v54 = vmul.f32 %v10708_v9, %v10670_v6  ;;  %v10324_v27 = vmul.f32 %v10268_v0, %v10220_v55  ;;  %v12801_v36 = vcombine.low %v10889_v14, %v13148_v45  ;;  %11649 = vmatprep.subr.bf16.mxu0 %v13446_v62  ;;  %v19611_v9 = vld [vmem:[#allocation61_spill] sm:$0xff]  ;;  %v10961_v0 = vld [vmem:[#allocation3 + $0x358] sm:$0x77] }
 0x66e   : > { %v12802_v47 = vcombine.high %v10889_v14, %v13148_v45  ;;  %v10669_v24 = vsel %vm2781_vm15, %v19610_v30, %v19611_v9  ;;  %v12847_v44 = vcombine.low %v10936_v4, %v10944_v39  ;;  %v12864_v17 = vcombine.high %v10952_v53, %v10960_v15  ;;  %v9489_v51 = vld [vmem:[#allocation11 + $0x42] ss:$8 sm:$0xf0] }
 0x66f   : > { %v13171_v21 = vpack.c.bf16 %v10770_v54, %v10769_v13  ;;  %v18711_v37 = vpop.permute.xlu0 %9233  ;;  %v18713_v23 = vpop.permute.xlu1 %10421  ;;  %v18733_v63 = vor.u32 %v9041_v38, %v9040_v57  ;;  %v12848_v11 = vcombine.high %v10936_v4, %v10944_v39  ;;  %v12863_v59 = vcombine.low %v10952_v53, %v10960_v15  ;;  %v18740_v30 = vld [vmem:[#allocation3 + $0x2d8] sm:$0xff] }
 0x670   : > { %v10444_v33 = vsel %vm2554_vm14, %v19609_v19, %v18713_v23  ;;  %11688 = vmatprep.subr.bf16.mxu1 %v12802_v47  ;;  %11650 = vmatpush1.bf16.msra.mxu0 %v13445_v25  ;;  %v10771_v19 = vmul.f32 %v10712_v20, %v10669_v24  ;;  %v13447_v45 = vpack.c.bf16 %v10547_v40, %v18688_v18  ;;  %v10953_v6 = vld [vmem:[#allocation3 + $0x318] sm:$0xff]  ;;  %v19614_v40 = vld [vmem:[#allocation20_spill] sm:$0xff] }
 0x671   : > { %v10548_v43 = vmul.f32 %v10492_v5, %v10444_v33  ;;  %11689 = vmatpush1.bf16.msra.mxu1 %v12801_v36  ;;  %v12831_v22 = vcombine.low %v13171_v21, %v10928_v52  ;;  %v12832_v58 = vcombine.high %v13171_v21, %v10928_v52  ;;  %v18742_v61 = vor.u32 %v9265_v49, %v9264_v28  ;;  %v19612_v36 = vld [vmem:[#allocation21_spill] sm:$0xff]  ;;  %v19613_v21 = vld [vmem:[#allocation19_spill] sm:$0xff]  ;;  %v10929_v33 = vld [vmem:[#allocation3 + $0x258] sm:$0xff] }
 0x672   : > { %v12849_v55 = vcombine.low %v18727_v34, %v18740_v30  ;;  %v12865_v5 = vcombine.low %v10953_v6, %v10961_v0  ;;  %v12866_v13 = vcombine.high %v10953_v6, %v10961_v0  ;;  %v18746_v54 = vor.u32 %v9489_v51, %v9488_v10  ;;  %v19615_v39 = vld [vmem:[#allocation42_spill] sm:$0xff]  ;;  %v19618_v24 = vld [vmem:[#allocation24_spill] sm:$0xff]  ;;  %v19619_v6 = vld [vmem:[#allocation27_spill] sm:$0xff] }
 0x673   : > { %v18729_v31 = vpop.permute.xlu0 %9457  ;;  %v18731_v3 = vpop.permute.xlu1 %10645  ;;  %11651 = vmatprep.subr.bf16.mxu0 %v12832_v58  ;;  %v13448_v48 = vpack.c.bf16 %v10548_v43, %v10324_v27  ;;  %v11529_v18 = vand.u32 %v12864_v17, %v15313_v32  ;;  %v12850_v27 = vcombine.high %v18727_v34, %v18740_v30  ;;  %v9092_v47 = vrot.slane %v18733_v63, %v19612_v36  ;;  %v19616_v15 = vld [vmem:[#allocation62_spill] sm:$0xff] }
 0x674   : > { %v10668_v2 = vsel %vm2781_vm15, %v19611_v9, %v18731_v3  ;;  %11652 = vmatpush1.bf16.msra.mxu0 %v12831_v22  ;;  %v9080_v52 = vrot.slane %v18733_v63, %v19613_v21  ;;  %v9084_v20 = vrot.slane %v18733_v63, %v19614_v40  ;;  %v11526_v4 = vand.u32 %v12863_v59, %v15313_v32  ;;  %v19617_v38 = vld [vmem:[#allocation22_spill] sm:$0xff] }
 0x675   : > { %v10772_v8 = vmul.f32 %v10716_v46, %v10668_v2  ;;  %11653 = vmatprep.subr.bf16.mxu0 %v12848_v11  ;;  %11690 = vmatprep.subr.bf16.mxu1 %v13448_v48  ;;  %v9025_v57 = vsel %vm1121_vm1, %v19616_v15, %v19615_v39  ;;  %v9088_v43 = vrot.slane %v18733_v63, %v19617_v38  ;;  %v9712_v51 = vld [vmem:[#allocation11 + $0x43] ss:$8 sm:$0xf] }
 0x676   : > { %11691 = vmatpush1.bf16.msra.mxu1 %v13447_v45  ;;  %v9316_v9 = vrot.slane %v18742_v61, %v19612_v36  ;;  %v11535_v53 = vand.u32 %v12866_v13, %v15313_v32  ;;  %v11532_v34 = vand.u32 %v12865_v5, %v15313_v32  ;;  %v9540_v0 = vrot.slane %v18746_v54, %v19612_v36  ;;  %v9713_v2 = vld [vmem:[#allocation11 + $0x43] ss:$8 sm:$0xf0] }
 0x677   : > { %v13172_v25 = vpack.c.bf16 %v10772_v8, %v10771_v19  ;;  %v9006_v14 = vpop.permute.xlu0 %9005  ;;  %v18748_v62 = vpop.permute.xlu1 %9683  ;;  %v9304_v28 = vrot.slane %v18742_v61, %v19613_v21  ;;  %v9308_v17 = vrot.slane %v18742_v61, %v19614_v40  ;;  %v9312_v10 = vrot.slane %v18742_v61, %v19617_v38 }
 0x678   : > { %11654 = vmatpush1.bf16.msra.mxu0 %v12847_v44  ;;  %v9028_v58 = vsel %vm1121_vm1, %v19618_v24, %v9006_v14  ;;  %v9136_v11 = vmul.f32 %v9092_v47, %v9025_v57  ;;  %v9249_v59 = vsel %vm1347_vm2, %v18711_v37, %v18607_v35  ;;  %v9528_v13 = vrot.slane %v18746_v54, %v19613_v21 }
 0x679   : > { %v12833_v46 = vcombine.low %v13172_v25, %v10929_v33  ;;  %v12834_v22 = vcombine.high %v13172_v25, %v10929_v33  ;;  %11655 = vmatprep.subr.bf16.mxu0 %v11529_v18  ;;  %v9133_v45 = vmul.f32 %v9080_v52, %v9028_v58  ;;  %v18795_v25 = vor.u32 %v9713_v2, %v9712_v51 }
 0x67a   : > { %v9532_v18 = vrot.slane %v18746_v54, %v19614_v40  ;;  %v9360_v47 = vmul.f32 %v9316_v9, %v9249_v59  ;;  %v9536_v52 = vrot.slane %v18746_v54, %v19617_v38  ;;  %v19620_v9 = vld [vmem:[#allocation37_spill] sm:$0xff] }
 0x67b   : > { %v9230_v49 = vpop.permute.xlu0 %9229  ;;  %v9008_v44 = vpop.permute.xlu1 %9007  ;;  %11692 = vmatprep.subr.bf16.mxu1 %v12834_v22  ;;  %v9764_v58 = vrot.slane %v18795_v25, %v19612_v36 }
 0x67c   : > { %v9026_v19 = vsel %vm1121_vm1, %v9008_v44, %v19616_v15  ;;  %v9027_v8 = vsel %vm1121_vm1, %v9006_v14, %v9008_v44  ;;  %11693 = vmatpush1.bf16.msra.mxu1 %v12833_v46  ;;  %11656 = vmatpush1.bf16.msra.mxu0 %v11526_v4  ;;  %v9252_v5 = vsel %vm1347_vm2, %v19619_v6, %v9230_v49 }
 0x67d   : > { %v9134_v48 = vmul.f32 %v9084_v20, %v9027_v8  ;;  %v9135_v30 = vmul.f32 %v9088_v43, %v9026_v19  ;;  %11694 = vmatprep.subr.bf16.mxu1 %v12850_v27  ;;  %v10008_v20 = vld [vmem:[#allocation11 + $0x44] ss:$8 sm:$0xf]  ;;  %v9473_v4 = vsel %vm1574_vm3, %v18729_v31, %v18641_v50  ;;  %v9357_v43 = vmul.f32 %v9304_v28, %v9252_v5 }
 0x67e   : > { %v10009_v27 = vld [vmem:[#allocation11 + $0x44] ss:$8 sm:$0xf0]  ;;  %v9756_v28 = vrot.slane %v18795_v25, %v19614_v40 }
 0x67f   : > { %v9454_v14 = vpop.permute.xlu0 %9453  ;;  %v9232_v33 = vpop.permute.xlu1 %9231  ;;  %12877 = vmatmul.mubr.msk.bf16.vlgmr.msra.gmra.mrb[36].mxu0 %vm5545_vm7, %v18615_v16  ;;  %v13449_v6 = vpack.c.bf16 %v9357_v43, %v9133_v45 }
 0x680   : > { %v9250_v15 = vsel %vm1347_vm2, %v9232_v33, %v18711_v37  ;;  %v9251_v57 = vsel %vm1347_vm2, %v9230_v49, %v9232_v33  ;;  %11695 = vmatpush1.bf16.msra.mxu1 %v12849_v55  ;;  %11757 = vmatprep.mubr.bf16.mxu0 %v19605_v12  ;;  %v9476_v24 = vsel %vm1574_vm3, %v19620_v9, %v9454_v14 }
 0x681   : > { %v9358_v46 = vmul.f32 %v9308_v17, %v9251_v57  ;;  %v9359_v22 = vmul.f32 %v9312_v10, %v9250_v15  ;;  %11696 = vmatprep.subr.bf16.mxu1 %v11535_v53  ;;  %v9752_v37 = vrot.slane %v18795_v25, %v19613_v21  ;;  %v18820_v55 = vor.u32 %v10009_v27, %v10008_v20 }
 0x682   : > { %v9760_v53 = vrot.slane %v18795_v25, %v19617_v38  ;;  %v9584_v17 = vmul.f32 %v9540_v0, %v9473_v4  ;;  %v9581_v59 = vmul.f32 %v9528_v13, %v9476_v24  ;;  %v13452_v20 = vpack.c.bf16 %v9360_v47, %v9136_v11  ;;  %v10233_v47 = vld [vmem:[#allocation11 + $0x45] ss:$8 sm:$0xf0] }
 0x683   : > { %v9678_v49 = vpop.permute.xlu0 %9677  ;;  %v9456_v44 = vpop.permute.xlu1 %9455  ;;  %v10048_v5 = vrot.slane %v18820_v55, %v19613_v21  ;;  %v13450_v0 = vpack.c.bf16 %v9358_v46, %v9134_v48  ;;  %v13451_v33 = vpack.c.bf16 %v9359_v22, %v9135_v30 }
 0x684   : > { %v9700_v10 = vsel %vm1801_vm4, %v19590_v1, %v9678_v49  ;;  %v9474_v51 = vsel %vm1574_vm3, %v9456_v44, %v18729_v31  ;;  %v9475_v2 = vsel %vm1574_vm3, %v9454_v14, %v9456_v44  ;;  %11697 = vmatpush1.bf16.msra.mxu1 %v11532_v34  ;;  %v10052_v31 = vrot.slane %v18820_v55, %v19614_v40 }
 0x685   : > { %v9582_v19 = vmul.f32 %v9532_v18, %v9475_v2  ;;  %v9583_v8 = vmul.f32 %v9536_v52, %v9474_v51  ;;  %v9805_v27 = vmul.f32 %v9752_v37, %v9700_v10  ;;  %11725 = vmatprep.subr.bf16.mxu0 %v13450_v0  ;;  %11766 = vmatprep.subr.bf16.mxu1 %v13452_v20  ;;  %v10232_v18 = vld [vmem:[#allocation11 + $0x45] ss:$8 sm:$0xf]  ;;  %v10456_v51 = vld [vmem:[#allocation11 + $0x46] ss:$8 sm:$0xf] }
 0x686   : > { %11726 = vmatpush1.bf16.msra.mxu0 %v13449_v6  ;;  %v18853_v43 = vor.u32 %v10233_v47, %v10232_v18  ;;  %v10457_v2 = vld [vmem:[#allocation11 + $0x46] ss:$8 sm:$0xf0] }
 0x687   : > { %v9682_v1 = vpop.permute.xlu0 %9681  ;;  %v9680_v4 = vpop.permute.xlu1 %9679  ;;  %12878 = vmatmul.mubr.msk.bf16.vlgmr.msra.gmra.mrb[36].mxu1 %vm5545_vm7, %v18615_v16  ;;  %v13453_v9 = vpack.c.bf16 %v9805_v27, %v9581_v59  ;;  %v18864_v0 = vor.u32 %v10457_v2, %v10456_v51 }
 0x688   : > { %v9697_v34 = vsel %vm1801_vm4, %v9682_v1, %v18748_v62  ;;  %v9698_v45 = vsel %vm1801_vm4, %v9680_v4, %v9682_v1  ;;  %v9699_v48 = vsel %vm1801_vm4, %v9678_v49, %v9680_v4  ;;  %11767 = vmatpush1.bf16.msra.mxu1 %v13451_v33  ;;  %11798 = vmatprep.mubr.bf16.mxu1 %v19605_v12 }
 0x689   : > { %v9808_v11 = vmul.f32 %v9764_v58, %v9697_v34  ;;  %v9806_v30 = vmul.f32 %v9756_v28, %v9699_v48  ;;  %v9807_v13 = vmul.f32 %v9760_v53, %v9698_v45  ;;  %v10890_v53 = vld [vmem:[#allocation3 + $0x120] sm:$0xff]  ;;  %v10276_v10 = vrot.slane %v18853_v43, %v19614_v40 }
 0x68a   : > { %v10056_v33 = vrot.slane %v18820_v55, %v19617_v38  ;;  %v10060_v1 = vrot.slane %v18820_v55, %v19612_v36  ;;  %v10496_v48 = vrot.slane %v18864_v0, %v19613_v21 }
 0x68b   : > { %v9976_v14 = vpop.permute.xlu0 %9975  ;;  %v9978_v52 = vpop.permute.xlu1 %9977  ;;  %v13454_v24 = vpack.c.bf16 %v9806_v30, %v9582_v19  ;;  %v13455_v37 = vpack.c.bf16 %v9807_v13, %v9583_v8  ;;  %v13456_v58 = vpack.c.bf16 %v9808_v11, %v9584_v17  ;;  %v10500_v11 = vrot.slane %v18864_v0, %v19614_v40  ;;  %v10680_v30 = vld [vmem:[#allocation11 + $0x47] ss:$8 sm:$0xf] }
 0x68c   : > { %v9995_v15 = vsel %vm2100_vm12, %v18670_v7, %v9976_v14  ;;  %v9994_v57 = vsel %vm2100_vm12, %v9976_v14, %v9978_v52  ;;  %v10272_v7 = vrot.slane %v18853_v43, %v19613_v21  ;;  %v10681_v13 = vld [vmem:[#allocation11 + $0x47] ss:$8 sm:$0xf0] }
 0x68d   : > { %v10101_v46 = vmul.f32 %v10048_v5, %v9995_v15  ;;  %v10102_v22 = vmul.f32 %v10052_v31, %v9994_v57  ;;  %11727 = vmatprep.subr.bf16.mxu0 %v13454_v24  ;;  %11768 = vmatprep.subr.bf16.mxu1 %v13456_v58  ;;  %v18893_v24 = vor.u32 %v10681_v13, %v10680_v30 }
 0x68e   : > { %11728 = vmatpush1.bf16.msra.mxu0 %v13453_v9  ;;  %11769 = vmatpush1.bf16.msra.mxu1 %v13455_v37  ;;  %v10508_v9 = vrot.slane %v18864_v0, %v19612_v36 }
 0x68f   : > { %v13149_v49 = vpack.c.bf16 %v10102_v22, %v10101_v46  ;;  %v9980_v44 = vpop.permute.xlu0 %9979  ;;  %v10202_v28 = vpop.permute.xlu1 %10201  ;;  %v10504_v22 = vrot.slane %v18864_v0, %v19617_v38 }
 0x690   : > { %v9993_v4 = vsel %vm2100_vm12, %v9978_v52, %v9980_v44  ;;  %v10284_v52 = vrot.slane %v18853_v43, %v19612_v36 }
 0x691   : > { %v12803_v59 = vcombine.low %v10890_v53, %v13149_v49  ;;  %v12804_v19 = vcombine.high %v10890_v53, %v13149_v49  ;;  %v10103_v18 = vmul.f32 %v10056_v33, %v9993_v4 }
 0x693   : > { %v10200_v8 = vpop.permute.xlu0 %10199  ;;  %v10426_v17 = vpop.permute.xlu1 %10425  ;;  %11729 = vmatprep.subr.bf16.mxu0 %v12804_v19 }
 0x694   : > { %v10218_v6 = vsel %vm2327_vm13, %v10200_v8, %v10202_v28  ;;  %v10219_v5 = vsel %vm2327_vm13, %v18697_v29, %v10200_v8  ;;  %11730 = vmatpush1.bf16.msra.mxu0 %v12803_v59  ;;  %v10280_v29 = vrot.slane %v18853_v43, %v19617_v38 }
 0x695   : > { %v10325_v20 = vmul.f32 %v10272_v7, %v10219_v5  ;;  %v10326_v27 = vmul.f32 %v10276_v10, %v10218_v6  ;;  %v10720_v6 = vrot.slane %v18893_v24, %v19613_v21  ;;  %v10724_v5 = vrot.slane %v18893_v24, %v19614_v40 }
 0x696   : > { %v10728_v21 = vrot.slane %v18893_v24, %v19617_v38  ;;  %v10732_v40 = vrot.slane %v18893_v24, %v19612_v36  ;;  %v9096_v36 = vrot.slane %v18733_v63, %v19584_v41 }
 0x697   : > { %v10204_v31 = vpop.permute.xlu0 %10203  ;;  %v18872_v34 = vpop.permute.xlu1 %9981 }
 0x698   : > { %v9992_v45 = vsel %vm2100_vm12, %v9980_v44, %v18872_v34  ;;  %v10217_v47 = vsel %vm2327_vm13, %v10202_v28, %v10204_v31  ;;  %v10891_v28 = vld [vmem:[#allocation3 + $0x128] sm:$0xff] }
 0x699   : > { %v10104_v14 = vmul.f32 %v10060_v1, %v9992_v45  ;;  %v10327_v37 = vmul.f32 %v10280_v29, %v10217_v47 }
 0x69b   : > { %v13150_v15 = vpack.c.bf16 %v10104_v14, %v10103_v18  ;;  %v10424_v57 = vpop.permute.xlu0 %10423  ;;  %v18887_v46 = vpop.permute.xlu1 %10205 }
 0x69c   : > { %v10442_v58 = vsel %vm2554_vm14, %v10424_v57, %v10426_v17  ;;  %v10443_v49 = vsel %vm2554_vm14, %v18713_v23, %v10424_v57  ;;  %v10216_v44 = vsel %vm2327_vm13, %v10204_v31, %v18887_v46  ;;  %v10938_v57 = vld [vmem:[#allocation3 + $0x2a0] sm:$0xff] }
 0x69d   : > { %v10549_v53 = vmul.f32 %v10496_v48, %v10443_v49  ;;  %v10550_v7 = vmul.f32 %v10500_v11, %v10442_v58  ;;  %v10328_v10 = vmul.f32 %v10284_v52, %v10216_v44  ;;  %v12805_v51 = vcombine.low %v10891_v28, %v13150_v15  ;;  %v10954_v49 = vld [vmem:[#allocation3 + $0x320] sm:$0xff] }
 0x69e   : > { %v12806_v2 = vcombine.high %v10891_v28, %v13150_v15  ;;  %v9100_v52 = vrot.slane %v18733_v63, %v19585_v60  ;;  %v10930_v15 = vld [vmem:[#allocation3 + $0x260] sm:$0xff] }
 0x69f   : > { %v10428_v59 = vpop.permute.xlu0 %10427  ;;  %v18903_v19 = vpop.permute.xlu1 %10429  ;;  %v13457_v4 = vpack.c.bf16 %v10549_v53, %v10325_v20  ;;  %v13458_v31 = vpack.c.bf16 %v10550_v7, %v10326_v27  ;;  %v10946_v44 = vld [vmem:[#allocation3 + $0x2e0] sm:$0xff] }
 0x6a0   : > { %v10441_v8 = vsel %vm2554_vm14, %v10426_v17, %v10428_v59  ;;  %v10440_v23 = vsel %vm2554_vm14, %v10428_v59, %v18903_v19  ;;  %11770 = vmatprep.subr.bf16.mxu1 %v12806_v2  ;;  %v10939_v2 = vld [vmem:[#allocation3 + $0x2a8] sm:$0xff] }
 0x6a1   : > { %v10551_v33 = vmul.f32 %v10504_v22, %v10441_v8  ;;  %v10552_v1 = vmul.f32 %v10508_v9, %v10440_v23  ;;  %11771 = vmatpush1.bf16.msra.mxu1 %v12805_v51  ;;  %11731 = vmatprep.subr.bf16.mxu0 %v13458_v31  ;;  %v12852_v51 = vcombine.high %v10938_v57, %v10946_v44 }
 0x6a2   : > { %11732 = vmatpush1.bf16.msra.mxu0 %v13457_v4  ;;  %v9104_v23 = vrot.slane %v18733_v63, %v19575_v56 }
 0x6a3   : > { %v10648_v29 = vpop.permute.xlu0 %10647  ;;  %v10650_v45 = vpop.permute.xlu1 %10649  ;;  %v13459_v27 = vpack.c.bf16 %v10551_v33, %v10327_v37  ;;  %v13460_v30 = vpack.c.bf16 %v10552_v1, %v10328_v10  ;;  %v10963_v33 = vld [vmem:[#allocation3 + $0x368] sm:$0x77] }
 0x6a4   : > { %v10667_v17 = vsel %vm2781_vm15, %v18731_v3, %v10648_v29  ;;  %v10666_v48 = vsel %vm2781_vm15, %v10648_v29, %v10650_v45  ;;  %v10962_v3 = vld [vmem:[#allocation3 + $0x360] sm:$0x77] }
 0x6a5   : > { %v10773_v11 = vmul.f32 %v10720_v6, %v10667_v17  ;;  %v10774_v20 = vmul.f32 %v10724_v5, %v10666_v48  ;;  %11772 = vmatprep.subr.bf16.mxu1 %v13460_v30  ;;  %v12868_v28 = vcombine.high %v10954_v49, %v10962_v3  ;;  %v9108_v6 = vrot.slane %v18733_v63, %v19574_v42  ;;  %v10931_v5 = vld [vmem:[#allocation3 + $0x268] sm:$0xff] }
 0x6a6   : > { %11773 = vmatpush1.bf16.msra.mxu1 %v13459_v27  ;;  %v12867_v17 = vcombine.low %v10954_v49, %v10962_v3  ;;  %v9320_v63 = vrot.slane %v18742_v61, %v19584_v41  ;;  %v9324_v27 = vrot.slane %v18742_v61, %v19585_v60  ;;  %v9544_v49 = vrot.slane %v18746_v54, %v19584_v41 }
 0x6a7   : > { %v13173_v13 = vpack.c.bf16 %v10774_v20, %v10773_v11  ;;  %v10652_v18 = vpop.permute.xlu0 %10651  ;;  %v18923_v47 = vpop.permute.xlu1 %10653  ;;  %v11541_v48 = vand.u32 %v12868_v28, %v15313_v32 }
 0x6a8   : > { %v10665_v14 = vsel %vm2781_vm15, %v10650_v45, %v10652_v18  ;;  %v10664_v38 = vsel %vm2781_vm15, %v10652_v18, %v18923_v47  ;;  %v12851_v45 = vcombine.low %v10938_v57, %v10946_v44  ;;  %v9548_v44 = vrot.slane %v18746_v54, %v19585_v60 }
 0x6a9   : > { %v10775_v22 = vmul.f32 %v10728_v21, %v10665_v14  ;;  %v10776_v9 = vmul.f32 %v10732_v40, %v10664_v38  ;;  %v12835_v37 = vcombine.low %v13173_v13, %v10930_v15  ;;  %v12836_v58 = vcombine.high %v13173_v13, %v10930_v15  ;;  %v10955_v40 = vld [vmem:[#allocation3 + $0x328] sm:$0xff]  ;;  %v19621_v13 = vld [vmem:[#allocation66_spill] sm:$0xff] }
 0x6aa   : > { %v12870_v30 = vcombine.high %v10955_v40, %v10963_v33  ;;  %v9328_v14 = vrot.slane %v18742_v61, %v19575_v56 }
 0x6ab   : > { %v13174_v53 = vpack.c.bf16 %v10776_v9, %v10775_v22  ;;  %v9014_v7 = vpop.permute.xlu0 %9013  ;;  %v9016_v10 = vpop.permute.xlu1 %9015  ;;  %11733 = vmatprep.subr.bf16.mxu0 %v12836_v58  ;;  %v11538_v22 = vand.u32 %v12867_v17, %v15313_v32  ;;  %v12869_v9 = vcombine.low %v10955_v40, %v10963_v33 }
 0x6ac   : > { %v9024_v59 = vsel %vm1121_vm1, %v19615_v39, %v9014_v7  ;;  %v9023_v8 = vsel %vm1121_vm1, %v9014_v7, %v9016_v10  ;;  %11734 = vmatpush1.bf16.msra.mxu0 %v12835_v37  ;;  %v10947_v39 = vld [vmem:[#allocation3 + $0x2e8] sm:$0xff] }
 0x6ad   : > { %v18943_v1 = vmul.f32 %v9096_v36, %v9024_v59  ;;  %v18945_v4 = vmul.f32 %v9100_v52, %v9023_v8  ;;  %11735 = vmatprep.subr.bf16.mxu0 %v12852_v51  ;;  %v12837_v31 = vcombine.low %v13174_v53, %v10931_v5  ;;  %v12838_v29 = vcombine.high %v13174_v53, %v10931_v5  ;;  %v19622_v53 = vld [vmem:[#allocation52_spill] sm:$0xff] }
 0x6ae   : > { %v12854_v21 = vcombine.high %v10939_v2, %v10947_v39  ;;  %v9332_v52 = vrot.slane %v18742_v61, %v19574_v42  ;;  %v12853_v57 = vcombine.low %v10939_v2, %v10947_v39  ;;  %v11547_v61 = vand.u32 %v12870_v30, %v15313_v32 }
 0x6af   : > { %v9018_v11 = vpop.permute.xlu0 %9017  ;;  %v9238_v20 = vpop.permute.xlu1 %9237  ;;  %11774 = vmatprep.subr.bf16.mxu1 %v12838_v29  ;;  %v11544_v8 = vand.u32 %v12869_v9, %v15313_v32  ;;  %v9552_v5 = vrot.slane %v18746_v54, %v19575_v56  ;;  %v9556_v29 = vrot.slane %v18746_v54, %v19574_v42  ;;  %v19623_v54 = vld [vmem:[#allocation70_spill] sm:$0xff] }
 0x6b0   : > { %v9021_v18 = vsel %vm1121_vm1, %v9018_v11, %v19621_v13  ;;  %v9022_v3 = vsel %vm1121_vm1, %v9016_v10, %v9018_v11  ;;  %11736 = vmatpush1.bf16.msra.mxu0 %v12851_v45  ;;  %11775 = vmatpush1.bf16.msra.mxu1 %v12837_v31  ;;  %v9248_v15 = vsel %vm1347_vm2, %v18607_v35, %v9238_v20 }
 0x6b1   : > { %v9139_v38 = vmul.f32 %v9104_v23, %v9022_v3  ;;  %v9140_v36 = vmul.f32 %v9108_v6, %v9021_v18  ;;  %11737 = vmatprep.subr.bf16.mxu0 %v11541_v48  ;;  %11776 = vmatprep.subr.bf16.mxu1 %v12854_v21  ;;  %v9361_v10 = vmul.f32 %v9320_v63, %v9248_v15 }
 0x6b2   : > { %v9780_v18 = vrot.slane %v18795_v25, %v19574_v42 }
 0x6b3   : > { %v9240_v37 = vpop.permute.xlu0 %9239  ;;  %v9242_v58 = vpop.permute.xlu1 %9241  ;;  %v13461_v17 = vpack.c.bf16 %v9361_v10, %v18943_v1 }
 0x6b4   : > { %v9247_v28 = vsel %vm1347_vm2, %v9238_v20, %v9240_v37  ;;  %v9245_v35 = vsel %vm1347_vm2, %v9242_v58, %v19622_v53  ;;  %v9246_v7 = vsel %vm1347_vm2, %v9240_v37, %v9242_v58  ;;  %11738 = vmatpush1.bf16.msra.mxu0 %v11538_v22  ;;  %11777 = vmatpush1.bf16.msra.mxu1 %v12853_v57 }
 0x6b5   : > { %v9362_v51 = vmul.f32 %v9324_v27, %v9247_v28  ;;  %v9363_v2 = vmul.f32 %v9328_v14, %v9246_v7  ;;  %v9364_v59 = vmul.f32 %v9332_v52, %v9245_v35  ;;  %11778 = vmatprep.subr.bf16.mxu1 %v11547_v61  ;;  %v9772_v20 = vrot.slane %v18795_v25, %v19585_v60  ;;  %v19624_v52 = vld [vmem:[#allocation49_spill] sm:$0xff] }
 0x6b6   : > { %v9776_v27 = vrot.slane %v18795_v25, %v19575_v56  ;;  %v10072_v61 = vrot.slane %v18820_v55, %v19575_v56  ;;  %v10076_v28 = vrot.slane %v18820_v55, %v19574_v42 }
 0x6b7   : > { %v9462_v23 = vpop.permute.xlu0 %9461  ;;  %v9464_v6 = vpop.permute.xlu1 %9463  ;;  %12879 = vmatmul.mubr.msk.bf16.vlgmr.msra.gmra.mrb[40].mxu0 %vm5545_vm7, %v18615_v16  ;;  %v13462_v48 = vpack.c.bf16 %v9362_v51, %v18945_v4  ;;  %v13463_v21 = vpack.c.bf16 %v9363_v2, %v9139_v38  ;;  %v13464_v40 = vpack.c.bf16 %v9364_v59, %v9140_v36  ;;  %v10064_v38 = vrot.slane %v18820_v55, %v19584_v41 }
 0x6b8   : > { %v9472_v33 = vsel %vm1574_vm3, %v18641_v50, %v9462_v23  ;;  %v9471_v31 = vsel %vm1574_vm3, %v9462_v23, %v9464_v6  ;;  %11779 = vmatpush1.bf16.msra.mxu1 %v11544_v8  ;;  %11839 = vmatprep.mubr.bf16.mxu0 %v19605_v12  ;;  %v9768_v50 = vrot.slane %v18795_v25, %v19584_v41 }
 0x6b9   : > { %v9585_v39 = vmul.f32 %v9544_v49, %v9472_v33  ;;  %v9586_v45 = vmul.f32 %v9548_v44, %v9471_v31  ;;  %11807 = vmatprep.subr.bf16.mxu0 %v13462_v48  ;;  %11848 = vmatprep.subr.bf16.mxu1 %v13464_v40  ;;  %v19625_v33 = vld [vmem:[#allocation53_spill] sm:$0xff] }
 0x6ba   : > { %11808 = vmatpush1.bf16.msra.mxu0 %v13461_v17 }
 0x6bb   : > { %v9466_v11 = vpop.permute.xlu0 %9465  ;;  %v9686_v63 = vpop.permute.xlu1 %9685  ;;  %12880 = vmatmul.mubr.msk.bf16.vlgmr.msra.gmra.mrb[40].mxu1 %vm5545_vm7, %v18615_v16 }
 0x6bc   : > { %v9469_v1 = vsel %vm1574_vm3, %v9466_v11, %v19623_v54  ;;  %v9470_v4 = vsel %vm1574_vm3, %v9464_v6, %v9466_v11  ;;  %11849 = vmatpush1.bf16.msra.mxu1 %v13463_v21  ;;  %11880 = vmatprep.mubr.bf16.mxu1 %v19605_v12  ;;  %v9696_v16 = vsel %vm1801_vm4, %v18748_v62, %v9686_v63 }
 0x6bd   : > { %v9587_v30 = vmul.f32 %v9552_v5, %v9470_v4  ;;  %v9588_v13 = vmul.f32 %v9556_v29, %v9469_v1  ;;  %v10068_v12 = vrot.slane %v18820_v55, %v19585_v60  ;;  %v9809_v57 = vmul.f32 %v9768_v50, %v9696_v16 }
 0x6be   : > { %v10292_v6 = vrot.slane %v18853_v43, %v19585_v60  ;;  %v10296_v5 = vrot.slane %v18853_v43, %v19575_v56  ;;  %v10300_v29 = vrot.slane %v18853_v43, %v19574_v42 }
 0x6bf   : > { %v9688_v3 = vpop.permute.xlu0 %9687  ;;  %v9690_v14 = vpop.permute.xlu1 %9689  ;;  %v13465_v7 = vpack.c.bf16 %v9809_v57, %v9585_v39  ;;  %v10892_v39 = vld [vmem:[#allocation3 + $0x130] sm:$0xff]  ;;  %v10520_v57 = vrot.slane %v18864_v0, %v19575_v56 }
 0x6c0   : > { %v9695_v36 = vsel %vm1801_vm4, %v9686_v63, %v9688_v3  ;;  %v9693_v15 = vsel %vm1801_vm4, %v9690_v14, %v19624_v52  ;;  %v9694_v25 = vsel %vm1801_vm4, %v9688_v3, %v9690_v14 }
 0x6c1   : > { %v9810_v62 = vmul.f32 %v9772_v20, %v9695_v36  ;;  %v9811_v22 = vmul.f32 %v9776_v27, %v9694_v25  ;;  %v9812_v9 = vmul.f32 %v9780_v18, %v9693_v15  ;;  %v10512_v20 = vrot.slane %v18864_v0, %v19584_v41 }
 0x6c3   : > { %v9984_v37 = vpop.permute.xlu0 %9983  ;;  %v9986_v58 = vpop.permute.xlu1 %9985  ;;  %v13466_v10 = vpack.c.bf16 %v9810_v62, %v9586_v45  ;;  %v13467_v51 = vpack.c.bf16 %v9811_v22, %v9587_v30  ;;  %v13468_v2 = vpack.c.bf16 %v9812_v9, %v9588_v13  ;;  %v10893_v30 = vld [vmem:[#allocation3 + $0x138] sm:$0xff]  ;;  %v10524_v62 = vrot.slane %v18864_v0, %v19574_v42 }
 0x6c4   : > { %v9991_v49 = vsel %vm2100_vm12, %v18872_v34, %v9984_v37  ;;  %v9990_v44 = vsel %vm2100_vm12, %v9984_v37, %v9986_v58  ;;  %v10288_v34 = vrot.slane %v18853_v43, %v19584_v41  ;;  %v10516_v43 = vrot.slane %v18864_v0, %v19585_v60 }
 0x6c5   : > { %v10105_v53 = vmul.f32 %v10064_v38, %v9991_v49  ;;  %v10106_v35 = vmul.f32 %v10068_v12, %v9990_v44  ;;  %11809 = vmatprep.subr.bf16.mxu0 %v13466_v10  ;;  %11850 = vmatprep.subr.bf16.mxu1 %v13468_v2  ;;  %v10736_v9 = vrot.slane %v18893_v24, %v19584_v41  ;;  %v19627_v49 = vld [vmem:[#allocation56_spill] sm:$0xff] }
 0x6c6   : > { %11810 = vmatpush1.bf16.msra.mxu0 %v13465_v7  ;;  %11851 = vmatpush1.bf16.msra.mxu1 %v13467_v51  ;;  %v10748_v0 = vrot.slane %v18893_v24, %v19574_v42 }
 0x6c7   : > { %v13151_v59 = vpack.c.bf16 %v10106_v35, %v10105_v53  ;;  %v9988_v8 = vpop.permute.xlu0 %9987  ;;  %v10208_v23 = vpop.permute.xlu1 %10207 }
 0x6c8   : > { %v9989_v55 = vsel %vm2100_vm12, %v9986_v58, %v9988_v8  ;;  %v10004_v31 = vsel %vm2100_vm12, %v9988_v8, %v19625_v33  ;;  %v10215_v48 = vsel %vm2327_vm13, %v18887_v46, %v10208_v23  ;;  %v19626_v46 = vld [vmem:[#allocation67_spill] sm:$0xff]  ;;  %v10933_v33 = vld [vmem:[#allocation3 + $0x278] sm:$0xff] }
 0x6c9   : > { %v10107_v45 = vmul.f32 %v10072_v61, %v9989_v55  ;;  %v10108_v17 = vmul.f32 %v10076_v28, %v10004_v31  ;;  %v12807_v21 = vcombine.low %v10892_v39, %v13151_v59  ;;  %v12808_v40 = vcombine.high %v10892_v39, %v13151_v59  ;;  %v19628_v59 = vld [vmem:[#allocation71_spill] sm:$0xff]  ;;  %v10932_v55 = vld [vmem:[#allocation3 + $0x270] sm:$0xff] }
 0x6ca   : > { %v10329_v54 = vmul.f32 %v10288_v34, %v10215_v48  ;;  %v10744_v61 = vrot.slane %v18893_v24, %v19575_v56  ;;  %v10940_v31 = vld [vmem:[#allocation3 + $0x2b0] sm:$0xff]  ;;  %v10941_v48 = vld [vmem:[#allocation3 + $0x2b8] sm:$0xff] }
 0x6cb   : > { %v13152_v11 = vpack.c.bf16 %v10108_v17, %v10107_v45  ;;  %v10210_v50 = vpop.permute.xlu0 %10209  ;;  %v10212_v63 = vpop.permute.xlu1 %10211  ;;  %11811 = vmatprep.subr.bf16.mxu0 %v12808_v40  ;;  %v10948_v40 = vld [vmem:[#allocation3 + $0x2f0] sm:$0xff] }
 0x6cc   : > { %v10214_v1 = vsel %vm2327_vm13, %v10208_v23, %v10210_v50  ;;  %v10213_v4 = vsel %vm2327_vm13, %v10210_v50, %v10212_v63  ;;  %v10228_v27 = vsel %vm2327_vm13, %v10212_v63, %v19626_v46  ;;  %11812 = vmatpush1.bf16.msra.mxu0 %v12807_v21  ;;  %v10965_v21 = vld [vmem:[#allocation3 + $0x378] sm:$0x77]  ;;  %v12856_v50 = vcombine.high %v10940_v31, %v10948_v40 }
 0x6cd   : > { %v10330_v13 = vmul.f32 %v10292_v6, %v10214_v1  ;;  %v10331_v18 = vmul.f32 %v10296_v5, %v10213_v4  ;;  %v10332_v16 = vmul.f32 %v10300_v29, %v10228_v27  ;;  %v12809_v3 = vcombine.low %v10893_v30, %v13152_v11  ;;  %v10964_v29 = vld [vmem:[#allocation3 + $0x370] sm:$0x77]  ;;  %v10949_v63 = vld [vmem:[#allocation3 + $0x2f8] sm:$0xff] }
 0x6ce   : > { %v12810_v14 = vcombine.high %v10893_v30, %v13152_v11  ;;  %v10956_v11 = vld [vmem:[#allocation3 + $0x330] sm:$0xff]  ;;  %v12855_v4 = vcombine.low %v10940_v31, %v10948_v40  ;;  %v12857_v27 = vcombine.low %v10941_v48, %v10949_v63 }
 0x6cf   : > { %v10432_v38 = vpop.permute.xlu0 %10431  ;;  %v12871_v46 = vcombine.low %v10956_v11, %v10964_v29 }
 0x6d0   : > { %v10434_v36 = vpop.permute.xlu1 %10433  ;;  %v10439_v52 = vsel %vm2554_vm14, %v18903_v19, %v10432_v38  ;;  %11852 = vmatprep.subr.bf16.mxu1 %v12810_v14  ;;  %v10740_v19 = vrot.slane %v18893_v24, %v19585_v60  ;;  %v13292_v14 = vld [vmem:[%s19166_s6] sm:$0x3] }
 0x6d1   : > { %v10438_v15 = vsel %vm2554_vm14, %v10432_v38, %v10434_v36  ;;  %v10553_v25 = vmul.f32 %v10512_v20, %v10439_v52  ;;  %11853 = vmatpush1.bf16.msra.mxu1 %v12809_v3  ;;  %v12872_v20 = vcombine.high %v10956_v11, %v10964_v29 }
 0x6d2   : > { %v10554_v12 = vmul.f32 %v10516_v43, %v10438_v15  ;;  %v10957_v43 = vld [vmem:[#allocation3 + $0x338] sm:$0xff] }
 0x6d3   : > { %v10436_v22 = vpop.permute.xlu0 %10435  ;;  %v13469_v60 = vpack.c.bf16 %v10553_v25, %v10329_v54  ;;  %v12858_v54 = vcombine.high %v10941_v48, %v10949_v63  ;;  %v12874_v1 = vcombine.high %v10957_v43, %v10965_v21  ;;  %v11553_v30 = vand.u32 %v12872_v20, %v15313_v32 }
 0x6d4   : > { %v10656_v37 = vpop.permute.xlu1 %10655  ;;  %v10437_v58 = vsel %vm2554_vm14, %v10434_v36, %v10436_v22  ;;  %v10452_v44 = vsel %vm2554_vm14, %v10436_v22, %v19627_v49  ;;  %v13470_v35 = vpack.c.bf16 %v10554_v12, %v10330_v13  ;;  %v12873_v13 = vcombine.low %v10957_v43, %v10965_v21 }
 0x6d5   : > { %v10555_v28 = vmul.f32 %v10520_v57, %v10437_v58  ;;  %v10556_v53 = vmul.f32 %v10524_v62, %v10452_v44  ;;  %v10663_v41 = vsel %vm2781_vm15, %v18923_v47, %v10656_v37 }
 0x6d6   : > { %v10777_v51 = vmul.f32 %v10736_v9, %v10663_v41  ;;  %11813 = vmatprep.subr.bf16.mxu0 %v13470_v35  ;;  %v11556_v3 = vand.u32 %v12873_v13, %v15313_v32 }
 0x6d7   : > { %v10658_v7 = vpop.permute.xlu0 %10657  ;;  %11814 = vmatpush1.bf16.msra.mxu0 %v13469_v60  ;;  %v13471_v47 = vpack.c.bf16 %v10555_v28, %v10331_v18  ;;  %v13472_v23 = vpack.c.bf16 %v10556_v53, %v10332_v16  ;;  %v11559_v18 = vand.u32 %v12874_v1, %v15313_v32  ;;  %v11550_v16 = vand.u32 %v12871_v46, %v15313_v32 }
 0x6d8   : > { %v10660_v10 = vpop.permute.xlu1 %10659  ;;  %v10662_v2 = vsel %vm2781_vm15, %v10656_v37, %v10658_v7 }
 0x6d9   : > { %v10661_v56 = vsel %vm2781_vm15, %v10658_v7, %v10660_v10  ;;  %v10676_v42 = vsel %vm2781_vm15, %v10660_v10, %v19628_v59  ;;  %v10778_v24 = vmul.f32 %v10740_v19, %v10662_v2  ;;  %11854 = vmatprep.subr.bf16.mxu1 %v13472_v23 }
 0x6da   : > { %v10779_v8 = vmul.f32 %v10744_v61, %v10661_v56  ;;  %v10780_v34 = vmul.f32 %v10748_v0, %v10676_v42  ;;  %11855 = vmatpush1.bf16.msra.mxu1 %v13471_v47 }
 0x6db   : > { %v13175_v6 = vpack.c.bf16 %v10778_v24, %v10777_v51 }
 0x6dc   : > { %v13176_v5 = vpack.c.bf16 %v10780_v34, %v10779_v8 }
 0x6dd   : > { %v12839_v39 = vcombine.low %v13175_v6, %v10932_v55  ;;  %v12840_v45 = vcombine.high %v13175_v6, %v10932_v55 }
 0x6de   : > { %v12841_v17 = vcombine.low %v13176_v5, %v10933_v33  ;;  %v12842_v26 = vcombine.high %v13176_v5, %v10933_v33 }
 0x6df   : > { %11815 = vmatprep.subr.bf16.mxu0 %v12840_v45 }
 0x6e0   : > { %11856 = vmatprep.subr.bf16.mxu1 %v12842_v26  ;;  %11816 = vmatpush1.bf16.msra.mxu0 %v12839_v39 }
 0x6e1   : > { %11857 = vmatpush1.bf16.msra.mxu1 %v12841_v17  ;;  %11817 = vmatprep.subr.bf16.mxu0 %v12856_v50 }
 0x6e2   : > { %11858 = vmatprep.subr.bf16.mxu1 %v12858_v54 }
 0x6e4   : > { %11818 = vmatpush1.bf16.msra.mxu0 %v12855_v4 }
 0x6e5   : > { %11859 = vmatpush1.bf16.msra.mxu1 %v12857_v27  ;;  %11819 = vmatprep.subr.bf16.mxu0 %v11553_v30 }
 0x6e6   : > { %11860 = vmatprep.subr.bf16.mxu1 %v11559_v18 }
 0x6e8   : > { %11820 = vmatpush1.bf16.msra.mxu0 %v11550_v16 }
 0x6e9   : > { %11861 = vmatpush1.bf16.msra.mxu1 %v11556_v3 }
 0x6eb   : > { %12881 = vmatmul.mubr.msk.bf16.vlgmr.msra.gmra.mrb[44].mxu0 %vm5545_vm7, %v13292_v14 }
 0x6ec   : > { %12882 = vmatmul.mubr.msk.bf16.vlgmr.msra.gmra.mrb[44].mxu1 %vm5545_vm7, %v13292_v14 }
 0x736   : > { %v11595_v38 = vpop.f32.mrb[32].mxu0 }
 0x737   : > { %vm11889_vm1 = vcmp.gt.f32.partialorder %v11595_v38, 0.0  ;;  %v11905_v36 = vmul.f32 0.1, %v11595_v38  ;;  %v11597_v52 = vpop.f32.mrb[33].mxu0 }
 0x738   : > { %vm11890_vm2 = vcmp.gt.f32.partialorder %v11597_v52, 0.0  ;;  %v11906_v15 = vmul.f32 0.1, %v11597_v52  ;;  %v11599_v25 = vpop.f32.mrb[34].mxu0 }
 0x739   : > { %v11921_v12 = vsel %vm11889_vm1, %v11595_v38, %v11905_v36  ;;  %v11600_v32 = vpop.f32.mrb[35].mxu0  ;;  %v11636_v57 = vpop.f32.mrb[32].mxu1 }
 0x73a   : > { %v11922_v62 = vsel %vm11890_vm2, %v11597_v52, %v11906_v15  ;;  %vm11891_vm3 = vcmp.gt.f32.partialorder %v11636_v57, 0.0  ;;  %v11907_v22 = vmul.f32 0.1, %v11636_v57  ;;  %v11638_v37 = vpop.f32.mrb[33].mxu1 }
 0x73b   : > { %v11953_v9 = vcombine.low %v11921_v12, %v11922_v62  ;;  %vm11892_vm4 = vcmp.gt.f32.partialorder %v11638_v37, 0.0  ;;  %v11908_v19 = vmul.f32 0.1, %v11638_v37  ;;  %v11640_v58 = vpop.f32.mrb[34].mxu1 }
 0x73c   : > { %v11923_v49 = vsel %vm11891_vm3, %v11636_v57, %v11907_v22  ;;  %v11641_v44 = vpop.f32.mrb[35].mxu1 }
 0x73d   : > { %11969 = vst [vmem:[%s19101_s2] sm:$0xff] %v11953_v9  ;;  %v11924_v61 = vsel %vm11892_vm4, %v11638_v37, %v11908_v19 }
 0x73e   : > { %v11954_v0 = vcombine.low %v11923_v49, %v11924_v61 }
 0x740   : > { %11970 = vst [vmem:[%s19101_s2 + $0x8] sm:$0xff] %v11954_v0 }
 0x752   : > { %v11677_v28 = vpop.f32.mrb[36].mxu0 }
 0x753   : > { %vm11893_vm12 = vcmp.gt.f32.partialorder %v11677_v28, 0.0  ;;  %v11909_v53 = vmul.f32 0.1, %v11677_v28  ;;  %v11679_v41 = vpop.f32.mrb[37].mxu0 }
 0x754   : > { %vm11894_vm13 = vcmp.gt.f32.partialorder %v11679_v41, 0.0  ;;  %v11910_v60 = vmul.f32 0.1, %v11679_v41  ;;  %v11681_v35 = vpop.f32.mrb[38].mxu0 }
 0x755   : > { %v11925_v7 = vsel %vm11893_vm12, %v11677_v28, %v11909_v53  ;;  %v11682_v10 = vpop.f32.mrb[39].mxu0 }
 0x756   : > { %v11926_v51 = vsel %vm11894_vm13, %v11679_v41, %v11910_v60 }
 0x757   : > { %v11955_v2 = vcombine.low %v11925_v7, %v11926_v51 }
 0x759   : > { %11971 = vst [vmem:[%s19101_s2 + $0x10] sm:$0xff] %v11955_v2 }
 0x75a   : > { %v11718_v56 = vpop.f32.mrb[36].mxu1 }
 0x75b   : > { %vm11895_vm14 = vcmp.gt.f32.partialorder %v11718_v56, 0.0  ;;  %v11911_v59 = vmul.f32 0.1, %v11718_v56  ;;  %v11720_v42 = vpop.f32.mrb[37].mxu1 }
 0x75c   : > { %vm11896_vm15 = vcmp.gt.f32.partialorder %v11720_v42, 0.0  ;;  %v11912_v24 = vmul.f32 0.1, %v11720_v42  ;;  %v11722_v8 = vpop.f32.mrb[38].mxu1 }
 0x75d   : > { %v11927_v34 = vsel %vm11895_vm14, %v11718_v56, %v11911_v59  ;;  %v11723_v47 = vpop.f32.mrb[39].mxu1 }
 0x75e   : > { %v11928_v23 = vsel %vm11896_vm15, %v11720_v42, %v11912_v24 }
 0x75f   : > { %v11956_v6 = vcombine.low %v11927_v34, %v11928_v23 }
 0x761   : > { %11972 = vst [vmem:[%s19101_s2 + $0x18] sm:$0xff] %v11956_v6 }
 0x78a   : > { %v11759_v5 = vpop.f32.mrb[40].mxu0 }
 0x78b   : > { %vm11897_vm7 = vcmp.gt.f32.partialorder %v11759_v5, 0.0  ;;  %v11913_v55 = vmul.f32 0.1, %v11759_v5  ;;  %v11761_v33 = vpop.f32.mrb[41].mxu0 }
 0x78c   : > { %vm11898_vm11 = vcmp.gt.f32.partialorder %v11761_v33, 0.0  ;;  %v11914_v31 = vmul.f32 0.1, %v11761_v33  ;;  %v11763_v29 = vpop.f32.mrb[42].mxu0 }
 0x78d   : > { %v11929_v39 = vsel %vm11897_vm7, %v11759_v5, %v11913_v55  ;;  %v11764_v45 = vpop.f32.mrb[43].mxu0 }
 0x78e   : > { %v11800_v17 = vpop.f32.mrb[40].mxu1  ;;  %v11930_v26 = vsel %vm11898_vm11, %v11761_v33, %v11914_v31 }
 0x78f   : > { %vm11899_vm5 = vcmp.gt.f32.partialorder %v11800_v17, 0.0  ;;  %v11915_v48 = vmul.f32 0.1, %v11800_v17  ;;  %v11957_v21 = vcombine.low %v11929_v39, %v11930_v26  ;;  %v11802_v40 = vpop.f32.mrb[41].mxu1 }
 0x790   : > { %vm11900_vm6 = vcmp.gt.f32.partialorder %v11802_v40, 0.0  ;;  %v11916_v11 = vmul.f32 0.1, %v11802_v40  ;;  %v11804_v50 = vpop.f32.mrb[42].mxu1 }
 0x791   : > { %v11931_v63 = vsel %vm11899_vm5, %v11800_v17, %v11915_v48  ;;  %11973 = vst [vmem:[%s19101_s2 + $0x20] sm:$0xff] %v11957_v21  ;;  %v11805_v20 = vpop.f32.mrb[43].mxu1 }
 0x792   : > { %v11932_v43 = vsel %vm11900_vm6, %v11802_v40, %v11916_v11 }
 0x793   : > { %v11958_v54 = vcombine.low %v11931_v63, %v11932_v43 }
 0x795   : > { %11974 = vst [vmem:[%s19101_s2 + $0x28] sm:$0xff] %v11958_v54 }
 0x7be   : > { %v11841_v1 = vpop.f32.mrb[44].mxu0 }
 0x7bf   : > { %vm11901_vm0 = vcmp.gt.f32.partialorder %v11841_v1, 0.0  ;;  %v11917_v4 = vmul.f32 0.1, %v11841_v1  ;;  %v11882_v46 = vpop.f32.mrb[44].mxu1  ;;  %v11843_v27 = vpop.f32.mrb[45].mxu0 }
 0x7c0   : > { %vm11903_vm8 = vcmp.gt.f32.partialorder %v11882_v46, 0.0  ;;  %v11919_v30 = vmul.f32 0.1, %v11882_v46  ;;  %vm11902_vm9 = vcmp.gt.f32.partialorder %v11843_v27, 0.0  ;;  %v11918_v13 = vmul.f32 0.1, %v11843_v27 }
 0x7c1   : > { %v11933_v18 = vsel %vm11901_vm0, %v11841_v1, %v11917_v4  ;;  %v11884_v16 = vpop.f32.mrb[45].mxu1  ;;  %v11845_v3 = vpop.f32.mrb[46].mxu0 }
 0x7c2   : > { %v11935_v14 = vsel %vm11903_vm8, %v11882_v46, %v11919_v30  ;;  %v11934_v38 = vsel %vm11902_vm9, %v11843_v27, %v11918_v13  ;;  %vm11904_vm10 = vcmp.gt.f32.partialorder %v11884_v16, 0.0  ;;  %v11920_v36 = vmul.f32 0.1, %v11884_v16  ;;  %v11886_v52 = vpop.f32.mrb[46].mxu1  ;;  %v11846_v15 = vpop.f32.mrb[47].mxu0 }
 0x7c3   : > { %v11959_v25 = vcombine.low %v11933_v18, %v11934_v38  ;;  %v11887_v12 = vpop.f32.mrb[47].mxu1 }
 0x7c4   : > { %v11936_v32 = vsel %vm11904_vm10, %v11884_v16, %v11920_v36 }
 0x7c5   : > { %11975 = vst [vmem:[%s19101_s2 + $0x30] sm:$0xff] %v11959_v25  ;;  %v11960_v57 = vcombine.low %v11935_v14, %v11936_v32 }
 0x7c7   : > { %11976 = vst [vmem:[%s19101_s2 + $0x38] sm:$0xff] %v11960_v57 }
 0x7c8   : > { %13570 = shalt.err (!%p13567_p5)
}
 0x7c9   : > { %s13571_s21 = scalar_lea.hbm %s19115_s22, 1024  ;;  %s13575_s10 = scalar_lea.hbm %s19167_s7, 2048 }
 0x7ca   : > { %p13572_p10 = scmp.ne.s32.totalorder %s19115_s22, %s13571_s21  ;;  %p13576_p8 = scmp.lt.u32.totalorder %s19115_s22, %s19167_s7 }
 0x7cb   : > { %p13577_p0 = scmp.lt.u32.totalorder %s13575_s10, %s13571_s21  ;;  %p13579_p13 = scmp.lt.u32.totalorder %s13571_s21, %s19115_s22 }
 0x7cc   : > { %p13573_p9 = pnand %p13572_p10, %p19630_p12 }
 0x7cd   : > { %p13578_p11 = por %p13577_p0, %p13576_p8 }
 0x7ce   : > { %p13574_p4 = pneg %p13573_p9 }
 0x7cf   : > { %p13580_p3 = por %p13579_p13, %p13578_p11 }
 0x7d1   : > { %p13581_p7 = pnand %p13580_p3, %p13574_p4 }
 0x7d3   : > { %13584 = shalt.err (!%p13581_p7)
}
 0x7d4   : > { %13192 = dma.vmem_to_hbm [thread:$0]  (%p19630_p12), %s19117_s11, 1024, %s19115_s22, %s11978_s28  }
 0x7d5 PF: > { %s12004_s18 = sand.u32 1, %s13623_s24   ;;  %p19631_p1 = scmp.ne.s32.totalorder %s19334_s8, 0 }
 0x7d6   : > { %p19632_p2 = scmp.ge.s32.totalorder %s13635_s27, 2  ;;  %s12005_s2 = scalar_lea.sflag [#allocation6], %s12004_s18 }
 0x7d8   : > { %p13209_p6 = pnand %p19632_p2, %p19631_p1 }
 0x7da   : > { %13618 = dma.done.wait (!%p13209_p6), %s12005_s2, 1024  }
 0x7db   : > { %13620 = vsyncadd (!%p13209_p6), %s12005_s2, 4294966272  ;;  %p23_p5 = scmp.ge.s32.totalorder %s13748_s13, 4   ;;  %s19633_s24 = smov %s13627_s25 }
 0x7dc   : > { %s19634_s25 = smov %s13631_s26  ;;  %s19635_s26 = smov %s13824_s29 }
 0x7dd   : > { %s19636_s27 = smov %s13748_s13  ;;  %25 = sbr.rel (!%p23_p5) target bundleno = 12 (0xc), region = 121 }
 0x7e4   :  { %12010 = vsyncpa [#allocation5], 1 }
 0x7e5   :  { %12012 = vsyncpa [#allocation5 + $0x1], 1 }
 0x7e6   :  { %12013 = vsyncpa [#allocation12], 1 }
 0x7e7   :  { %12014 = vsyncpa [#allocation6], 1 }
 0x7e8   :  { %12016 = vsyncpa [#allocation6 + $0x1], 1 }
 0x7e9   :  { %12017 = vsyncpa [#allocation7], 1 }
 0x7ea   :  { %12019 = vsyncpa [#allocation7 + $0x1], 1 }
 0x7eb   :  { %12020 = vsyncpa [#allocation9], 1 }

</bundles_post_ra>
